<compile_context>
chip_gen: v5e
topology: v5e:2x2
jax: 0.10.0
libtpu: 0.0.40
codegen_flags: <defaults>
</compile_context>

<pallas_src>
import jax
import jax.numpy as jnp
from jax.experimental import pallas as pl
from jax.experimental.pallas import tpu as pltpu


def gru_recurrence_kernel(max_le_ref, gi_ref, whh_ref, le_ref, out_ref, h_ref):
    """One (batch block, time chunk) grid step of the GRU recurrence.

    max_le_ref : SMEM (1,)            int32  max(le)  (scalar prefetch)
    gi_ref     : VMEM (Bb, Tt, 3*Hp)  bf16   precomputed x @ W_ih^T (gate order r,z,n)
    whh_ref    : VMEM (Hp, 3*Hp)      bf16   W_hh^T, gate blocks padded to Hp lanes
    le_ref     : VMEM (Bb, 1)         int32  per-sequence lengths
    out_ref    : VMEM (Bb, Tt, Hp)    f32    padded GRU outputs (0 for t >= le[b])
    h_ref      : VMEM (Bb, Hp)        f32    scratch: hidden-state carry across chunks
    """
    Tt = gi_ref.shape[1]
    Hp = h_ref.shape[-1]
    tc = pl.program_id(1)
    t0 = tc * Tt
    max_le = max_le_ref[0]

    # Reset hidden carry at the first time chunk of each batch block.
    @pl.when(tc == 0)
    def _():
        h_ref[...] = jnp.zeros(h_ref.shape, h_ref.dtype)

    # Fully padded chunk: just zero the output block (pad_packed_sequence semantics).
    @pl.when(t0 >= max_le)
    def _():
        out_ref[...] = jnp.zeros(out_ref.shape, out_ref.dtype)

    # Active chunk: run the recurrence with the hidden state in the loop carry (vregs).
    @pl.when(t0 < max_le)
    def _():
        len_col = le_ref[...]                                  # (Bb, 1) int32
        whh = whh_ref[...]                                     # (Hp, 3Hp) bf16 (hoisted)

        def step(i, h_prev):
            t = t0 + i
            gi_t = gi_ref[:, pl.ds(i, 1), :][:, 0, :]          # (Bb, 3Hp) bf16
            gh = jnp.dot(h_prev.astype(jnp.bfloat16), whh,
                         preferred_element_type=jnp.float32)   # (Bb, 3Hp) f32

            i_r = gi_t[:, 0 * Hp:1 * Hp]
            i_z = gi_t[:, 1 * Hp:2 * Hp]
            i_n = gi_t[:, 2 * Hp:3 * Hp]
            h_r = gh[:, 0 * Hp:1 * Hp]
            h_z = gh[:, 1 * Hp:2 * Hp]
            h_n = gh[:, 2 * Hp:3 * Hp]

            # PyTorch GRU equations (gate order r, z, n), zero biases.
            r = jax.nn.sigmoid(i_r + h_r)                      # bf16+f32 -> f32
            z = jax.nn.sigmoid(i_z + h_z)
            n = jnp.tanh(i_n + r * h_n)
            h_new = (1.0 - z) * n + z * h_prev

            valid = t < len_col                                # (Bb, 1) bool
            out_ref[:, pl.ds(i, 1), :] = jnp.where(valid, h_new, 0.0)[:, None, :]
            return jnp.where(valid, h_new, h_prev)             # frozen past le[b]

        h_fin = jax.lax.fori_loop(0, Tt, step, h_ref[...], unroll=min(Tt, 8))
        h_ref[...] = h_fin


def _pad_gates_transposed(w, in_dim, H, Hp, dtype):
    """(3H, in_dim) -> (in_dim, 3*Hp): transpose, each gate block at [:, g*Hp:g*Hp+H]."""
    gates = jnp.split(w, 3, axis=0)                            # 3 x (H, in_dim)
    out = jnp.zeros((in_dim, 3 * Hp), dtype)
    for g, wg in enumerate(gates):
        out = out.at[:, g * Hp:g * Hp + H].set(wg.T.astype(dtype))
    return out


def _choose_bb(B):
    """Batch block: >=8 sublanes, split into >=2 blocks for megacore when B allows,
    capped at 256 rows (vreg-carried hidden state + single EUP headroom)."""
    if B <= 8:
        return 8
    Bb = (pl.cdiv(B, 2) + 7) // 8 * 8
    return min(Bb, 256)


def txt_encoder_forward(txt, le, emb_table, w_ih, w_hh, max_length,
                        *, vmem_budget_bytes=32 << 20):
    """txt: (B, T) int32 token ids, le: (B,) lengths, emb_table: (V, E),
    w_ih: (3H, E), w_hh: (3H, H).  Returns (B, max_length, H) float32, matching
    pad_packed_sequence(GRU(pack_padded_sequence(emb(txt), le)),
    batch_first=True, total_length=max_length)."""
    B, T = txt.shape
    assert T == max_length
    H = w_hh.shape[1]
    E = emb_table.shape[1]
    Hp = max(128, ((H + 127) // 128) * 128)        # 128-lane aligned hidden size

    # ---- batch / time tiling ----
    Bb = _choose_bb(B)
    nb = pl.cdiv(B, Bb)
    Bp = nb * Bb

    # Time chunk sized so 2 double-buffered chunks of (bf16 gi + f32 out) fit the budget.
    bytes_per_t = Bb * (3 * Hp * 2 + Hp * 4)
    T8 = ((T + 7) // 8) * 8
    Tt = max(8, min(T8, (vmem_budget_bytes // (2 * bytes_per_t)) // 8 * 8))
    nt = pl.cdiv(T8, Tt)
    Tp = nt * Tt

    # ---- glue outside the serial path (no sequential dependence) ----
    x = jnp.take(emb_table, txt, axis=0).astype(jnp.bfloat16)            # (B, T, E)
    wih_t = _pad_gates_transposed(w_ih, E, H, Hp, jnp.bfloat16)          # (E, 3Hp)
    whh_t = jnp.zeros((Hp, 3 * Hp), jnp.bfloat16).at[:H, :].set(
        _pad_gates_transposed(w_hh, H, H, Hp, jnp.bfloat16))             # (Hp, 3Hp)

    # Hoisted input->hidden projection: one big bf16 matmul, f32 accumulation,
    # stored bf16 (dominant HBM stream into the recurrence kernel).
    gi = jnp.einsum('bte,eg->btg', x, wih_t,
                    preferred_element_type=jnp.float32).astype(jnp.bfloat16)  # (B,T,3Hp)

    # Pad batch (padded rows get le=0 -> zero output) and time (padded chunks are
    # fully beyond max(le) -> zeroed and sliced off).
    gi = jnp.pad(gi, ((0, Bp - B), (0, Tp - T), (0, 0)))
    le_col = jnp.pad(le.astype(jnp.int32), (0, Bp - B)).reshape(Bp, 1)
    max_le = jnp.max(le).astype(jnp.int32).reshape(1)

    out_padded = pl.pallas_call(
        gru_recurrence_kernel,
        out_shape=jax.ShapeDtypeStruct((Bp, Tp, Hp), jnp.float32),
        grid_spec=pltpu.PrefetchScalarGridSpec(
            num_scalar_prefetch=1,
            grid=(nb, nt),                                    # batch outer, time inner
            in_specs=[
                pl.BlockSpec((Bb, Tt, 3 * Hp), lambda b, t, m: (b, t, 0)),  # gi chunk
                pl.BlockSpec((Hp, 3 * Hp), lambda b, t, m: (0, 0)),         # W_hh^T
                pl.BlockSpec((Bb, 1), lambda b, t, m: (b, 0)),              # lengths
            ],
            out_specs=pl.BlockSpec((Bb, Tt, Hp), lambda b, t, m: (b, t, 0)),
            scratch_shapes=[pltpu.VMEM((Bb, Hp), jnp.float32)],             # hidden carry
        ),
        compiler_params=pltpu.CompilerParams(
            dimension_semantics=("parallel", "arbitrary"),
            vmem_limit_bytes=int(vmem_budget_bytes + (16 << 20)),  # <=48MiB: fits v7x too
        ),
    )(max_le, gi, whh_t, le_col)

    return out_padded[:B, :T, :H]          # drop batch/time/lane padding; batch-first


def txt_encoder_reference(txt, le, emb_table, w_ih, w_hh):
    """Pure-JAX f32 reference (same math as torch GRU + pack/pad masking)."""
    x = jnp.take(emb_table, txt, axis=0).astype(jnp.float32)             # (B, T, E)
    B, T, _ = x.shape
    H = w_hh.shape[1]

    def step(h, xt_t):
        xt, t = xt_t
        gi = xt @ w_ih.T
        gh = h @ w_hh.T
        i_r, i_z, i_n = jnp.split(gi, 3, axis=-1)
        h_r, h_z, h_n = jnp.split(gh, 3, axis=-1)
        r = jax.nn.sigmoid(i_r + h_r)
        z = jax.nn.sigmoid(i_z + h_z)
        n = jnp.tanh(i_n + r * h_n)
        h_new = (1.0 - z) * n + z * h
        valid = (t < le)[:, None]
        h = jnp.where(valid, h_new, h)
        return h, jnp.where(valid, h_new, 0.0)

    h0 = jnp.zeros((B, H), jnp.float32)
    xs = jnp.transpose(x, (1, 0, 2))
    _, outs = jax.lax.scan(step, h0, (xs, jnp.arange(T, dtype=jnp.int32)))
    return jnp.transpose(outs, (1, 0, 2))                                # (B, T, H)


if __name__ == "__main__":
    # Small config consistent with the module's __init__ args.
    num_embeddings = 32      # arg.num_embeddings
    word_embed_size = 32     # arg.word_embed_size
    gru_hidden = 32          # arg.GRU_hidden
    max_length = 8           # arg.max_length
    batch = 2

    key = jax.random.PRNGKey(0)
    k_emb, k_ih, k_hh, k_txt = jax.random.split(key, 4)

    # Embedding weight ~ N(0, 1) (nn.Embedding default init).
    emb_table = jax.random.normal(k_emb, (num_embeddings, word_embed_size), jnp.float32)

    # GRU weights: xavier_uniform per gate chunk (as _init_lstm does), biases zero.
    def xavier_chunks(k, rows_per_gate, cols):
        limit = (6.0 / (rows_per_gate + cols)) ** 0.5
        ks = jax.random.split(k, 3)
        return jnp.concatenate(
            [jax.random.uniform(kk, (rows_per_gate, cols), jnp.float32, -limit, limit)
             for kk in ks], axis=0)

    w_ih = xavier_chunks(k_ih, gru_hidden, word_embed_size)   # (3H, E)
    w_hh = xavier_chunks(k_hh, gru_hidden, gru_hidden)        # (3H, H)

    txt = jax.random.randint(k_txt, (batch, max_length), 0, num_embeddings, jnp.int32)
    le = jnp.array([max_length, 5], dtype=jnp.int32)          # sorted descending

    out = txt_encoder_forward(txt, le, emb_table, w_ih, w_hh, max_length)
    jax.block_until_ready(out)
    assert out.shape == (batch, max_length, gru_hidden)

    # Numerical check vs pure-JAX f32 reference (bf16 matmuls + bf16 gi -> loose tol).
    ref = txt_encoder_reference(txt, le, emb_table, w_ih, w_hh)
    assert jnp.allclose(out, ref, atol=5e-2, rtol=5e-2), float(jnp.max(jnp.abs(out - ref)))
    # TODO(synk): the PyTorch GRU also returns a final hidden state h_T; the module
    # discards it, so it is not emitted (trivially available from h_ref if needed).
    print("KERNEL_OK")
</pallas_src>

<mosaic_0001>
module attributes {stable_mosaic.version = 11 : i64} {
  func.func @gru_recurrence_kernel(%arg0: i32, %arg1: i32, %arg2: memref<1xi32, #tpu.memory_space<smem>>, %arg3: memref<8x8x384xbf16, #tpu.memory_space<vmem>>, %arg4: memref<128x384xbf16, #tpu.memory_space<vmem>>, %arg5: memref<8x1xi32, #tpu.memory_space<vmem>>, %arg6: memref<8x8x128xf32, #tpu.memory_space<vmem>>, %arg7: memref<8x128xf32, #tpu.memory_space<vmem>>) attributes {dimension_semantics = [#tpu.dimension_semantics<parallel>, #tpu.dimension_semantics<arbitrary>], iteration_bounds = array<i64: 1, 1>, scalar_prefetch = 1 : i64, scratch_operands = 1 : i64, tpu.core_type = #tpu.core_type<tc>, window_params = [{transform_indices = @transform_0, window_bounds = array<i64: 8, 8, 384>}, {pipeline_mode = #tpu.pipeline_mode<synchronous>, transform_indices = @transform_1, window_bounds = array<i64: 128, 384>}, {transform_indices = @transform_2, window_bounds = array<i64: 8, 1>}, {transform_indices = @transform_3, window_bounds = array<i64: 8, 8, 128>}]} {
    %c8_i32 = arith.constant 8 : i32
    %0 = arith.muli %arg1, %c8_i32 : i32
    %c0 = arith.constant 0 : index
    %1 = memref.load %arg2[%c0] : memref<1xi32, #tpu.memory_space<smem>>
    %c0_i32 = arith.constant 0 : i32
    %2 = arith.cmpi eq, %arg1, %c0_i32 : i32
    %3 = arith.extui %2 : i1 to i32
    %c0_i32_0 = arith.constant 0 : i32
    %4 = arith.cmpi ne, %3, %c0_i32_0 : i32
    scf.if %4 {
      %cst = arith.constant 0.000000e+00 : f32
      %11 = vector.broadcast %cst : f32 to vector<8x128xf32>
      %c0_3 = arith.constant 0 : index
      %c0_4 = arith.constant 0 : index
      %12 = vector.load %arg7[%c0_3, %c0_4] : memref<8x128xf32, #tpu.memory_space<vmem>>, vector<8x128xf32>
      tpu.vector_store %arg7[%c0_3, %c0_4], %11 {strides = array<i32>} : memref<8x128xf32, #tpu.memory_space<vmem>>, vector<8x128xf32>,
    } else {
    }
    %5 = arith.cmpi sge, %0, %1 : i32
    %6 = arith.extui %5 : i1 to i32
    %c0_i32_1 = arith.constant 0 : i32
    %7 = arith.cmpi ne, %6, %c0_i32_1 : i32
    scf.if %7 {
      %cst = arith.constant 0.000000e+00 : f32
      %11 = vector.broadcast %cst : f32 to vector<8x8x128xf32>
      %c0_3 = arith.constant 0 : index
      %c0_4 = arith.constant 0 : index
      %c0_5 = arith.constant 0 : index
      %12 = vector.load %arg6[%c0_3, %c0_4, %c0_5] : memref<8x8x128xf32, #tpu.memory_space<vmem>>, vector<8x8x128xf32>
      tpu.vector_store %arg6[%c0_3, %c0_4, %c0_5], %11 {strides = array<i32>} : memref<8x8x128xf32, #tpu.memory_space<vmem>>, vector<8x8x128xf32>,
    } else {
    }
    %8 = arith.cmpi slt, %0, %1 : i32
    %9 = arith.extui %8 : i1 to i32
    %c0_i32_2 = arith.constant 0 : i32
    %10 = arith.cmpi ne, %9, %c0_i32_2 : i32
    scf.if %10 {
      %c0_3 = arith.constant 0 : index
      %c0_4 = arith.constant 0 : index
      %11 = vector.load %arg5[%c0_3, %c0_4] : memref<8x1xi32, #tpu.memory_space<vmem>>, vector<8x1xi32>
      %c0_5 = arith.constant 0 : index
      %c0_6 = arith.constant 0 : index
      %12 = vector.load %arg4[%c0_5, %c0_6] : memref<128x384xbf16, #tpu.memory_space<vmem>>, vector<128x384xbf16>
      %c0_7 = arith.constant 0 : index
      %c0_8 = arith.constant 0 : index
      %13 = vector.load %arg7[%c0_7, %c0_8] : memref<8x128xf32, #tpu.memory_space<vmem>>, vector<8x128xf32>
      %c0_i32_9 = arith.constant 0 : i32
      %14 = arith.addi %0, %c0_i32_9 : i32
      %c0_10 = arith.constant 0 : index
      %15 = arith.index_cast %c0_i32_9 : i32 to index
      %c0_11 = arith.constant 0 : index
      %16 = vector.load %arg3[%c0_10, %15, %c0_11] : memref<8x8x384xbf16, #tpu.memory_space<vmem>>, vector<8x1x384xbf16>
      %17 = vector.shape_cast %16 : vector<8x1x384xbf16> to vector<8x384xbf16>
      %18 = arith.truncf %13 : vector<8x128xf32> to vector<8x128xbf16>
      %cst = arith.constant dense<0.000000e+00> : vector<8x384xf32>
      %19 = tpu.matmul %18, %12, %cst {dimension_numbers = #tpu.dot_dimension_numbers<[1], [0], [0], [1], [0, 0, 1, 1], [], []>} : vector<8x128xbf16>, vector<128x384xbf16>, vector<8x384xf32> -> vector<8x384xf32>
      %20 = vector.extract_strided_slice %17 {offsets = [0, 0], sizes = [8, 128], strides = [1, 1]} : vector<8x384xbf16> to vector<8x128xbf16>
      %21 = vector.extract_strided_slice %17 {offsets = [0, 128], sizes = [8, 128], strides = [1, 1]} : vector<8x384xbf16> to vector<8x128xbf16>
      %22 = vector.extract_strided_slice %17 {offsets = [0, 256], sizes = [8, 128], strides = [1, 1]} : vector<8x384xbf16> to vector<8x128xbf16>
      %23 = vector.extract_strided_slice %19 {offsets = [0, 0], sizes = [8, 128], strides = [1, 1]} : vector<8x384xf32> to vector<8x128xf32>
      %24 = vector.extract_strided_slice %19 {offsets = [0, 128], sizes = [8, 128], strides = [1, 1]} : vector<8x384xf32> to vector<8x128xf32>
      %25 = vector.extract_strided_slice %19 {offsets = [0, 256], sizes = [8, 128], strides = [1, 1]} : vector<8x384xf32> to vector<8x128xf32>
      %26 = arith.extf %20 : vector<8x128xbf16> to vector<8x128xf32>
      %27 = arith.addf %26, %23 : vector<8x128xf32>
      %28 = arith.negf %27 : vector<8x128xf32>
      %29 = math.exp %28 : vector<8x128xf32>
      %cst_12 = arith.constant 1.000000e+00 : f32
      %30 = vector.broadcast %cst_12 : f32 to vector<8x128xf32>
      %31 = arith.addf %30, %29 : vector<8x128xf32>
      %32 = arith.divf %30, %31 : vector<8x128xf32>
      %33 = arith.extf %21 : vector<8x128xbf16> to vector<8x128xf32>
      %34 = arith.addf %33, %24 : vector<8x128xf32>
      %35 = arith.negf %34 : vector<8x128xf32>
      %36 = math.exp %35 : vector<8x128xf32>
      %cst_13 = arith.constant 1.000000e+00 : f32
      %37 = vector.broadcast %cst_13 : f32 to vector<8x128xf32>
      %38 = arith.addf %37, %36 : vector<8x128xf32>
      %39 = arith.divf %37, %38 : vector<8x128xf32>
      %40 = arith.mulf %32, %25 : vector<8x128xf32>
      %41 = arith.extf %22 : vector<8x128xbf16> to vector<8x128xf32>
      %42 = arith.addf %41, %40 : vector<8x128xf32>
      %43 = math.tanh %42 : vector<8x128xf32>
      %cst_14 = arith.constant 1.000000e+00 : f32
      %44 = vector.broadcast %cst_14 : f32 to vector<8x128xf32>
      %45 = arith.subf %44, %39 : vector<8x128xf32>
      %46 = arith.mulf %45, %43 : vector<8x128xf32>
      %47 = arith.mulf %39, %13 : vector<8x128xf32>
      %48 = arith.addf %46, %47 : vector<8x128xf32>
      %49 = vector.broadcast %14 : i32 to vector<8x1xi32>
      %50 = arith.cmpi slt, %49, %11 : vector<8x1xi32>
      %cst_15 = arith.constant 0.000000e+00 : f32
      %51 = vector.shape_cast %50 : vector<8x1xi1> to vector<8x1xi1>
      %52 = vector.broadcast %51 : vector<8x1xi1> to vector<8x128xi1>
      %53 = vector.broadcast %cst_15 : f32 to vector<8x128xf32>
      %54 = arith.select %52, %48, %53 : vector<8x128xi1>, vector<8x128xf32>
      %55 = vector.shape_cast %54 : vector<8x128xf32> to vector<8x1x128xf32>
      %c0_16 = arith.constant 0 : index
      %56 = arith.index_cast %c0_i32_9 : i32 to index
      %c0_17 = arith.constant 0 : index
      %57 = vector.load %arg6[%c0_16, %56, %c0_17] : memref<8x8x128xf32, #tpu.memory_space<vmem>>, vector<8x1x128xf32>
      tpu.vector_store %arg6[%c0_16, %56, %c0_17], %55 {strides = array<i32>} : memref<8x8x128xf32, #tpu.memory_space<vmem>>, vector<8x1x128xf32>,
      %58 = vector.shape_cast %50 : vector<8x1xi1> to vector<8x1xi1>
      %59 = vector.broadcast %58 : vector<8x1xi1> to vector<8x128xi1>
      %60 = arith.select %59, %48, %13 : vector<8x128xi1>, vector<8x128xf32>
      %c1_i32 = arith.constant 1 : i32
      %61 = arith.addi %0, %c1_i32 : i32
      %c0_18 = arith.constant 0 : index
      %62 = arith.index_cast %c1_i32 : i32 to index
      %c0_19 = arith.constant 0 : index
      %63 = vector.load %arg3[%c0_18, %62, %c0_19] : memref<8x8x384xbf16, #tpu.memory_space<vmem>>, vector<8x1x384xbf16>
      %64 = vector.shape_cast %63 : vector<8x1x384xbf16> to vector<8x384xbf16>
      %65 = arith.truncf %60 : vector<8x128xf32> to vector<8x128xbf16>
      %cst_20 = arith.constant dense<0.000000e+00> : vector<8x384xf32>
      %66 = tpu.matmul %65, %12, %cst_20 {dimension_numbers = #tpu.dot_dimension_numbers<[1], [0], [0], [1], [0, 0, 1, 1], [], []>} : vector<8x128xbf16>, vector<128x384xbf16>, vector<8x384xf32> -> vector<8x384xf32>
      %67 = vector.extract_strided_slice %64 {offsets = [0, 0], sizes = [8, 128], strides = [1, 1]} : vector<8x384xbf16> to vector<8x128xbf16>
      %68 = vector.extract_strided_slice %64 {offsets = [0, 128], sizes = [8, 128], strides = [1, 1]} : vector<8x384xbf16> to vector<8x128xbf16>
      %69 = vector.extract_strided_slice %64 {offsets = [0, 256], sizes = [8, 128], strides = [1, 1]} : vector<8x384xbf16> to vector<8x128xbf16>
      %70 = vector.extract_strided_slice %66 {offsets = [0, 0], sizes = [8, 128], strides = [1, 1]} : vector<8x384xf32> to vector<8x128xf32>
      %71 = vector.extract_strided_slice %66 {offsets = [0, 128], sizes = [8, 128], strides = [1, 1]} : vector<8x384xf32> to vector<8x128xf32>
      %72 = vector.extract_strided_slice %66 {offsets = [0, 256], sizes = [8, 128], strides = [1, 1]} : vector<8x384xf32> to vector<8x128xf32>
      %73 = arith.extf %67 : vector<8x128xbf16> to vector<8x128xf32>
      %74 = arith.addf %73, %70 : vector<8x128xf32>
      %75 = arith.negf %74 : vector<8x128xf32>
      %76 = math.exp %75 : vector<8x128xf32>
      %cst_21 = arith.constant 1.000000e+00 : f32
      %77 = vector.broadcast %cst_21 : f32 to vector<8x128xf32>
      %78 = arith.addf %77, %76 : vector<8x128xf32>
      %79 = arith.divf %77, %78 : vector<8x128xf32>
      %80 = arith.extf %68 : vector<8x128xbf16> to vector<8x128xf32>
      %81 = arith.addf %80, %71 : vector<8x128xf32>
      %82 = arith.negf %81 : vector<8x128xf32>
      %83 = math.exp %82 : vector<8x128xf32>
      %cst_22 = arith.constant 1.000000e+00 : f32
      %84 = vector.broadcast %cst_22 : f32 to vector<8x128xf32>
      %85 = arith.addf %84, %83 : vector<8x128xf32>
      %86 = arith.divf %84, %85 : vector<8x128xf32>
      %87 = arith.mulf %79, %72 : vector<8x128xf32>
      %88 = arith.extf %69 : vector<8x128xbf16> to vector<8x128xf32>
      %89 = arith.addf %88, %87 : vector<8x128xf32>
      %90 = math.tanh %89 : vector<8x128xf32>
      %cst_23 = arith.constant 1.000000e+00 : f32
      %91 = vector.broadcast %cst_23 : f32 to vector<8x128xf32>
      %92 = arith.subf %91, %86 : vector<8x128xf32>
      %93 = arith.mulf %92, %90 : vector<8x128xf32>
      %94 = arith.mulf %86, %60 : vector<8x128xf32>
      %95 = arith.addf %93, %94 : vector<8x128xf32>
      %96 = vector.broadcast %61 : i32 to vector<8x1xi32>
      %97 = arith.cmpi slt, %96, %11 : vector<8x1xi32>
      %cst_24 = arith.constant 0.000000e+00 : f32
      %98 = vector.shape_cast %97 : vector<8x1xi1> to vector<8x1xi1>
      %99 = vector.broadcast %98 : vector<8x1xi1> to vector<8x128xi1>
      %100 = vector.broadcast %cst_24 : f32 to vector<8x128xf32>
      %101 = arith.select %99, %95, %100 : vector<8x128xi1>, vector<8x128xf32>
      %102 = vector.shape_cast %101 : vector<8x128xf32> to vector<8x1x128xf32>
      %c0_25 = arith.constant 0 : index
      %103 = arith.index_cast %c1_i32 : i32 to index
      %c0_26 = arith.constant 0 : index
      %104 = vector.load %arg6[%c0_25, %103, %c0_26] : memref<8x8x128xf32, #tpu.memory_space<vmem>>, vector<8x1x128xf32>
      tpu.vector_store %arg6[%c0_25, %103, %c0_26], %102 {strides = array<i32>} : memref<8x8x128xf32, #tpu.memory_space<vmem>>, vector<8x1x128xf32>,
      %105 = vector.shape_cast %97 : vector<8x1xi1> to vector<8x1xi1>
      %106 = vector.broadcast %105 : vector<8x1xi1> to vector<8x128xi1>
      %107 = arith.select %106, %95, %60 : vector<8x128xi1>, vector<8x128xf32>
      %c2_i32 = arith.constant 2 : i32
      %108 = arith.addi %0, %c2_i32 : i32
      %c0_27 = arith.constant 0 : index
      %109 = arith.index_cast %c2_i32 : i32 to index
      %c0_28 = arith.constant 0 : index
      %110 = vector.load %arg3[%c0_27, %109, %c0_28] : memref<8x8x384xbf16, #tpu.memory_space<vmem>>, vector<8x1x384xbf16>
      %111 = vector.shape_cast %110 : vector<8x1x384xbf16> to vector<8x384xbf16>
      %112 = arith.truncf %107 : vector<8x128xf32> to vector<8x128xbf16>
      %cst_29 = arith.constant dense<0.000000e+00> : vector<8x384xf32>
      %113 = tpu.matmul %112, %12, %cst_29 {dimension_numbers = #tpu.dot_dimension_numbers<[1], [0], [0], [1], [0, 0, 1, 1], [], []>} : vector<8x128xbf16>, vector<128x384xbf16>, vector<8x384xf32> -> vector<8x384xf32>
      %114 = vector.extract_strided_slice %111 {offsets = [0, 0], sizes = [8, 128], strides = [1, 1]} : vector<8x384xbf16> to vector<8x128xbf16>
      %115 = vector.extract_strided_slice %111 {offsets = [0, 128], sizes = [8, 128], strides = [1, 1]} : vector<8x384xbf16> to vector<8x128xbf16>
      %116 = vector.extract_strided_slice %111 {offsets = [0, 256], sizes = [8, 128], strides = [1, 1]} : vector<8x384xbf16> to vector<8x128xbf16>
      %117 = vector.extract_strided_slice %113 {offsets = [0, 0], sizes = [8, 128], strides = [1, 1]} : vector<8x384xf32> to vector<8x128xf32>
      %118 = vector.extract_strided_slice %113 {offsets = [0, 128], sizes = [8, 128], strides = [1, 1]} : vector<8x384xf32> to vector<8x128xf32>
      %119 = vector.extract_strided_slice %113 {offsets = [0, 256], sizes = [8, 128], strides = [1, 1]} : vector<8x384xf32> to vector<8x128xf32>
      %120 = arith.extf %114 : vector<8x128xbf16> to vector<8x128xf32>
      %121 = arith.addf %120, %117 : vector<8x128xf32>
      %122 = arith.negf %121 : vector<8x128xf32>
      %123 = math.exp %122 : vector<8x128xf32>
      %cst_30 = arith.constant 1.000000e+00 : f32
      %124 = vector.broadcast %cst_30 : f32 to vector<8x128xf32>
      %125 = arith.addf %124, %123 : vector<8x128xf32>
      %126 = arith.divf %124, %125 : vector<8x128xf32>
      %127 = arith.extf %115 : vector<8x128xbf16> to vector<8x128xf32>
      %128 = arith.addf %127, %118 : vector<8x128xf32>
      %129 = arith.negf %128 : vector<8x128xf32>
      %130 = math.exp %129 : vector<8x128xf32>
      %cst_31 = arith.constant 1.000000e+00 : f32
      %131 = vector.broadcast %cst_31 : f32 to vector<8x128xf32>
      %132 = arith.addf %131, %130 : vector<8x128xf32>
      %133 = arith.divf %131, %132 : vector<8x128xf32>
      %134 = arith.mulf %126, %119 : vector<8x128xf32>
      %135 = arith.extf %116 : vector<8x128xbf16> to vector<8x128xf32>
      %136 = arith.addf %135, %134 : vector<8x128xf32>
      %137 = math.tanh %136 : vector<8x128xf32>
      %cst_32 = arith.constant 1.000000e+00 : f32
      %138 = vector.broadcast %cst_32 : f32 to vector<8x128xf32>
      %139 = arith.subf %138, %133 : vector<8x128xf32>
      %140 = arith.mulf %139, %137 : vector<8x128xf32>
      %141 = arith.mulf %133, %107 : vector<8x128xf32>
      %142 = arith.addf %140, %141 : vector<8x128xf32>
      %143 = vector.broadcast %108 : i32 to vector<8x1xi32>
      %144 = arith.cmpi slt, %143, %11 : vector<8x1xi32>
      %cst_33 = arith.constant 0.000000e+00 : f32
      %145 = vector.shape_cast %144 : vector<8x1xi1> to vector<8x1xi1>
      %146 = vector.broadcast %145 : vector<8x1xi1> to vector<8x128xi1>
      %147 = vector.broadcast %cst_33 : f32 to vector<8x128xf32>
      %148 = arith.select %146, %142, %147 : vector<8x128xi1>, vector<8x128xf32>
      %149 = vector.shape_cast %148 : vector<8x128xf32> to vector<8x1x128xf32>
      %c0_34 = arith.constant 0 : index
      %150 = arith.index_cast %c2_i32 : i32 to index
      %c0_35 = arith.constant 0 : index
      %151 = vector.load %arg6[%c0_34, %150, %c0_35] : memref<8x8x128xf32, #tpu.memory_space<vmem>>, vector<8x1x128xf32>
      tpu.vector_store %arg6[%c0_34, %150, %c0_35], %149 {strides = array<i32>} : memref<8x8x128xf32, #tpu.memory_space<vmem>>, vector<8x1x128xf32>,
      %152 = vector.shape_cast %144 : vector<8x1xi1> to vector<8x1xi1>
      %153 = vector.broadcast %152 : vector<8x1xi1> to vector<8x128xi1>
      %154 = arith.select %153, %142, %107 : vector<8x128xi1>, vector<8x128xf32>
      %c3_i32 = arith.constant 3 : i32
      %155 = arith.addi %0, %c3_i32 : i32
      %c0_36 = arith.constant 0 : index
      %156 = arith.index_cast %c3_i32 : i32 to index
      %c0_37 = arith.constant 0 : index
      %157 = vector.load %arg3[%c0_36, %156, %c0_37] : memref<8x8x384xbf16, #tpu.memory_space<vmem>>, vector<8x1x384xbf16>
      %158 = vector.shape_cast %157 : vector<8x1x384xbf16> to vector<8x384xbf16>
      %159 = arith.truncf %154 : vector<8x128xf32> to vector<8x128xbf16>
      %cst_38 = arith.constant dense<0.000000e+00> : vector<8x384xf32>
      %160 = tpu.matmul %159, %12, %cst_38 {dimension_numbers = #tpu.dot_dimension_numbers<[1], [0], [0], [1], [0, 0, 1, 1], [], []>} : vector<8x128xbf16>, vector<128x384xbf16>, vector<8x384xf32> -> vector<8x384xf32>
      %161 = vector.extract_strided_slice %158 {offsets = [0, 0], sizes = [8, 128], strides = [1, 1]} : vector<8x384xbf16> to vector<8x128xbf16>
      %162 = vector.extract_strided_slice %158 {offsets = [0, 128], sizes = [8, 128], strides = [1, 1]} : vector<8x384xbf16> to vector<8x128xbf16>
      %163 = vector.extract_strided_slice %158 {offsets = [0, 256], sizes = [8, 128], strides = [1, 1]} : vector<8x384xbf16> to vector<8x128xbf16>
      %164 = vector.extract_strided_slice %160 {offsets = [0, 0], sizes = [8, 128], strides = [1, 1]} : vector<8x384xf32> to vector<8x128xf32>
      %165 = vector.extract_strided_slice %160 {offsets = [0, 128], sizes = [8, 128], strides = [1, 1]} : vector<8x384xf32> to vector<8x128xf32>
      %166 = vector.extract_strided_slice %160 {offsets = [0, 256], sizes = [8, 128], strides = [1, 1]} : vector<8x384xf32> to vector<8x128xf32>
      %167 = arith.extf %161 : vector<8x128xbf16> to vector<8x128xf32>
      %168 = arith.addf %167, %164 : vector<8x128xf32>
      %169 = arith.negf %168 : vector<8x128xf32>
      %170 = math.exp %169 : vector<8x128xf32>
      %cst_39 = arith.constant 1.000000e+00 : f32
      %171 = vector.broadcast %cst_39 : f32 to vector<8x128xf32>
      %172 = arith.addf %171, %170 : vector<8x128xf32>
      %173 = arith.divf %171, %172 : vector<8x128xf32>
      %174 = arith.extf %162 : vector<8x128xbf16> to vector<8x128xf32>
      %175 = arith.addf %174, %165 : vector<8x128xf32>
      %176 = arith.negf %175 : vector<8x128xf32>
      %177 = math.exp %176 : vector<8x128xf32>
      %cst_40 = arith.constant 1.000000e+00 : f32
      %178 = vector.broadcast %cst_40 : f32 to vector<8x128xf32>
      %179 = arith.addf %178, %177 : vector<8x128xf32>
      %180 = arith.divf %178, %179 : vector<8x128xf32>
      %181 = arith.mulf %173, %166 : vector<8x128xf32>
      %182 = arith.extf %163 : vector<8x128xbf16> to vector<8x128xf32>
      %183 = arith.addf %182, %181 : vector<8x128xf32>
      %184 = math.tanh %183 : vector<8x128xf32>
      %cst_41 = arith.constant 1.000000e+00 : f32
      %185 = vector.broadcast %cst_41 : f32 to vector<8x128xf32>
      %186 = arith.subf %185, %180 : vector<8x128xf32>
      %187 = arith.mulf %186, %184 : vector<8x128xf32>
      %188 = arith.mulf %180, %154 : vector<8x128xf32>
      %189 = arith.addf %187, %188 : vector<8x128xf32>
      %190 = vector.broadcast %155 : i32 to vector<8x1xi32>
      %191 = arith.cmpi slt, %190, %11 : vector<8x1xi32>
      %cst_42 = arith.constant 0.000000e+00 : f32
      %192 = vector.shape_cast %191 : vector<8x1xi1> to vector<8x1xi1>
      %193 = vector.broadcast %192 : vector<8x1xi1> to vector<8x128xi1>
      %194 = vector.broadcast %cst_42 : f32 to vector<8x128xf32>
      %195 = arith.select %193, %189, %194 : vector<8x128xi1>, vector<8x128xf32>
      %196 = vector.shape_cast %195 : vector<8x128xf32> to vector<8x1x128xf32>
      %c0_43 = arith.constant 0 : index
      %197 = arith.index_cast %c3_i32 : i32 to index
      %c0_44 = arith.constant 0 : index
      %198 = vector.load %arg6[%c0_43, %197, %c0_44] : memref<8x8x128xf32, #tpu.memory_space<vmem>>, vector<8x1x128xf32>
      tpu.vector_store %arg6[%c0_43, %197, %c0_44], %196 {strides = array<i32>} : memref<8x8x128xf32, #tpu.memory_space<vmem>>, vector<8x1x128xf32>,
      %199 = vector.shape_cast %191 : vector<8x1xi1> to vector<8x1xi1>
      %200 = vector.broadcast %199 : vector<8x1xi1> to vector<8x128xi1>
      %201 = arith.select %200, %189, %154 : vector<8x128xi1>, vector<8x128xf32>
      %c4_i32 = arith.constant 4 : i32
      %202 = arith.addi %0, %c4_i32 : i32
      %c0_45 = arith.constant 0 : index
      %203 = arith.index_cast %c4_i32 : i32 to index
      %c0_46 = arith.constant 0 : index
      %204 = vector.load %arg3[%c0_45, %203, %c0_46] : memref<8x8x384xbf16, #tpu.memory_space<vmem>>, vector<8x1x384xbf16>
      %205 = vector.shape_cast %204 : vector<8x1x384xbf16> to vector<8x384xbf16>
      %206 = arith.truncf %201 : vector<8x128xf32> to vector<8x128xbf16>
      %cst_47 = arith.constant dense<0.000000e+00> : vector<8x384xf32>
      %207 = tpu.matmul %206, %12, %cst_47 {dimension_numbers = #tpu.dot_dimension_numbers<[1], [0], [0], [1], [0, 0, 1, 1], [], []>} : vector<8x128xbf16>, vector<128x384xbf16>, vector<8x384xf32> -> vector<8x384xf32>
      %208 = vector.extract_strided_slice %205 {offsets = [0, 0], sizes = [8, 128], strides = [1, 1]} : vector<8x384xbf16> to vector<8x128xbf16>
      %209 = vector.extract_strided_slice %205 {offsets = [0, 128], sizes = [8, 128], strides = [1, 1]} : vector<8x384xbf16> to vector<8x128xbf16>
      %210 = vector.extract_strided_slice %205 {offsets = [0, 256], sizes = [8, 128], strides = [1, 1]} : vector<8x384xbf16> to vector<8x128xbf16>
      %211 = vector.extract_strided_slice %207 {offsets = [0, 0], sizes = [8, 128], strides = [1, 1]} : vector<8x384xf32> to vector<8x128xf32>
      %212 = vector.extract_strided_slice %207 {offsets = [0, 128], sizes = [8, 128], strides = [1, 1]} : vector<8x384xf32> to vector<8x128xf32>
      %213 = vector.extract_strided_slice %207 {offsets = [0, 256], sizes = [8, 128], strides = [1, 1]} : vector<8x384xf32> to vector<8x128xf32>
      %214 = arith.extf %208 : vector<8x128xbf16> to vector<8x128xf32>
      %215 = arith.addf %214, %211 : vector<8x128xf32>
      %216 = arith.negf %215 : vector<8x128xf32>
      %217 = math.exp %216 : vector<8x128xf32>
      %cst_48 = arith.constant 1.000000e+00 : f32
      %218 = vector.broadcast %cst_48 : f32 to vector<8x128xf32>
      %219 = arith.addf %218, %217 : vector<8x128xf32>
      %220 = arith.divf %218, %219 : vector<8x128xf32>
      %221 = arith.extf %209 : vector<8x128xbf16> to vector<8x128xf32>
      %222 = arith.addf %221, %212 : vector<8x128xf32>
      %223 = arith.negf %222 : vector<8x128xf32>
      %224 = math.exp %223 : vector<8x128xf32>
      %cst_49 = arith.constant 1.000000e+00 : f32
      %225 = vector.broadcast %cst_49 : f32 to vector<8x128xf32>
      %226 = arith.addf %225, %224 : vector<8x128xf32>
      %227 = arith.divf %225, %226 : vector<8x128xf32>
      %228 = arith.mulf %220, %213 : vector<8x128xf32>
      %229 = arith.extf %210 : vector<8x128xbf16> to vector<8x128xf32>
      %230 = arith.addf %229, %228 : vector<8x128xf32>
      %231 = math.tanh %230 : vector<8x128xf32>
      %cst_50 = arith.constant 1.000000e+00 : f32
      %232 = vector.broadcast %cst_50 : f32 to vector<8x128xf32>
      %233 = arith.subf %232, %227 : vector<8x128xf32>
      %234 = arith.mulf %233, %231 : vector<8x128xf32>
      %235 = arith.mulf %227, %201 : vector<8x128xf32>
      %236 = arith.addf %234, %235 : vector<8x128xf32>
      %237 = vector.broadcast %202 : i32 to vector<8x1xi32>
      %238 = arith.cmpi slt, %237, %11 : vector<8x1xi32>
      %cst_51 = arith.constant 0.000000e+00 : f32
      %239 = vector.shape_cast %238 : vector<8x1xi1> to vector<8x1xi1>
      %240 = vector.broadcast %239 : vector<8x1xi1> to vector<8x128xi1>
      %241 = vector.broadcast %cst_51 : f32 to vector<8x128xf32>
      %242 = arith.select %240, %236, %241 : vector<8x128xi1>, vector<8x128xf32>
      %243 = vector.shape_cast %242 : vector<8x128xf32> to vector<8x1x128xf32>
      %c0_52 = arith.constant 0 : index
      %244 = arith.index_cast %c4_i32 : i32 to index
      %c0_53 = arith.constant 0 : index
      %245 = vector.load %arg6[%c0_52, %244, %c0_53] : memref<8x8x128xf32, #tpu.memory_space<vmem>>, vector<8x1x128xf32>
      tpu.vector_store %arg6[%c0_52, %244, %c0_53], %243 {strides = array<i32>} : memref<8x8x128xf32, #tpu.memory_space<vmem>>, vector<8x1x128xf32>,
      %246 = vector.shape_cast %238 : vector<8x1xi1> to vector<8x1xi1>
      %247 = vector.broadcast %246 : vector<8x1xi1> to vector<8x128xi1>
      %248 = arith.select %247, %236, %201 : vector<8x128xi1>, vector<8x128xf32>
      %c5_i32 = arith.constant 5 : i32
      %249 = arith.addi %0, %c5_i32 : i32
      %c0_54 = arith.constant 0 : index
      %250 = arith.index_cast %c5_i32 : i32 to index
      %c0_55 = arith.constant 0 : index
      %251 = vector.load %arg3[%c0_54, %250, %c0_55] : memref<8x8x384xbf16, #tpu.memory_space<vmem>>, vector<8x1x384xbf16>
      %252 = vector.shape_cast %251 : vector<8x1x384xbf16> to vector<8x384xbf16>
      %253 = arith.truncf %248 : vector<8x128xf32> to vector<8x128xbf16>
      %cst_56 = arith.constant dense<0.000000e+00> : vector<8x384xf32>
      %254 = tpu.matmul %253, %12, %cst_56 {dimension_numbers = #tpu.dot_dimension_numbers<[1], [0], [0], [1], [0, 0, 1, 1], [], []>} : vector<8x128xbf16>, vector<128x384xbf16>, vector<8x384xf32> -> vector<8x384xf32>
      %255 = vector.extract_strided_slice %252 {offsets = [0, 0], sizes = [8, 128], strides = [1, 1]} : vector<8x384xbf16> to vector<8x128xbf16>
      %256 = vector.extract_strided_slice %252 {offsets = [0, 128], sizes = [8, 128], strides = [1, 1]} : vector<8x384xbf16> to vector<8x128xbf16>
      %257 = vector.extract_strided_slice %252 {offsets = [0, 256], sizes = [8, 128], strides = [1, 1]} : vector<8x384xbf16> to vector<8x128xbf16>
      %258 = vector.extract_strided_slice %254 {offsets = [0, 0], sizes = [8, 128], strides = [1, 1]} : vector<8x384xf32> to vector<8x128xf32>
      %259 = vector.extract_strided_slice %254 {offsets = [0, 128], sizes = [8, 128], strides = [1, 1]} : vector<8x384xf32> to vector<8x128xf32>
      %260 = vector.extract_strided_slice %254 {offsets = [0, 256], sizes = [8, 128], strides = [1, 1]} : vector<8x384xf32> to vector<8x128xf32>
      %261 = arith.extf %255 : vector<8x128xbf16> to vector<8x128xf32>
      %262 = arith.addf %261, %258 : vector<8x128xf32>
      %263 = arith.negf %262 : vector<8x128xf32>
      %264 = math.exp %263 : vector<8x128xf32>
      %cst_57 = arith.constant 1.000000e+00 : f32
      %265 = vector.broadcast %cst_57 : f32 to vector<8x128xf32>
      %266 = arith.addf %265, %264 : vector<8x128xf32>
      %267 = arith.divf %265, %266 : vector<8x128xf32>
      %268 = arith.extf %256 : vector<8x128xbf16> to vector<8x128xf32>
      %269 = arith.addf %268, %259 : vector<8x128xf32>
      %270 = arith.negf %269 : vector<8x128xf32>
      %271 = math.exp %270 : vector<8x128xf32>
      %cst_58 = arith.constant 1.000000e+00 : f32
      %272 = vector.broadcast %cst_58 : f32 to vector<8x128xf32>
      %273 = arith.addf %272, %271 : vector<8x128xf32>
      %274 = arith.divf %272, %273 : vector<8x128xf32>
      %275 = arith.mulf %267, %260 : vector<8x128xf32>
      %276 = arith.extf %257 : vector<8x128xbf16> to vector<8x128xf32>
      %277 = arith.addf %276, %275 : vector<8x128xf32>
      %278 = math.tanh %277 : vector<8x128xf32>
      %cst_59 = arith.constant 1.000000e+00 : f32
      %279 = vector.broadcast %cst_59 : f32 to vector<8x128xf32>
      %280 = arith.subf %279, %274 : vector<8x128xf32>
      %281 = arith.mulf %280, %278 : vector<8x128xf32>
      %282 = arith.mulf %274, %248 : vector<8x128xf32>
      %283 = arith.addf %281, %282 : vector<8x128xf32>
      %284 = vector.broadcast %249 : i32 to vector<8x1xi32>
      %285 = arith.cmpi slt, %284, %11 : vector<8x1xi32>
      %cst_60 = arith.constant 0.000000e+00 : f32
      %286 = vector.shape_cast %285 : vector<8x1xi1> to vector<8x1xi1>
      %287 = vector.broadcast %286 : vector<8x1xi1> to vector<8x128xi1>
      %288 = vector.broadcast %cst_60 : f32 to vector<8x128xf32>
      %289 = arith.select %287, %283, %288 : vector<8x128xi1>, vector<8x128xf32>
      %290 = vector.shape_cast %289 : vector<8x128xf32> to vector<8x1x128xf32>
      %c0_61 = arith.constant 0 : index
      %291 = arith.index_cast %c5_i32 : i32 to index
      %c0_62 = arith.constant 0 : index
      %292 = vector.load %arg6[%c0_61, %291, %c0_62] : memref<8x8x128xf32, #tpu.memory_space<vmem>>, vector<8x1x128xf32>
      tpu.vector_store %arg6[%c0_61, %291, %c0_62], %290 {strides = array<i32>} : memref<8x8x128xf32, #tpu.memory_space<vmem>>, vector<8x1x128xf32>,
      %293 = vector.shape_cast %285 : vector<8x1xi1> to vector<8x1xi1>
      %294 = vector.broadcast %293 : vector<8x1xi1> to vector<8x128xi1>
      %295 = arith.select %294, %283, %248 : vector<8x128xi1>, vector<8x128xf32>
      %c6_i32 = arith.constant 6 : i32
      %296 = arith.addi %0, %c6_i32 : i32
      %c0_63 = arith.constant 0 : index
      %297 = arith.index_cast %c6_i32 : i32 to index
      %c0_64 = arith.constant 0 : index
      %298 = vector.load %arg3[%c0_63, %297, %c0_64] : memref<8x8x384xbf16, #tpu.memory_space<vmem>>, vector<8x1x384xbf16>
      %299 = vector.shape_cast %298 : vector<8x1x384xbf16> to vector<8x384xbf16>
      %300 = arith.truncf %295 : vector<8x128xf32> to vector<8x128xbf16>
      %cst_65 = arith.constant dense<0.000000e+00> : vector<8x384xf32>
      %301 = tpu.matmul %300, %12, %cst_65 {dimension_numbers = #tpu.dot_dimension_numbers<[1], [0], [0], [1], [0, 0, 1, 1], [], []>} : vector<8x128xbf16>, vector<128x384xbf16>, vector<8x384xf32> -> vector<8x384xf32>
      %302 = vector.extract_strided_slice %299 {offsets = [0, 0], sizes = [8, 128], strides = [1, 1]} : vector<8x384xbf16> to vector<8x128xbf16>
      %303 = vector.extract_strided_slice %299 {offsets = [0, 128], sizes = [8, 128], strides = [1, 1]} : vector<8x384xbf16> to vector<8x128xbf16>
      %304 = vector.extract_strided_slice %299 {offsets = [0, 256], sizes = [8, 128], strides = [1, 1]} : vector<8x384xbf16> to vector<8x128xbf16>
      %305 = vector.extract_strided_slice %301 {offsets = [0, 0], sizes = [8, 128], strides = [1, 1]} : vector<8x384xf32> to vector<8x128xf32>
      %306 = vector.extract_strided_slice %301 {offsets = [0, 128], sizes = [8, 128], strides = [1, 1]} : vector<8x384xf32> to vector<8x128xf32>
      %307 = vector.extract_strided_slice %301 {offsets = [0, 256], sizes = [8, 128], strides = [1, 1]} : vector<8x384xf32> to vector<8x128xf32>
      %308 = arith.extf %302 : vector<8x128xbf16> to vector<8x128xf32>
      %309 = arith.addf %308, %305 : vector<8x128xf32>
      %310 = arith.negf %309 : vector<8x128xf32>
      %311 = math.exp %310 : vector<8x128xf32>
      %cst_66 = arith.constant 1.000000e+00 : f32
      %312 = vector.broadcast %cst_66 : f32 to vector<8x128xf32>
      %313 = arith.addf %312, %311 : vector<8x128xf32>
      %314 = arith.divf %312, %313 : vector<8x128xf32>
      %315 = arith.extf %303 : vector<8x128xbf16> to vector<8x128xf32>
      %316 = arith.addf %315, %306 : vector<8x128xf32>
      %317 = arith.negf %316 : vector<8x128xf32>
      %318 = math.exp %317 : vector<8x128xf32>
      %cst_67 = arith.constant 1.000000e+00 : f32
      %319 = vector.broadcast %cst_67 : f32 to vector<8x128xf32>
      %320 = arith.addf %319, %318 : vector<8x128xf32>
      %321 = arith.divf %319, %320 : vector<8x128xf32>
      %322 = arith.mulf %314, %307 : vector<8x128xf32>
      %323 = arith.extf %304 : vector<8x128xbf16> to vector<8x128xf32>
      %324 = arith.addf %323, %322 : vector<8x128xf32>
      %325 = math.tanh %324 : vector<8x128xf32>
      %cst_68 = arith.constant 1.000000e+00 : f32
      %326 = vector.broadcast %cst_68 : f32 to vector<8x128xf32>
      %327 = arith.subf %326, %321 : vector<8x128xf32>
      %328 = arith.mulf %327, %325 : vector<8x128xf32>
      %329 = arith.mulf %321, %295 : vector<8x128xf32>
      %330 = arith.addf %328, %329 : vector<8x128xf32>
      %331 = vector.broadcast %296 : i32 to vector<8x1xi32>
      %332 = arith.cmpi slt, %331, %11 : vector<8x1xi32>
      %cst_69 = arith.constant 0.000000e+00 : f32
      %333 = vector.shape_cast %332 : vector<8x1xi1> to vector<8x1xi1>
      %334 = vector.broadcast %333 : vector<8x1xi1> to vector<8x128xi1>
      %335 = vector.broadcast %cst_69 : f32 to vector<8x128xf32>
      %336 = arith.select %334, %330, %335 : vector<8x128xi1>, vector<8x128xf32>
      %337 = vector.shape_cast %336 : vector<8x128xf32> to vector<8x1x128xf32>
      %c0_70 = arith.constant 0 : index
      %338 = arith.index_cast %c6_i32 : i32 to index
      %c0_71 = arith.constant 0 : index
      %339 = vector.load %arg6[%c0_70, %338, %c0_71] : memref<8x8x128xf32, #tpu.memory_space<vmem>>, vector<8x1x128xf32>
      tpu.vector_store %arg6[%c0_70, %338, %c0_71], %337 {strides = array<i32>} : memref<8x8x128xf32, #tpu.memory_space<vmem>>, vector<8x1x128xf32>,
      %340 = vector.shape_cast %332 : vector<8x1xi1> to vector<8x1xi1>
      %341 = vector.broadcast %340 : vector<8x1xi1> to vector<8x128xi1>
      %342 = arith.select %341, %330, %295 : vector<8x128xi1>, vector<8x128xf32>
      %c7_i32 = arith.constant 7 : i32
      %343 = arith.addi %0, %c7_i32 : i32
      %c0_72 = arith.constant 0 : index
      %344 = arith.index_cast %c7_i32 : i32 to index
      %c0_73 = arith.constant 0 : index
      %345 = vector.load %arg3[%c0_72, %344, %c0_73] : memref<8x8x384xbf16, #tpu.memory_space<vmem>>, vector<8x1x384xbf16>
      %346 = vector.shape_cast %345 : vector<8x1x384xbf16> to vector<8x384xbf16>
      %347 = arith.truncf %342 : vector<8x128xf32> to vector<8x128xbf16>
      %cst_74 = arith.constant dense<0.000000e+00> : vector<8x384xf32>
      %348 = tpu.matmul %347, %12, %cst_74 {dimension_numbers = #tpu.dot_dimension_numbers<[1], [0], [0], [1], [0, 0, 1, 1], [], []>} : vector<8x128xbf16>, vector<128x384xbf16>, vector<8x384xf32> -> vector<8x384xf32>
      %349 = vector.extract_strided_slice %346 {offsets = [0, 0], sizes = [8, 128], strides = [1, 1]} : vector<8x384xbf16> to vector<8x128xbf16>
      %350 = vector.extract_strided_slice %346 {offsets = [0, 128], sizes = [8, 128], strides = [1, 1]} : vector<8x384xbf16> to vector<8x128xbf16>
      %351 = vector.extract_strided_slice %346 {offsets = [0, 256], sizes = [8, 128], strides = [1, 1]} : vector<8x384xbf16> to vector<8x128xbf16>
      %352 = vector.extract_strided_slice %348 {offsets = [0, 0], sizes = [8, 128], strides = [1, 1]} : vector<8x384xf32> to vector<8x128xf32>
      %353 = vector.extract_strided_slice %348 {offsets = [0, 128], sizes = [8, 128], strides = [1, 1]} : vector<8x384xf32> to vector<8x128xf32>
      %354 = vector.extract_strided_slice %348 {offsets = [0, 256], sizes = [8, 128], strides = [1, 1]} : vector<8x384xf32> to vector<8x128xf32>
      %355 = arith.extf %349 : vector<8x128xbf16> to vector<8x128xf32>
      %356 = arith.addf %355, %352 : vector<8x128xf32>
      %357 = arith.negf %356 : vector<8x128xf32>
      %358 = math.exp %357 : vector<8x128xf32>
      %cst_75 = arith.constant 1.000000e+00 : f32
      %359 = vector.broadcast %cst_75 : f32 to vector<8x128xf32>
      %360 = arith.addf %359, %358 : vector<8x128xf32>
      %361 = arith.divf %359, %360 : vector<8x128xf32>
      %362 = arith.extf %350 : vector<8x128xbf16> to vector<8x128xf32>
      %363 = arith.addf %362, %353 : vector<8x128xf32>
      %364 = arith.negf %363 : vector<8x128xf32>
      %365 = math.exp %364 : vector<8x128xf32>
      %cst_76 = arith.constant 1.000000e+00 : f32
      %366 = vector.broadcast %cst_76 : f32 to vector<8x128xf32>
      %367 = arith.addf %366, %365 : vector<8x128xf32>
      %368 = arith.divf %366, %367 : vector<8x128xf32>
      %369 = arith.mulf %361, %354 : vector<8x128xf32>
      %370 = arith.extf %351 : vector<8x128xbf16> to vector<8x128xf32>
      %371 = arith.addf %370, %369 : vector<8x128xf32>
      %372 = math.tanh %371 : vector<8x128xf32>
      %cst_77 = arith.constant 1.000000e+00 : f32
      %373 = vector.broadcast %cst_77 : f32 to vector<8x128xf32>
      %374 = arith.subf %373, %368 : vector<8x128xf32>
      %375 = arith.mulf %374, %372 : vector<8x128xf32>
      %376 = arith.mulf %368, %342 : vector<8x128xf32>
      %377 = arith.addf %375, %376 : vector<8x128xf32>
      %378 = vector.broadcast %343 : i32 to vector<8x1xi32>
      %379 = arith.cmpi slt, %378, %11 : vector<8x1xi32>
      %cst_78 = arith.constant 0.000000e+00 : f32
      %380 = vector.shape_cast %379 : vector<8x1xi1> to vector<8x1xi1>
      %381 = vector.broadcast %380 : vector<8x1xi1> to vector<8x128xi1>
      %382 = vector.broadcast %cst_78 : f32 to vector<8x128xf32>
      %383 = arith.select %381, %377, %382 : vector<8x128xi1>, vector<8x128xf32>
      %384 = vector.shape_cast %383 : vector<8x128xf32> to vector<8x1x128xf32>
      %c0_79 = arith.constant 0 : index
      %385 = arith.index_cast %c7_i32 : i32 to index
      %c0_80 = arith.constant 0 : index
      %386 = vector.load %arg6[%c0_79, %385, %c0_80] : memref<8x8x128xf32, #tpu.memory_space<vmem>>, vector<8x1x128xf32>
      tpu.vector_store %arg6[%c0_79, %385, %c0_80], %384 {strides = array<i32>} : memref<8x8x128xf32, #tpu.memory_space<vmem>>, vector<8x1x128xf32>,
      %387 = vector.shape_cast %379 : vector<8x1xi1> to vector<8x1xi1>
      %388 = vector.broadcast %387 : vector<8x1xi1> to vector<8x128xi1>
      %389 = arith.select %388, %377, %342 : vector<8x128xi1>, vector<8x128xf32>
      %c8_i32_81 = arith.constant 8 : i32
      %c0_82 = arith.constant 0 : index
      %c0_83 = arith.constant 0 : index
      %390 = vector.load %arg7[%c0_82, %c0_83] : memref<8x128xf32, #tpu.memory_space<vmem>>, vector<8x128xf32>
      tpu.vector_store %arg7[%c0_82, %c0_83], %389 {strides = array<i32>} : memref<8x128xf32, #tpu.memory_space<vmem>>, vector<8x128xf32>,
    } else {
    }
    return
  }
  func.func @transform_0(%arg0: i32, %arg1: i32, %arg2: memref<1xi32, #tpu.memory_space<smem>>) -> (i32, i32, i32) {
    %c0_i32 = arith.constant 0 : i32
    %c0_i32_0 = arith.constant 0 : i32
    return %arg0, %arg1, %c0_i32 : i32, i32, i32
  }
  func.func @transform_1(%arg0: i32, %arg1: i32, %arg2: memref<1xi32, #tpu.memory_space<smem>>) -> (i32, i32) {
    %c0_i32 = arith.constant 0 : i32
    %c0_i32_0 = arith.constant 0 : i32
    %c0_i32_1 = arith.constant 0 : i32
    return %c0_i32, %c0_i32_0 : i32, i32
  }
  func.func @transform_2(%arg0: i32, %arg1: i32, %arg2: memref<1xi32, #tpu.memory_space<smem>>) -> (i32, i32) {
    %c0_i32 = arith.constant 0 : i32
    %c0_i32_0 = arith.constant 0 : i32
    return %arg0, %c0_i32 : i32, i32
  }
  func.func @transform_3(%arg0: i32, %arg1: i32, %arg2: memref<1xi32, #tpu.memory_space<smem>>) -> (i32, i32, i32) {
    %c0_i32 = arith.constant 0 : i32
    %c0_i32_0 = arith.constant 0 : i32
    return %arg0, %arg1, %c0_i32 : i32, i32, i32
  }
}

</mosaic_0001>

<bundles_post_ra>
// kernel: tpu_custom_call.1
= control target key start
LH: loop header
LB: loop body
LE: loop exit
PB: predicated region body
PF: predicated region fallthrough
CT: control target
= control target key end

     0   :  { %10 = vsyncpa [#allocation6], 0  ;;  %s10877_s0 = inlined_call_operand.<no memory space> [shape: s32[1], index: 0, kind: input, shape index: {}]   ;;  %s10878_s1 = inlined_call_operand.hbm [shape: bf16[8,8,384], index: 1, kind: input, shape index: {}]   ;;  %s10879_s2 = inlined_call_operand.hbm [shape: bf16[128,384], index: 2, kind: input, shape index: {}]   ;;  %s10880_s3 = inlined_call_operand.vmem [shape: s32[8,1], index: 3, kind: input, shape index: {}]   ;;  %s10881_s4 = inlined_call_operand.hbm [shape: f32[8,8,128], index: 4, kind: output, shape index: {}]  }
   0x1   :  { %11 = vsyncpa [#allocation9], 0 }
   0x2   :  { %12 = vsyncpa [#allocation7], 0  ;;  %s17_s17 = sshll.u32 %s10878_s1, 4  ;;  %s6055_s18 = smov [#allocation5]   ;;  %s18_s17 = int_to_ptr.hbm [resolvable:$true] %s17_s17 }
   0x3   :  { %s19_s19 = sshll.u32 %s6055_s18, 4  ;;  %s30_s22 = sshll.u32 %s10879_s2, 4  ;;  %s20_s19 = int_to_ptr.vmem [resolvable:$true] %s19_s19  ;;  %s31_s22 = int_to_ptr.hbm [resolvable:$true] %s30_s22 }
   0x4   :  { %s6056_s23 = smov 192   ;;  %s6057_s24 = smov 12  }
   0x5   :  { %25 = dma.hbm_to_vmem [thread:$0]  %s18_s17, 1536, %s20_s19, [#allocation6], %s6056_s23, %s6056_s23, %s6057_s24  }
   0x6   :  { %s6058_s25 = smov [#allocation8]  }
   0x7   :  { %s32_s26 = sshll.u32 %s6058_s25, 4  ;;  %s33_s26 = int_to_ptr.vmem [resolvable:$true] %s32_s26 }
   0x8   :  { %38 = dma.hbm_to_vmem [thread:$0]  %s31_s22, 3072, %s33_s26, [#allocation9], %s6056_s23, %s6056_s23, %s6057_s24  }
   0x9   :  { %6049 = dma.done.wait [#allocation6], 1536  }
   0xa   :  { %6050 = vsyncadd [#allocation6], 4294965760 }
   0xb   :  { %6051 = dma.done.wait [#allocation9], 3072  }
   0xc   :  { %6052 = vsyncadd [#allocation9], 4294964224  ;;  %v6059_v0 = vmov 0.0   ;;  %p5062_p0 = scmp.gt.s32.totalorder %s10877_s0, 0 }
   0xd   :  { %55 = vst [vmem:[#allocation2] sm:$0xff] %v6059_v0 }
   0xe   :  { %59 = sbr.rel (%p5062_p0) target bundleno = 28 (0x1c), region = 29 }
  0x13   :  { %v6060_v1 = vmov 0.0  }
  0x14   :  { %60 = vst [vmem:[#allocation10] sm:$0xff] %v6060_v1 }
  0x15   :  { %61 = vst [vmem:[#allocation10 + $0x8] sm:$0xff] %v6060_v1 }
  0x16   :  { %62 = vst [vmem:[#allocation10 + $0x10] sm:$0xff] %v6060_v1 }
  0x17   :  { %63 = vst [vmem:[#allocation10 + $0x18] sm:$0xff] %v6060_v1 }
  0x18   :  { %64 = vst [vmem:[#allocation10 + $0x20] sm:$0xff] %v6060_v1 }
  0x19   :  { %65 = vst [vmem:[#allocation10 + $0x28] sm:$0xff] %v6060_v1 }
  0x1a   :  { %66 = vst [vmem:[#allocation10 + $0x30] sm:$0xff] %v6060_v1 }
  0x1b   :  { %67 = vst [vmem:[#allocation10 + $0x38] sm:$0xff] %v6060_v1 }
  0x1c PF:  { %p5064_p1 = scmp.le.s32.totalorder %s10877_s0, 0 }
  0x1e   :  { %71 = sbr.rel (%p5064_p1) target bundleno = 1940 (0x794), region = 33 }
  0x23   :  { %v5151_v2 = vld [vmem:[#allocation8 + $0xa8] sm:$0xf]  ;;  %v5319_v3 = vld [vmem:[#allocation8 + $0xb0] sm:$0xf0]  ;;  %v5318_v4 = vld [vmem:[#allocation8 + $0xac] sm:$0xf] }
  0x24   :  { %v6102_v5 = vor.u32 %v5319_v3, %v5151_v2  ;;  %v5153_v6 = vld [vmem:[#allocation8 + $0xb4] sm:$0xf0]  ;;  %v5139_v7 = vld [vmem:[#allocation8 + $0x90] sm:$0xf]  ;;  %v5316_v8 = vld [vmem:[#allocation8 + $0x98] sm:$0xf0] }
  0x25   :  { %v6104_v9 = vor.u32 %v5318_v4, %v5153_v6  ;;  %v5315_v10 = vld [vmem:[#allocation8 + $0x94] sm:$0xf]  ;;  %v5141_v11 = vld [vmem:[#allocation8 + $0x9c] sm:$0xf0]  ;;  %v6107_v12 = vor.u32 %v5316_v8, %v5139_v7  ;;  %v5127_v14 = vld [vmem:[#allocation8 + $0x78] sm:$0xf] }
  0x26   :  { %10944 = vst [vmem:[#allocation14_spill] sm:$0xff] %v6102_v5  ;;  %251 = vmatpush.bf16.msra.mxu0 %v6102_v5  ;;  %858 = vmatpush.bf16.msra.mxu3 %v6102_v5  ;;  %v6111_v13 = vor.u32 %v5315_v10, %v5141_v11  ;;  %v5313_v15 = vld [vmem:[#allocation8 + $0x80] sm:$0xf0]  ;;  %v5312_v16 = vld [vmem:[#allocation8 + $0x7c] sm:$0xf]  ;;  %v10882_v39 = vmov 0  }
  0x27   :  { %10945 = vst [vmem:[#allocation15_spill] sm:$0xff] %v6104_v9  ;;  %264 = vmatpush.bf16.msra.mxu1 %v6104_v9  ;;  %v5129_v17 = vld [vmem:[#allocation8 + $0x84] sm:$0xf0]  ;;  %v5159_v18 = vld [vmem:[#allocation8 + $0xb0] sm:$0xf]  ;;  %v6114_v19 = vor.u32 %v5313_v15, %v5127_v14  ;;  %5331 = vset.pattern.permute.xlu0 %v10882_v39  ;;  %v72_v46 = vld [vmem:[%s10880_s3] sm:$0xff] }
  0x28   :  { %10946 = vst [vmem:[#allocation16_spill] sm:$0xff] %v6107_v12  ;;  %v5320_v20 = vld [vmem:[#allocation8 + $0xb8] sm:$0xf0]  ;;  %v6118_v21 = vor.u32 %v5312_v16, %v5129_v17  ;;  %v5115_v22 = vld [vmem:[#allocation8 + $0x60] sm:$0xf]  ;;  %5332 = vset.pattern.permute.xlu1 %v10882_v39  ;;  %vm5177_vm0 = vcmp.gt.s32.totalorder %v72_v46, 0  ;;  %5333 = vset.pattern.permute.xlu2 %v10882_v39 }
  0x29   :  { %10947 = vst [vmem:[#allocation17_spill] sm:$0xff] %v6111_v13  ;;  %v5310_v23 = vld [vmem:[#allocation8 + $0x68] sm:$0xf0]  ;;  %v6120_v24 = vor.u32 %v5320_v20, %v5159_v18  ;;  %v5147_v25 = vld [vmem:[#allocation8 + $0x98] sm:$0xf]  ;;  %v780_v50 = vsel %vm5177_vm0, 1, %v10882_v39 }
  0x2a   :  { %252 = vmatpush.bf16.msra.mxu0 %v6107_v12  ;;  %10948 = vst [vmem:[#allocation18_spill] sm:$0xff] %v6114_v19  ;;  %859 = vmatpush.bf16.msra.mxu3 %v6107_v12  ;;  %v5309_v26 = vld [vmem:[#allocation8 + $0x64] sm:$0xf]  ;;  %v5117_v27 = vld [vmem:[#allocation8 + $0x6c] sm:$0xf0]  ;;  %v6126_v30 = vor.u32 %v5310_v23, %v5115_v22  ;;  %vm5194_vm1 = vcmp.gt.s32.totalorder %v72_v46, 1 }
  0x2b   :  { %265 = vmatpush.bf16.msra.mxu1 %v6111_v13  ;;  %10949 = vst [vmem:[#allocation19_spill] sm:$0xff] %v6118_v21  ;;  %v5317_v28 = vld [vmem:[#allocation8 + $0xa0] sm:$0xf0]  ;;  %277 = vmatpush.bf16.msra.mxu2 %v6120_v24  ;;  %v5135_v31 = vld [vmem:[#allocation8 + $0x80] sm:$0xf]  ;;  %v6130_v33 = vor.u32 %v5309_v26, %v5117_v27  ;;  %v1387_v2 = vsel %vm5194_vm1, 1, %v10882_v39 }
  0x2c   :  { %10950 = vst [vmem:[#allocation20_spill] sm:$0xff] %v6120_v24  ;;  %v6123_v29 = vor.u32 %v5317_v28, %v5147_v25  ;;  %v5314_v32 = vld [vmem:[#allocation8 + $0x88] sm:$0xf0]  ;;  %v5103_v34 = vld [vmem:[#allocation8 + $0x48] sm:$0xf]  ;;  %782 = vperm.xlu0 %5331, %v780_v50   ;;  %v105_v8 = vld [vmem:[#allocation2] sm:$0xff] }
  0x2d   :  { %10952 = vst [vmem:[#allocation22_spill] sm:$0xff] %v6126_v30  ;;  %v5307_v35 = vld [vmem:[#allocation8 + $0x50] sm:$0xf0]  ;;  %v5306_v36 = vld [vmem:[#allocation8 + $0x4c] sm:$0xf]  ;;  %v6133_v38 = vor.u32 %v5314_v32, %v5135_v31  ;;  %vm5279_vm2 = vcmp.gt.s32.totalorder %v72_v46, 6  ;;  %v122_v15 = vpack.c.bf16 %v105_v8, %v105_v8 }
  0x2e   :  { %10951 = vst [vmem:[#allocation21_spill] sm:$0xff] %v6123_v29  ;;  %253 = vmatpush.bf16.msra.mxu0 %v6114_v19  ;;  %860 = vmatpush.bf16.msra.mxu3 %v6114_v19  ;;  %v5105_v37 = vld [vmem:[#allocation8 + $0x54] sm:$0xf0]  ;;  %v6137_v40 = vor.u32 %v5307_v35, %v5103_v34  ;;  %v5123_v41 = vld [vmem:[#allocation8 + $0x68] sm:$0xf]  ;;  %v4387_v20 = vsel %vm5279_vm2, 1, %v10882_v39 }
  0x2f   :  { %266 = vmatpush.bf16.msra.mxu1 %v6118_v21  ;;  %10953 = vst [vmem:[#allocation23_spill] sm:$0xff] %v6130_v33  ;;  %278 = vmatpush.bf16.msra.mxu2 %v6123_v29  ;;  %v5311_v42 = vld [vmem:[#allocation8 + $0x70] sm:$0xf0]  ;;  %v6141_v43 = vor.u32 %v5306_v36, %v5105_v37  ;;  %v5091_v44 = vld [vmem:[#allocation8 + $0x30] sm:$0xf] }
  0x30   :  { %10954 = vst [vmem:[#allocation24_spill] sm:$0xff] %v6133_v38  ;;  %v5304_v45 = vld [vmem:[#allocation8 + $0x38] sm:$0xf0]  ;;  %v5303_v47 = vld [vmem:[#allocation8 + $0x34] sm:$0xf]  ;;  %v6149_v49 = vor.u32 %v5311_v42, %v5123_v41 }
  0x31   :  { %10955 = vst [vmem:[#allocation25_spill] sm:$0xff] %v6137_v40  ;;  %v5093_v48 = vld [vmem:[#allocation8 + $0x3c] sm:$0xf0]  ;;  %v6153_v51 = vor.u32 %v5304_v45, %v5091_v44  ;;  %v5111_v52 = vld [vmem:[#allocation8 + $0x50] sm:$0xf] }
  0x32   :  { %254 = vmatpush.bf16.msra.mxu0 %v6126_v30  ;;  %861 = vmatpush.bf16.msra.mxu3 %v6126_v30  ;;  %10956 = vst [vmem:[#allocation26_spill] sm:$0xff] %v6141_v43  ;;  %v5308_v53 = vld [vmem:[#allocation8 + $0x58] sm:$0xf0]  ;;  %v6156_v54 = vor.u32 %v5303_v47, %v5093_v48  ;;  %v5079_v55 = vld [vmem:[#allocation8 + $0x18] sm:$0xf] }
  0x33   :  { %267 = vmatpush.bf16.msra.mxu1 %v6130_v33  ;;  %279 = vmatpush.bf16.msra.mxu2 %v6133_v38  ;;  %10957 = vst [vmem:[#allocation27_spill] sm:$0xff] %v6149_v49  ;;  %v5301_v56 = vld [vmem:[#allocation8 + $0x20] sm:$0xf0]  ;;  %v5300_v57 = vld [vmem:[#allocation8 + $0x1c] sm:$0xf]  ;;  %v6160_v59 = vor.u32 %v5308_v53, %v5111_v52 }
  0x34   :  { %10958 = vst [vmem:[#allocation28_spill] sm:$0xff] %v6153_v51  ;;  %v5081_v58 = vld [vmem:[#allocation8 + $0x24] sm:$0xf0]  ;;  %v6163_v60 = vor.u32 %v5301_v56, %v5079_v55  ;;  %v5099_v61 = vld [vmem:[#allocation8 + $0x38] sm:$0xf]  ;;  %1389 = vperm.xlu0 %5331, %v1387_v2  }
  0x35   :  { %10959 = vst [vmem:[#allocation29_spill] sm:$0xff] %v6156_v54  ;;  %v5305_v62 = vld [vmem:[#allocation8 + $0x40] sm:$0xf0]  ;;  %v6166_v63 = vor.u32 %v5300_v57, %v5081_v58  ;;  %v5067_v0 = vld [vmem:[#allocation8] sm:$0xf] }
  0x36   :  { %255 = vmatpush.bf16.msra.mxu0 %v6137_v40  ;;  %862 = vmatpush.bf16.msra.mxu3 %v6137_v40  ;;  %10960 = vst [vmem:[#allocation30_spill] sm:$0xff] %v6160_v59  ;;  %v5298_v1 = vld [vmem:[#allocation8 + $0x8] sm:$0xf0]  ;;  %v5297_v3 = vld [vmem:[#allocation8 + $0x4] sm:$0xf]  ;;  %v6171_v6 = vor.u32 %v5305_v62, %v5099_v61 }
  0x37   :  { %268 = vmatpush.bf16.msra.mxu1 %v6141_v43  ;;  %280 = vmatpush.bf16.msra.mxu2 %v6149_v49  ;;  %10961 = vst [vmem:[#allocation31_spill] sm:$0xff] %v6163_v60  ;;  %v5069_v4 = vld [vmem:[#allocation8 + $0xc] sm:$0xf0]  ;;  %v6174_v7 = vor.u32 %v5298_v1, %v5067_v0  ;;  %v5087_v10 = vld [vmem:[#allocation8 + $0x20] sm:$0xf] }
  0x38   :  { %10962 = vst [vmem:[#allocation32_spill] sm:$0xff] %v6166_v63  ;;  %v5302_v11 = vld [vmem:[#allocation8 + $0x28] sm:$0xf0]  ;;  %v6177_v14 = vor.u32 %v5297_v3, %v5069_v4  ;;  %v5075_v17 = vld [vmem:[#allocation8 + $0x8] sm:$0xf] }
  0x39   :  { %10963 = vst [vmem:[#allocation33_spill] sm:$0xff] %v6171_v6  ;;  %v6181_v16 = vor.u32 %v5302_v11, %v5087_v10  ;;  %v5299_v18 = vld [vmem:[#allocation8 + $0x10] sm:$0xf0]  ;;  %v106_v23 = vld [vmem:[#allocation5] sm:$0x11] }
  0x3a   :  { %256 = vmatpush.bf16.msra.mxu0 %v6153_v51  ;;  %863 = vmatpush.bf16.msra.mxu3 %v6153_v51  ;;  %10964 = vst [vmem:[#allocation34_spill] sm:$0xff] %v6174_v7  ;;  %v6190_v22 = vor.u32 %v5299_v18, %v5075_v17  ;;  %v108_v25 = vld [vmem:[#allocation5 + $0xc] sm:$0x11]  ;;  %v110_v26 = vld [vmem:[#allocation5 + $0x18] sm:$0x11]  ;;  %v482_v34 = vrot.slane %v106_v23, 4  ;;  %v290_v44 = vunpack.c.l.bf16 %v106_v23 }
  0x3b   :  { %269 = vmatpush.bf16.msra.mxu1 %v6156_v54  ;;  %281 = vmatpush.bf16.msra.mxu2 %v6160_v59  ;;  %10965 = vst [vmem:[#allocation35_spill] sm:$0xff] %v6177_v14  ;;  %v112_v27 = vld [vmem:[#allocation5 + $0x24] sm:$0x11]  ;;  %v114_v28 = vld [vmem:[#allocation5 + $0x30] sm:$0x11]  ;;  %v483_v36 = vrot.slane %v108_v25, 4  ;;  %v291_v45 = vunpack.c.l.bf16 %v108_v25  ;;  %v292_v46 = vunpack.c.l.bf16 %v110_v26 }
  0x3c   :  { %10966 = vst [vmem:[#allocation36_spill] sm:$0xff] %v6181_v16  ;;  %4389 = vperm.xlu0 %5331, %v4387_v20   ;;  %v116_v31 = vld [vmem:[#allocation5 + $0x3c] sm:$0x11]  ;;  %v118_v32 = vld [vmem:[#allocation5 + $0x48] sm:$0x11]  ;;  %v484_v37 = vrot.slane %v110_v26, 4  ;;  %v293_v47 = vunpack.c.l.bf16 %v112_v27  ;;  %v294_v48 = vunpack.c.l.bf16 %v114_v28  ;;  %v498_v58 = vunpack.c.l.bf16 %v482_v34 }
  0x3d   :  { %10967 = vst [vmem:[#allocation37_spill] sm:$0xff] %v6190_v22  ;;  %v120_v35 = vld [vmem:[#allocation5 + $0x54] sm:$0x11]  ;;  %v485_v41 = vrot.slane %v112_v27, 4  ;;  %v486_v42 = vrot.slane %v114_v28, 4  ;;  %v295_v50 = vunpack.c.l.bf16 %v116_v31  ;;  %v296_v52 = vunpack.c.l.bf16 %v118_v32 }
  0x3e   :  { %257 = vmatpush.bf16.msra.mxu0 %v6163_v60  ;;  %864 = vmatpush.bf16.msra.mxu3 %v6163_v60  ;;  %v297_v53 = vunpack.c.l.bf16 %v120_v35  ;;  %v487_v55 = vrot.slane %v116_v31, 4  ;;  %v488_v56 = vrot.slane %v118_v32, 4  ;;  %v489_v57 = vrot.slane %v120_v35, 4 }
  0x3f   :  { %270 = vmatpush.bf16.msra.mxu1 %v6166_v63  ;;  %282 = vmatpush.bf16.msra.mxu2 %v6171_v6  ;;  %v499_v62 = vunpack.c.l.bf16 %v483_v36  ;;  %v500_v0 = vunpack.c.l.bf16 %v484_v37  ;;  %v501_v1 = vunpack.c.l.bf16 %v485_v41  ;;  %v502_v2 = vunpack.c.l.bf16 %v486_v42 }
  0x40   :  { %v503_v34 = vunpack.c.l.bf16 %v487_v55 }
  0x42   :  { %258 = vmatpush.bf16.msra.mxu0 %v6174_v7  ;;  %865 = vmatpush.bf16.msra.mxu3 %v6174_v7 }
  0x43   :  { %271 = vmatpush.bf16.msra.mxu1 %v6177_v14  ;;  %283 = vmatpush.bf16.msra.mxu2 %v6181_v16 }
  0x45   :  { %259 = vmatmul.bf16.vlgmr.msra.gmra.mxu0 %v122_v15 }
  0x46   :  { %871 = vmatpush.bf16.msrb.mxu0 %v6104_v9  ;;  %272 = vmatmul.bf16.vlgmr.msra.gmra.mxu1 %v122_v15 }
  0x47   :  { %884 = vmatpush.bf16.msrb.mxu1 %v6120_v24  ;;  %1471 = vmatpush.bf16.msrb.mxu3 %v6104_v9 }
  0x48   :  { %284 = vmatpush.bf16.msra.mxu2 %v6190_v22 }
  0x4a   :  { %872 = vmatpush.bf16.msrb.mxu0 %v6111_v13 }
  0x4b   :  { %885 = vmatpush.bf16.msrb.mxu1 %v6123_v29  ;;  %1472 = vmatpush.bf16.msrb.mxu3 %v6111_v13 }
  0x4c   :  { %1458 = vmatpush.bf16.msrb.mxu2 %v6102_v5 }
  0x4d   :  { %285 = vmatmul.bf16.vlgmr.msra.gmra.mxu2 %v122_v15 }
  0x4e   :  { %873 = vmatpush.bf16.msrb.mxu0 %v6118_v21 }
  0x4f   :  { %886 = vmatpush.bf16.msrb.mxu1 %v6133_v38  ;;  %1473 = vmatpush.bf16.msrb.mxu3 %v6118_v21 }
  0x50   :  { %1459 = vmatpush.bf16.msrb.mxu2 %v6107_v12 }
  0x52   :  { %874 = vmatpush.bf16.msrb.mxu0 %v6130_v33 }
  0x53   :  { %887 = vmatpush.bf16.msrb.mxu1 %v6149_v49  ;;  %1474 = vmatpush.bf16.msrb.mxu3 %v6130_v33 }
  0x54   :  { %1460 = vmatpush.bf16.msrb.mxu2 %v6114_v19 }
  0x56   :  { %875 = vmatpush.bf16.msrb.mxu0 %v6141_v43 }
  0x57   :  { %888 = vmatpush.bf16.msrb.mxu1 %v6160_v59  ;;  %1475 = vmatpush.bf16.msrb.mxu3 %v6141_v43 }
  0x58   :  { %1461 = vmatpush.bf16.msrb.mxu2 %v6126_v30 }
  0x5a   :  { %876 = vmatpush.bf16.msrb.mxu0 %v6156_v54 }
  0x5b   :  { %889 = vmatpush.bf16.msrb.mxu1 %v6171_v6  ;;  %1476 = vmatpush.bf16.msrb.mxu3 %v6156_v54 }
  0x5c   :  { %1462 = vmatpush.bf16.msrb.mxu2 %v6137_v40 }
  0x5e   :  { %877 = vmatpush.bf16.msrb.mxu0 %v6166_v63 }
  0x5f   :  { %890 = vmatpush.bf16.msrb.mxu1 %v6181_v16  ;;  %1477 = vmatpush.bf16.msrb.mxu3 %v6166_v63 }
  0x60   :  { %1463 = vmatpush.bf16.msrb.mxu2 %v6153_v51 }
  0x62   :  { %878 = vmatpush.bf16.msrb.mxu0 %v6177_v14 }
  0x63   :  { %891 = vmatpush.bf16.msrb.mxu1 %v6190_v22  ;;  %1478 = vmatpush.bf16.msrb.mxu3 %v6177_v14 }
  0x64   :  { %1464 = vmatpush.bf16.msrb.mxu2 %v6163_v60 }
  0x66   :  { %1484 = vmatpush.bf16.msra.mxu0 %v6120_v24 }
  0x67   :  { %2058 = vmatpush.bf16.msra.mxu1 %v6102_v5 }
  0x68   :  { %1465 = vmatpush.bf16.msrb.mxu2 %v6174_v7 }
  0x6a   :  { %1485 = vmatpush.bf16.msra.mxu0 %v6123_v29 }
  0x6b   :  { %2059 = vmatpush.bf16.msra.mxu1 %v6107_v12 }
  0x6c   :  { %2071 = vmatpush.bf16.msra.mxu2 %v6104_v9 }
  0x6e   :  { %1486 = vmatpush.bf16.msra.mxu0 %v6133_v38 }
  0x6f   :  { %2060 = vmatpush.bf16.msra.mxu1 %v6114_v19 }
  0x70   :  { %2072 = vmatpush.bf16.msra.mxu2 %v6111_v13 }
  0x72   :  { %1487 = vmatpush.bf16.msra.mxu0 %v6149_v49 }
  0x73   :  { %2061 = vmatpush.bf16.msra.mxu1 %v6126_v30 }
  0x74   :  { %2073 = vmatpush.bf16.msra.mxu2 %v6118_v21 }
  0x76   :  { %1488 = vmatpush.bf16.msra.mxu0 %v6160_v59 }
  0x77   :  { %2062 = vmatpush.bf16.msra.mxu1 %v6137_v40 }
  0x78   :  { %2074 = vmatpush.bf16.msra.mxu2 %v6130_v33 }
  0x7a   :  { %1489 = vmatpush.bf16.msra.mxu0 %v6171_v6 }
  0x7b   :  { %2063 = vmatpush.bf16.msra.mxu1 %v6153_v51 }
  0x7c   :  { %2075 = vmatpush.bf16.msra.mxu2 %v6141_v43 }
  0x7e   :  { %1490 = vmatpush.bf16.msra.mxu0 %v6181_v16 }
  0x7f   :  { %2064 = vmatpush.bf16.msra.mxu1 %v6163_v60 }
  0x80   :  { %2076 = vmatpush.bf16.msra.mxu2 %v6156_v54 }
  0x82   :  { %1491 = vmatpush.bf16.msra.mxu0 %v6190_v22 }
  0x83   :  { %2065 = vmatpush.bf16.msra.mxu1 %v6174_v7 }
  0x84   :  { %2077 = vmatpush.bf16.msra.mxu2 %v6166_v63 }
  0x88   :  { %2078 = vmatpush.bf16.msra.mxu2 %v6177_v14 }
  0xc2   :  { %v260_v61 = vpop.f32.mrf.mxu0 }
  0xc3   :  { %v299_v3 = vrot.slane %v260_v61, 1  ;;  %v300_v4 = vrot.slane %v260_v61, 2  ;;  %v301_v8 = vrot.slane %v260_v61, 3  ;;  %v302_v10 = vrot.slane %v260_v61, 4  ;;  %v273_v11 = vpop.f32.mrf.mxu1 }
  0xc4   :  { %v303_v15 = vrot.slane %v260_v61, 5  ;;  %v304_v17 = vrot.slane %v260_v61, 6  ;;  %v305_v18 = vrot.slane %v260_v61, 7  ;;  %v314_v20 = vadd.f32 %v290_v44, %v260_v61 }
  0xc5   :  { %v315_v23 = vadd.f32 %v299_v3, %v291_v45  ;;  %v316_v25 = vadd.f32 %v300_v4, %v292_v46  ;;  %v317_v26 = vadd.f32 %v301_v8, %v293_v47  ;;  %v318_v27 = vadd.f32 %v302_v10, %v294_v48 }
  0xc6   :  { %v319_v28 = vadd.f32 %v303_v15, %v295_v50  ;;  %v320_v31 = vadd.f32 %v304_v17, %v296_v52  ;;  %v5161_v32 = vmul.f32 -1.442695, %v314_v20  ;;  %v321_v35 = vadd.f32 %v305_v18, %v297_v53 }
  0xc7   :  { %v5162_v36 = vmul.f32 -1.442695, %v315_v23  ;;  %v5163_v37 = vmul.f32 -1.442695, %v316_v25  ;;  %v5164_v41 = vmul.f32 -1.442695, %v317_v26  ;;  %v522_v14 = vadd.f32 %v498_v58, %v273_v11 }
  0xc8   :  { %5334 = vpow2.f32 %v5161_v32  ;;  %v5165_v42 = vmul.f32 -1.442695, %v318_v27  ;;  %v5166_v39 = vmul.f32 -1.442695, %v319_v28  ;;  %v5167_v7 = vmul.f32 -1.442695, %v320_v31 }
  0xc9   :  { %5336 = vpow2.f32 %v5162_v36  ;;  %v507_v22 = vrot.slane %v273_v11, 1  ;;  %v508_v44 = vrot.slane %v273_v11, 2  ;;  %v509_v45 = vrot.slane %v273_v11, 3 }
  0xca   :  { %5338 = vpow2.f32 %v5163_v37  ;;  %v510_v46 = vrot.slane %v273_v11, 4  ;;  %v511_v47 = vrot.slane %v273_v11, 5  ;;  %v262_v48 = vpop.f32.mrf.mxu0  ;;  %v5168_v50 = vmul.f32 -1.442695, %v321_v35 }
  0xcb   :  { %5340 = vpow2.f32 %v5164_v41  ;;  %v504_v52 = vunpack.c.l.bf16 %v488_v56  ;;  %v512_v53 = vrot.slane %v273_v11, 6  ;;  %v275_v55 = vpop.f32.mrf.mxu1  ;;  %v505_v61 = vunpack.c.l.bf16 %v489_v57 }
  0xcc   :  { %5342 = vpow2.f32 %v5165_v42  ;;  %v513_v3 = vrot.slane %v273_v11, 7  ;;  %v523_v4 = vadd.f32 %v507_v22, %v499_v62  ;;  %v524_v58 = vadd.f32 %v508_v44, %v500_v0 }
  0xcd   :  { %5344 = vpow2.f32 %v5166_v39  ;;  %v525_v8 = vadd.f32 %v509_v45, %v501_v1  ;;  %v526_v15 = vadd.f32 %v510_v46, %v502_v2  ;;  %v527_v17 = vadd.f32 %v511_v47, %v503_v34 }
  0xce   :  { %v5335_v10 = vpop.eup %5334  ;;  %5346 = vpow2.f32 %v5167_v7  ;;  %v5169_v18 = vmul.f32 -1.442695, %v522_v14  ;;  %v528_v25 = vadd.f32 %v512_v53, %v504_v52  ;;  %v529_v57 = vadd.f32 %v513_v3, %v505_v61 }
  0xcf   :  { %v5337_v20 = vpop.eup %5336  ;;  %5348 = vpow2.f32 %v5168_v50  ;;  %v6247_v23 = vadd.f32 1.0, %v5335_v10  ;;  %v5170_v39 = vmul.f32 -1.442695, %v523_v4  ;;  %v5171_v7 = vmul.f32 -1.442695, %v524_v58 }
  0xd0   :  { %v6249_v56 = vpop.f32.mrf.mxu2  ;;  %v5339_v26 = vpop.eup %5338  ;;  %v6251_v27 = vadd.f32 1.0, %v5337_v20  ;;  %5350 = vpow2.f32 %v5169_v18  ;;  %v5172_v14 = vmul.f32 -1.442695, %v525_v8  ;;  %v5173_v2 = vmul.f32 -1.442695, %v526_v15 }
  0xd1   :  { %v5341_v22 = vpop.eup %5340  ;;  %v6253_v62 = vadd.f32 1.0, %v5339_v26  ;;  %5352 = vrcp.f32 %v6247_v23  ;;  %v5174_v11 = vmul.f32 -1.442695, %v527_v17  ;;  %v5175_v32 = vmul.f32 -1.442695, %v528_v25 }
  0xd2   :  { %v5343_v0 = vpop.eup %5342  ;;  %v6256_v1 = vadd.f32 1.0, %v5341_v22  ;;  %5354 = vrcp.f32 %v6251_v27  ;;  %v365_v34 = vand.u32 2147483648, %v6247_v23  ;;  %v5176_v37 = vmul.f32 -1.442695, %v529_v57 }
  0xd3   :  { %v5345_v28 = vpop.eup %5344  ;;  %v6259_v31 = vadd.f32 1.0, %v5343_v0  ;;  %5356 = vrcp.f32 %v6253_v62  ;;  %v363_v41 = vand.u32 2147483647, %v6247_v23  ;;  %v378_v45 = vand.u32 2147483647, %v6251_v27 }
  0xd4   :  { %v5347_v35 = vpop.eup %5346  ;;  %v6263_v36 = vadd.f32 1.0, %v5345_v28  ;;  %5358 = vrcp.f32 %v6256_v1  ;;  %v380_v46 = vand.u32 2147483648, %v6251_v27  ;;  %vm359_vm3 = vweird.f32 %v6247_v23 }
  0xd5   :  { %v5349_v42 = vpop.eup %5348  ;;  %v6267_v44 = vadd.f32 1.0, %v5347_v35  ;;  %5360 = vrcp.f32 %v6259_v31  ;;  %v393_v50 = vand.u32 2147483647, %v6253_v62  ;;  %v366_v55 = vor.u32 1.1754944e-38, %v365_v34 }
  0xd6   :  { %v5351_v47 = vpop.eup %5350  ;;  %v6272_v48 = vadd.f32 1.0, %v5349_v42  ;;  %5362 = vrcp.f32 %v6263_v36  ;;  %vm374_vm4 = vweird.f32 %v6251_v27  ;;  %v395_v61 = vand.u32 2147483648, %v6253_v62 }
  0xd7   :  { %v5353_v52 = vpop.eup %5352  ;;  %5364 = vrcp.f32 %v6267_v44  ;;  %v6278_v53 = vadd.f32 1.0, %v5351_v47  ;;  %vm6284_vm6 = vcmp.eq.f32.partialorder %v363_v41, 8.507059e+37  ;;  %v381_v10 = vor.u32 1.1754944e-38, %v380_v46 }
  0xd8   :  { %v288_v3 = vpop.f32.mrf.mxu2  ;;  %v5355_v4 = vpop.eup %5354  ;;  %5366 = vrcp.f32 %v6272_v48  ;;  %v355_v58 = vmul.f32 %v5353_v52, %v6247_v23  ;;  %vm360_vm5 = vweird.f32 %v5353_v52  ;;  %vm389_vm7 = vweird.f32 %v6253_v62 }
  0xd9   :  { %v5357_v15 = vpop.eup %5356  ;;  %5368 = vpow2.f32 %v5170_v39  ;;  %v370_v17 = vmul.f32 %v5355_v4, %v6251_v27  ;;  %vm375_vm8 = vweird.f32 %v5355_v4  ;;  %vm6290_vm9 = vcmp.eq.f32.partialorder %v378_v45, 8.507059e+37  ;;  %vm361_vm14 = vmor %vm359_vm3, %vm360_vm5 }
  0xda   :  { %v396_v20 = vor.u32 1.1754944e-38, %v395_v61  ;;  %v6294_v25 = vpop.eup %5358  ;;  %5370 = vpow2.f32 %v5171_v7  ;;  %v356_v26 = vsub.f32 1.0, %v355_v58  ;;  %v385_v57 = vmul.f32 %v5357_v15, %v6253_v62  ;;  %vm376_vm0 = vmor %vm374_vm4, %vm375_vm8 }
  0xdb   :  { %vm390_vm10 = vweird.f32 %v5357_v15  ;;  %vm6297_vm11 = vcmp.eq.f32.partialorder %v393_v50, 8.507059e+37  ;;  %v6301_v39 = vpop.eup %5360  ;;  %5372 = vpow2.f32 %v5172_v14  ;;  %v371_v0 = vsub.f32 1.0, %v370_v17 }
  0xdc   :  { %v400_v28 = vmul.f32 %v6294_v25, %v6256_v1  ;;  %vm404_vm12 = vweird.f32 %v6256_v1  ;;  %v6306_v34 = vpop.eup %5362  ;;  %5374 = vpow2.f32 %v5173_v2  ;;  %v357_v7 = vmul.f32 %v5353_v52, %v356_v26  ;;  %vm391_vm1 = vmor %vm389_vm7, %vm390_vm10 }
  0xdd   :  { %v386_v35 = vsub.f32 1.0, %v385_v57  ;;  %vm405_vm13 = vweird.f32 %v6294_v25  ;;  %v6309_v41 = vpop.eup %5364  ;;  %5376 = vpow2.f32 %v5174_v11  ;;  %v372_v42 = vmul.f32 %v5355_v4, %v371_v0 }
  0xde   :  { %v401_v45 = vsub.f32 1.0, %v400_v28  ;;  %v408_v14 = vand.u32 2147483647, %v6256_v1  ;;  %v6312_v46 = vpop.eup %5366  ;;  %5378 = vpow2.f32 %v5175_v32  ;;  %v358_v47 = vadd.f32 %v5353_v52, %v357_v7  ;;  %vm6350_vm2 = vmor %vm404_vm12, %vm405_vm13 }
  0xdf   :  { %v387_v50 = vmul.f32 %v5357_v15, %v386_v35  ;;  %v410_v61 = vand.u32 2147483648, %v6256_v1  ;;  %v5369_v3 = vpop.eup %5368  ;;  %5380 = vpow2.f32 %v5176_v37  ;;  %v373_v2 = vadd.f32 %v5355_v4, %v372_v42 }
  0xe0   :  { %v402_v11 = vmul.f32 %v6294_v25, %v401_v45  ;;  %vm6319_vm15 = vcmp.eq.f32.partialorder %v408_v14, 8.507059e+37  ;;  %v5371_v17 = vpop.eup %5370  ;;  %v6323_v26 = vadd.f32 1.0, %v5369_v3  ;;  %5382 = vrcp.f32 %v6278_v53 }
  0xe1   :  { %v362_v32 = vsel %vm361_vm14, %v5353_v52, %v358_v47  ;;  %v388_v37 = vadd.f32 %v5357_v15, %v387_v50  ;;  %v5373_v23 = vpop.eup %5372  ;;  %v6329_v57 = vadd.f32 1.0, %v5371_v17  ;;  %v377_v28 = vsel %vm376_vm0, %v5355_v4, %v373_v2 }
  0xe2   :  { %v6333_v0 = vsel %vm6284_vm6, %v366_v55, %v362_v32  ;;  %v403_v7 = vadd.f32 %v6294_v25, %v402_v11  ;;  %v5375_v52 = vpop.eup %5374  ;;  %v6339_v35 = vadd.f32 1.0, %v5373_v23  ;;  %5384 = vrcp.f32 %v6323_v26 }
  0xe3   :  { %v6344_v27 = vsel %vm6290_vm9, %v381_v10, %v377_v28  ;;  %v392_v42 = vsel %vm391_vm1, %v5357_v15, %v388_v37  ;;  %v5377_v62 = vpop.eup %5376  ;;  %v6354_v4 = vadd.f32 1.0, %v5375_v52  ;;  %5386 = vrcp.f32 %v6329_v57  ;;  %v107_v52 = vld [vmem:[#allocation5 + $0x8] sm:$0x1] }
  0xe4   :  { %v397_v8 = vsel %vm6297_vm11, %v396_v20, %v392_v42  ;;  %v407_v10 = vsel %vm6350_vm2, %v6294_v25, %v403_v7  ;;  %v5379_v15 = vpop.eup %5378  ;;  %v6362_v18 = vadd.f32 1.0, %v5377_v62  ;;  %5388 = vrcp.f32 %v6339_v35 }
  0xe5   :  { %v411_v1 = vor.u32 1.1754944e-38, %v410_v61  ;;  %v415_v45 = vmul.f32 %v6301_v39, %v6259_v31  ;;  %v5381_v14 = vpop.eup %5380  ;;  %v6367_v47 = vadd.f32 1.0, %v5379_v15  ;;  %5390 = vrcp.f32 %v6354_v4 }
  0xe6   :  { %vm419_vm3 = vweird.f32 %v6259_v31  ;;  %vm420_vm4 = vweird.f32 %v6301_v39  ;;  %v6372_v20 = vpop.eup %5382  ;;  %v6374_v25 = vadd.f32 1.0, %v5381_v14  ;;  %5392 = vrcp.f32 %v6362_v18 }
  0xe7   :  { %v412_v22 = vsel %vm6319_vm15, %v411_v1, %v407_v10  ;;  %v416_v50 = vsub.f32 1.0, %v415_v45  ;;  %5394 = vrcp.f32 %v6367_v47  ;;  %v423_v61 = vand.u32 2147483647, %v6259_v31  ;;  %v109_v1 = vld [vmem:[#allocation5 + $0x14] sm:$0x1]  ;;  %vm421_vm8 = vmor %vm419_vm3, %vm420_vm4 }
  0xe8   :  { %v425_v3 = vand.u32 2147483648, %v6259_v31  ;;  %v430_v2 = vmul.f32 %v6306_v34, %v6263_v36  ;;  %v6384_v11 = vpop.eup %5384  ;;  %5396 = vrcp.f32 %v6374_v25  ;;  %vm434_vm5 = vweird.f32 %v6263_v36 }
  0xe9   :  { %v417_v17 = vmul.f32 %v6301_v39, %v416_v50  ;;  %vm435_vm6 = vweird.f32 %v6306_v34  ;;  %v6390_v58 = vpop.eup %5386  ;;  %vm6392_vm7 = vcmp.eq.f32.partialorder %v423_v61, 8.507059e+37  ;;  %v438_v28 = vand.u32 2147483647, %v6263_v36 }
  0xea   :  { %v426_v37 = vor.u32 1.1754944e-38, %v425_v3  ;;  %v431_v23 = vsub.f32 1.0, %v430_v2  ;;  %v6397_v7 = vpop.eup %5388  ;;  %v440_v55 = vand.u32 2147483648, %v6263_v36  ;;  %v683_v62 = vrot.slane %v6249_v56, 1  ;;  %v111_v2 = vld [vmem:[#allocation5 + $0x20] sm:$0x1]  ;;  %vm436_vm10 = vmor %vm434_vm5, %vm435_vm6 }
  0xeb   :  { %v418_v42 = vadd.f32 %v6301_v39, %v417_v17  ;;  %v684_v10 = vrot.slane %v6249_v56, 2  ;;  %v6403_v15 = vpop.eup %5390  ;;  %vm6410_vm9 = vcmp.eq.f32.partialorder %v438_v28, 8.507059e+37  ;;  %v685_v50 = vrot.slane %v6249_v56, 3 }
  0xec   :  { %v432_v45 = vmul.f32 %v6306_v34, %v431_v23  ;;  %v686_v61 = vrot.slane %v6249_v56, 4  ;;  %v6416_v3 = vpop.eup %5392  ;;  %v441_v63 = vor.u32 1.1754944e-38, %v440_v55  ;;  %v687_v60 = vrot.slane %v6249_v56, 5  ;;  %v113_v23 = vld [vmem:[#allocation5 + $0x2c] sm:$0x1] }
  0xed   :  { %v422_v17 = vsel %vm421_vm8, %v6301_v39, %v418_v42  ;;  %v6421_v16 = vpop.eup %5394  ;;  %v698_v6 = vmul.f32 %v6333_v0, %v6249_v56  ;;  %v699_v39 = vmul.f32 %v683_v62, %v6344_v27  ;;  %v700_v42 = vmul.f32 %v684_v10, %v397_v8 }
  0xee   :  { %v427_v28 = vsel %vm6392_vm7, %v426_v37, %v422_v17  ;;  %v433_v54 = vadd.f32 %v6306_v34, %v432_v45  ;;  %v6429_v43 = vpop.eup %5396  ;;  %v701_v55 = vmul.f32 %v685_v50, %v412_v22  ;;  %v706_v45 = vunpack.c.l.bf16 %v107_v52 }
  0xef   :  { %v6436_v32 = vmul.f32 %v686_v61, %v427_v28  ;;  %v707_v17 = vunpack.c.l.bf16 %v109_v1  ;;  %v708_v51 = vunpack.c.l.bf16 %v111_v2  ;;  %v709_v31 = vunpack.c.l.bf16 %v113_v23 }
  0xf0   :  { %v437_v37 = vsel %vm436_vm10, %v6306_v34, %v433_v54  ;;  %v445_v40 = vmul.f32 %v6309_v41, %v6267_v44  ;;  %vm449_vm11 = vweird.f32 %v6267_v44  ;;  %v714_v27 = vadd.f32 %v706_v45, %v698_v6 }
  0xf1   :  { %v442_v0 = vsel %vm6410_vm9, %v441_v63, %v437_v37  ;;  %v715_v8 = vadd.f32 %v707_v17, %v699_v39  ;;  %v716_v22 = vadd.f32 %v708_v51, %v700_v42  ;;  %v717_v62 = vadd.f32 %v709_v31, %v701_v55 }
  0xf2   :  { %v6444_v36 = vmul.f32 %v687_v60, %v442_v0  ;;  %v446_v10 = vsub.f32 1.0, %v445_v40  ;;  %vm450_vm12 = vweird.f32 %v6309_v41  ;;  %v453_v54 = vand.u32 2147483647, %v6267_v44 }
  0xf3   :  { %5398 = vtanh.f32 %v714_v27  ;;  %v455_v63 = vand.u32 2147483648, %v6267_v44  ;;  %v460_v34 = vmul.f32 %v6312_v46, %v6272_v48  ;;  %vm464_vm13 = vweird.f32 %v6272_v48  ;;  %vm451_vm0 = vmor %vm449_vm11, %vm450_vm12 }
  0xf4   :  { %5400 = vtanh.f32 %v715_v8  ;;  %v447_v60 = vmul.f32 %v6309_v41, %v446_v10  ;;  %vm6453_vm14 = vcmp.eq.f32.partialorder %v453_v54, 8.507059e+37  ;;  %vm465_vm15 = vweird.f32 %v6312_v46 }
  0xf5   :  { %5402 = vtanh.f32 %v716_v22  ;;  %v456_v40 = vor.u32 1.1754944e-38, %v455_v63  ;;  %v461_v51 = vsub.f32 1.0, %v460_v34  ;;  %v468_v52 = vand.u32 2147483647, %v6272_v48  ;;  %vm466_vm4 = vmor %vm464_vm13, %vm465_vm15 }
  0xf6   :  { %5404 = vtanh.f32 %v717_v62  ;;  %v448_v1 = vadd.f32 %v6309_v41, %v447_v60  ;;  %v470_v14 = vand.u32 2147483648, %v6272_v48  ;;  %v563_v50 = vmul.f32 %v6372_v20, %v6278_v53 }
  0xf7   :  { %v462_v61 = vmul.f32 %v6312_v46, %v461_v51  ;;  %vm6468_vm1 = vcmp.eq.f32.partialorder %v468_v52, 8.507059e+37  ;;  %vm567_vm2 = vweird.f32 %v6278_v53  ;;  %vm568_vm3 = vweird.f32 %v6372_v20 }
  0xf8   :  { %v452_v31 = vsel %vm451_vm0, %v6309_v41, %v448_v1  ;;  %v471_v23 = vor.u32 1.1754944e-38, %v470_v14  ;;  %v564_v28 = vsub.f32 1.0, %v563_v50  ;;  %v571_v39 = vand.u32 2147483647, %v6278_v53  ;;  %vm569_vm8 = vmor %vm567_vm2, %vm568_vm3 }
  0xf9   :  { %v6476_v42 = vpop.eup %5398  ;;  %v6480_v44 = vsel %vm6453_vm14, %v456_v40, %v452_v31  ;;  %v463_v55 = vadd.f32 %v6312_v46, %v462_v61  ;;  %v573_v37 = vand.u32 2147483648, %v6278_v53  ;;  %v578_v45 = vmul.f32 %v6384_v11, %v6323_v26 }
  0xfa   :  { %v6486_v17 = vpop.eup %5400  ;;  %v565_v41 = vmul.f32 %v6372_v20, %v564_v28  ;;  %vm6493_vm5 = vcmp.eq.f32.partialorder %v571_v39, 8.507059e+37  ;;  %vm582_vm6 = vweird.f32 %v6323_v26  ;;  %vm583_vm7 = vweird.f32 %v6384_v11 }
  0xfb   :  { %v6499_v27 = vpop.eup %5402  ;;  %v467_v8 = vsel %vm466_vm4, %v6312_v46, %v463_v55  ;;  %v574_v22 = vor.u32 1.1754944e-38, %v573_v37  ;;  %v579_v62 = vsub.f32 1.0, %v578_v45  ;;  %v586_v10 = vand.u32 2147483647, %v6323_v26  ;;  %vm584_vm12 = vmor %vm582_vm6, %vm583_vm7 }
  0xfc   :  { %v6503_v48 = vpop.eup %5404  ;;  %v6507_v54 = vsel %vm6468_vm1, %v471_v23, %v467_v8  ;;  %v566_v63 = vadd.f32 %v6372_v20, %v565_v41  ;;  %v588_v34 = vand.u32 2147483648, %v6323_v26  ;;  %v593_v60 = vmul.f32 %v6390_v58, %v6329_v57 }
  0xfd   :  { %v580_v46 = vmul.f32 %v6384_v11, %v579_v62  ;;  %vm6518_vm9 = vcmp.eq.f32.partialorder %v586_v10, 8.507059e+37  ;;  %vm597_vm10 = vweird.f32 %v6329_v57  ;;  %vm598_vm11 = vweird.f32 %v6390_v58 }
  0xfe   :  { %v570_v40 = vsel %vm569_vm8, %v6372_v20, %v566_v63  ;;  %v589_v51 = vor.u32 1.1754944e-38, %v588_v34  ;;  %v594_v52 = vsub.f32 1.0, %v593_v60  ;;  %v601_v1 = vand.u32 2147483647, %v6329_v57  ;;  %vm599_vm0 = vmor %vm597_vm10, %vm598_vm11 }
  0xff   :  { %v6528_v53 = vsel %vm6493_vm5, %v574_v22, %v570_v40  ;;  %v581_v14 = vadd.f32 %v6384_v11, %v580_v46  ;;  %v603_v50 = vand.u32 2147483648, %v6329_v57  ;;  %v608_v61 = vmul.f32 %v6397_v7, %v6339_v35 }
 0x100   :  { %v595_v20 = vmul.f32 %v6390_v58, %v594_v52  ;;  %vm6539_vm13 = vcmp.eq.f32.partialorder %v601_v1, 8.507059e+37  ;;  %vm612_vm14 = vweird.f32 %v6339_v35  ;;  %vm613_vm15 = vweird.f32 %v6397_v7 }
 0x101   :  { %v585_v31 = vsel %vm584_vm12, %v6384_v11, %v581_v14  ;;  %v604_v23 = vor.u32 1.1754944e-38, %v603_v50  ;;  %v609_v28 = vsub.f32 1.0, %v608_v61  ;;  %v616_v39 = vand.u32 2147483647, %v6339_v35  ;;  %vm614_vm4 = vmor %vm612_vm14, %vm613_vm15 }
 0x102   :  { %v6549_v26 = vsel %vm6518_vm9, %v589_v51, %v585_v31  ;;  %v596_v55 = vadd.f32 %v6390_v58, %v595_v20  ;;  %v618_v37 = vand.u32 2147483648, %v6339_v35  ;;  %v623_v45 = vmul.f32 %v6403_v15, %v6354_v4 }
 0x103   :  { %v610_v11 = vmul.f32 %v6397_v7, %v609_v28  ;;  %vm6560_vm1 = vcmp.eq.f32.partialorder %v616_v39, 8.507059e+37  ;;  %vm627_vm2 = vweird.f32 %v6354_v4  ;;  %vm628_vm3 = vweird.f32 %v6403_v15 }
 0x104   :  { %v600_v0 = vsel %vm599_vm0, %v6390_v58, %v596_v55  ;;  %v619_v8 = vor.u32 1.1754944e-38, %v618_v37  ;;  %v624_v22 = vsub.f32 1.0, %v623_v45  ;;  %v631_v62 = vand.u32 2147483647, %v6354_v4  ;;  %vm629_vm8 = vmor %vm627_vm2, %vm628_vm3  ;;  %v115_v55 = vld [vmem:[#allocation5 + $0x38] sm:$0x1] }
 0x105   :  { %v6570_v57 = vsel %vm6539_vm13, %v604_v23, %v600_v0  ;;  %v611_v10 = vadd.f32 %v6397_v7, %v610_v11  ;;  %v633_v63 = vand.u32 2147483648, %v6354_v4  ;;  %v638_v34 = vmul.f32 %v6416_v3, %v6362_v18  ;;  %v117_v37 = vld [vmem:[#allocation5 + $0x44] sm:$0x1]  ;;  %v119_v11 = vld [vmem:[#allocation5 + $0x50] sm:$0x1]  ;;  %v5974_v45 = vld [vmem:[#allocation2] sm:$0xff] }
 0x106   :  { %v625_v58 = vmul.f32 %v6403_v15, %v624_v22  ;;  %vm6581_vm5 = vcmp.eq.f32.partialorder %v631_v62, 8.507059e+37  ;;  %vm642_vm6 = vweird.f32 %v6362_v18  ;;  %vm643_vm7 = vweird.f32 %v6416_v3  ;;  %v121_v62 = vld [vmem:[#allocation5 + $0x5c] sm:$0x1] }
 0x107   :  { %v615_v46 = vsel %vm614_vm4, %v6397_v7, %v611_v10  ;;  %v634_v6 = vor.u32 1.1754944e-38, %v633_v63  ;;  %v639_v40 = vsub.f32 1.0, %v638_v34  ;;  %v646_v51 = vand.u32 2147483647, %v6362_v18  ;;  %vm644_vm12 = vmor %vm642_vm6, %vm643_vm7 }
 0x108   :  { %v6591_v35 = vsel %vm6560_vm1, %v619_v8, %v615_v46  ;;  %v626_v52 = vadd.f32 %v6403_v15, %v625_v58  ;;  %v648_v1 = vand.u32 2147483648, %v6362_v18  ;;  %v653_v14 = vmul.f32 %v6421_v16, %v6367_v47 }
 0x109   :  { %v640_v7 = vmul.f32 %v6416_v3, %v639_v40  ;;  %vm6602_vm9 = vcmp.eq.f32.partialorder %v646_v51, 8.507059e+37  ;;  %vm657_vm10 = vweird.f32 %v6367_v47  ;;  %vm658_vm11 = vweird.f32 %v6421_v16 }
 0x10a   :  { %v630_v61 = vsel %vm629_vm8, %v6403_v15, %v626_v52  ;;  %v649_v20 = vor.u32 1.1754944e-38, %v648_v1  ;;  %v654_v2 = vsub.f32 1.0, %v653_v14  ;;  %v661_v31 = vand.u32 2147483647, %v6367_v47  ;;  %vm659_vm0 = vmor %vm657_vm10, %vm658_vm11 }
 0x10b   :  { %v6612_v4 = vsel %vm6581_vm5, %v634_v6, %v630_v61  ;;  %v641_v23 = vadd.f32 %v6416_v3, %v640_v7  ;;  %v663_v28 = vand.u32 2147483648, %v6367_v47  ;;  %v668_v39 = vmul.f32 %v6429_v43, %v6374_v25 }
 0x10c   :  { %v655_v15 = vmul.f32 %v6421_v16, %v654_v2  ;;  %vm6623_vm13 = vcmp.eq.f32.partialorder %v661_v31, 8.507059e+37  ;;  %vm672_vm14 = vweird.f32 %v6374_v25  ;;  %vm673_vm15 = vweird.f32 %v6429_v43 }
 0x10d   :  { %v645_v41 = vsel %vm644_vm12, %v6416_v3, %v641_v23  ;;  %v664_v0 = vor.u32 1.1754944e-38, %v663_v28  ;;  %v669_v8 = vsub.f32 1.0, %v668_v39  ;;  %v676_v22 = vand.u32 2147483647, %v6374_v25  ;;  %vm674_vm2 = vmor %vm672_vm14, %vm673_vm15 }
 0x10e   :  { %v650_v18 = vsel %vm6602_vm9, %v649_v20, %v645_v41  ;;  %v656_v10 = vadd.f32 %v6421_v16, %v655_v15  ;;  %v678_v63 = vand.u32 2147483648, %v6374_v25  ;;  %v11000_v34 = vrot.slane %v6249_v56, 6 }
 0x10f   :  { %v670_v3 = vmul.f32 %v6429_v43, %v669_v8  ;;  %vm6643_vm1 = vcmp.eq.f32.partialorder %v676_v22, 8.507059e+37  ;;  %v11003_v46 = vrot.slane %v6249_v56, 7  ;;  %v710_v40 = vunpack.c.l.bf16 %v115_v55 }
 0x110   :  { %v704_v58 = vmul.f32 %v11000_v34, %v6480_v44  ;;  %v660_v51 = vsel %vm659_vm0, %v6421_v16, %v656_v10  ;;  %v679_v52 = vor.u32 1.1754944e-38, %v678_v63  ;;  %v711_v44 = vunpack.c.l.bf16 %v117_v37 }
 0x111   :  { %v705_v6 = vmul.f32 %v11003_v46, %v6507_v54  ;;  %v712_v1 = vunpack.c.l.bf16 %v119_v11  ;;  %v665_v47 = vsel %vm6623_vm13, %v664_v0, %v660_v51  ;;  %v671_v14 = vadd.f32 %v6429_v43, %v670_v3 }
 0x112   :  { %v713_v7 = vunpack.c.l.bf16 %v121_v62  ;;  %v718_v50 = vadd.f32 %v710_v40, %v6436_v32  ;;  %v719_v56 = vadd.f32 %v711_v44, %v6444_v36  ;;  %v730_v16 = vsub.f32 1.0, %v6528_v53 }
 0x113   :  { %v720_v54 = vadd.f32 %v712_v1, %v704_v58  ;;  %v731_v61 = vsub.f32 1.0, %v6549_v26  ;;  %v675_v20 = vsel %vm674_vm2, %v6429_v43, %v671_v14  ;;  %v732_v31 = vsub.f32 1.0, %v6570_v57 }
 0x114   :  { %v721_v2 = vadd.f32 %v713_v7, %v705_v6  ;;  %5406 = vtanh.f32 %v718_v50  ;;  %v680_v32 = vsel %vm6643_vm1, %v679_v52, %v675_v20  ;;  %v733_v25 = vsub.f32 1.0, %v6591_v35 }
 0x115   :  { %5408 = vtanh.f32 %v719_v56  ;;  %v734_v23 = vsub.f32 1.0, %v6612_v4  ;;  %v735_v36 = vsub.f32 1.0, %v650_v18  ;;  %v736_v28 = vsub.f32 1.0, %v665_v47 }
 0x116   :  { %5410 = vtanh.f32 %v720_v54  ;;  %v737_v39 = vsub.f32 1.0, %v680_v32  ;;  %v738_v55 = vmul.f32 %v6476_v42, %v730_v16  ;;  %v739_v43 = vmul.f32 %v6486_v17, %v731_v61 }
 0x117   :  { %5412 = vtanh.f32 %v721_v2  ;;  %v740_v37 = vmul.f32 %v6499_v27, %v732_v31  ;;  %v741_v15 = vmul.f32 %v6503_v48, %v733_v25  ;;  %v747_v11 = vrot.slane %v5974_v45, 1  ;;  %v783_v25 = vpop.permute.xlu0 %782 }
 0x118   :  { %v748_v41 = vrot.slane %v5974_v45, 2  ;;  %v749_v0 = vrot.slane %v5974_v45, 3  ;;  %v750_v8 = vrot.slane %v5974_v45, 4  ;;  %v751_v22 = vrot.slane %v5974_v45, 5 }
 0x119   :  { %v752_v62 = vrot.slane %v5974_v45, 6  ;;  %v753_v10 = vrot.slane %v5974_v45, 7  ;;  %v762_v34 = vmul.f32 %v5974_v45, %v6528_v53  ;;  %v763_v58 = vmul.f32 %v747_v11, %v6549_v26 }
 0x11a   :  { %v5407_v63 = vpop.eup %5406  ;;  %v764_v42 = vmul.f32 %v748_v41, %v6570_v57  ;;  %v765_v17 = vmul.f32 %v749_v0, %v6591_v35  ;;  %v766_v48 = vmul.f32 %v750_v8, %v6612_v4  ;;  %v767_v60 = vmul.f32 %v751_v22, %v650_v18 }
 0x11b   :  { %v5409_v27 = vpop.eup %5408  ;;  %v742_v3 = vmul.f32 %v5407_v63, %v734_v23  ;;  %v768_v46 = vmul.f32 %v752_v62, %v665_v47  ;;  %v769_v51 = vmul.f32 %v753_v10, %v680_v32  ;;  %v770_v52 = vadd.f32 %v762_v34, %v738_v55  ;;  %v11005_v10 = vld [vmem:[#allocation26_spill] sm:$0xff]  ;;  %v11006_v63 = vld [vmem:[#allocation33_spill] sm:$0xff]  ;;  %v11007_v34 = vld [vmem:[#allocation28_spill] sm:$0xff] }
 0x11c   :  { %v5411_v6 = vpop.eup %5410  ;;  %v743_v40 = vmul.f32 %v5409_v27, %v735_v36  ;;  %v771_v44 = vadd.f32 %v763_v58, %v739_v43  ;;  %v772_v53 = vadd.f32 %v764_v42, %v740_v37  ;;  %v773_v7 = vadd.f32 %v765_v17, %v741_v15  ;;  %v11008_v58 = vld [vmem:[#allocation29_spill] sm:$0xff]  ;;  %v11009_v42 = vld [vmem:[#allocation36_spill] sm:$0xff]  ;;  %v11010_v17 = vld [vmem:[#allocation31_spill] sm:$0xff] }
 0x11d   :  { %v5413_v1 = vpop.eup %5412  ;;  %v744_v14 = vmul.f32 %v5411_v6, %v736_v28  ;;  %v774_v26 = vadd.f32 %v766_v48, %v742_v3  ;;  %vm10922_vm3 = vcmask 1041409   ;;  %vm10921_vm4 = vcmask 1042434   ;;  %v11011_v27 = vld [vmem:[#allocation32_spill] sm:$0xff]  ;;  %v11012_v3 = vld [vmem:[#allocation37_spill] sm:$0xff]  ;;  %v11013_v48 = vld [vmem:[#allocation34_spill] sm:$0xff] }
 0x11e   :  { %v745_v50 = vmul.f32 %v5413_v1, %v737_v39  ;;  %v775_v57 = vadd.f32 %v767_v60, %v743_v40  ;;  %v793_v56 = vrot.slane %v771_v44, 7  ;;  %v796_v54 = vrot.slane %v772_v53, 6  ;;  %v11014_v60 = vld [vmem:[#allocation35_spill] sm:$0xff]  ;;  %v6714_v6 = vld [vmem:[#allocation5] sm:$0x11] }
 0x11f   :  { %v776_v35 = vadd.f32 %v768_v46, %v744_v14  ;;  %v799_v47 = vrot.slane %v773_v7, 5  ;;  %vm10910_vm5 = vcmask 1043459   ;;  %v802_v61 = vrot.slane %v774_v26, 4  ;;  %v6712_v46 = vld [vmem:[#allocation5 + $0xc] sm:$0x11] }
 0x120   :  { %v777_v4 = vadd.f32 %v769_v51, %v745_v50  ;;  %v795_v18 = vsel %vm10922_vm3, %v793_v56, %v770_v52  ;;  %vm10909_vm6 = vcmask 1044484   ;;  %vm10908_vm7 = vcmask 1045509   ;;  %v6716_v40 = vld [vmem:[#allocation5 + $0x18] sm:$0x11]  ;;  %v6718_v51 = vld [vmem:[#allocation5 + $0x24] sm:$0x11] }
 0x121   :  { %v798_v16 = vsel %vm10921_vm4, %v796_v54, %v795_v18  ;;  %v805_v2 = vrot.slane %v775_v57, 3  ;;  %vm10907_vm8 = vcmask 1046534   ;;  %v808_v32 = vrot.slane %v776_v35, 2  ;;  %v6720_v52 = vld [vmem:[#allocation5 + $0x30] sm:$0x11] }
 0x122   :  { %v801_v20 = vsel %vm10910_vm5, %v799_v47, %v798_v16  ;;  %vm10906_vm9 = vcmask 1047559   ;;  %v811_v36 = vrot.slane %v777_v4, 1  ;;  %vm784_vm10 = vcmp.eq.s32.totalorder %v783_v25, 1  ;;  %v6727_v4 = vld [vmem:[#allocation5 + $0x3c] sm:$0x11] }
 0x123   :  { %v804_v31 = vsel %vm10909_vm6, %v802_v61, %v801_v20  ;;  %v1090_v44 = vrot.slane %v6712_v46, 4  ;;  %v1089_v1 = vrot.slane %v6714_v6, 4  ;;  %v1091_v14 = vrot.slane %v6716_v40, 4 }
 0x124   :  { %v807_v23 = vsel %vm10908_vm7, %v805_v2, %v804_v31  ;;  %v1092_v53 = vrot.slane %v6718_v51, 4  ;;  %v1093_v7 = vrot.slane %v6720_v52, 4  ;;  %v6731_v2 = vld [vmem:[#allocation5 + $0x48] sm:$0x11] }
 0x125   :  { %v810_v28 = vsel %vm10907_vm8, %v808_v32, %v807_v23  ;;  %v1106_v26 = vunpack.c.l.bf16 %v1090_v44  ;;  %v1105_v50 = vunpack.c.l.bf16 %v1089_v1  ;;  %v1107_v57 = vunpack.c.l.bf16 %v1091_v14 }
 0x126   :  { %v813_v39 = vsel %vm10906_vm9, %v811_v36, %v810_v28  ;;  %v1108_v56 = vunpack.c.l.bf16 %v1092_v53  ;;  %v1109_v54 = vunpack.c.l.bf16 %v1093_v7  ;;  %v1094_v36 = vrot.slane %v6727_v4, 4  ;;  %v6737_v53 = vld [vmem:[#allocation5 + $0x54] sm:$0x11] }
 0x127   :  { %v815_v55 = vsel %vm784_vm10, %v813_v39, 0.0  ;;  %v6684_v11 = vsel %vm784_vm10, %v813_v39, %v5974_v45  ;;  %v11004_v45 = vld [vmem:[#allocation25_spill] sm:$0xff] }
 0x128   :  { %v817_v43 = vrot.slane %v815_v55, 1  ;;  %v818_v37 = vrot.slane %v815_v55, 2  ;;  %v819_v15 = vrot.slane %v815_v55, 3  ;;  %831 = vst [vmem:[#allocation10] sm:$0x1] %v815_v55  ;;  %v820_v41 = vrot.slane %v815_v55, 4 }
 0x129   :  { %v821_v0 = vrot.slane %v815_v55, 5  ;;  %v822_v8 = vrot.slane %v815_v55, 6  ;;  %v857_v22 = vpack.c.bf16 %v6684_v11, %v6684_v11  ;;  %v823_v62 = vrot.slane %v815_v55, 7 }
 0x12a   :  { %832 = vst [vmem:[#allocation10 + $0x8] sm:$0x1] %v817_v43  ;;  %v1095_v55 = vrot.slane %v6731_v2, 4 }
 0x12b   :  { %833 = vst [vmem:[#allocation10 + $0x10] sm:$0x1] %v818_v37  ;;  %866 = vmatmul.bf16.vlgmr.msra.gmra.mxu3 %v857_v22  ;;  %879 = vmatmul.bf16.vlgmr.msrb.gmra.mxu0 %v857_v22 }
 0x12c   :  { %834 = vst [vmem:[#allocation10 + $0x18] sm:$0x1] %v819_v15  ;;  %892 = vmatmul.bf16.vlgmr.msrb.gmra.mxu1 %v857_v22  ;;  %2084 = vmatpush.bf16.msra.mxu3 %v6120_v24  ;;  %v1111_v44 = vunpack.c.l.bf16 %v1095_v55 }
 0x12d   :  { %835 = vst [vmem:[#allocation10 + $0x20] sm:$0x1] %v820_v41  ;;  %2658 = vmatpush.bf16.msrb.mxu0 %v6102_v5  ;;  %2671 = vmatpush.bf16.msrb.mxu1 %v6104_v9 }
 0x12e   :  { %836 = vst [vmem:[#allocation10 + $0x28] sm:$0x1] %v821_v0  ;;  %v1110_v0 = vunpack.c.l.bf16 %v1094_v36 }
 0x12f   :  { %837 = vst [vmem:[#allocation10 + $0x30] sm:$0x1] %v822_v8 }
 0x130   :  { %838 = vst [vmem:[#allocation10 + $0x38] sm:$0x1] %v823_v62  ;;  %2085 = vmatpush.bf16.msra.mxu3 %v6123_v29 }
 0x131   :  { %2659 = vmatpush.bf16.msrb.mxu0 %v6107_v12  ;;  %2672 = vmatpush.bf16.msrb.mxu1 %v6111_v13 }
 0x134   :  { %2086 = vmatpush.bf16.msra.mxu3 %v6133_v38 }
 0x135   :  { %2660 = vmatpush.bf16.msrb.mxu0 %v6114_v19  ;;  %2673 = vmatpush.bf16.msrb.mxu1 %v6118_v21 }
 0x138   :  { %2087 = vmatpush.bf16.msra.mxu3 %v6149_v49 }
 0x139   :  { %2661 = vmatpush.bf16.msrb.mxu0 %v6126_v30  ;;  %2674 = vmatpush.bf16.msrb.mxu1 %v6130_v33 }
 0x13c   :  { %2088 = vmatpush.bf16.msra.mxu3 %v6160_v59 }
 0x13d   :  { %2662 = vmatpush.bf16.msrb.mxu0 %v11004_v45  ;;  %2675 = vmatpush.bf16.msrb.mxu1 %v11005_v10 }
 0x140   :  { %2089 = vmatpush.bf16.msra.mxu3 %v11006_v63 }
 0x141   :  { %2663 = vmatpush.bf16.msrb.mxu0 %v11007_v34  ;;  %2676 = vmatpush.bf16.msrb.mxu1 %v11008_v58 }
 0x144   :  { %2090 = vmatpush.bf16.msra.mxu3 %v11009_v42 }
 0x145   :  { %2664 = vmatpush.bf16.msrb.mxu0 %v11010_v17  ;;  %2677 = vmatpush.bf16.msrb.mxu1 %v11011_v27 }
 0x148   :  { %2091 = vmatpush.bf16.msra.mxu3 %v11012_v3 }
 0x149   :  { %2665 = vmatpush.bf16.msrb.mxu0 %v11013_v48  ;;  %2678 = vmatpush.bf16.msrb.mxu1 %v11014_v60 }
 0x1a8   :  { %v880_v35 = vpop.f32.mrf.mxu0 }
 0x1a9   :  { %v1114_v18 = vrot.slane %v880_v35, 7  ;;  %v1115_v47 = vrot.slane %v880_v35, 1  ;;  %v1116_v16 = vrot.slane %v880_v35, 2  ;;  %v1117_v61 = vrot.slane %v880_v35, 3  ;;  %v6729_v20 = vpop.f32.mrf.mxu1 }
 0x1aa   :  { %v1130_v31 = vadd.f32 %v1106_v26, %v880_v35  ;;  %v1118_v8 = vrot.slane %v880_v35, 4  ;;  %v1119_v1 = vrot.slane %v880_v35, 5 }
 0x1ab   :  { %v1129_v32 = vadd.f32 %v1114_v18, %v1105_v50  ;;  %v1131_v25 = vadd.f32 %v1115_v47, %v1107_v57  ;;  %v1132_v23 = vadd.f32 %v1116_v16, %v1108_v56  ;;  %v1133_v28 = vadd.f32 %v1117_v61, %v1109_v54 }
 0x1ac   :  { %v5187_v39 = vmul.f32 -1.442695, %v1130_v31  ;;  %v1134_v26 = vadd.f32 %v1118_v8, %v1110_v0  ;;  %v1096_v57 = vrot.slane %v6737_v53, 4  ;;  %v1135_v56 = vadd.f32 %v1119_v1, %v1111_v44 }
 0x1ad   :  { %v5186_v43 = vmul.f32 -1.442695, %v1129_v32  ;;  %v5188_v37 = vmul.f32 -1.442695, %v1131_v25  ;;  %v5189_v41 = vmul.f32 -1.442695, %v1132_v23  ;;  %v898_v44 = vunpack.c.l.bf16 %v6712_v46 }
 0x1ae   :  { %5414 = vpow2.f32 %v5187_v39  ;;  %v6735_v15 = vpop.f32.mrf.mxu3  ;;  %v5190_v22 = vmul.f32 -1.442695, %v1133_v28  ;;  %v5191_v61 = vmul.f32 -1.442695, %v1134_v26  ;;  %v1112_v32 = vunpack.c.l.bf16 %v1096_v57 }
 0x1af   :  { %5416 = vpow2.f32 %v5186_v43  ;;  %v1120_v25 = vrot.slane %v880_v35, 6  ;;  %v5192_v23 = vmul.f32 -1.442695, %v1135_v56  ;;  %v899_v1 = vunpack.c.l.bf16 %v6716_v40 }
 0x1b0   :  { %v882_v62 = vpop.f32.mrf.mxu0  ;;  %5418 = vpow2.f32 %v5188_v37  ;;  %v903_v57 = vunpack.c.l.bf16 %v6731_v2  ;;  %v907_v2 = vrot.slane %v6735_v15, 1  ;;  %v912_v55 = vrot.slane %v6735_v15, 6 }
 0x1b1   :  { %v895_v14 = vpop.f32.mrf.mxu1  ;;  %5420 = vpow2.f32 %v5189_v41  ;;  %v1136_v35 = vadd.f32 %v1120_v25, %v1112_v32  ;;  %v897_v62 = vunpack.c.l.bf16 %v6714_v6  ;;  %v904_v6 = vunpack.c.l.bf16 %v6737_v53 }
 0x1b2   :  { %5422 = vpow2.f32 %v5190_v22  ;;  %v900_v14 = vunpack.c.l.bf16 %v6718_v51  ;;  %v909_v32 = vrot.slane %v6735_v15, 3  ;;  %v910_v25 = vrot.slane %v6735_v15, 4 }
 0x1b3   :  { %v5193_v46 = vmul.f32 -1.442695, %v1136_v35  ;;  %v911_v22 = vrot.slane %v6735_v15, 5  ;;  %v6804_v35 = vadd.f32 %v907_v2, %v899_v1  ;;  %v6823_v1 = vadd.f32 %v912_v55, %v904_v6 }
 0x1b4   :  { %v5415_v7 = vpop.eup %5414 }
 0x1b5   :  { %v5417_v50 = vpop.eup %5416  ;;  %v6740_v54 = vadd.f32 1.0, %v5415_v7  ;;  %v901_v7 = vunpack.c.l.bf16 %v6720_v52 }
 0x1b6   :  { %v869_v18 = vpop.f32.mrf.mxu3  ;;  %v6742_v47 = vadd.f32 1.0, %v5417_v50  ;;  %v5419_v16 = vpop.eup %5418  ;;  %v902_v50 = vunpack.c.l.bf16 %v6727_v4  ;;  %v906_v4 = vrot.slane %v6735_v15, 7 }
 0x1b7   :  { %v5421_v31 = vpop.eup %5420  ;;  %5424 = vrcp.f32 %v6740_v54  ;;  %v6746_v39 = vadd.f32 1.0, %v5419_v16  ;;  %v6810_v40 = vadd.f32 %v909_v32, %v901_v7  ;;  %v1193_v7 = vand.u32 2147483647, %v6740_v54 }
 0x1b8   :  { %v5423_v36 = vpop.eup %5422  ;;  %5426 = vrcp.f32 %v6742_v47  ;;  %v6751_v37 = vadd.f32 1.0, %v5421_v31  ;;  %v908_v31 = vrot.slane %v6735_v15, 2  ;;  %v6799_v18 = vadd.f32 %v906_v4, %v897_v62 }
 0x1b9   :  { %5428 = vpow2.f32 %v5191_v61  ;;  %v6754_v0 = vadd.f32 1.0, %v5423_v36  ;;  %v6802_v36 = vadd.f32 %v898_v44, %v6735_v15  ;;  %v6812_v43 = vadd.f32 %v910_v25, %v902_v50 }
 0x1ba   :  { %5430 = vpow2.f32 %v5192_v23  ;;  %v6817_v4 = vadd.f32 %v911_v22, %v903_v57  ;;  %v1195_v15 = vand.u32 2147483648, %v6740_v54  ;;  %vm1189_vm11 = vweird.f32 %v6740_v54 }
 0x1bb   :  { %5432 = vrcp.f32 %v6746_v39  ;;  %v1210_v2 = vand.u32 2147483648, %v6746_v39  ;;  %vm1174_vm12 = vweird.f32 %v6742_v47  ;;  %v1208_v25 = vand.u32 2147483647, %v6746_v39 }
 0x1bc   :  { %5434 = vrcp.f32 %v6751_v37  ;;  %v1196_v32 = vor.u32 1.1754944e-38, %v1195_v15  ;;  %v1240_v48 = vand.u32 2147483648, %v6754_v0  ;;  %vm6845_vm15 = vcmp.eq.f32.partialorder %v1193_v7, 8.507059e+37 }
 0x1bd   :  { %v6764_v26 = vpop.eup %5424  ;;  %5436 = vrcp.f32 %v6754_v0  ;;  %vm1204_vm0 = vweird.f32 %v6746_v39  ;;  %vm1219_vm2 = vweird.f32 %v6751_v37  ;;  %vm1234_vm9 = vweird.f32 %v6754_v0 }
 0x1be   :  { %v6770_v56 = vpop.eup %5426  ;;  %v1185_v53 = vmul.f32 %v6764_v26, %v6740_v54  ;;  %5438 = vpow2.f32 %v5193_v46  ;;  %vm1190_vm14 = vweird.f32 %v6764_v26  ;;  %vm6876_vm6 = vcmp.eq.f32.partialorder %v1208_v25, 8.507059e+37 }
 0x1bf   :  { %v5429_v52 = vpop.eup %5428  ;;  %v1170_v23 = vmul.f32 %v6770_v56, %v6742_v47  ;;  %vm1175_vm1 = vweird.f32 %v6770_v56  ;;  %vm6872_vm7 = vmor %vm1189_vm11, %vm1190_vm14  ;;  %v5178_v58 = vmul.f32 -1.442695, %v6799_v18  ;;  %v5182_v18 = vmul.f32 -1.442695, %v6810_v40 }
 0x1c0   :  { %v5431_v61 = vpop.eup %5430  ;;  %v6791_v41 = vadd.f32 1.0, %v5429_v52  ;;  %v1186_v46 = vsub.f32 1.0, %v1185_v53  ;;  %v6808_v52 = vadd.f32 %v908_v31, %v900_v14  ;;  %v1178_v14 = vand.u32 2147483647, %v6742_v47  ;;  %vm6889_vm11 = vmor %vm1174_vm12, %vm1175_vm1 }
 0x1c1   :  { %v6789_v8 = vpop.eup %5432  ;;  %v6797_v16 = vadd.f32 1.0, %v5431_v61  ;;  %v1171_v60 = vsub.f32 1.0, %v1170_v23  ;;  %v1180_v61 = vand.u32 2147483648, %v6742_v47  ;;  %v1225_v53 = vand.u32 2147483648, %v6751_v37 }
 0x1c2   :  { %v6795_v28 = vpop.eup %5434  ;;  %v1200_v62 = vmul.f32 %v6789_v8, %v6746_v39  ;;  %5440 = vrcp.f32 %v6791_v41  ;;  %v1187_v57 = vmul.f32 %v6764_v26, %v1186_v46  ;;  %vm6840_vm13 = vcmp.eq.f32.partialorder %v1178_v14, 8.507059e+37 }
 0x1c3   :  { %v6806_v51 = vpop.eup %5436  ;;  %v1215_v44 = vmul.f32 %v6795_v28, %v6751_v37  ;;  %5442 = vrcp.f32 %v6797_v16  ;;  %v1172_v55 = vmul.f32 %v6770_v56, %v1171_v60  ;;  %v1181_v6 = vor.u32 1.1754944e-38, %v1180_v61 }
 0x1c4   :  { %v1230_v50 = vmul.f32 %v6806_v51, %v6754_v0  ;;  %v5439_v22 = vpop.eup %5438  ;;  %v1201_v31 = vsub.f32 1.0, %v1200_v62  ;;  %v1223_v61 = vand.u32 2147483647, %v6751_v37  ;;  %v1211_v14 = vor.u32 1.1754944e-38, %v1210_v2 }
 0x1c5   :  { %v1216_v23 = vsub.f32 1.0, %v1215_v44  ;;  %v6838_v3 = vadd.f32 1.0, %v5439_v22  ;;  %v1188_v44 = vadd.f32 %v6764_v26, %v1187_v57  ;;  %v6856_v22 = vor.u32 1.1754944e-38, %v1225_v53 }
 0x1c6   :  { %v1231_v62 = vsub.f32 1.0, %v1230_v50  ;;  %v1173_v27 = vadd.f32 %v6770_v56, %v1172_v55  ;;  %v1202_v17 = vmul.f32 %v6789_v8, %v1201_v31  ;;  %vm1205_vm10 = vweird.f32 %v6789_v8 }
 0x1c7   :  { %v1238_v50 = vand.u32 2147483647, %v6754_v0  ;;  %v1217_v42 = vmul.f32 %v6795_v28, %v1216_v23  ;;  %vm1220_vm8 = vweird.f32 %v6795_v28  ;;  %v1241_v57 = vor.u32 1.1754944e-38, %v1240_v48 }
 0x1c8   :  { %v6851_v15 = vpop.eup %5440  ;;  %v1232_v31 = vmul.f32 %v6806_v51, %v1231_v62  ;;  %vm1235_vm5 = vweird.f32 %v6806_v51  ;;  %5444 = vrcp.f32 %v6838_v3  ;;  %v1192_v25 = vsel %vm6872_vm7, %v6764_v26, %v1188_v44  ;;  %vm6931_vm7 = vmor %vm1204_vm0, %vm1205_vm10 }
 0x1c9   :  { %v6858_v7 = vpop.eup %5442  ;;  %v1245_v48 = vmul.f32 %v6851_v15, %v6791_v41  ;;  %vm6896_vm14 = vcmp.eq.f32.partialorder %v1223_v61, 8.507059e+37  ;;  %v1255_v62 = vand.u32 2147483648, %v6791_v41  ;;  %v1177_v47 = vsel %vm6889_vm11, %v6770_v56, %v1173_v27  ;;  %vm6958_vm0 = vmor %vm1234_vm9, %vm1235_vm5 }
 0x1ca   :  { %v1260_v2 = vmul.f32 %v6858_v7, %v6797_v16  ;;  %v1203_v34 = vadd.f32 %v6789_v8, %v1202_v17  ;;  %vm6908_vm12 = vcmp.eq.f32.partialorder %v1238_v50, 8.507059e+37  ;;  %v5179_v26 = vmul.f32 -1.442695, %v6802_v36 }
 0x1cb   :  { %v5180_v61 = vmul.f32 -1.442695, %v6804_v35  ;;  %v1218_v44 = vadd.f32 %v6795_v28, %v1217_v42  ;;  %5446 = vpow2.f32 %v5178_v58  ;;  %v5181_v63 = vmul.f32 -1.442695, %v6808_v52 }
 0x1cc   :  { %v1233_v54 = vadd.f32 %v6806_v51, %v1232_v31  ;;  %v1246_v27 = vsub.f32 1.0, %v1245_v48  ;;  %5448 = vpow2.f32 %v5179_v26  ;;  %v5183_v17 = vmul.f32 -1.442695, %v6812_v43 }
 0x1cd   :  { %v6921_v56 = vsel %vm6840_vm13, %v1181_v6, %v1177_v47  ;;  %v6925_v36 = vsel %vm6845_vm15, %v1196_v32, %v1192_v25  ;;  %v1261_v42 = vsub.f32 1.0, %v1260_v2  ;;  %5450 = vpow2.f32 %v5180_v61  ;;  %vm6944_vm13 = vmor %vm1219_vm2, %vm1220_vm8 }
 0x1ce   :  { %v6935_v40 = vpop.eup %5444  ;;  %v1207_v43 = vsel %vm6931_vm7, %v6789_v8, %v1203_v34  ;;  %vm1249_vm15 = vweird.f32 %v6791_v41  ;;  %v1270_v39 = vand.u32 2147483648, %v6797_v16  ;;  %5452 = vpow2.f32 %v5181_v63 }
 0x1cf   :  { %v5184_v52 = vmul.f32 -1.442695, %v6817_v4  ;;  %v1222_v6 = vsel %vm6944_vm13, %v6795_v28, %v1218_v44  ;;  %vm1250_vm8 = vweird.f32 %v6851_v15  ;;  %vm1264_vm1 = vweird.f32 %v6797_v16 }
 0x1d0   :  { %5454 = vpow2.f32 %v5182_v18  ;;  %v5185_v63 = vmul.f32 -1.442695, %v6823_v1  ;;  %v1237_v37 = vsel %vm6958_vm0, %v6806_v51, %v1233_v54  ;;  %v1247_v28 = vmul.f32 %v6851_v15, %v1246_v27 }
 0x1d1   :  { %v6969_v8 = vor.u32 1.1754944e-38, %v1255_v62  ;;  %5456 = vpow2.f32 %v5183_v17  ;;  %v5447_v0 = vpop.eup %5446  ;;  %v6973_v4 = vsel %vm6876_vm6, %v1211_v14, %v1207_v43  ;;  %v1262_v32 = vmul.f32 %v6858_v7, %v1261_v42  ;;  %vm7017_vm6 = vmor %vm1249_vm15, %vm1250_vm8 }
 0x1d2   :  { %v1275_v1 = vmul.f32 %v6935_v40, %v6838_v3  ;;  %v5449_v60 = vpop.eup %5448  ;;  %v6982_v51 = vsel %vm6896_vm14, %v6856_v22, %v1222_v6  ;;  %v6984_v50 = vor.u32 1.1754944e-38, %v1270_v39  ;;  %5458 = vpow2.f32 %v5184_v52 }
 0x1d3   :  { %v6986_v2 = vadd.f32 1.0, %v5447_v0  ;;  %v5451_v14 = vpop.eup %5450  ;;  %v6990_v55 = vsel %vm6908_vm12, %v1241_v57, %v1237_v37  ;;  %vm1265_vm5 = vweird.f32 %v6858_v7  ;;  %5460 = vpow2.f32 %v5185_v63 }
 0x1d4   :  { %v6993_v31 = vadd.f32 1.0, %v5449_v60  ;;  %v5453_v48 = vpop.eup %5452  ;;  %v6996_v25 = vadd.f32 %v6851_v15, %v1247_v28  ;;  %v1285_v22 = vand.u32 2147483648, %v6838_v3  ;;  %v6999_v23 = vadd.f32 1.0, %v5451_v14  ;;  %vm7033_vm9 = vmor %vm1264_vm1, %vm1265_vm5 }
 0x1d5   :  { %5462 = vrcp.f32 %v6986_v2  ;;  %v7003_v47 = vadd.f32 %v6858_v7, %v1262_v32  ;;  %v1276_v57 = vsub.f32 1.0, %v1275_v1  ;;  %v7005_v53 = vadd.f32 1.0, %v5453_v48 }
 0x1d6   :  { %v5455_v62 = vpop.eup %5454  ;;  %5464 = vrcp.f32 %v6993_v31  ;;  %v972_v42 = vand.u32 2147483648, %v6986_v2  ;;  %v7037_v52 = vor.u32 1.1754944e-38, %v1285_v22  ;;  %v987_v34 = vand.u32 2147483648, %v6993_v31 }
 0x1d7   :  { %v5457_v26 = vpop.eup %5456  ;;  %v7011_v54 = vadd.f32 1.0, %v5455_v62  ;;  %5466 = vrcp.f32 %v6999_v23  ;;  %v7046_v28 = vmul.f32 %v6935_v40, %v1276_v57  ;;  %vm966_vm2 = vweird.f32 %v6986_v2 }
 0x1d8   :  { %v5459_v43 = vpop.eup %5458  ;;  %v7048_v0 = vadd.f32 1.0, %v5457_v26  ;;  %5468 = vrcp.f32 %v7005_v53  ;;  %v970_v1 = vand.u32 2147483647, %v6986_v2  ;;  %v1002_v60 = vand.u32 2147483648, %v6999_v23 }
 0x1d9   :  { %v5461_v63 = vpop.eup %5460  ;;  %5470 = vrcp.f32 %v7011_v54  ;;  %v7059_v48 = vadd.f32 1.0, %v5459_v43  ;;  %v7063_v62 = vor.u32 1.1754944e-38, %v972_v42  ;;  %vm981_vm10 = vweird.f32 %v6993_v31 }
 0x1da   :  { %v985_v57 = vand.u32 2147483647, %v6993_v31  ;;  %v7069_v6 = vor.u32 1.1754944e-38, %v987_v34  ;;  %v1000_v58 = vand.u32 2147483647, %v6999_v23  ;;  %v1017_v17 = vand.u32 2147483648, %v7005_v53 }
 0x1db   :  { %v7051_v32 = vpop.eup %5462  ;;  %v7075_v18 = vadd.f32 1.0, %v5461_v63  ;;  %v1015_v42 = vand.u32 2147483647, %v7005_v53  ;;  %5472 = vrcp.f32 %v7048_v0  ;;  %v7083_v35 = vor.u32 1.1754944e-38, %v1002_v60 }
 0x1dc   :  { %v7057_v14 = vpop.eup %5464  ;;  %v962_v22 = vmul.f32 %v7051_v32, %v6986_v2  ;;  %vm967_vm14 = vweird.f32 %v7051_v32  ;;  %vm7089_vm7 = vcmp.eq.f32.partialorder %v970_v1, 8.507059e+37  ;;  %vm7094_vm15 = vcmp.eq.f32.partialorder %v985_v57, 8.507059e+37  ;;  %v848_v57 = vld [vmem:[#allocation5 + $0x2c] sm:$0x1] }
 0x1dd   :  { %v977_v26 = vmul.f32 %v7057_v14, %v6993_v31  ;;  %v7073_v43 = vpop.eup %5466  ;;  %vm982_vm13 = vweird.f32 %v7057_v14  ;;  %v1030_v60 = vand.u32 2147483647, %v7011_v54  ;;  %v1018_v1 = vor.u32 1.1754944e-38, %v1017_v17  ;;  %vm7124_vm4 = vmor %vm966_vm2, %vm967_vm14 }
 0x1de   :  { %v963_v44 = vsub.f32 1.0, %v962_v22  ;;  %v992_v34 = vmul.f32 %v7073_v43, %v6999_v23  ;;  %v7086_v61 = vpop.eup %5468  ;;  %vm997_vm8 = vweird.f32 %v7073_v43  ;;  %vm7105_vm1 = vcmp.eq.f32.partialorder %v1000_v58, 8.507059e+37  ;;  %vm7139_vm11 = vmor %vm981_vm10, %vm982_vm13 }
 0x1df   :  { %v978_v37 = vsub.f32 1.0, %v977_v26  ;;  %v5471_v26 = vpop.eup %5470  ;;  %vm7109_vm5 = vcmp.eq.f32.partialorder %v1015_v42, 8.507059e+37  ;;  %vm1012_vm3 = vweird.f32 %v7086_v61  ;;  %vm7129_vm0 = vcmp.eq.f32.partialorder %v1030_v60, 8.507059e+37 }
 0x1e0   :  { %v964_v63 = vmul.f32 %v7051_v32, %v963_v44  ;;  %v993_v45 = vsub.f32 1.0, %v992_v34  ;;  %v1007_v44 = vmul.f32 %v7086_v61, %v7005_v53  ;;  %v1022_v30 = vmul.f32 %v5471_v26, %v7011_v54 }
 0x1e1   :  { %v979_v10 = vmul.f32 %v7057_v14, %v978_v37  ;;  %v1032_v37 = vand.u32 2147483648, %v7011_v54  ;;  %v7118_v21 = vpop.eup %5472  ;;  %vm1041_vm12 = vweird.f32 %v7048_v0  ;;  %5474 = vrcp.f32 %v7059_v48 }
 0x1e2   :  { %v965_v59 = vadd.f32 %v7051_v32, %v964_v63  ;;  %v994_v17 = vmul.f32 %v7073_v43, %v993_v45  ;;  %v1008_v49 = vsub.f32 1.0, %v1007_v44  ;;  %v1045_v63 = vand.u32 2147483647, %v7048_v0 }
 0x1e3   :  { %v980_v34 = vadd.f32 %v7057_v14, %v979_v10  ;;  %v1023_v42 = vsub.f32 1.0, %v1022_v30  ;;  %vm1027_vm2 = vweird.f32 %v5471_v26  ;;  %v1047_v60 = vand.u32 2147483648, %v7048_v0 }
 0x1e4   :  { %v995_v2 = vadd.f32 %v7073_v43, %v994_v17  ;;  %v1009_v30 = vmul.f32 %v7086_v61, %v1008_v49  ;;  %v969_v44 = vsel %vm7124_vm4, %v7051_v32, %v965_v59  ;;  %v1037_v38 = vmul.f32 %v7118_v21, %v7048_v0 }
 0x1e5   :  { %v984_v19 = vsel %vm7139_vm11, %v7057_v14, %v980_v34  ;;  %v1024_v31 = vmul.f32 %v5471_v26, %v1023_v42  ;;  %vm11053_vm10 = vweird.f32 %v6999_v23  ;;  %v1033_v58 = vor.u32 1.1754944e-38, %v1032_v37 }
 0x1e6   :  { %vm7158_vm14 = vmor %vm11053_vm10, %vm997_vm8  ;;  %v1010_v17 = vadd.f32 %v7086_v61, %v1009_v30  ;;  %vm7163_vm4 = vcmp.eq.f32.partialorder %v1045_v63, 8.507059e+37  ;;  %v1060_v32 = vand.u32 2147483647, %v7059_v48  ;;  %vm11058_vm11 = vweird.f32 %v7005_v53  ;;  %v846_v30 = vld [vmem:[#allocation5 + $0x20] sm:$0x1] }
 0x1e7   :  { %v999_v14 = vsel %vm7158_vm14, %v7073_v43, %v995_v2  ;;  %vm7175_vm13 = vmor %vm11058_vm11, %vm1012_vm3  ;;  %v1025_v34 = vadd.f32 %v5471_v26, %v1024_v31  ;;  %v1038_v37 = vsub.f32 1.0, %v1037_v38  ;;  %v1062_v63 = vand.u32 2147483648, %v7059_v48  ;;  %v5475_v38 = vpop.eup %5474 }
 0x1e8   :  { %v974_v42 = vsel %vm7089_vm7, %v7063_v62, %v969_v44  ;;  %v989_v43 = vsel %vm7094_vm15, %v7069_v6, %v984_v19  ;;  %v1014_v53 = vsel %vm7175_vm13, %v7086_v61, %v1010_v17  ;;  %vm11061_vm3 = vweird.f32 %v7011_v54  ;;  %v842_v6 = vld [vmem:[#allocation5 + $0x8] sm:$0x1] }
 0x1e9   :  { %vm7192_vm8 = vmor %vm11061_vm3, %vm1027_vm2  ;;  %vm1056_vm10 = vweird.f32 %v7059_v48  ;;  %5476 = vrcp.f32 %v7075_v18  ;;  %v1039_v19 = vmul.f32 %v7118_v21, %v1038_v37  ;;  %vm1042_vm7 = vweird.f32 %v7118_v21 }
 0x1ea   :  { %v1029_v46 = vsel %vm7192_vm8, %v5471_v26, %v1025_v34  ;;  %v1048_v61 = vor.u32 1.1754944e-38, %v1047_v60  ;;  %v1004_v54 = vsel %vm7105_vm1, %v7083_v35, %v999_v14  ;;  %v1019_v62 = vsel %vm7109_vm5, %v1018_v1, %v1014_v53  ;;  %v844_v26 = vld [vmem:[#allocation5 + $0x14] sm:$0x1]  ;;  %vm1043_vm1 = vmor %vm1041_vm12, %vm1042_vm7  ;;  %v852_v14 = vld [vmem:[#allocation5 + $0x44] sm:$0x1] }
 0x1eb   :  { %v1052_v22 = vmul.f32 %v5475_v38, %v7059_v48  ;;  %vm7208_vm15 = vcmp.eq.f32.partialorder %v1060_v32, 8.507059e+37  ;;  %v1034_v44 = vsel %vm7129_vm0, %v1033_v58, %v1029_v46  ;;  %v1040_v60 = vadd.f32 %v7118_v21, %v1039_v19  ;;  %v850_v32 = vld [vmem:[#allocation5 + $0x38] sm:$0x1]  ;;  %v854_v19 = vld [vmem:[#allocation5 + $0x50] sm:$0x1] }
 0x1ec   :  { %vm1057_vm2 = vweird.f32 %v5475_v38  ;;  %v1063_v31 = vor.u32 1.1754944e-38, %v1062_v63  ;;  %v1075_v35 = vand.u32 2147483647, %v7075_v18  ;;  %v11066_v1 = vrot.slane %v6729_v20, 7 }
 0x1ed   :  { %v1053_v33 = vsub.f32 1.0, %v1052_v22  ;;  %v1306_v17 = vmul.f32 %v989_v43, %v6729_v20  ;;  %v1044_v10 = vsel %vm1043_vm1, %v7118_v21, %v1040_v60  ;;  %v11067_v58 = vrot.slane %v6729_v20, 1 }
 0x1ee   :  { %v1305_v49 = vmul.f32 %v11066_v1, %v974_v42  ;;  %v11068_v34 = vrot.slane %v6729_v20, 2  ;;  %v1313_v0 = vunpack.c.l.bf16 %v842_v6  ;;  %vm1280_vm12 = vweird.f32 %v6935_v40 }
 0x1ef   :  { %v1307_v23 = vmul.f32 %v11067_v58, %v1004_v54  ;;  %v5477_v63 = vpop.eup %5476  ;;  %v1049_v53 = vsel %vm7163_vm4, %v1048_v61, %v1044_v10  ;;  %v1054_v42 = vmul.f32 %v5475_v38, %v1053_v33  ;;  %v1314_v45 = vunpack.c.l.bf16 %v844_v26  ;;  %vm1058_vm4 = vmor %vm1056_vm10, %vm1057_vm2 }
 0x1f0   :  { %v1308_v37 = vmul.f32 %v11068_v34, %v1019_v62  ;;  %v1315_v43 = vunpack.c.l.bf16 %v846_v30  ;;  %v11069_v46 = vand.u32 2147483647, %v6791_v41  ;;  %v1067_v54 = vmul.f32 %v5477_v63, %v7075_v18 }
 0x1f1   :  { %v1077_v6 = vand.u32 2147483648, %v7075_v18  ;;  %v11072_v62 = vrot.slane %v6729_v20, 3  ;;  %v1316_v60 = vunpack.c.l.bf16 %v848_v57  ;;  %v11073_v59 = vand.u32 2147483647, %v6797_v16 }
 0x1f2   :  { %vm7231_vm0 = vcmp.eq.f32.partialorder %v11069_v46, 8.507059e+37  ;;  %vm1279_vm14 = vweird.f32 %v6838_v3  ;;  %v1055_v41 = vadd.f32 %v5475_v38, %v1054_v42  ;;  %v11076_v26 = vrot.slane %v6729_v20, 4 }
 0x1f3   :  { %v1309_v22 = vmul.f32 %v11072_v62, %v1034_v44  ;;  %vm7241_vm5 = vcmp.eq.f32.partialorder %v11073_v59, 8.507059e+37  ;;  %v1317_v33 = vunpack.c.l.bf16 %v850_v32  ;;  %v1318_v1 = vunpack.c.l.bf16 %v852_v14 }
 0x1f4   :  { %v1310_v30 = vmul.f32 %v11076_v26, %v1049_v53  ;;  %v1068_v44 = vsub.f32 1.0, %v1067_v54  ;;  %vm1072_vm11 = vweird.f32 %v5477_v63  ;;  %v1321_v57 = vadd.f32 %v1313_v0, %v1305_v49  ;;  %v856_v49 = vld [vmem:[#allocation5 + $0x5c] sm:$0x1] }
 0x1f5   :  { %v1322_v16 = vadd.f32 %v1314_v45, %v1306_v17  ;;  %v1059_v10 = vsel %vm1058_vm4, %v5475_v38, %v1055_v41  ;;  %v1319_v58 = vunpack.c.l.bf16 %v854_v19  ;;  %v1323_v34 = vadd.f32 %v1315_v43, %v1307_v23 }
 0x1f6   :  { %v1324_v46 = vadd.f32 %v1316_v60, %v1308_v37  ;;  %v1064_v42 = vsel %vm7208_vm15, %v1063_v31, %v1059_v10  ;;  %v1069_v62 = vmul.f32 %v5477_v63, %v1068_v44  ;;  %v1325_v59 = vadd.f32 %v1317_v33, %v1309_v22  ;;  %v7268_v37 = vld [vmem:[%s10880_s3] sm:$0xff] }
 0x1f7   :  { %5478 = vtanh.f32 %v1321_v57  ;;  %v1278_v32 = vadd.f32 %v6935_v40, %v7046_v28  ;;  %v11077_v48 = vand.u32 2147483647, %v6838_v3  ;;  %v11080_v38 = vrot.slane %v6729_v20, 5 }
 0x1f8   :  { %v1326_v23 = vadd.f32 %v1318_v1, %v1310_v30  ;;  %5480 = vtanh.f32 %v1322_v16  ;;  %v1070_v2 = vadd.f32 %v5477_v63, %v1069_v62  ;;  %vm1071_vm3 = vweird.f32 %v7075_v18 }
 0x1f9   :  { %vm7257_vm13 = vcmp.eq.f32.partialorder %v11077_v48, 8.507059e+37  ;;  %v1311_v17 = vmul.f32 %v11080_v38, %v1064_v42  ;;  %vm1076_vm8 = vcmp.eq.f32.partialorder %v1075_v35, 8.507059e+37  ;;  %5482 = vtanh.f32 %v1323_v34  ;;  %vm1073_vm10 = vmor %vm1071_vm3, %vm1072_vm11 }
 0x1fa   :  { %v1078_v28 = vor.u32 1.1754944e-38, %v1077_v6  ;;  %5484 = vtanh.f32 %v1324_v46  ;;  %vm5211_vm7 = vcmp.gt.s32.totalorder %v7268_v37, 2  ;;  %v1074_v0 = vsel %vm1073_vm10, %v5477_v63, %v1070_v2 }
 0x1fb   :  { %v1327_v31 = vadd.f32 %v1319_v58, %v1311_v17  ;;  %v1320_v53 = vunpack.c.l.bf16 %v856_v49  ;;  %5486 = vtanh.f32 %v1325_v59  ;;  %v11081_v45 = vmov 0  }
 0x1fc   :  { %v1987_v43 = vsel %vm5211_vm7, 1, %v11081_v45  ;;  %v11082_v18 = vsel %vm7017_vm6, %v6851_v15, %v6996_v25  ;;  %v11083_v19 = vrot.slane %v6684_v11, 7  ;;  %v1079_v6 = vsel %vm1076_vm8, %v1078_v28, %v1074_v0  ;;  %vm7295_vm6 = vmor %vm1279_vm14, %vm1280_vm12 }
 0x1fd   :  { %v1257_v35 = vsel %vm7231_vm0, %v6969_v8, %v11082_v18  ;;  %5488 = vtanh.f32 %v1326_v23  ;;  %1989 = vperm.xlu1 %5332, %v1987_v43   ;;  %v5479_v63 = vpop.eup %5478  ;;  %v11084_v27 = vsel %vm7033_vm9, %v6858_v7, %v7003_v47  ;;  %v1370_v25 = vmul.f32 %v6925_v36, %v6684_v11 }
 0x1fe   :  { %v1369_v54 = vmul.f32 %v11083_v19, %v6921_v56  ;;  %v1272_v15 = vsel %vm7241_vm5, %v6984_v50, %v11084_v27  ;;  %v11087_v39 = vrot.slane %v6729_v20, 6  ;;  %5490 = vtanh.f32 %v1327_v31  ;;  %v5481_v7 = vpop.eup %5480 }
 0x1ff   :  { %v1282_v50 = vsel %vm7295_vm6, %v6935_v40, %v1278_v32  ;;  %v11088_v47 = vrot.slane %v6684_v11, 1  ;;  %v11089_v22 = vsub.f32 1.0, %v6921_v56  ;;  %vm5228_vm9 = vcmp.gt.s32.totalorder %v7268_v37, 3  ;;  %v5483_v61 = vpop.eup %5482 }
 0x200   :  { %v1312_v21 = vmul.f32 %v11087_v39, %v1079_v6  ;;  %v1342_v41 = vsub.f32 1.0, %v1257_v35  ;;  %v11090_v20 = vrot.slane %v6684_v11, 2  ;;  %v11091_v33 = vsub.f32 1.0, %v6925_v36  ;;  %v5485_v40 = vpop.eup %5484 }
 0x201   :  { %v1371_v3 = vmul.f32 %v11088_v47, %v6973_v4  ;;  %v1345_v60 = vmul.f32 %v5479_v63, %v11089_v22  ;;  %v1343_v44 = vsub.f32 1.0, %v1272_v15  ;;  %v11092_v57 = vrot.slane %v6684_v11, 3  ;;  %v5487_v34 = vpop.eup %5486 }
 0x202   :  { %v1372_v26 = vmul.f32 %v11090_v20, %v6982_v51  ;;  %v1328_v30 = vadd.f32 %v1320_v53, %v1312_v21  ;;  %v1346_v1 = vmul.f32 %v5481_v7, %v11091_v33  ;;  %v11093_v56 = vsub.f32 1.0, %v6973_v4 }
 0x203   :  { %v1373_v16 = vmul.f32 %v11092_v57, %v6990_v55  ;;  %v1377_v58 = vadd.f32 %v1369_v54, %v1345_v60  ;;  %v1287_v46 = vsel %vm7257_vm13, %v7037_v52, %v1282_v50  ;;  %v11094_v42 = vsub.f32 1.0, %v6982_v51  ;;  %v5489_v59 = vpop.eup %5488 }
 0x204   :  { %v1347_v10 = vmul.f32 %v5483_v61, %v11093_v56  ;;  %5492 = vtanh.f32 %v1328_v30  ;;  %v2587_v62 = vsel %vm5228_vm9, 1, %v11081_v45  ;;  %v11095_v32 = vsub.f32 1.0, %v6990_v55  ;;  %v5491_v17 = vpop.eup %5490  ;;  %v1390_v61 = vpop.permute.xlu0 %1389  ;;  %v11106_v56 = vld [vmem:[#allocation18_spill] sm:$0xff] }
 0x205   :  { %v1348_v36 = vmul.f32 %v5485_v40, %v11094_v42  ;;  %v1378_v49 = vadd.f32 %v1370_v25, %v1346_v1  ;;  %v1400_v4 = vrot.slane %v1377_v58, 1  ;;  %v11096_v23 = vrot.slane %v6684_v11, 4  ;;  %2589 = vperm.xlu1 %5332, %v2587_v62   ;;  %v11108_v58 = vld [vmem:[#allocation27_spill] sm:$0xff]  ;;  %v11111_v42 = vld [vmem:[#allocation30_spill] sm:$0xff] }
 0x206   :  { %v1349_v48 = vmul.f32 %v5487_v34, %v11095_v32  ;;  %v1379_v38 = vadd.f32 %v1371_v3, %v1347_v10  ;;  %v1350_v28 = vmul.f32 %v5489_v59, %v1342_v41  ;;  %v11097_v14 = vrot.slane %v6684_v11, 5  ;;  %v11107_v10 = vld [vmem:[#allocation19_spill] sm:$0xff]  ;;  %v11109_v34 = vld [vmem:[#allocation22_spill] sm:$0xff]  ;;  %v11114_v59 = vld [vmem:[#allocation33_spill] sm:$0xff] }
 0x207   :  { %v1374_v2 = vmul.f32 %v11096_v23, %v1257_v35  ;;  %v1380_v31 = vadd.f32 %v1372_v26, %v1348_v36  ;;  %v1351_v51 = vmul.f32 %v5491_v17, %v1343_v44  ;;  %vm11098_vm15 = vcmask 1041409   ;;  %v11112_v36 = vld [vmem:[#allocation25_spill] sm:$0xff]  ;;  %v11113_v62 = vld [vmem:[#allocation26_spill] sm:$0xff]  ;;  %v11115_v32 = vld [vmem:[#allocation28_spill] sm:$0xff] }
 0x208   :  { %v1375_v52 = vmul.f32 %v11097_v14, %v1272_v15  ;;  %v1381_v0 = vadd.f32 %v1373_v16, %v1349_v48  ;;  %v1401_v53 = vsel %vm11098_vm15, %v1378_v49, %v1400_v4  ;;  %v1402_v43 = vrot.slane %v1379_v38, 7  ;;  %v11116_v48 = vld [vmem:[#allocation29_spill] sm:$0xff]  ;;  %v11117_v49 = vld [vmem:[#allocation36_spill] sm:$0xff]  ;;  %v11118_v38 = vld [vmem:[#allocation31_spill] sm:$0xff] }
 0x209   :  { %v1360_v55 = vrot.slane %v6684_v11, 6  ;;  %v1344_v18 = vsub.f32 1.0, %v1287_v46  ;;  %v1382_v19 = vadd.f32 %v1374_v2, %v1350_v28  ;;  %v1404_v54 = vrot.slane %v1380_v31, 6  ;;  %v11119_v4 = vld [vmem:[#allocation32_spill] sm:$0xff]  ;;  %v11120_v17 = vld [vmem:[#allocation37_spill] sm:$0xff]  ;;  %v11121_v23 = vld [vmem:[#allocation34_spill] sm:$0xff] }
 0x20a   :  { %v1383_v6 = vadd.f32 %v1375_v52, %v1351_v51  ;;  %vm11099_vm2 = vcmask 1042434   ;;  %v1406_v35 = vrot.slane %v1381_v0, 5  ;;  %vm5296_vm1 = vcmp.gt.s32.totalorder %v7268_v37, 7  ;;  %v5493_v27 = vpop.eup %5492  ;;  %v11122_v2 = vld [vmem:[#allocation35_spill] sm:$0xff]  ;;  %v1441_v51 = vld [vmem:[#allocation5] sm:$0x22] }
 0x20b   :  { %v1403_v63 = vsel %vm11099_vm2, %v1402_v43, %v1401_v53  ;;  %vm11100_vm12 = vcmask 1043459   ;;  %v1408_v8 = vrot.slane %v1382_v19, 4  ;;  %v1352_v25 = vmul.f32 %v5493_v27, %v1344_v18  ;;  %v1443_v18 = vld [vmem:[#allocation5 + $0xc] sm:$0x22]  ;;  %v1445_v19 = vld [vmem:[#allocation5 + $0x18] sm:$0x22] }
 0x20c   :  { %v1405_v15 = vsel %vm11100_vm12, %v1404_v54, %v1403_v63  ;;  %v1376_v39 = vmul.f32 %v1360_v55, %v1287_v46  ;;  %vm11101_vm0 = vcmask 1044484   ;;  %vm11102_vm5 = vcmask 1045509   ;;  %v11110_v46 = vld [vmem:[#allocation23_spill] sm:$0xff]  ;;  %v1451_v63 = vld [vmem:[#allocation5 + $0x3c] sm:$0x22] }
 0x20d   :  { %v1407_v21 = vsel %vm11101_vm0, %v1406_v35, %v1405_v15  ;;  %v1410_v50 = vrot.slane %v1383_v6, 3  ;;  %v4987_v47 = vsel %vm5296_vm1, 1, %v11081_v45  ;;  %vm11103_vm14 = vcmask 1046534   ;;  %v1447_v54 = vld [vmem:[#allocation5 + $0x24] sm:$0x22] }
 0x20e   :  { %v1409_v7 = vsel %vm11102_vm5, %v1408_v8, %v1407_v21  ;;  %v1384_v3 = vadd.f32 %v1376_v39, %v1352_v25  ;;  %4989 = vperm.xlu1 %5332, %v4987_v47   ;;  %vm1391_vm4 = vcmp.eq.s32.totalorder %v1390_v61, 1  ;;  %vm11104_vm11 = vcmask 1047559   ;;  %v1449_v6 = vld [vmem:[#allocation5 + $0x30] sm:$0x22]  ;;  %v1453_v35 = vld [vmem:[#allocation5 + $0x48] sm:$0x22] }
 0x20f   :  { %v1411_v22 = vsel %vm11103_vm14, %v1410_v50, %v1409_v7  ;;  %v1497_v27 = vunpack.c.l.bf16 %v1441_v51  ;;  %v1498_v15 = vunpack.c.l.bf16 %v1443_v18  ;;  %v1499_v8 = vunpack.c.l.bf16 %v1445_v19  ;;  %v1455_v0 = vld [vmem:[#allocation5 + $0x54] sm:$0x22] }
 0x210   :  { %v1412_v60 = vrot.slane %v1384_v3, 2  ;;  %v1500_v25 = vunpack.c.l.bf16 %v1447_v54  ;;  %v1501_v39 = vunpack.c.l.bf16 %v1449_v6  ;;  %v1502_v21 = vunpack.c.l.bf16 %v1451_v63 }
 0x211   :  { %v1503_v7 = vunpack.c.l.bf16 %v1453_v35  ;;  %v1689_v3 = vrot.slane %v1441_v51, 4  ;;  %v1692_v61 = vrot.slane %v1447_v54, 4  ;;  %v1694_v51 = vrot.slane %v1451_v63, 4 }
 0x212   :  { %v1413_v37 = vsel %vm11104_vm11, %v1412_v60, %v1411_v22  ;;  %v1690_v22 = vrot.slane %v1443_v18, 4  ;;  %v1691_v60 = vrot.slane %v1445_v19, 4  ;;  %v1695_v18 = vrot.slane %v1453_v35, 4 }
 0x213   :  { %v1415_v41 = vsel %vm1391_vm4, %v1413_v37, 0.0  ;;  %v7345_v20 = vsel %vm1391_vm4, %v1413_v37, %v6684_v11  ;;  %v11105_v11 = vld [vmem:[#allocation24_spill] sm:$0xff]  ;;  %v1504_v19 = vunpack.c.l.bf16 %v1455_v0  ;;  %v1708_v35 = vunpack.c.l.bf16 %v1692_v61 }
 0x214   :  { %v1417_v26 = vrot.slane %v1415_v41, 1  ;;  %v1418_v30 = vrot.slane %v1415_v41, 2  ;;  %v1419_v33 = vrot.slane %v1415_v41, 3  ;;  %1431 = vst [vmem:[#allocation10 + $0x1] sm:$0x1] %v1415_v41  ;;  %v1420_v1 = vrot.slane %v1415_v41, 4 }
 0x215   :  { %v1457_v40 = vpack.c.bf16 %v7345_v20, %v7345_v20  ;;  %v1421_v44 = vrot.slane %v1415_v41, 5  ;;  %v1422_v57 = vrot.slane %v1415_v41, 6  ;;  %v1423_v16 = vrot.slane %v1415_v41, 7 }
 0x216   :  { %1432 = vst [vmem:[#allocation10 + $0x9] sm:$0x1] %v1417_v26 }
 0x217   :  { %1433 = vst [vmem:[#allocation10 + $0x11] sm:$0x1] %v1418_v30  ;;  %1466 = vmatmul.bf16.vlgmr.msrb.gmra.mxu2 %v1457_v40  ;;  %1479 = vmatmul.bf16.vlgmr.msrb.gmra.mxu3 %v1457_v40 }
 0x218   :  { %1434 = vst [vmem:[#allocation10 + $0x19] sm:$0x1] %v1419_v33  ;;  %1492 = vmatmul.bf16.vlgmr.msra.gmra.mxu0 %v1457_v40  ;;  %2684 = vmatpush.bf16.msrb.mxu2 %v6120_v24 }
 0x219   :  { %1435 = vst [vmem:[#allocation10 + $0x21] sm:$0x1] %v1420_v1  ;;  %3258 = vmatpush.bf16.msrb.mxu3 %v6102_v5  ;;  %3271 = vmatpush.bf16.msra.mxu0 %v6104_v9 }
 0x21a   :  { %1436 = vst [vmem:[#allocation10 + $0x29] sm:$0x1] %v1421_v44  ;;  %v1693_v44 = vrot.slane %v1449_v6, 4 }
 0x21b   :  { %1437 = vst [vmem:[#allocation10 + $0x31] sm:$0x1] %v1422_v57 }
 0x21c   :  { %1438 = vst [vmem:[#allocation10 + $0x39] sm:$0x1] %v1423_v16  ;;  %2685 = vmatpush.bf16.msrb.mxu2 %v6123_v29 }
 0x21d   :  { %3259 = vmatpush.bf16.msrb.mxu3 %v6107_v12  ;;  %3272 = vmatpush.bf16.msra.mxu0 %v6111_v13 }
 0x220   :  { %2686 = vmatpush.bf16.msrb.mxu2 %v11105_v11 }
 0x221   :  { %3260 = vmatpush.bf16.msrb.mxu3 %v11106_v56  ;;  %3273 = vmatpush.bf16.msra.mxu0 %v11107_v10 }
 0x224   :  { %2687 = vmatpush.bf16.msrb.mxu2 %v11108_v58 }
 0x225   :  { %3261 = vmatpush.bf16.msrb.mxu3 %v11109_v34  ;;  %3274 = vmatpush.bf16.msra.mxu0 %v11110_v46 }
 0x228   :  { %2688 = vmatpush.bf16.msrb.mxu2 %v11111_v42 }
 0x229   :  { %3262 = vmatpush.bf16.msrb.mxu3 %v11112_v36  ;;  %3275 = vmatpush.bf16.msra.mxu0 %v11113_v62 }
 0x22c   :  { %2689 = vmatpush.bf16.msrb.mxu2 %v11114_v59 }
 0x22d   :  { %3263 = vmatpush.bf16.msrb.mxu3 %v11115_v32  ;;  %3276 = vmatpush.bf16.msra.mxu0 %v11116_v48 }
 0x230   :  { %2690 = vmatpush.bf16.msrb.mxu2 %v11117_v49 }
 0x231   :  { %3264 = vmatpush.bf16.msrb.mxu3 %v11118_v38  ;;  %3277 = vmatpush.bf16.msra.mxu0 %v11119_v4 }
 0x234   :  { %2691 = vmatpush.bf16.msrb.mxu2 %v11120_v17 }
 0x235   :  { %3265 = vmatpush.bf16.msrb.mxu3 %v11121_v23  ;;  %3278 = vmatpush.bf16.msra.mxu0 %v11122_v2 }
 0x295   :  { %v7373_v28 = vpop.f32.mrf.mxu0 }
 0x29a   :  { %v1467_v50 = vpop.f32.mrf.mxu2  ;;  %v7382_v47 = vpop.f32.mrf.mxu3 }
 0x29b   :  { %v1506_v37 = vrot.slane %v1467_v50, 6  ;;  %v1507_v41 = vrot.slane %v1467_v50, 7  ;;  %v1508_v26 = vrot.slane %v1467_v50, 1  ;;  %v1509_v30 = vrot.slane %v1467_v50, 2 }
 0x29c   :  { %v1510_v33 = vrot.slane %v1467_v50, 3  ;;  %v1511_v1 = vrot.slane %v1467_v50, 4  ;;  %v1523_v40 = vadd.f32 %v1499_v8, %v1467_v50  ;;  %v1512_v2 = vrot.slane %v1467_v50, 5 }
 0x29d   :  { %v1521_v57 = vadd.f32 %v1506_v37, %v1497_v27  ;;  %v1522_v16 = vadd.f32 %v1507_v41, %v1498_v15  ;;  %v1524_v55 = vadd.f32 %v1508_v26, %v1500_v25  ;;  %v1525_v43 = vadd.f32 %v1509_v30, %v1501_v39  ;;  %v1495_v53 = vpop.f32.mrf.mxu0 }
 0x29e   :  { %v1526_v31 = vadd.f32 %v1510_v33, %v1502_v21  ;;  %v5197_v52 = vmul.f32 -1.442695, %v1523_v40  ;;  %v1527_v23 = vadd.f32 %v1511_v1, %v1503_v7  ;;  %v1696_v27 = vrot.slane %v1455_v0, 4 }
 0x29f   :  { %v5195_v54 = vmul.f32 -1.442695, %v1521_v57  ;;  %v5196_v14 = vmul.f32 -1.442695, %v1522_v16  ;;  %v5198_v45 = vmul.f32 -1.442695, %v1524_v55  ;;  %v1707_v15 = vunpack.c.l.bf16 %v1691_v60 }
 0x2a0   :  { %5494 = vpow2.f32 %v5197_v52  ;;  %v5199_v17 = vmul.f32 -1.442695, %v1525_v43  ;;  %v5200_v6 = vmul.f32 -1.442695, %v1526_v31  ;;  %v1705_v8 = vunpack.c.l.bf16 %v1689_v3  ;;  %v7476_v3 = vld [vmem:[#allocation5 + $0x50] sm:$0x2] }
 0x2a1   :  { %5496 = vpow2.f32 %v5195_v54  ;;  %v1706_v53 = vunpack.c.l.bf16 %v1690_v22  ;;  %v1714_v25 = vrot.slane %v7382_v47, 6  ;;  %v1709_v21 = vunpack.c.l.bf16 %v1693_v44 }
 0x2a2   :  { %5498 = vpow2.f32 %v5196_v14  ;;  %v1469_v39 = vpop.f32.mrf.mxu2  ;;  %v1482_v63 = vpop.f32.mrf.mxu3  ;;  %v1710_v37 = vunpack.c.l.bf16 %v1694_v51  ;;  %v1528_v55 = vadd.f32 %v1512_v2, %v1504_v19  ;;  %v5201_v7 = vmul.f32 -1.442695, %v1527_v23 }
 0x2a3   :  { %5500 = vpow2.f32 %v5198_v45  ;;  %v1711_v52 = vunpack.c.l.bf16 %v1695_v18  ;;  %v1712_v31 = vunpack.c.l.bf16 %v1696_v27  ;;  %v1715_v14 = vrot.slane %v7382_v47, 7 }
 0x2a4   :  { %5502 = vpow2.f32 %v5199_v17  ;;  %v1716_v45 = vrot.slane %v7382_v47, 1  ;;  %v1729_v22 = vadd.f32 %v1714_v25, %v1705_v8  ;;  %v1717_v23 = vrot.slane %v7382_v47, 2 }
 0x2a5   :  { %5504 = vpow2.f32 %v5200_v6  ;;  %v1718_v61 = vrot.slane %v7382_v47, 3  ;;  %v5202_v26 = vmul.f32 -1.442695, %v1528_v55  ;;  %v1719_v33 = vrot.slane %v7382_v47, 4 }
 0x2a6   :  { %v5495_v0 = vpop.eup %5494  ;;  %5506 = vpow2.f32 %v5201_v7  ;;  %v1730_v44 = vadd.f32 %v1715_v14, %v1706_v53  ;;  %v1731_v57 = vadd.f32 %v1707_v15, %v7382_v47  ;;  %v1732_v18 = vadd.f32 %v1716_v45, %v1708_v35 }
 0x2a7   :  { %v5497_v60 = vpop.eup %5496  ;;  %v7391_v17 = vadd.f32 1.0, %v5495_v0  ;;  %v5203_v19 = vmul.f32 -1.442695, %v1729_v22  ;;  %v1720_v6 = vrot.slane %v7382_v47, 5  ;;  %v1733_v27 = vadd.f32 %v1717_v23, %v1709_v21 }
 0x2a8   :  { %v5499_v41 = vpop.eup %5498  ;;  %v7395_v30 = vadd.f32 1.0, %v5497_v60  ;;  %v1734_v8 = vadd.f32 %v1718_v61, %v1710_v37  ;;  %v1735_v15 = vadd.f32 %v1719_v33, %v1711_v52  ;;  %v5204_v7 = vmul.f32 -1.442695, %v1730_v44 }
 0x2a9   :  { %v5501_v1 = vpop.eup %5500  ;;  %v7398_v40 = vadd.f32 1.0, %v5499_v41  ;;  %5508 = vrcp.f32 %v7391_v17  ;;  %v5205_v47 = vmul.f32 -1.442695, %v1731_v57  ;;  %v5206_v21 = vmul.f32 -1.442695, %v1732_v18 }
 0x2aa   :  { %v5503_v16 = vpop.eup %5502  ;;  %v7402_v51 = vadd.f32 1.0, %v5501_v1  ;;  %5510 = vrcp.f32 %v7395_v30  ;;  %v1572_v14 = vand.u32 2147483648, %v7395_v30  ;;  %v1736_v0 = vadd.f32 %v1720_v6, %v1712_v31  ;;  %v7432_v1 = vld [vmem:[#allocation5 + $0x8] sm:$0x2]  ;;  %v7437_v18 = vld [vmem:[#allocation5 + $0x14] sm:$0x2] }
 0x2ab   :  { %v5505_v54 = vpop.eup %5504  ;;  %5512 = vrcp.f32 %v7398_v40  ;;  %v7408_v53 = vadd.f32 1.0, %v5503_v16  ;;  %v5207_v45 = vmul.f32 -1.442695, %v1733_v27  ;;  %v5208_v52 = vmul.f32 -1.442695, %v1734_v8 }
 0x2ac   :  { %5514 = vpow2.f32 %v5202_v26  ;;  %v7412_v55 = vadd.f32 1.0, %v5505_v54  ;;  %v5507_v35 = vpop.eup %5506  ;;  %v1587_v60 = vand.u32 2147483648, %v7398_v40  ;;  %v5209_v61 = vmul.f32 -1.442695, %v1735_v15 }
 0x2ad   :  { %5516 = vrcp.f32 %v7402_v51  ;;  %v7426_v26 = vadd.f32 1.0, %v5507_v35  ;;  %vm1566_vm13 = vweird.f32 %v7395_v30  ;;  %v7441_v6 = vor.u32 1.1754944e-38, %v1572_v14 }
 0x2ae   :  { %5518 = vpow2.f32 %v5203_v19  ;;  %vm1581_vm3 = vweird.f32 %v7398_v40  ;;  %v5210_v27 = vmul.f32 -1.442695, %v1736_v0  ;;  %v7444_v35 = vor.u32 1.1754944e-38, %v1587_v60 }
 0x2af   :  { %v7415_v37 = vpop.eup %5508  ;;  %5520 = vrcp.f32 %v7408_v53  ;;  %vm1596_vm8 = vweird.f32 %v7391_v17  ;;  %v1585_v63 = vand.u32 2147483647, %v7398_v40  ;;  %vm1611_vm14 = vweird.f32 %v7402_v51 }
 0x2b0   :  { %v7418_v22 = vpop.eup %5510  ;;  %v1592_v23 = vmul.f32 %v7415_v37, %v7391_v17  ;;  %5522 = vrcp.f32 %v7412_v55  ;;  %vm1597_vm6 = vweird.f32 %v7415_v37  ;;  %vm1626_vm11 = vweird.f32 %v7408_v53 }
 0x2b1   :  { %v7424_v41 = vpop.eup %5512  ;;  %v1562_v33 = vmul.f32 %v7418_v22, %v7395_v30  ;;  %5524 = vpow2.f32 %v5204_v7  ;;  %v7449_v7 = vld [vmem:[#allocation5 + $0x2c] sm:$0x2]  ;;  %vm1567_vm10 = vweird.f32 %v7418_v22  ;;  %vm7527_vm1 = vmor %vm1596_vm8, %vm1597_vm6  ;;  %vm1586_vm12 = vcmp.eq.f32.partialorder %v1585_v63, 8.507059e+37 }
 0x2b2   :  { %v5515_v44 = vpop.eup %5514  ;;  %v1577_v57 = vmul.f32 %v7424_v41, %v7398_v40  ;;  %v1593_v16 = vsub.f32 1.0, %v1592_v23  ;;  %5526 = vpow2.f32 %v5205_v47  ;;  %v7447_v23 = vld [vmem:[#allocation5 + $0x20] sm:$0x2]  ;;  %v7456_v47 = vld [vmem:[#allocation5 + $0x38] sm:$0x2]  ;;  %vm1582_vm7 = vweird.f32 %v7424_v41  ;;  %vm7497_vm9 = vmor %vm1566_vm13, %vm1567_vm10 }
 0x2b3   :  { %v7439_v19 = vpop.eup %5516  ;;  %v1563_v54 = vsub.f32 1.0, %v1562_v33  ;;  %5528 = vpow2.f32 %v5206_v21  ;;  %v7452_v33 = vadd.f32 1.0, %v5515_v44  ;;  %vm7511_vm15 = vmor %vm1581_vm3, %vm1582_vm7  ;;  %vm1641_vm10 = vweird.f32 %v7412_v55 }
 0x2b4   :  { %v5519_v8 = vpop.eup %5518  ;;  %v1578_v15 = vsub.f32 1.0, %v1577_v57  ;;  %5530 = vrcp.f32 %v7426_v26  ;;  %v1594_v57 = vmul.f32 %v7415_v37, %v1593_v16  ;;  %v1607_v39 = vmul.f32 %v7439_v19, %v7402_v51 }
 0x2b5   :  { %v1564_v14 = vmul.f32 %v7418_v22, %v1563_v54  ;;  %v7459_v60 = vpop.eup %5520  ;;  %5532 = vpow2.f32 %v5207_v45  ;;  %v7467_v54 = vadd.f32 1.0, %v5519_v8  ;;  %v1570_v16 = vand.u32 2147483647, %v7395_v30  ;;  %v7474_v45 = vld [vmem:[#allocation5 + $0x44] sm:$0x2] }
 0x2b6   :  { %v1579_v21 = vmul.f32 %v7424_v41, %v1578_v15  ;;  %v7465_v44 = vpop.eup %5522  ;;  %5534 = vpow2.f32 %v5208_v52  ;;  %v7478_v52 = vld [vmem:[#allocation5 + $0x5c] sm:$0x2]  ;;  %v1608_v2 = vsub.f32 1.0, %v1607_v39  ;;  %v1595_v50 = vadd.f32 %v7415_v37, %v1594_v57 }
 0x2b7   :  { %v5525_v0 = vpop.eup %5524  ;;  %5536 = vpow2.f32 %v5209_v61  ;;  %v1565_v8 = vadd.f32 %v7418_v22, %v1564_v14  ;;  %v1622_v43 = vmul.f32 %v7459_v60, %v7408_v53  ;;  %vm1571_vm2 = vcmp.eq.f32.partialorder %v1570_v16, 8.507059e+37 }
 0x2b8   :  { %v5527_v15 = vpop.eup %5526  ;;  %5538 = vpow2.f32 %v5210_v27  ;;  %v1580_v25 = vadd.f32 %v7424_v41, %v1579_v21  ;;  %v7491_v14 = vadd.f32 1.0, %v5525_v0  ;;  %v1600_v21 = vand.u32 2147483647, %v7391_v17 }
 0x2b9   :  { %v5529_v61 = vpop.eup %5528  ;;  %5540 = vrcp.f32 %v7452_v33  ;;  %v7502_v31 = vadd.f32 1.0, %v5527_v15  ;;  %v1569_v15 = vsel %vm7497_vm9, %v7418_v22, %v1565_v8  ;;  %v1599_v22 = vsel %vm7527_vm1, %v7415_v37, %v1595_v50 }
 0x2ba   :  { %v7486_v27 = vpop.eup %5530  ;;  %v7515_v48 = vadd.f32 1.0, %v5529_v61  ;;  %v1584_v0 = vsel %vm7511_vm15, %v7424_v41, %v1580_v25  ;;  %5542 = vrcp.f32 %v7467_v54  ;;  %v1609_v16 = vmul.f32 %v7439_v19, %v1608_v2 }
 0x2bb   :  { %v5533_v57 = vpop.eup %5532  ;;  %5544 = vrcp.f32 %v7491_v14  ;;  %vm7539_vm0 = vcmp.eq.f32.partialorder %v1600_v21, 8.507059e+37  ;;  %v1623_v61 = vsub.f32 1.0, %v1622_v43  ;;  %v7547_v63 = vsel %vm1571_vm2, %v7441_v6, %v1569_v15 }
 0x2bc   :  { %v5535_v49 = vpop.eup %5534  ;;  %v7536_v25 = vadd.f32 1.0, %v5533_v57  ;;  %5546 = vrcp.f32 %v7502_v31  ;;  %v7550_v50 = vsel %vm1586_vm12, %v7444_v35, %v1584_v0  ;;  %v11131_v21 = vand.u32 2147483648, %v7391_v17 }
 0x2bd   :  { %v5537_v38 = vpop.eup %5536  ;;  %v7543_v39 = vadd.f32 1.0, %v5535_v49  ;;  %5548 = vrcp.f32 %v7515_v48  ;;  %v1624_v49 = vmul.f32 %v7459_v60, %v1623_v61  ;;  %v1610_v30 = vadd.f32 %v7439_v19, %v1609_v16 }
 0x2be   :  { %v5539_v8 = vpop.eup %5538  ;;  %v7554_v37 = vadd.f32 1.0, %v5537_v38  ;;  %v1603_v57 = vor.u32 1.1754944e-38, %v11131_v21  ;;  %vm1612_vm5 = vweird.f32 %v7439_v19  ;;  %v1637_v6 = vmul.f32 %v7465_v44, %v7412_v55 }
 0x2bf   :  { %v7552_v2 = vpop.eup %5540  ;;  %v7560_v43 = vadd.f32 1.0, %v5539_v8  ;;  %5550 = vrcp.f32 %v7536_v25  ;;  %v1615_v17 = vand.u32 2147483647, %v7402_v51  ;;  %v1617_v0 = vand.u32 2147483648, %v7402_v51  ;;  %vm7582_vm4 = vmor %vm1611_vm14, %vm1612_vm5 }
 0x2c0   :  { %v7569_v38 = vsel %vm7539_vm0, %v1603_v57, %v1599_v22  ;;  %v7573_v35 = vpop.eup %5542  ;;  %5552 = vrcp.f32 %v7543_v39  ;;  %v1638_v15 = vsub.f32 1.0, %v1637_v6  ;;  %v1652_v40 = vmul.f32 %v7486_v27, %v7426_v26 }
 0x2c1   :  { %v7579_v16 = vpop.eup %5544  ;;  %5554 = vrcp.f32 %v7554_v37  ;;  %v1625_v8 = vadd.f32 %v7459_v60, %v1624_v49  ;;  %vm1627_vm13 = vweird.f32 %v7459_v60  ;;  %v1614_v51 = vsel %vm7582_vm4, %v7439_v19, %v1610_v30 }
 0x2c2   :  { %v7589_v41 = vpop.eup %5546  ;;  %5556 = vrcp.f32 %v7560_v43  ;;  %v1632_v61 = vand.u32 2147483648, %v7408_v53  ;;  %v1653_v21 = vsub.f32 1.0, %v1652_v40  ;;  %vm1616_vm3 = vcmp.eq.f32.partialorder %v1615_v17, 8.507059e+37  ;;  %vm7602_vm8 = vmor %vm1626_vm11, %vm1627_vm13 }
 0x2c3   :  { %v7596_v57 = vpop.eup %5548  ;;  %v1630_v49 = vand.u32 2147483647, %v7408_v53  ;;  %v1639_v6 = vmul.f32 %v7465_v44, %v1638_v15  ;;  %v1667_v4 = vmul.f32 %v7552_v2, %v7452_v33  ;;  %v1618_v32 = vor.u32 1.1754944e-38, %v1617_v0 }
 0x2c4   :  { %vm1642_vm7 = vweird.f32 %v7465_v44  ;;  %v1645_v19 = vand.u32 2147483647, %v7412_v55  ;;  %v1629_v53 = vsel %vm7602_vm8, %v7459_v60, %v1625_v8  ;;  %v1654_v17 = vmul.f32 %v7486_v27, %v1653_v21 }
 0x2c5   :  { %v7609_v30 = vpop.eup %5550  ;;  %v1668_v15 = vsub.f32 1.0, %v1667_v4  ;;  %v1770_v0 = vmul.f32 %v7573_v35, %v7467_v54  ;;  %v7619_v22 = vsel %vm1616_vm3, %v1618_v32, %v1614_v51  ;;  %v1633_v62 = vor.u32 1.1754944e-38, %v1632_v61  ;;  %vm7646_vm1 = vmor %vm1641_vm10, %vm1642_vm7 }
 0x2c6   :  { %v7617_v40 = vpop.eup %5552  ;;  %v1647_v36 = vand.u32 2147483648, %v7412_v55  ;;  %v1660_v42 = vand.u32 2147483647, %v7426_v26  ;;  %vm1631_vm6 = vcmp.eq.f32.partialorder %v1630_v49, 8.507059e+37  ;;  %v1640_v59 = vadd.f32 %v7465_v44, %v1639_v6 }
 0x2c7   :  { %v7623_v46 = vpop.eup %5554  ;;  %v1669_v60 = vmul.f32 %v7552_v2, %v1668_v15  ;;  %v1771_v4 = vsub.f32 1.0, %v1770_v0  ;;  %v7629_v21 = vsel %vm1631_vm6, %v1633_v62, %v1629_v53  ;;  %vm7631_vm9 = vcmp.eq.f32.partialorder %v1645_v19, 8.507059e+37 }
 0x2c8   :  { %v7627_v8 = vpop.eup %5556  ;;  %vm1656_vm15 = vweird.f32 %v7426_v26  ;;  %vm1657_vm2 = vweird.f32 %v7486_v27  ;;  %v1655_v51 = vadd.f32 %v7486_v27, %v1654_v17  ;;  %v1662_v61 = vand.u32 2147483648, %v7426_v26 }
 0x2c9   :  { %v1675_v49 = vand.u32 2147483647, %v7452_v33  ;;  %v1785_v6 = vmul.f32 %v7579_v16, %v7491_v14  ;;  %v1648_v19 = vor.u32 1.1754944e-38, %v1647_v36  ;;  %vm7650_vm12 = vcmp.eq.f32.partialorder %v1660_v42, 8.507059e+37  ;;  %vm7663_vm5 = vmor %vm1656_vm15, %vm1657_vm2 }
 0x2ca   :  { %vm1672_vm0 = vweird.f32 %v7552_v2  ;;  %v1677_v17 = vand.u32 2147483648, %v7452_v33  ;;  %v1644_v15 = vsel %vm7646_vm1, %v7465_v44, %v1640_v59  ;;  %v1670_v0 = vadd.f32 %v7552_v2, %v1669_v60 }
 0x2cb   :  { %v1772_v55 = vmul.f32 %v7573_v35, %v1771_v4  ;;  %v1786_v34 = vsub.f32 1.0, %v1785_v6  ;;  %vm1671_vm14 = vweird.f32 %v7452_v33  ;;  %v1778_v36 = vand.u32 2147483647, %v7467_v54 }
 0x2cc   :  { %v1780_v58 = vand.u32 2147483648, %v7467_v54  ;;  %v1800_v44 = vmul.f32 %v7589_v41, %v7502_v31  ;;  %v1659_v59 = vsel %vm7663_vm5, %v7486_v27, %v1655_v51  ;;  %v1663_v60 = vor.u32 1.1754944e-38, %v1662_v61  ;;  %vm7686_vm11 = vmor %vm1671_vm14, %vm1672_vm0 }
 0x2cd   :  { %vm7675_vm4 = vcmp.eq.f32.partialorder %v1675_v49, 8.507059e+37  ;;  %v1787_v4 = vmul.f32 %v7579_v16, %v1786_v34  ;;  %v7682_v33 = vsel %vm7631_vm9, %v1648_v19, %v1644_v15  ;;  %v1678_v62 = vor.u32 1.1754944e-38, %v1677_v17 }
 0x2ce   :  { %vm1774_vm13 = vweird.f32 %v7467_v54  ;;  %v1801_v27 = vsub.f32 1.0, %v1800_v44  ;;  %v1674_v51 = vsel %vm7686_vm11, %v7552_v2, %v1670_v0  ;;  %v1773_v34 = vadd.f32 %v7573_v35, %v1772_v55 }
 0x2cf   :  { %vm1775_vm3 = vweird.f32 %v7573_v35  ;;  %v1815_v32 = vmul.f32 %v7596_v57, %v7515_v48  ;;  %v7700_v61 = vsel %vm7650_vm12, %v1663_v60, %v1659_v59  ;;  %vm7702_vm8 = vcmp.eq.f32.partialorder %v1778_v36, 8.507059e+37 }
 0x2d0   :  { %v1781_v19 = vor.u32 1.1754944e-38, %v1780_v58  ;;  %v1793_v17 = vand.u32 2147483647, %v7491_v14  ;;  %v1788_v2 = vadd.f32 %v7579_v16, %v1787_v4  ;;  %vm1790_vm10 = vweird.f32 %v7579_v16  ;;  %vm7716_vm7 = vmor %vm1774_vm13, %vm1775_vm3 }
 0x2d1   :  { %v1802_v15 = vmul.f32 %v7589_v41, %v1801_v27  ;;  %v1816_v0 = vsub.f32 1.0, %v1815_v32  ;;  %v7712_v55 = vsel %vm7675_vm4, %v1678_v62, %v1674_v51  ;;  %vm1789_vm6 = vweird.f32 %v7491_v14 }
 0x2d2   :  { %v1795_v58 = vand.u32 2147483648, %v7491_v14  ;;  %v1830_v42 = vmul.f32 %v7609_v30, %v7536_v25  ;;  %v1777_v36 = vsel %vm7716_vm7, %v7573_v35, %v1773_v34  ;;  %v1808_v44 = vand.u32 2147483647, %v7502_v31  ;;  %vm7730_vm9 = vmor %vm1789_vm6, %vm1790_vm10 }
 0x2d3   :  { %v1810_v59 = vand.u32 2147483648, %v7502_v31  ;;  %v1817_v54 = vmul.f32 %v7596_v57, %v1816_v0  ;;  %vm7734_vm15 = vcmp.eq.f32.partialorder %v1793_v17, 8.507059e+37  ;;  %vm1804_vm2 = vweird.f32 %v7502_v31 }
 0x2d4   :  { %vm1805_vm1 = vweird.f32 %v7589_v41  ;;  %v1831_v14 = vsub.f32 1.0, %v1830_v42  ;;  %v1792_v35 = vsel %vm7730_vm9, %v7579_v16, %v1788_v2  ;;  %v1803_v4 = vadd.f32 %v7589_v41, %v1802_v15 }
 0x2d5   :  { %v1823_v6 = vand.u32 2147483647, %v7515_v48  ;;  %v1845_v62 = vmul.f32 %v7617_v40, %v7543_v39  ;;  %v7749_v27 = vsel %vm7702_vm8, %v1781_v19, %v1777_v36  ;;  %v1796_v51 = vor.u32 1.1754944e-38, %v1795_v58  ;;  %vm7767_vm14 = vmor %vm1804_vm2, %vm1805_vm1 }
 0x2d6   :  { %vm1819_vm12 = vweird.f32 %v7515_v48  ;;  %v1825_v34 = vand.u32 2147483648, %v7515_v48  ;;  %vm7753_vm0 = vcmp.eq.f32.partialorder %v1808_v44, 8.507059e+37  ;;  %v1811_v16 = vor.u32 1.1754944e-38, %v1810_v59 }
 0x2d7   :  { %v1818_v17 = vadd.f32 %v7596_v57, %v1817_v54  ;;  %vm1820_vm5 = vweird.f32 %v7596_v57  ;;  %v7761_v2 = vsel %vm7734_vm15, %v1796_v51, %v1792_v35  ;;  %v1832_v19 = vmul.f32 %v7609_v30, %v1831_v14 }
 0x2d8   :  { %v1840_v15 = vand.u32 2147483648, %v7536_v25  ;;  %v1860_v0 = vmul.f32 %v7623_v46, %v7554_v37  ;;  %v1807_v53 = vsel %vm7767_vm14, %v7589_v41, %v1803_v4  ;;  %vm7778_vm4 = vcmp.eq.f32.partialorder %v1823_v6, 8.507059e+37  ;;  %vm7785_vm11 = vmor %vm1819_vm12, %vm1820_vm5 }
 0x2d9   :  { %v1838_v31 = vand.u32 2147483647, %v7536_v25  ;;  %v1846_v42 = vsub.f32 1.0, %v1845_v62  ;;  %v1826_v44 = vor.u32 1.1754944e-38, %v1825_v34  ;;  %vm1834_vm13 = vweird.f32 %v7536_v25 }
 0x2da   :  { %vm1835_vm3 = vweird.f32 %v7609_v30  ;;  %v1861_v59 = vsub.f32 1.0, %v1860_v0  ;;  %v1822_v41 = vsel %vm7785_vm11, %v7596_v57, %v1818_v17  ;;  %v1853_v54 = vand.u32 2147483647, %v7543_v39 }
 0x2db   :  { %v1855_v60 = vand.u32 2147483648, %v7543_v39  ;;  %v1875_v48 = vmul.f32 %v7627_v8, %v7560_v43  ;;  %v7800_v26 = vsel %vm7753_vm0, %v1811_v16, %v1807_v53  ;;  %v1833_v14 = vadd.f32 %v7609_v30, %v1832_v19  ;;  %vm7826_vm9 = vmor %vm1834_vm13, %vm1835_vm3 }
 0x2dc   :  { %v1841_v35 = vor.u32 1.1754944e-38, %v1840_v15  ;;  %vm1849_vm8 = vweird.f32 %v7543_v39  ;;  %vm7804_vm10 = vcmp.eq.f32.partialorder %v1838_v31, 8.507059e+37  ;;  %v1847_v57 = vmul.f32 %v7617_v40, %v1846_v42 }
 0x2dd   :  { %vm1850_vm7 = vweird.f32 %v7617_v40  ;;  %v1862_v6 = vmul.f32 %v7623_v46, %v1861_v59  ;;  %v1876_v62 = vsub.f32 1.0, %v1875_v48  ;;  %v7813_v51 = vsel %vm7778_vm4, %v1826_v44, %v1822_v41 }
 0x2de   :  { %vm1864_vm6 = vweird.f32 %v7554_v37  ;;  %v11166_v34 = vrot.slane %v7373_v28, 6  ;;  %v11167_v16 = vrot.slane %v7373_v28, 7  ;;  %vm7830_vm15 = vcmp.eq.f32.partialorder %v1853_v54, 8.507059e+37  ;;  %vm7874_vm12 = vmor %vm1849_vm8, %vm1850_vm7 }
 0x2df   :  { %v1856_v15 = vor.u32 1.1754944e-38, %v1855_v60  ;;  %vm1865_vm2 = vweird.f32 %v7623_v46  ;;  %v1837_v25 = vsel %vm7826_vm9, %v7609_v30, %v1833_v14  ;;  %v1868_v0 = vand.u32 2147483647, %v7554_v37 }
 0x2e0   :  { %v1905_v32 = vmul.f32 %v11166_v34, %v7547_v63  ;;  %v1906_v17 = vmul.f32 %v11167_v16, %v7550_v50  ;;  %v1877_v63 = vmul.f32 %v7627_v8, %v1876_v62  ;;  %v1907_v50 = vmul.f32 %v7569_v38, %v7373_v28  ;;  %vm7889_vm5 = vmor %vm1864_vm6, %vm1865_vm2 }
 0x2e1   :  { %v11172_v53 = vrot.slane %v7373_v28, 1  ;;  %v11173_v31 = vrot.slane %v7373_v28, 2  ;;  %v1848_v36 = vadd.f32 %v7617_v40, %v1847_v57  ;;  %v1863_v44 = vadd.f32 %v7623_v46, %v1862_v6 }
 0x2e2   :  { %v1870_v38 = vand.u32 2147483648, %v7554_v37  ;;  %v11174_v59 = vrot.slane %v7373_v28, 3  ;;  %v11175_v41 = vrot.slane %v7373_v28, 4  ;;  %v11177_v48 = vunpack.c.l.bf16 %v7437_v18 }
 0x2e3   :  { %v1908_v58 = vmul.f32 %v11172_v53, %v7619_v22  ;;  %v1909_v42 = vmul.f32 %v11173_v31, %v7629_v21  ;;  %v11176_v22 = vunpack.c.l.bf16 %v7432_v1  ;;  %v11178_v14 = vunpack.c.l.bf16 %v7447_v23 }
 0x2e4   :  { %v1910_v30 = vmul.f32 %v11174_v59, %v7682_v33  ;;  %v1911_v54 = vmul.f32 %v11175_v41, %v7700_v61  ;;  %v1922_v21 = vadd.f32 %v11177_v48, %v1906_v17  ;;  %v1878_v6 = vadd.f32 %v7627_v8, %v1877_v63 }
 0x2e5   :  { %v1921_v60 = vadd.f32 %v11176_v22, %v1905_v32  ;;  %v1923_v57 = vadd.f32 %v11178_v14, %v1907_v50  ;;  %vm1880_vm1 = vweird.f32 %v7627_v8  ;;  %v11179_v33 = vrot.slane %v7373_v28, 5 }
 0x2e6   :  { %v11180_v34 = vunpack.c.l.bf16 %v7449_v7  ;;  %vm1879_vm0 = vweird.f32 %v7560_v43  ;;  %v1885_v18 = vand.u32 2147483648, %v7560_v43  ;;  %v11183_v23 = vunpack.c.l.bf16 %v7456_v47 }
 0x2e7   :  { %v1912_v62 = vmul.f32 %v11179_v33, %v7712_v55  ;;  %5558 = vtanh.f32 %v1921_v60  ;;  %v1852_v28 = vsel %vm7874_vm12, %v7617_v40, %v1848_v36  ;;  %v1883_v39 = vand.u32 2147483647, %v7560_v43  ;;  %vm7903_vm14 = vmor %vm1879_vm0, %vm1880_vm1 }
 0x2e8   :  { %v1924_v61 = vadd.f32 %v11180_v34, %v1908_v58  ;;  %v1925_v32 = vadd.f32 %v11183_v23, %v1909_v42  ;;  %v11186_v55 = vunpack.c.l.bf16 %v7474_v45  ;;  %5560 = vtanh.f32 %v1922_v21 }
 0x2e9   :  { %v1842_v47 = vsel %vm7804_vm10, %v1841_v35, %v1837_v25  ;;  %v1867_v40 = vsel %vm7889_vm5, %v7623_v46, %v1863_v44  ;;  %v11189_v17 = vunpack.c.l.bf16 %v7476_v3  ;;  %5562 = vtanh.f32 %v1923_v57 }
 0x2ea   :  { %v1926_v16 = vadd.f32 %v11186_v55, %v1910_v30  ;;  %v1871_v45 = vor.u32 1.1754944e-38, %v1870_v38  ;;  %v1882_v4 = vsel %vm7903_vm14, %v7627_v8, %v1878_v6  ;;  %v11190_v35 = vunpack.c.l.bf16 %v7478_v52 }
 0x2eb   :  { %v1927_v43 = vadd.f32 %v11189_v17, %v1911_v54  ;;  %5564 = vtanh.f32 %v1924_v61  ;;  %v1857_v46 = vsel %vm7830_vm15, %v1856_v15, %v1852_v28  ;;  %vm1869_vm4 = vcmp.eq.f32.partialorder %v1868_v0, 8.507059e+37 }
 0x2ec   :  { %v1928_v49 = vadd.f32 %v11190_v35, %v1912_v62  ;;  %v1886_v63 = vor.u32 1.1754944e-38, %v1885_v18  ;;  %5566 = vtanh.f32 %v1925_v32  ;;  %v1872_v50 = vsel %vm1869_vm4, %v1871_v45, %v1867_v40 }
 0x2ed   :  { %vm1884_vm11 = vcmp.eq.f32.partialorder %v1883_v39, 8.507059e+37  ;;  %5568 = vtanh.f32 %v1926_v16  ;;  %v1937_v3 = vsub.f32 1.0, %v7749_v27  ;;  %v5559_v25 = vpop.eup %5558  ;;  %v1938_v8 = vsub.f32 1.0, %v7761_v2 }
 0x2ee   :  { %v1887_v53 = vsel %vm1884_vm11, %v1886_v63, %v1882_v4  ;;  %5570 = vtanh.f32 %v1927_v43  ;;  %v1939_v52 = vsub.f32 1.0, %v7800_v26  ;;  %v5561_v58 = vpop.eup %5560  ;;  %v1940_v19 = vsub.f32 1.0, %v7813_v51 }
 0x2ef   :  { %5572 = vtanh.f32 %v1928_v49  ;;  %v1945_v15 = vmul.f32 %v5559_v25, %v1937_v3  ;;  %v11191_v0 = vrot.slane %v7345_v20, 6  ;;  %v5563_v42 = vpop.eup %5562  ;;  %v1941_v36 = vsub.f32 1.0, %v1842_v47 }
 0x2f0   :  { %v1942_v44 = vsub.f32 1.0, %v1857_v46  ;;  %v1946_v38 = vmul.f32 %v5561_v58, %v1938_v8  ;;  %v11192_v59 = vrot.slane %v7345_v20, 7  ;;  %v1943_v54 = vsub.f32 1.0, %v1872_v50  ;;  %v1990_v8 = vpop.permute.xlu1 %1989 }
 0x2f1   :  { %v1969_v31 = vmul.f32 %v11191_v0, %v7749_v27  ;;  %v5565_v41 = vpop.eup %5564  ;;  %v1944_v22 = vsub.f32 1.0, %v1887_v53  ;;  %v1947_v60 = vmul.f32 %v5563_v42, %v1939_v52  ;;  %v1971_v57 = vmul.f32 %v7800_v26, %v7345_v20 }
 0x2f2   :  { %v1970_v30 = vmul.f32 %v11192_v59, %v7761_v2  ;;  %v5567_v21 = vpop.eup %5566  ;;  %v1948_v14 = vmul.f32 %v5565_v41, %v1940_v19  ;;  %v11193_v27 = vrot.slane %v7345_v20, 1  ;;  %v11194_v61 = vrot.slane %v7345_v20, 2 }
 0x2f3   :  { %v1977_v48 = vadd.f32 %v1969_v31, %v1945_v15  ;;  %v5569_v62 = vpop.eup %5568  ;;  %v1949_v34 = vmul.f32 %v5567_v21, %v1941_v36  ;;  %v11195_v1 = vrot.slane %v7345_v20, 3  ;;  %v11196_v7 = vrot.slane %v7345_v20, 4  ;;  %v11209_v21 = vld [vmem:[#allocation30_spill] sm:$0xff] }
 0x2f4   :  { %v1972_v6 = vmul.f32 %v11193_v27, %v7813_v51  ;;  %v1978_v33 = vadd.f32 %v1970_v30, %v1946_v38  ;;  %v1973_v2 = vmul.f32 %v11194_v61, %v1842_v47  ;;  %v5571_v32 = vpop.eup %5570  ;;  %v1950_v28 = vmul.f32 %v5569_v62, %v1942_v44  ;;  %v11212_v27 = vld [vmem:[#allocation33_spill] sm:$0xff]  ;;  %v11215_v62 = vld [vmem:[#allocation36_spill] sm:$0xff] }
 0x2f5   :  { %v1974_v18 = vmul.f32 %v11195_v1, %v1857_v46  ;;  %v2000_v23 = vrot.slane %v1977_v48, 2  ;;  %v1975_v39 = vmul.f32 %v11196_v7, %v1872_v50  ;;  %v5573_v16 = vpop.eup %5572  ;;  %v1951_v40 = vmul.f32 %v5571_v32, %v1943_v54  ;;  %v11208_v48 = vld [vmem:[#allocation23_spill] sm:$0xff]  ;;  %v11217_v61 = vld [vmem:[#allocation32_spill] sm:$0xff]  ;;  %v11219_v1 = vld [vmem:[#allocation34_spill] sm:$0xff] }
 0x2f6   :  { %v1980_v26 = vadd.f32 %v1972_v6, %v1948_v14  ;;  %v2001_v55 = vrot.slane %v1978_v33, 1  ;;  %v11197_v51 = vrot.slane %v7345_v20, 5  ;;  %v1979_v17 = vadd.f32 %v1971_v57, %v1947_v60  ;;  %v11207_v60 = vld [vmem:[#allocation22_spill] sm:$0xff]  ;;  %v11210_v14 = vld [vmem:[#allocation25_spill] sm:$0xff]  ;;  %v11213_v6 = vld [vmem:[#allocation28_spill] sm:$0xff] }
 0x2f7   :  { %v1981_v43 = vadd.f32 %v1973_v2, %v1949_v34  ;;  %v1952_v45 = vmul.f32 %v5573_v16, %v1944_v22  ;;  %v1982_v47 = vadd.f32 %v1974_v18, %v1950_v28  ;;  %vm11198_vm13 = vcmask 1041409   ;;  %v11211_v57 = vld [vmem:[#allocation26_spill] sm:$0xff]  ;;  %v11214_v33 = vld [vmem:[#allocation29_spill] sm:$0xff]  ;;  %v11216_v34 = vld [vmem:[#allocation31_spill] sm:$0xff] }
 0x2f8   :  { %v1976_v37 = vmul.f32 %v11197_v51, %v1887_v53  ;;  %v2002_v4 = vsel %vm11198_vm13, %v2001_v55, %v2000_v23  ;;  %v2004_v35 = vrot.slane %v1980_v26, 7  ;;  %v1983_v49 = vadd.f32 %v1975_v39, %v1951_v40  ;;  %v11218_v2 = vld [vmem:[#allocation37_spill] sm:$0xff]  ;;  %v11220_v18 = vld [vmem:[#allocation35_spill] sm:$0xff]  ;;  %v2041_v23 = vld [vmem:[#allocation5] sm:$0x22] }
 0x2f9   :  { %vm11199_vm3 = vcmask 1042434   ;;  %v2006_v63 = vrot.slane %v1981_v43, 6  ;;  %vm11200_vm8 = vcmask 1043459   ;;  %v2008_v25 = vrot.slane %v1982_v47, 5  ;;  %v7975_v32 = vld [vmem:[#allocation5 + $0x24] sm:$0x22] }
 0x2fa   :  { %v2003_v46 = vsel %vm11199_vm3, %v1979_v17, %v2002_v4  ;;  %v1984_v3 = vadd.f32 %v1976_v37, %v1952_v45  ;;  %vm11201_vm10 = vcmask 1044484   ;;  %v2010_v58 = vrot.slane %v1983_v49, 4  ;;  %v2043_v28 = vld [vmem:[#allocation5 + $0xc] sm:$0x22]  ;;  %v2045_v7 = vld [vmem:[#allocation5 + $0x18] sm:$0x22] }
 0x2fb   :  { %v2005_v50 = vsel %vm11200_vm8, %v2004_v35, %v2003_v46  ;;  %vm1991_vm7 = vcmp.eq.s32.totalorder %v1990_v8, 1  ;;  %vm11202_vm6 = vcmask 1045509   ;;  %vm11203_vm9 = vcmask 1046534   ;;  %v7977_v39 = vld [vmem:[#allocation5 + $0x30] sm:$0x22] }
 0x2fc   :  { %v2007_v52 = vsel %vm11201_vm10, %v2006_v63, %v2005_v50  ;;  %v2012_v19 = vrot.slane %v1984_v3, 3  ;;  %vm11204_vm15 = vcmask 1047559   ;;  %v7979_v26 = vld [vmem:[#allocation5 + $0x3c] sm:$0x22]  ;;  %v7981_v55 = vld [vmem:[#allocation5 + $0x48] sm:$0x22]  ;;  %v2100_v40 = vunpack.c.l.bf16 %v7975_v32 }
 0x2fd   :  { %v2009_v53 = vsel %vm11202_vm6, %v2008_v25, %v2007_v52  ;;  %v7983_v16 = vld [vmem:[#allocation5 + $0x54] sm:$0x22]  ;;  %v2097_v51 = vunpack.c.l.bf16 %v2041_v23  ;;  %v2098_v37 = vunpack.c.l.bf16 %v2043_v28  ;;  %v2099_v17 = vunpack.c.l.bf16 %v2045_v7 }
 0x2fe   :  { %v2011_v15 = vsel %vm11203_vm9, %v2010_v58, %v2009_v53  ;;  %v2101_v43 = vunpack.c.l.bf16 %v7977_v39  ;;  %v2102_v47 = vunpack.c.l.bf16 %v7979_v26  ;;  %v2103_v4 = vunpack.c.l.bf16 %v7981_v55 }
 0x2ff   :  { %v2013_v0 = vsel %vm11204_vm15, %v2012_v19, %v2011_v15  ;;  %v2104_v35 = vunpack.c.l.bf16 %v7983_v16  ;;  %v2289_v49 = vrot.slane %v2041_v23, 4  ;;  %v2290_v23 = vrot.slane %v2043_v28, 4 }
 0x300   :  { %v2015_v31 = vsel %vm1991_vm7, %v2013_v0, 0.0  ;;  %v7947_v38 = vsel %vm1991_vm7, %v2013_v0, %v7345_v20  ;;  %v11206_v20 = vld [vmem:[#allocation27_spill] sm:$0xff] }
 0x301   :  { %v2017_v42 = vrot.slane %v2015_v31, 1  ;;  %v2018_v36 = vrot.slane %v2015_v31, 2  ;;  %v2019_v44 = vrot.slane %v2015_v31, 3  ;;  %2031 = vst [vmem:[#allocation10 + $0x2] sm:$0x1] %v2015_v31  ;;  %v2020_v59 = vrot.slane %v2015_v31, 4 }
 0x302   :  { %11205 = vst [vmem:[#allocation38_spill] sm:$0xff] %v7947_v38  ;;  %v2021_v30 = vrot.slane %v2015_v31, 5  ;;  %v2022_v41 = vrot.slane %v2015_v31, 6  ;;  %v2057_v54 = vpack.c.bf16 %v7947_v38, %v7947_v38  ;;  %v2023_v22 = vrot.slane %v2015_v31, 7 }
 0x303   :  { %2032 = vst [vmem:[#allocation10 + $0xa] sm:$0x1] %v2017_v42 }
 0x304   :  { %2033 = vst [vmem:[#allocation10 + $0x12] sm:$0x1] %v2018_v36  ;;  %2066 = vmatmul.bf16.vlgmr.msra.gmra.mxu1 %v2057_v54  ;;  %2079 = vmatmul.bf16.vlgmr.msra.gmra.mxu2 %v2057_v54 }
 0x305   :  { %2034 = vst [vmem:[#allocation10 + $0x1a] sm:$0x1] %v2019_v44  ;;  %2092 = vmatmul.bf16.vlgmr.msra.gmra.mxu3 %v2057_v54  ;;  %3284 = vmatpush.bf16.msra.mxu1 %v6120_v24 }
 0x306   :  { %2035 = vst [vmem:[#allocation10 + $0x22] sm:$0x1] %v2020_v59  ;;  %3858 = vmatpush.bf16.msra.mxu2 %v6102_v5  ;;  %3871 = vmatpush.bf16.msra.mxu3 %v6104_v9 }
 0x307   :  { %2036 = vst [vmem:[#allocation10 + $0x2a] sm:$0x1] %v2021_v30  ;;  %v2305_v30 = vunpack.c.l.bf16 %v2289_v49  ;;  %v2296_v49 = vrot.slane %v7983_v16, 4 }
 0x308   :  { %2037 = vst [vmem:[#allocation10 + $0x32] sm:$0x1] %v2022_v41 }
 0x309   :  { %2038 = vst [vmem:[#allocation10 + $0x3a] sm:$0x1] %v2023_v22  ;;  %3285 = vmatpush.bf16.msra.mxu1 %v6123_v29 }
 0x30a   :  { %3859 = vmatpush.bf16.msra.mxu2 %v6107_v12  ;;  %3872 = vmatpush.bf16.msra.mxu3 %v6111_v13 }
 0x30d   :  { %3286 = vmatpush.bf16.msra.mxu1 %v11105_v11 }
 0x30e   :  { %3860 = vmatpush.bf16.msra.mxu2 %v11106_v56  ;;  %3873 = vmatpush.bf16.msra.mxu3 %v11107_v10 }
 0x311   :  { %3287 = vmatpush.bf16.msra.mxu1 %v11206_v20 }
 0x312   :  { %3861 = vmatpush.bf16.msra.mxu2 %v11207_v60  ;;  %3874 = vmatpush.bf16.msra.mxu3 %v11208_v48 }
 0x315   :  { %3288 = vmatpush.bf16.msra.mxu1 %v11209_v21 }
 0x316   :  { %3862 = vmatpush.bf16.msra.mxu2 %v11210_v14  ;;  %3875 = vmatpush.bf16.msra.mxu3 %v11211_v57 }
 0x319   :  { %3289 = vmatpush.bf16.msra.mxu1 %v11212_v27 }
 0x31a   :  { %3863 = vmatpush.bf16.msra.mxu2 %v11213_v6  ;;  %3876 = vmatpush.bf16.msra.mxu3 %v11214_v33 }
 0x31d   :  { %3290 = vmatpush.bf16.msra.mxu1 %v11215_v62 }
 0x31e   :  { %3864 = vmatpush.bf16.msra.mxu2 %v11216_v34  ;;  %3877 = vmatpush.bf16.msra.mxu3 %v11217_v61 }
 0x321   :  { %3291 = vmatpush.bf16.msra.mxu1 %v11218_v2 }
 0x322   :  { %3865 = vmatpush.bf16.msra.mxu2 %v11219_v1  ;;  %3878 = vmatpush.bf16.msra.mxu3 %v11220_v18 }
 0x381   :  { %v2067_v45 = vpop.f32.mrf.mxu1 }
 0x382   :  { %v2106_v46 = vrot.slane %v2067_v45, 5  ;;  %v2107_v63 = vrot.slane %v2067_v45, 6  ;;  %v2108_v3 = vrot.slane %v2067_v45, 7  ;;  %v2109_v50 = vrot.slane %v2067_v45, 1 }
 0x383   :  { %v2110_v25 = vrot.slane %v2067_v45, 2  ;;  %v2111_v8 = vrot.slane %v2067_v45, 3  ;;  %v2112_v52 = vrot.slane %v2067_v45, 4  ;;  %v2124_v58 = vadd.f32 %v2100_v40, %v2067_v45 }
 0x384   :  { %v2121_v53 = vadd.f32 %v2106_v46, %v2097_v51  ;;  %v2122_v19 = vadd.f32 %v2107_v63, %v2098_v37  ;;  %v2123_v15 = vadd.f32 %v2108_v3, %v2099_v17  ;;  %v2125_v0 = vadd.f32 %v2109_v50, %v2101_v43 }
 0x385   :  { %v2126_v31 = vadd.f32 %v2110_v25, %v2102_v47  ;;  %v5215_v42 = vmul.f32 -1.442695, %v2124_v58  ;;  %v2127_v41 = vadd.f32 %v2111_v8, %v2103_v4  ;;  %v2128_v18 = vadd.f32 %v2112_v52, %v2104_v35 }
 0x386   :  { %v5212_v36 = vmul.f32 -1.442695, %v2121_v53  ;;  %v5213_v44 = vmul.f32 -1.442695, %v2122_v19  ;;  %v5214_v59 = vmul.f32 -1.442695, %v2123_v15  ;;  %v2306_v63 = vunpack.c.l.bf16 %v2290_v23 }
 0x387   :  { %5574 = vpow2.f32 %v5215_v42  ;;  %v5216_v54 = vmul.f32 -1.442695, %v2125_v0  ;;  %v7990_v22 = vpop.f32.mrf.mxu2  ;;  %v5217_v1 = vmul.f32 -1.442695, %v2126_v31  ;;  %v2291_v37 = vrot.slane %v2045_v7, 4 }
 0x388   :  { %5576 = vpow2.f32 %v5212_v36  ;;  %v2314_v40 = vrot.slane %v7990_v22, 5  ;;  %v7993_v51 = vpop.f32.mrf.mxu3  ;;  %v2292_v17 = vrot.slane %v7975_v32, 4  ;;  %v2293_v43 = vrot.slane %v7977_v39, 4 }
 0x389   :  { %11221 = vst [vmem:[#allocation39_spill] sm:$0xff] %v7993_v51  ;;  %5578 = vpow2.f32 %v5213_v44  ;;  %v2069_v45 = vpop.f32.mrf.mxu1  ;;  %v2294_v47 = vrot.slane %v7979_v26, 4  ;;  %v2295_v4 = vrot.slane %v7981_v55, 4  ;;  %v5218_v35 = vmul.f32 -1.442695, %v2127_v41 }
 0x38a   :  { %5580 = vpow2.f32 %v5214_v59  ;;  %v2329_v28 = vadd.f32 %v2314_v40, %v2305_v30  ;;  %v5219_v46 = vmul.f32 -1.442695, %v2128_v18  ;;  %v2315_v7 = vrot.slane %v7990_v22, 6 }
 0x38b   :  { %5582 = vpow2.f32 %v5216_v54  ;;  %v2307_v32 = vunpack.c.l.bf16 %v2291_v37  ;;  %v2308_v50 = vunpack.c.l.bf16 %v2292_v17  ;;  %v2316_v39 = vrot.slane %v7990_v22, 7 }
 0x38c   :  { %5584 = vpow2.f32 %v5217_v1  ;;  %v5220_v25 = vmul.f32 -1.442695, %v2329_v28  ;;  %v2309_v55 = vunpack.c.l.bf16 %v2293_v43  ;;  %v2310_v52 = vunpack.c.l.bf16 %v2294_v47 }
 0x38d   :  { %v5575_v3 = vpop.eup %5574  ;;  %v2311_v58 = vunpack.c.l.bf16 %v2295_v4  ;;  %5586 = vpow2.f32 %v5218_v35  ;;  %v2312_v1 = vunpack.c.l.bf16 %v2296_v49  ;;  %v2317_v18 = vrot.slane %v7990_v22, 1 }
 0x38e   :  { %v5577_v8 = vpop.eup %5576  ;;  %v8002_v26 = vadd.f32 1.0, %v5575_v3  ;;  %5588 = vpow2.f32 %v5219_v46  ;;  %v2318_v31 = vrot.slane %v7990_v22, 2  ;;  %v2330_v42 = vadd.f32 %v2315_v7, %v2306_v63 }
 0x38f   :  { %v5579_v53 = vpop.eup %5578  ;;  %v8004_v16 = vadd.f32 1.0, %v5577_v8  ;;  %v2082_v19 = vpop.f32.mrf.mxu2  ;;  %v2319_v30 = vrot.slane %v7990_v22, 3  ;;  %v2331_v41 = vadd.f32 %v2316_v39, %v2307_v32  ;;  %5590 = vpow2.f32 %v5220_v25 }
 0x390   :  { %v5581_v15 = vpop.eup %5580  ;;  %v8007_v0 = vadd.f32 1.0, %v5579_v53  ;;  %v2095_v36 = vpop.f32.mrf.mxu3  ;;  %5592 = vrcp.f32 %v8002_v26  ;;  %v2320_v40 = vrot.slane %v7990_v22, 4  ;;  %v2332_v37 = vadd.f32 %v2308_v50, %v7990_v22 }
 0x391   :  { %v5583_v44 = vpop.eup %5582  ;;  %v8010_v59 = vadd.f32 1.0, %v5581_v15  ;;  %5594 = vrcp.f32 %v8004_v16  ;;  %v2333_v43 = vadd.f32 %v2317_v18, %v2309_v55  ;;  %v2334_v45 = vadd.f32 %v2318_v31, %v2310_v52 }
 0x392   :  { %v5585_v54 = vpop.eup %5584  ;;  %v8013_v23 = vadd.f32 1.0, %v5583_v44  ;;  %5596 = vrcp.f32 %v8007_v0  ;;  %v5221_v47 = vmul.f32 -1.442695, %v2330_v42  ;;  %v2335_v28 = vadd.f32 %v2319_v30, %v2311_v58 }
 0x393   :  { %v8018_v17 = vadd.f32 1.0, %v5585_v54  ;;  %v5587_v4 = vpop.eup %5586  ;;  %5598 = vrcp.f32 %v8010_v59  ;;  %v5222_v35 = vmul.f32 -1.442695, %v2331_v41  ;;  %v2336_v46 = vadd.f32 %v2320_v40, %v2312_v1 }
 0x394   :  { %v5589_v49 = vpop.eup %5588  ;;  %5600 = vrcp.f32 %v8013_v23  ;;  %v5223_v63 = vmul.f32 -1.442695, %v2332_v37  ;;  %v5224_v7 = vmul.f32 -1.442695, %v2333_v43  ;;  %v5225_v32 = vmul.f32 -1.442695, %v2334_v45 }
 0x395   :  { %v5591_v22 = vpop.eup %5590  ;;  %5602 = vrcp.f32 %v8018_v17  ;;  %v5226_v39 = vmul.f32 -1.442695, %v2335_v28  ;;  %v5227_v8 = vmul.f32 -1.442695, %v2336_v46  ;;  %v8033_v52 = vadd.f32 1.0, %v5587_v4 }
 0x396   :  { %v8025_v3 = vpop.eup %5592  ;;  %5604 = vpow2.f32 %v5221_v47  ;;  %v8037_v53 = vadd.f32 1.0, %v5591_v22  ;;  %vm2166_vm2 = vweird.f32 %v8004_v16  ;;  %v2185_v54 = vand.u32 2147483647, %v8007_v0 }
 0x397   :  { %v8027_v50 = vpop.eup %5594  ;;  %5606 = vpow2.f32 %v5222_v35  ;;  %v8059_v35 = vadd.f32 1.0, %v5589_v49  ;;  %v2202_v44 = vand.u32 2147483648, %v8010_v59  ;;  %vm2181_vm12 = vweird.f32 %v8007_v0 }
 0x398   :  { %v8029_v25 = vpop.eup %5596  ;;  %5608 = vpow2.f32 %v5223_v63  ;;  %v2162_v1 = vmul.f32 %v8027_v50, %v8004_v16  ;;  %v2172_v63 = vand.u32 2147483648, %v8004_v16  ;;  %v2380_v49 = vand.u32 2147483648, %v8037_v53 }
 0x399   :  { %v8031_v55 = vpop.eup %5598  ;;  %5610 = vpow2.f32 %v5224_v7  ;;  %v2177_v30 = vmul.f32 %v8029_v25, %v8007_v0  ;;  %vm2167_vm1 = vweird.f32 %v8027_v50  ;;  %vm2182_vm0 = vweird.f32 %v8029_v25 }
 0x39a   :  { %v8035_v58 = vpop.eup %5600  ;;  %5612 = vpow2.f32 %v5225_v32  ;;  %v2163_v47 = vsub.f32 1.0, %v2162_v1  ;;  %v8116_v61 = vor.u32 1.1754944e-38, %v2202_v44  ;;  %vm2212_vm5 = vweird.f32 %v8025_v3  ;;  %vm8143_vm4 = vmor %vm2166_vm2, %vm2167_vm1 }
 0x39b   :  { %v8041_v18 = vpop.eup %5602  ;;  %5614 = vpow2.f32 %v5226_v39  ;;  %v2178_v32 = vsub.f32 1.0, %v2177_v30  ;;  %v2187_v39 = vand.u32 2147483648, %v8007_v0  ;;  %v2192_v30 = vmul.f32 %v8031_v55, %v8010_v59  ;;  %vm8195_vm10 = vmor %vm2181_vm12, %vm2182_vm0 }
 0x39c   :  { %v5605_v42 = vpop.eup %5604  ;;  %5616 = vpow2.f32 %v5227_v8  ;;  %v2215_v34 = vand.u32 2147483647, %v8002_v26  ;;  %vm2197_vm14 = vweird.f32 %v8031_v55  ;;  %vm2211_vm11 = vweird.f32 %v8002_v26 }
 0x39d   :  { %v5607_v41 = vpop.eup %5606  ;;  %5618 = vrcp.f32 %v8033_v52  ;;  %v8053_v37 = vadd.f32 1.0, %v5605_v42  ;;  %v2207_v42 = vmul.f32 %v8025_v3, %v8002_v26  ;;  %v2193_v31 = vsub.f32 1.0, %v2192_v30  ;;  %vm8242_vm2 = vmor %vm2211_vm11, %vm2212_vm5 }
 0x39e   :  { %v5609_v43 = vpop.eup %5608  ;;  %v8055_v45 = vadd.f32 1.0, %v5607_v41  ;;  %5620 = vrcp.f32 %v8037_v53  ;;  %v11224_v20 = vand.u32 2147483647, %v8004_v16  ;;  %vm8162_vm3 = vcmp.eq.f32.partialorder %v2185_v54, 8.507059e+37 }
 0x39f   :  { %v5611_v28 = vpop.eup %5610  ;;  %v8061_v46 = vadd.f32 1.0, %v5609_v43  ;;  %5622 = vrcp.f32 %v8053_v37  ;;  %v2208_v4 = vsub.f32 1.0, %v2207_v42  ;;  %v2194_v11 = vmul.f32 %v8031_v55, %v2193_v31 }
 0x3a0   :  { %v5613_v22 = vpop.eup %5612  ;;  %v8065_v7 = vadd.f32 1.0, %v5611_v28  ;;  %5624 = vrcp.f32 %v8055_v45  ;;  %v2164_v28 = vmul.f32 %v8027_v50, %v2163_v47  ;;  %v2179_v47 = vmul.f32 %v8029_v25, %v2178_v32 }
 0x3a1   :  { %v5615_v8 = vpop.eup %5614  ;;  %v8070_v1 = vadd.f32 1.0, %v5613_v22  ;;  %5626 = vrcp.f32 %v8061_v46  ;;  %v8109_v32 = vor.u32 1.1754944e-38, %v2187_v39  ;;  %v2395_v39 = vand.u32 2147483648, %v8053_v37 }
 0x3a2   :  { %v5617_v41 = vpop.eup %5616  ;;  %v8076_v43 = vadd.f32 1.0, %v5615_v8  ;;  %5628 = vrcp.f32 %v8065_v7  ;;  %v8092_v8 = vor.u32 1.1754944e-38, %v2172_v63  ;;  %v8107_v63 = vadd.f32 %v8027_v50, %v2164_v28 }
 0x3a3   :  { %v8082_v40 = vpop.eup %5618  ;;  %v8084_v22 = vadd.f32 1.0, %v5617_v41  ;;  %5630 = vrcp.f32 %v8070_v1  ;;  %v8098_v41 = vor.u32 1.1754944e-38, %v2380_v49  ;;  %v2410_v28 = vand.u32 2147483648, %v8055_v45 }
 0x3a4   :  { %v8089_v36 = vpop.eup %5620  ;;  %5632 = vrcp.f32 %v8059_v35  ;;  %v2425_v42 = vand.u32 2147483648, %v8061_v46  ;;  %v8126_v30 = vadd.f32 %v8029_v25, %v2179_v47  ;;  %v2440_v21 = vand.u32 2147483648, %v8065_v7 }
 0x3a5   :  { %v8096_v15 = vpop.eup %5622  ;;  %5634 = vrcp.f32 %v8076_v43  ;;  %v2370_v49 = vmul.f32 %v8089_v36, %v8037_v53  ;;  %v2455_v48 = vand.u32 2147483648, %v8070_v1  ;;  %v2169_v60 = vsel %vm8143_vm4, %v8027_v50, %v8107_v63 }
 0x3a6   :  { %v8104_v19 = vpop.eup %5624  ;;  %5636 = vrcp.f32 %v8084_v22  ;;  %v2385_v44 = vmul.f32 %v8096_v15, %v8053_v37  ;;  %vm8158_vm13 = vcmp.eq.f32.partialorder %v11224_v20, 8.507059e+37  ;;  %vm2196_vm8 = vweird.f32 %v8010_v59 }
 0x3a7   :  { %v8111_v2 = vpop.eup %5626  ;;  %v2400_v6 = vmul.f32 %v8104_v19, %v8055_v45  ;;  %v2371_v12 = vsub.f32 1.0, %v2370_v49  ;;  %v2470_v16 = vand.u32 2147483648, %v8076_v43  ;;  %v2209_v20 = vmul.f32 %v8025_v3, %v2208_v4  ;;  %vm8266_vm0 = vmor %vm2196_vm8, %vm2197_vm14 }
 0x3a8   :  { %v8120_v62 = vpop.eup %5628  ;;  %v2415_v27 = vmul.f32 %v8111_v2, %v8061_v46  ;;  %v8174_v63 = vor.u32 1.1754944e-38, %v2395_v39  ;;  %v8176_v54 = vor.u32 1.1754944e-38, %v2410_v28  ;;  %v8178_v47 = vor.u32 1.1754944e-38, %v2425_v42 }
 0x3a9   :  { %v8129_v33 = vpop.eup %5630  ;;  %v2430_v57 = vmul.f32 %v8120_v62, %v8065_v7  ;;  %v2386_v9 = vsub.f32 1.0, %v2385_v44  ;;  %v2401_v49 = vsub.f32 1.0, %v2400_v6  ;;  %v8184_v38 = vor.u32 1.1754944e-38, %v2440_v21 }
 0x3aa   :  { %v8148_v14 = vpop.eup %5632  ;;  %v2445_v50 = vmul.f32 %v8129_v33, %v8070_v1  ;;  %v2416_v5 = vsub.f32 1.0, %v2415_v27  ;;  %v8186_v51 = vor.u32 1.1754944e-38, %v2455_v48  ;;  %v2485_v39 = vand.u32 2147483648, %v8084_v22 }
 0x3ab   :  { %v8168_v13 = vpop.eup %5634  ;;  %v2431_v24 = vsub.f32 1.0, %v2430_v57  ;;  %v8200_v27 = vmul.f32 %v8089_v36, %v2371_v12  ;;  %v8202_v57 = vor.u32 1.1754944e-38, %v2470_v16  ;;  %v2184_v48 = vsel %vm8195_vm10, %v8029_v25, %v8126_v30 }
 0x3ac   :  { %v2460_v31 = vmul.f32 %v8168_v13, %v8076_v43  ;;  %v8182_v29 = vpop.eup %5636  ;;  %v2446_v21 = vsub.f32 1.0, %v2445_v50  ;;  %v11231_v6 = vand.u32 2147483647, %v8010_v59  ;;  %vm8214_vm6 = vcmp.eq.f32.partialorder %v2215_v34, 8.507059e+37 }
 0x3ad   :  { %v2475_v4 = vmul.f32 %v8182_v29, %v8084_v22  ;;  %v2195_v44 = vadd.f32 %v8031_v55, %v2194_v11  ;;  %v2210_v50 = vadd.f32 %v8025_v3, %v2209_v20  ;;  %v2222_v16 = vmul.f32 %v8035_v58, %v8013_v23 }
 0x3ae   :  { %vm8210_vm7 = vcmp.eq.f32.partialorder %v11231_v6, 8.507059e+37  ;;  %v2461_v12 = vsub.f32 1.0, %v2460_v31  ;;  %vm2226_vm9 = vweird.f32 %v8013_v23  ;;  %vm2375_vm15 = vweird.f32 %v8089_v36 }
 0x3af   :  { %v8225_v25 = vmul.f32 %v8096_v15, %v2386_v9  ;;  %v8228_v34 = vmul.f32 %v8104_v19, %v2401_v49  ;;  %v8231_v30 = vmul.f32 %v8111_v2, %v2416_v5  ;;  %v8234_v11 = vmul.f32 %v8120_v62, %v2431_v24 }
 0x3b0   :  { %v2476_v20 = vsub.f32 1.0, %v2475_v4  ;;  %v8236_v31 = vor.u32 1.1754944e-38, %v2485_v39  ;;  %v2217_v9 = vand.u32 2147483648, %v8002_v26  ;;  %v2223_v49 = vsub.f32 1.0, %v2222_v16 }
 0x3b1   :  { %vm2374_vm1 = vweird.f32 %v8037_v53  ;;  %vm2390_vm12 = vweird.f32 %v8096_v15  ;;  %v8250_v5 = vmul.f32 %v8129_v33, %v2446_v21  ;;  %v8255_v24 = vsel %vm8158_vm13, %v8092_v8, %v2169_v60 }
 0x3b2   :  { %v8260_v4 = vsel %vm8162_vm3, %v8109_v32, %v2184_v48  ;;  %v2237_v39 = vmul.f32 %v8041_v18, %v8018_v17  ;;  %v8273_v10 = vmul.f32 %v8168_v13, %v2461_v12  ;;  %v2199_v56 = vsel %vm8266_vm0, %v8031_v55, %v2195_v44 }
 0x3b3   :  { %v2214_v60 = vsel %vm8242_vm2, %v8025_v3, %v2210_v50  ;;  %v2224_v59 = vmul.f32 %v8035_v58, %v2223_v49  ;;  %vm2389_vm5 = vweird.f32 %v8053_v37  ;;  %vm2405_vm14 = vweird.f32 %v8104_v19 }
 0x3b4   :  { %v2230_v8 = vand.u32 2147483647, %v8013_v23  ;;  %v2232_v32 = vand.u32 2147483648, %v8013_v23  ;;  %v2238_v21 = vsub.f32 1.0, %v2237_v39  ;;  %v2252_v48 = vmul.f32 %v8082_v40, %v8033_v52  ;;  %vm8370_vm3 = vmor %vm2389_vm5, %vm2390_vm12 }
 0x3b5   :  { %v8289_v55 = vmul.f32 %v8182_v29, %v2476_v20  ;;  %v2218_v6 = vor.u32 1.1754944e-38, %v2217_v9  ;;  %v2225_v3 = vadd.f32 %v8035_v58, %v2224_v59  ;;  %vm2227_vm4 = vweird.f32 %v8035_v58 }
 0x3b6   :  { %vm2404_vm11 = vweird.f32 %v8055_v45  ;;  %v2239_v12 = vmul.f32 %v8041_v18, %v2238_v21  ;;  %v2245_v44 = vand.u32 2147483647, %v8018_v17  ;;  %v2247_v50 = vand.u32 2147483648, %v8018_v17  ;;  %vm8313_vm8 = vmor %vm2226_vm9, %vm2227_vm4 }
 0x3b7   :  { %v2253_v16 = vsub.f32 1.0, %v2252_v48  ;;  %v8301_v20 = vsel %vm8210_vm7, %v8116_v61, %v2199_v56  ;;  %v8305_v28 = vsel %vm8214_vm6, %v2218_v6, %v2214_v60  ;;  %v2260_v9 = vand.u32 2147483647, %v8033_v52  ;;  %vm8339_vm6 = vmor %vm2374_vm1, %vm2375_vm15 }
 0x3b8   :  { %v2267_v49 = vmul.f32 %v8148_v14, %v8059_v35  ;;  %vm8317_vm10 = vcmp.eq.f32.partialorder %v2230_v8, 8.507059e+37  ;;  %v2233_v42 = vor.u32 1.1754944e-38, %v2232_v32  ;;  %vm2241_vm7 = vweird.f32 %v8018_v17  ;;  %vm8400_vm5 = vmor %vm2404_vm11, %vm2405_vm14 }
 0x3b9   :  { %v2254_v0 = vmul.f32 %v8082_v40, %v2253_v16  ;;  %v2229_v39 = vsel %vm8313_vm8, %v8035_v58, %v2225_v3  ;;  %v2240_v23 = vadd.f32 %v8041_v18, %v2239_v12  ;;  %vm2242_vm9 = vweird.f32 %v8041_v18  ;;  %v2044_v58 = vld [vmem:[#allocation5 + $0x14] sm:$0x2] }
 0x3ba   :  { %v2268_v56 = vsub.f32 1.0, %v2267_v49  ;;  %vm8329_vm2 = vcmp.eq.f32.partialorder %v2245_v44, 8.507059e+37  ;;  %v2248_v59 = vor.u32 1.1754944e-38, %v2247_v50  ;;  %vm2256_vm0 = vweird.f32 %v8033_v52  ;;  %vm8358_vm15 = vmor %vm2241_vm7, %vm2242_vm9 }
 0x3bb   :  { %vm2257_vm4 = vweird.f32 %v8082_v40  ;;  %vm2434_vm8 = vweird.f32 %v8065_v7  ;;  %v2255_v8 = vadd.f32 %v8082_v40, %v2254_v0  ;;  %vm8346_vm13 = vcmp.eq.f32.partialorder %v2260_v9, 8.507059e+37 }
 0x3bc   :  { %v2262_v21 = vand.u32 2147483648, %v8033_v52  ;;  %v2269_v48 = vmul.f32 %v8148_v14, %v2268_v56  ;;  %v8354_v6 = vsel %vm8317_vm10, %v2233_v42, %v2229_v39  ;;  %vm2271_vm1 = vweird.f32 %v8059_v35  ;;  %vm8386_vm12 = vmor %vm2256_vm0, %vm2257_vm4 }
 0x3bd   :  { %v2275_v12 = vand.u32 2147483647, %v8059_v35  ;;  %v2373_v44 = vadd.f32 %v8089_v36, %v8200_v27  ;;  %vm2449_vm10 = vweird.f32 %v8070_v1  ;;  %v2244_v17 = vsel %vm8358_vm15, %v8041_v18, %v2240_v23 }
 0x3be   :  { %v2270_v16 = vadd.f32 %v8148_v14, %v2269_v48  ;;  %vm2272_vm7 = vweird.f32 %v8148_v14  ;;  %v2388_v27 = vadd.f32 %v8096_v15, %v8225_v25  ;;  %v2277_v49 = vand.u32 2147483648, %v8059_v35  ;;  %v2046_v48 = vld [vmem:[#allocation5 + $0x20] sm:$0x2] }
 0x3bf   :  { %v2378_v26 = vand.u32 2147483647, %v8037_v53  ;;  %v2403_v18 = vadd.f32 %v8104_v19, %v8228_v34  ;;  %v2418_v61 = vadd.f32 %v8111_v2, %v8231_v30  ;;  %v2259_v25 = vsel %vm8386_vm12, %v8082_v40, %v2255_v8  ;;  %vm8413_vm9 = vmor %vm2271_vm1, %vm2272_vm7 }
 0x3c0   :  { %v2263_v42 = vor.u32 1.1754944e-38, %v2262_v21  ;;  %v2393_v53 = vand.u32 2147483647, %v8053_v37  ;;  %v2408_v34 = vand.u32 2147483647, %v8055_v45  ;;  %v2249_v30 = vsel %vm8329_vm2, %v2248_v59, %v2244_v17 }
 0x3c1   :  { %vm8417_vm14 = vcmp.eq.f32.partialorder %v2275_v12, 8.507059e+37  ;;  %v2377_v40 = vsel %vm8339_vm6, %v8089_v36, %v2373_v44  ;;  %v2423_v37 = vand.u32 2147483647, %v8061_v46  ;;  %vm11262_vm11 = vweird.f32 %v8111_v2  ;;  %v11272_v12 = vld [vmem:[#allocation39_spill] sm:$0xff] }
 0x3c2   :  { %vm11263_vm2 = vweird.f32 %v8061_v46  ;;  %v2274_v35 = vsel %vm8413_vm9, %v8148_v14, %v2270_v16  ;;  %v2392_v23 = vsel %vm8370_vm3, %v8096_v15, %v2388_v27  ;;  %v2407_v36 = vsel %vm8400_vm5, %v8104_v19, %v2403_v18  ;;  %v2048_v44 = vld [vmem:[#allocation5 + $0x2c] sm:$0x2]  ;;  %v2052_v27 = vld [vmem:[#allocation5 + $0x44] sm:$0x2] }
 0x3c3   :  { %vm8429_vm0 = vmor %vm11263_vm2, %vm11262_vm11  ;;  %v8444_v56 = vadd.f32 %v8120_v62, %v8234_v11  ;;  %vm2465_vm6 = vweird.f32 %v8168_v13  ;;  %v2264_v46 = vsel %vm8346_vm13, %v2263_v42, %v2259_v25  ;;  %v2278_v60 = vor.u32 1.1754944e-38, %v2277_v49  ;;  %v2056_v42 = vld [vmem:[#allocation5 + $0x5c] sm:$0x2] }
 0x3c4   :  { %vm2379_vm4 = vcmp.eq.f32.partialorder %v2378_v26, 8.507059e+37  ;;  %v2422_v14 = vsel %vm8429_vm0, %v8111_v2, %v2418_v61  ;;  %vm2480_vm3 = vweird.f32 %v8182_v29  ;;  %vm2394_vm15 = vcmp.eq.f32.partialorder %v2393_v53, 8.507059e+37  ;;  %v2054_v61 = vld [vmem:[#allocation5 + $0x50] sm:$0x2] }
 0x3c5   :  { %v8454_v15 = vsel %vm2379_vm4, %v8098_v41, %v2377_v40  ;;  %vm2409_vm1 = vcmp.eq.f32.partialorder %v2408_v34, 8.507059e+37  ;;  %v8458_v19 = vadd.f32 %v8129_v33, %v8250_v5  ;;  %vm11266_vm7 = vweird.f32 %v8120_v62  ;;  %v2042_v5 = vld [vmem:[#allocation5 + $0x8] sm:$0x2] }
 0x3c6   :  { %vm8464_vm13 = vmor %vm2434_vm8, %vm11266_vm7  ;;  %vm2464_vm12 = vweird.f32 %v8076_v43  ;;  %v2279_v2 = vsel %vm8417_vm14, %v2278_v60, %v2274_v35  ;;  %v8472_v41 = vsel %vm2394_vm15, %v8174_v63, %v2392_v23  ;;  %v8475_v59 = vsel %vm2409_vm1, %v8176_v54, %v2407_v36 }
 0x3c7   :  { %vm2424_vm5 = vcmp.eq.f32.partialorder %v2423_v37, 8.507059e+37  ;;  %vm2479_vm9 = vweird.f32 %v8084_v22  ;;  %v2437_v32 = vsel %vm8464_vm13, %v8120_v62, %v8444_v56  ;;  %v2438_v21 = vand.u32 2147483647, %v8065_v7 }
 0x3c8   :  { %v8479_v8 = vsel %vm2424_vm5, %v8178_v47, %v2422_v14  ;;  %v2453_v63 = vand.u32 2147483647, %v8070_v1  ;;  %vm11269_vm8 = vweird.f32 %v8129_v33  ;;  %v2463_v47 = vadd.f32 %v8168_v13, %v8273_v10  ;;  %v2050_v10 = vld [vmem:[#allocation5 + $0x38] sm:$0x2]  ;;  %vm8530_vm11 = vmor %vm2479_vm9, %vm2480_vm3 }
 0x3c9   :  { %vm8491_vm14 = vmor %vm2449_vm10, %vm11269_vm8  ;;  %v2468_v3 = vand.u32 2147483647, %v8076_v43  ;;  %v2490_v62 = vrot.slane %v11272_v12, 5  ;;  %v2491_v7 = vrot.slane %v11272_v12, 6  ;;  %v2478_v50 = vadd.f32 %v8182_v29, %v8289_v55 }
 0x3ca   :  { %v2452_v1 = vsel %vm8491_vm14, %v8129_v33, %v8458_v19  ;;  %v2483_v17 = vand.u32 2147483647, %v8084_v22  ;;  %v2492_v16 = vrot.slane %v11272_v12, 7  ;;  %v2493_v9 = vrot.slane %v11272_v12, 1  ;;  %vm8522_vm10 = vmor %vm2464_vm12, %vm2465_vm6 }
 0x3cb   :  { %v2494_v49 = vrot.slane %v11272_v12, 2  ;;  %v2505_v26 = vmul.f32 %v2490_v62, %v8255_v24  ;;  %v2506_v18 = vmul.f32 %v2491_v7, %v8260_v4  ;;  %v2495_v33 = vrot.slane %v11272_v12, 3 }
 0x3cc   :  { %v2496_v52 = vrot.slane %v11272_v12, 4  ;;  %v2507_v55 = vmul.f32 %v2492_v16, %v8301_v20  ;;  %v2508_v25 = vmul.f32 %v8305_v28, %v11272_v12  ;;  %v2509_v53 = vmul.f32 %v2493_v9, %v8354_v6 }
 0x3cd   :  { %v2510_v34 = vmul.f32 %v2494_v49, %v2249_v30  ;;  %v2513_v0 = vunpack.c.l.bf16 %v2042_v5  ;;  %v2514_v39 = vunpack.c.l.bf16 %v2044_v58  ;;  %v2515_v40 = vunpack.c.l.bf16 %v2046_v48 }
 0x3ce   :  { %v2516_v24 = vunpack.c.l.bf16 %v2048_v44  ;;  %v2517_v37 = vunpack.c.l.bf16 %v2050_v10  ;;  %v2518_v4 = vunpack.c.l.bf16 %v2052_v27  ;;  %v2511_v45 = vmul.f32 %v2495_v33, %v2264_v46 }
 0x3cf   :  { %v2519_v35 = vunpack.c.l.bf16 %v2054_v61  ;;  %v2521_v23 = vadd.f32 %v2513_v0, %v2505_v26  ;;  %v2522_v36 = vadd.f32 %v2514_v39, %v2506_v18  ;;  %v2512_v28 = vmul.f32 %v2496_v52, %v2279_v2 }
 0x3d0   :  { %v2520_v6 = vunpack.c.l.bf16 %v2056_v42  ;;  %v2523_v30 = vadd.f32 %v2515_v40, %v2507_v55  ;;  %v2524_v56 = vadd.f32 %v2516_v24, %v2508_v25  ;;  %vm2439_vm2 = vcmp.eq.f32.partialorder %v2438_v21, 8.507059e+37 }
 0x3d1   :  { %vm2454_vm0 = vcmp.eq.f32.partialorder %v2453_v63, 8.507059e+37  ;;  %v2525_v60 = vadd.f32 %v2517_v37, %v2509_v53  ;;  %5638 = vtanh.f32 %v2521_v23  ;;  %v2467_v43 = vsel %vm8522_vm10, %v8168_v13, %v2463_v47  ;;  %v11277_v47 = vld [vmem:[#allocation38_spill] sm:$0xff] }
 0x3d2   :  { %v2482_v14 = vsel %vm8530_vm11, %v8182_v29, %v2478_v50  ;;  %v2526_v19 = vadd.f32 %v2518_v4, %v2510_v34  ;;  %5640 = vtanh.f32 %v2522_v36  ;;  %v2442_v22 = vsel %vm2439_vm2, %v8184_v38, %v2437_v32 }
 0x3d3   :  { %v2457_v11 = vsel %vm2454_vm0, %v8186_v51, %v2452_v1  ;;  %v2527_v2 = vadd.f32 %v2519_v35, %v2511_v45  ;;  %5642 = vtanh.f32 %v2523_v30  ;;  %vm2469_vm6 = vcmp.eq.f32.partialorder %v2468_v3, 8.507059e+37 }
 0x3d4   :  { %vm2484_vm4 = vcmp.eq.f32.partialorder %v2483_v17, 8.507059e+37  ;;  %v2528_v5 = vadd.f32 %v2520_v6, %v2512_v28  ;;  %5644 = vtanh.f32 %v2524_v56  ;;  %v2472_v58 = vsel %vm2469_vm6, %v8202_v57, %v2467_v43  ;;  %v5976_v57 = vld [vmem:[%s10880_s3] sm:$0xff] }
 0x3d5   :  { %v2487_v13 = vsel %vm2484_vm4, %v8236_v31, %v2482_v14  ;;  %5646 = vtanh.f32 %v2525_v60  ;;  %v2537_v21 = vsub.f32 1.0, %v8454_v15  ;;  %v2538_v29 = vsub.f32 1.0, %v8472_v41 }
 0x3d6   :  { %5648 = vtanh.f32 %v2526_v19  ;;  %v2539_v38 = vsub.f32 1.0, %v8475_v59  ;;  %v2540_v51 = vsub.f32 1.0, %v8479_v8  ;;  %v2541_v63 = vsub.f32 1.0, %v2442_v22 }
 0x3d7   :  { %v5639_v32 = vpop.eup %5638  ;;  %5650 = vtanh.f32 %v2527_v2  ;;  %v2542_v54 = vsub.f32 1.0, %v2457_v11  ;;  %vm5245_vm3 = vcmp.gt.s32.totalorder %v5976_v57, 4  ;;  %v11278_v3 = vrot.slane %v11277_v47, 5 }
 0x3d8   :  { %v5641_v31 = vpop.eup %5640  ;;  %5652 = vtanh.f32 %v2528_v5  ;;  %v2545_v48 = vmul.f32 %v5639_v32, %v2537_v21  ;;  %v11279_v62 = vmov 0   ;;  %v2543_v1 = vsub.f32 1.0, %v2472_v58  ;;  %v2590_v21 = vpop.permute.xlu1 %2589 }
 0x3d9   :  { %v2569_v12 = vmul.f32 %v11278_v3, %v8454_v15  ;;  %v3187_v7 = vsel %vm5245_vm3, 1, %v11279_v62  ;;  %v5643_v44 = vpop.eup %5642  ;;  %v2544_v50 = vsub.f32 1.0, %v2487_v13  ;;  %v2546_v17 = vmul.f32 %v5641_v31, %v2538_v29 }
 0x3da   :  { %v11280_v16 = vrot.slane %v11277_v47, 6  ;;  %3189 = vperm.xlu2 %5333, %v3187_v7   ;;  %v5645_v27 = vpop.eup %5644  ;;  %v2547_v9 = vmul.f32 %v5643_v44, %v2539_v38  ;;  %v11281_v49 = vrot.slane %v11277_v47, 7  ;;  %v2572_v15 = vmul.f32 %v8479_v8, %v11277_v47  ;;  %v11293_v7 = vld [vmem:[#allocation20_spill] sm:$0xff]  ;;  %v11295_v44 = vld [vmem:[#allocation15_spill] sm:$0xff] }
 0x3db   :  { %v2577_v18 = vadd.f32 %v2569_v12, %v2545_v48  ;;  %v5647_v61 = vpop.eup %5646  ;;  %v2548_v33 = vmul.f32 %v5645_v27, %v2540_v51  ;;  %v11282_v52 = vrot.slane %v11277_v47, 1  ;;  %vm5262_vm15 = vcmp.gt.s32.totalorder %v5976_v57, 5  ;;  %v11301_v27 = vld [vmem:[#allocation19_spill] sm:$0xff] }
 0x3dc   :  { %v2570_v10 = vmul.f32 %v11280_v16, %v8472_v41  ;;  %v2571_v26 = vmul.f32 %v11281_v49, %v8475_v59  ;;  %v5649_v42 = vpop.eup %5648  ;;  %v2549_v41 = vmul.f32 %v5647_v61, %v2541_v63  ;;  %v11283_v53 = vrot.slane %v11277_v47, 2  ;;  %v11299_v16 = vld [vmem:[#allocation24_spill] sm:$0xff]  ;;  %v11303_v49 = vld [vmem:[#allocation22_spill] sm:$0xff] }
 0x3dd   :  { %v2573_v55 = vmul.f32 %v11282_v52, %v2442_v22  ;;  %v2600_v39 = vrot.slane %v2577_v18, 3  ;;  %v5651_v40 = vpop.eup %5650  ;;  %v2550_v59 = vmul.f32 %v5649_v42, %v2542_v54  ;;  %v11284_v24 = vrot.slane %v11277_v47, 3  ;;  %v11306_v18 = vld [vmem:[#allocation25_spill] sm:$0xff]  ;;  %v11307_v61 = vld [vmem:[#allocation26_spill] sm:$0xff]  ;;  %v11309_v52 = vld [vmem:[#allocation28_spill] sm:$0xff] }
 0x3de   :  { %v2578_v25 = vadd.f32 %v2570_v10, %v2546_v17  ;;  %v2574_v34 = vmul.f32 %v11283_v53, %v2457_v11  ;;  %v2579_v0 = vadd.f32 %v2571_v26, %v2547_v9  ;;  %v11285_v37 = vrot.slane %v11277_v47, 4  ;;  %v5653_v35 = vpop.eup %5652  ;;  %v11298_v17 = vld [vmem:[#allocation17_spill] sm:$0xff]  ;;  %v11300_v10 = vld [vmem:[#allocation18_spill] sm:$0xff]  ;;  %v11302_v9 = vld [vmem:[#allocation27_spill] sm:$0xff] }
 0x3df   :  { %v2575_v8 = vmul.f32 %v11284_v24, %v2472_v58  ;;  %v2551_v23 = vmul.f32 %v5651_v40, %v2543_v1  ;;  %v2581_v36 = vadd.f32 %v2573_v55, %v2549_v41  ;;  %v3787_v28 = vsel %vm5262_vm15, 1, %v11279_v62  ;;  %v11296_v1 = vld [vmem:[#allocation21_spill] sm:$0xff]  ;;  %v11304_v26 = vld [vmem:[#allocation23_spill] sm:$0xff]  ;;  %v11313_v41 = vld [vmem:[#allocation32_spill] sm:$0xff] }
 0x3e0   :  { %v2576_v4 = vmul.f32 %v11285_v37, %v2487_v13  ;;  %v2601_v45 = vrot.slane %v2578_v25, 2  ;;  %v2603_v20 = vrot.slane %v2579_v0, 1  ;;  %v2552_v6 = vmul.f32 %v5653_v35, %v2544_v50  ;;  %v11297_v50 = vld [vmem:[#allocation16_spill] sm:$0xff]  ;;  %v11310_v55 = vld [vmem:[#allocation29_spill] sm:$0xff]  ;;  %v11312_v42 = vld [vmem:[#allocation31_spill] sm:$0xff] }
 0x3e1   :  { %v2580_v30 = vadd.f32 %v2572_v15, %v2548_v33  ;;  %v2582_v56 = vadd.f32 %v2574_v34, %v2550_v59  ;;  %vm11286_vm1 = vcmask 1041409   ;;  %v2583_v60 = vadd.f32 %v2575_v8, %v2551_v23  ;;  %v11305_v15 = vld [vmem:[#allocation30_spill] sm:$0xff]  ;;  %v11308_v33 = vld [vmem:[#allocation33_spill] sm:$0xff]  ;;  %v11311_v25 = vld [vmem:[#allocation36_spill] sm:$0xff] }
 0x3e2   :  { %v2602_v46 = vsel %vm11286_vm1, %v2601_v45, %v2600_v39  ;;  %vm11287_vm7 = vcmask 1042434   ;;  %v2606_v14 = vrot.slane %v2581_v36, 7  ;;  %v2584_v19 = vadd.f32 %v2576_v4, %v2552_v6  ;;  %3789 = vperm.xlu2 %5333, %v3787_v28   ;;  %v11314_v53 = vld [vmem:[#allocation37_spill] sm:$0xff]  ;;  %v11315_v34 = vld [vmem:[#allocation34_spill] sm:$0xff]  ;;  %v11316_v0 = vld [vmem:[#allocation35_spill] sm:$0xff] }
 0x3e3   :  { %v2604_v43 = vsel %vm11287_vm7, %v2603_v20, %v2602_v46  ;;  %vm11288_vm13 = vcmask 1043459   ;;  %v2608_v11 = vrot.slane %v2582_v56, 6  ;;  %vm11289_vm12 = vcmask 1044484   ;;  %v2641_v39 = vld [vmem:[#allocation5] sm:$0x44] }
 0x3e4   :  { %v2605_v22 = vsel %vm11288_vm13, %v2580_v30, %v2604_v43  ;;  %v2610_v5 = vrot.slane %v2583_v60, 5  ;;  %vm11290_vm5 = vcmask 1045509   ;;  %v2612_v13 = vrot.slane %v2584_v19, 4  ;;  %v2643_v40 = vld [vmem:[#allocation5 + $0xc] sm:$0x44] }
 0x3e5   :  { %v2607_v2 = vsel %vm11289_vm12, %v2606_v14, %v2605_v22  ;;  %vm11291_vm9 = vcmask 1046534   ;;  %vm2591_vm8 = vcmp.eq.s32.totalorder %v2590_v21, 1  ;;  %vm11292_vm14 = vcmask 1047559   ;;  %v2645_v59 = vld [vmem:[#allocation5 + $0x18] sm:$0x44] }
 0x3e6   :  { %v2609_v58 = vsel %vm11290_vm5, %v2608_v11, %v2607_v2  ;;  %v2647_v24 = vld [vmem:[#allocation5 + $0x24] sm:$0x44]  ;;  %v8610_v4 = vld [vmem:[#allocation5 + $0x30] sm:$0x44]  ;;  %v2651_v20 = vld [vmem:[#allocation5 + $0x3c] sm:$0x44]  ;;  %v2697_v30 = vunpack.c.l.bf16 %v2641_v39  ;;  %v2698_v56 = vunpack.c.l.bf16 %v2643_v40  ;;  %v2699_v46 = vunpack.c.l.bf16 %v2645_v59 }
 0x3e7   :  { %v2611_v29 = vsel %vm11291_vm9, %v2610_v5, %v2609_v58  ;;  %v2653_v28 = vld [vmem:[#allocation5 + $0x48] sm:$0x44]  ;;  %v8616_v6 = vld [vmem:[#allocation5 + $0x54] sm:$0x44]  ;;  %v2700_v60 = vunpack.c.l.bf16 %v2647_v24  ;;  %v2701_v43 = vunpack.c.l.bf16 %v8610_v4  ;;  %v2702_v14 = vunpack.c.l.bf16 %v2651_v20 }
 0x3e8   :  { %v2613_v38 = vsel %vm11292_vm14, %v2612_v13, %v2611_v29  ;;  %v2703_v19 = vunpack.c.l.bf16 %v2653_v28  ;;  %v2704_v22 = vunpack.c.l.bf16 %v8616_v6  ;;  %v2889_v11 = vrot.slane %v2641_v39, 4 }
 0x3e9   :  { %v2615_v51 = vsel %vm2591_vm8, %v2613_v38, 0.0  ;;  %v8580_v32 = vsel %vm2591_vm8, %v2613_v38, %v11277_v47  ;;  %v11294_v47 = vld [vmem:[#allocation14_spill] sm:$0xff]  ;;  %v2890_v2 = vrot.slane %v2643_v40, 4  ;;  %v2891_v5 = vrot.slane %v2645_v59, 4 }
 0x3ea   :  { %v2617_v63 = vrot.slane %v2615_v51, 1  ;;  %v2618_v54 = vrot.slane %v2615_v51, 2  ;;  %v2619_v57 = vrot.slane %v2615_v51, 3  ;;  %2631 = vst [vmem:[#allocation10 + $0x3] sm:$0x1] %v2615_v51  ;;  %v2620_v31 = vrot.slane %v2615_v51, 4 }
 0x3eb   :  { %v2657_v48 = vpack.c.bf16 %v8580_v32, %v8580_v32  ;;  %v2621_v3 = vrot.slane %v2615_v51, 5  ;;  %v2622_v12 = vrot.slane %v2615_v51, 6  ;;  %v2623_v62 = vrot.slane %v2615_v51, 7 }
 0x3ec   :  { %2632 = vst [vmem:[#allocation10 + $0xb] sm:$0x1] %v2617_v63  ;;  %v3154_v8 = vrot.slane %v8580_v32, 4  ;;  %v3155_v37 = vrot.slane %v8580_v32, 5  ;;  %v3156_v45 = vrot.slane %v8580_v32, 6  ;;  %v3157_v35 = vrot.slane %v8580_v32, 7 }
 0x3ed   :  { %2633 = vst [vmem:[#allocation10 + $0x13] sm:$0x1] %v2618_v54  ;;  %2666 = vmatmul.bf16.vlgmr.msrb.gmra.mxu0 %v2657_v48  ;;  %2679 = vmatmul.bf16.vlgmr.msrb.gmra.mxu1 %v2657_v48  ;;  %v2893_v58 = vrot.slane %v8610_v4, 4  ;;  %v2892_v29 = vrot.slane %v2647_v24, 4  ;;  %v2894_v38 = vrot.slane %v2651_v20, 4  ;;  %v2895_v51 = vrot.slane %v2653_v28, 4 }
 0x3ee   :  { %2634 = vst [vmem:[#allocation10 + $0x1b] sm:$0x1] %v2619_v57  ;;  %2692 = vmatmul.bf16.vlgmr.msrb.gmra.mxu2 %v2657_v48  ;;  %3884 = vmatpush.bf16.msrb.mxu0 %v11293_v7  ;;  %v2896_v63 = vrot.slane %v8616_v6, 4 }
 0x3ef   :  { %2635 = vst [vmem:[#allocation10 + $0x23] sm:$0x1] %v2620_v31  ;;  %4458 = vmatpush.bf16.msrb.mxu1 %v11294_v47  ;;  %4471 = vmatpush.bf16.msrb.mxu2 %v11295_v44  ;;  %v2908_v40 = vunpack.c.l.bf16 %v2892_v29 }
 0x3f0   :  { %2636 = vst [vmem:[#allocation10 + $0x2b] sm:$0x1] %v2621_v3 }
 0x3f1   :  { %2637 = vst [vmem:[#allocation10 + $0x33] sm:$0x1] %v2622_v12 }
 0x3f2   :  { %2638 = vst [vmem:[#allocation10 + $0x3b] sm:$0x1] %v2623_v62  ;;  %3885 = vmatpush.bf16.msrb.mxu0 %v11296_v1 }
 0x3f3   :  { %4459 = vmatpush.bf16.msrb.mxu1 %v11297_v50  ;;  %4472 = vmatpush.bf16.msrb.mxu2 %v11298_v17 }
 0x3f6   :  { %3886 = vmatpush.bf16.msrb.mxu0 %v11299_v16 }
 0x3f7   :  { %4460 = vmatpush.bf16.msrb.mxu1 %v11300_v10  ;;  %4473 = vmatpush.bf16.msrb.mxu2 %v11301_v27 }
 0x3fa   :  { %3887 = vmatpush.bf16.msrb.mxu0 %v11302_v9 }
 0x3fb   :  { %4461 = vmatpush.bf16.msrb.mxu1 %v11303_v49  ;;  %4474 = vmatpush.bf16.msrb.mxu2 %v11304_v26 }
 0x3fe   :  { %3888 = vmatpush.bf16.msrb.mxu0 %v11305_v15 }
 0x3ff   :  { %4462 = vmatpush.bf16.msrb.mxu1 %v11306_v18  ;;  %4475 = vmatpush.bf16.msrb.mxu2 %v11307_v61 }
 0x402   :  { %3889 = vmatpush.bf16.msrb.mxu0 %v11308_v33 }
 0x403   :  { %4463 = vmatpush.bf16.msrb.mxu1 %v11309_v52  ;;  %4476 = vmatpush.bf16.msrb.mxu2 %v11310_v55 }
 0x406   :  { %3890 = vmatpush.bf16.msrb.mxu0 %v11311_v25 }
 0x407   :  { %4464 = vmatpush.bf16.msrb.mxu1 %v11312_v42  ;;  %4477 = vmatpush.bf16.msrb.mxu2 %v11313_v41  ;;  %v2905_v42 = vunpack.c.l.bf16 %v2889_v11 }
 0x40a   :  { %3891 = vmatpush.bf16.msrb.mxu0 %v11314_v53 }
 0x40b   :  { %4465 = vmatpush.bf16.msrb.mxu1 %v11315_v34  ;;  %4478 = vmatpush.bf16.msrb.mxu2 %v11316_v0  ;;  %v2906_v34 = vunpack.c.l.bf16 %v2890_v2  ;;  %v2907_v0 = vunpack.c.l.bf16 %v2891_v5 }
 0x46a   :  { %v2667_v13 = vpop.f32.mrf.mxu0  ;;  %v8621_v21 = vpop.f32.mrf.mxu1 }
 0x46b   :  { %v2706_v54 = vrot.slane %v2667_v13, 4  ;;  %v2707_v57 = vrot.slane %v2667_v13, 5  ;;  %v2708_v31 = vrot.slane %v2667_v13, 6  ;;  %v2709_v48 = vrot.slane %v2667_v13, 7 }
 0x46c   :  { %v2710_v3 = vrot.slane %v2667_v13, 1  ;;  %v2711_v12 = vrot.slane %v2667_v13, 2  ;;  %v2712_v62 = vrot.slane %v2667_v13, 3  ;;  %v2725_v47 = vadd.f32 %v2701_v43, %v2667_v13 }
 0x46d   :  { %v2721_v44 = vadd.f32 %v2706_v54, %v2697_v30  ;;  %v2722_v50 = vadd.f32 %v2707_v57, %v2698_v56  ;;  %v2723_v17 = vadd.f32 %v2708_v31, %v2699_v46  ;;  %v2724_v10 = vadd.f32 %v2709_v48, %v2700_v60 }
 0x46e   :  { %v2726_v27 = vadd.f32 %v2710_v3, %v2702_v14  ;;  %v2727_v49 = vadd.f32 %v2711_v12, %v2703_v19  ;;  %v2728_v26 = vadd.f32 %v2712_v62, %v2704_v22  ;;  %v5233_v18 = vmul.f32 -1.442695, %v2725_v47 }
 0x46f   :  { %v5229_v61 = vmul.f32 -1.442695, %v2721_v44  ;;  %v5230_v52 = vmul.f32 -1.442695, %v2722_v50  ;;  %v5231_v55 = vmul.f32 -1.442695, %v2723_v17  ;;  %v2909_v43 = vunpack.c.l.bf16 %v2893_v58 }
 0x470   :  { %v5232_v41 = vmul.f32 -1.442695, %v2724_v10  ;;  %5654 = vpow2.f32 %v5233_v18  ;;  %v5234_v39 = vmul.f32 -1.442695, %v2726_v27  ;;  %v2914_v59 = vrot.slane %v8621_v21, 4 }
 0x471   :  { %5656 = vpow2.f32 %v5229_v61  ;;  %v8625_v24 = vpop.f32.mrf.mxu2  ;;  %v5235_v4 = vmul.f32 -1.442695, %v2727_v49  ;;  %v5236_v20 = vmul.f32 -1.442695, %v2728_v26  ;;  %v2915_v28 = vrot.slane %v8621_v21, 5 }
 0x472   :  { %5658 = vpow2.f32 %v5230_v52  ;;  %v2669_v6 = vpop.f32.mrf.mxu0  ;;  %v2682_v30 = vpop.f32.mrf.mxu1  ;;  %v2916_v56 = vrot.slane %v8621_v21, 6  ;;  %v2917_v46 = vrot.slane %v8621_v21, 7  ;;  %v2929_v60 = vadd.f32 %v2914_v59, %v2905_v42 }
 0x473   :  { %5660 = vpow2.f32 %v5231_v55  ;;  %v2910_v14 = vunpack.c.l.bf16 %v2894_v38  ;;  %v2911_v19 = vunpack.c.l.bf16 %v2895_v51  ;;  %v2912_v22 = vunpack.c.l.bf16 %v2896_v63 }
 0x474   :  { %5662 = vpow2.f32 %v5232_v41  ;;  %v2918_v11 = vrot.slane %v8621_v21, 1  ;;  %v2919_v2 = vrot.slane %v8621_v21, 2  ;;  %v2920_v13 = vrot.slane %v8621_v21, 3 }
 0x475   :  { %5664 = vpow2.f32 %v5234_v39  ;;  %v2930_v29 = vadd.f32 %v2915_v28, %v2906_v34  ;;  %v5237_v54 = vmul.f32 -1.442695, %v2929_v60  ;;  %v2931_v48 = vadd.f32 %v2916_v56, %v2907_v0 }
 0x476   :  { %v5655_v5 = vpop.eup %5654  ;;  %5666 = vpow2.f32 %v5235_v4  ;;  %v2932_v58 = vadd.f32 %v2917_v46, %v2908_v40  ;;  %v2933_v63 = vadd.f32 %v2909_v43, %v8621_v21  ;;  %v2934_v47 = vadd.f32 %v2918_v11, %v2910_v14 }
 0x477   :  { %v5657_v57 = vpop.eup %5656  ;;  %5668 = vpow2.f32 %v5236_v20  ;;  %v8633_v31 = vadd.f32 1.0, %v5655_v5  ;;  %v2935_v44 = vadd.f32 %v2919_v2, %v2911_v19  ;;  %v2936_v27 = vadd.f32 %v2920_v13, %v2912_v22 }
 0x478   :  { %v5659_v38 = vpop.eup %5658  ;;  %v8635_v51 = vadd.f32 1.0, %v5657_v57  ;;  %5670 = vpow2.f32 %v5237_v54  ;;  %v5238_v49 = vmul.f32 -1.442695, %v2930_v29  ;;  %v5239_v18 = vmul.f32 -1.442695, %v2931_v48 }
 0x479   :  { %v5661_v12 = vpop.eup %5660  ;;  %v8639_v62 = vadd.f32 1.0, %v5659_v38  ;;  %5672 = vrcp.f32 %v8633_v31  ;;  %v2695_v50 = vpop.f32.mrf.mxu2  ;;  %v5240_v61 = vmul.f32 -1.442695, %v2932_v58  ;;  %v5241_v42 = vmul.f32 -1.442695, %v2933_v63 }
 0x47a   :  { %v5663_v17 = vpop.eup %5662  ;;  %v8642_v10 = vadd.f32 1.0, %v5661_v12  ;;  %5674 = vrcp.f32 %v8635_v51  ;;  %v2772_v41 = vand.u32 2147483648, %v8635_v51  ;;  %v5242_v39 = vmul.f32 -1.442695, %v2934_v47 }
 0x47b   :  { %v5665_v26 = vpop.eup %5664  ;;  %v8645_v21 = vadd.f32 1.0, %v5663_v17  ;;  %5676 = vrcp.f32 %v8639_v62  ;;  %v2787_v40 = vand.u32 2147483648, %v8639_v62  ;;  %v5243_v20 = vmul.f32 -1.442695, %v2935_v44 }
 0x47c   :  { %v5667_v52 = vpop.eup %5666  ;;  %v8648_v55 = vadd.f32 1.0, %v5665_v26  ;;  %5678 = vrcp.f32 %v8642_v10  ;;  %v2770_v28 = vand.u32 2147483647, %v8635_v51  ;;  %v5244_v30 = vmul.f32 -1.442695, %v2936_v27 }
 0x47d   :  { %v5669_v34 = vpop.eup %5668  ;;  %v8652_v0 = vadd.f32 1.0, %v5667_v52  ;;  %5680 = vrcp.f32 %v8645_v21  ;;  %vm2766_vm10 = vweird.f32 %v8635_v51  ;;  %v2785_v56 = vand.u32 2147483647, %v8639_v62 }
 0x47e   :  { %v5671_v59 = vpop.eup %5670  ;;  %v8656_v4 = vadd.f32 1.0, %v5669_v34  ;;  %5682 = vrcp.f32 %v8648_v55  ;;  %v8670_v43 = vor.u32 1.1754944e-38, %v2772_v41  ;;  %vm2781_vm11 = vweird.f32 %v8639_v62 }
 0x47f   :  { %v8660_v6 = vpop.eup %5672  ;;  %5684 = vrcp.f32 %v8652_v0  ;;  %v8668_v60 = vadd.f32 1.0, %v5671_v59  ;;  %v8677_v22 = vor.u32 1.1754944e-38, %v2787_v40  ;;  %v2802_v11 = vand.u32 2147483648, %v8642_v10 }
 0x480   :  { %v8665_v46 = vpop.eup %5674  ;;  %5686 = vrcp.f32 %v8656_v4  ;;  %vm8682_vm2 = vcmp.eq.f32.partialorder %v2770_v28, 8.507059e+37  ;;  %v2800_v29 = vand.u32 2147483647, %v8642_v10  ;;  %v2815_v54 = vand.u32 2147483647, %v8645_v21 }
 0x481   :  { %v8673_v14 = vpop.eup %5676  ;;  %5688 = vpow2.f32 %v5238_v49  ;;  %v2762_v19 = vmul.f32 %v8665_v46, %v8635_v51  ;;  %vm2767_vm0 = vweird.f32 %v8665_v46  ;;  %vm8693_vm6 = vcmp.eq.f32.partialorder %v2785_v56, 8.507059e+37 }
 0x482   :  { %v8680_v2 = vpop.eup %5678  ;;  %5690 = vpow2.f32 %v5239_v18  ;;  %v2777_v13 = vmul.f32 %v8673_v14, %v8639_v62  ;;  %vm2796_vm4 = vweird.f32 %v8642_v10  ;;  %vm2782_vm3 = vweird.f32 %v8673_v14  ;;  %vm8726_vm13 = vmor %vm2766_vm10, %vm2767_vm0 }
 0x483   :  { %v8690_v57 = vpop.eup %5680  ;;  %5692 = vpow2.f32 %v5240_v61  ;;  %v2763_v48 = vsub.f32 1.0, %v2762_v19  ;;  %v2792_v38 = vmul.f32 %v8680_v2, %v8642_v10  ;;  %vm2811_vm15 = vweird.f32 %v8645_v21  ;;  %vm8742_vm5 = vmor %vm2781_vm11, %vm2782_vm3 }
 0x484   :  { %v8700_v63 = vpop.eup %5682  ;;  %5694 = vpow2.f32 %v5241_v42  ;;  %v2778_v12 = vsub.f32 1.0, %v2777_v13  ;;  %v2807_v47 = vmul.f32 %v8690_v57, %v8645_v21  ;;  %v2803_v27 = vor.u32 1.1754944e-38, %v2802_v11 }
 0x485   :  { %v8706_v44 = vpop.eup %5684  ;;  %5696 = vpow2.f32 %v5242_v39  ;;  %v2764_v50 = vmul.f32 %v8665_v46, %v2763_v48  ;;  %v2793_v17 = vsub.f32 1.0, %v2792_v38  ;;  %vm2797_vm1 = vweird.f32 %v8680_v2 }
 0x486   :  { %v8709_v49 = vpop.eup %5686  ;;  %5698 = vpow2.f32 %v5243_v20  ;;  %v2779_v26 = vmul.f32 %v8673_v14, %v2778_v12  ;;  %v2808_v18 = vsub.f32 1.0, %v2807_v47  ;;  %vm8715_vm7 = vcmp.eq.f32.partialorder %v2800_v29, 8.507059e+37  ;;  %vm8776_vm14 = vmor %vm2796_vm4, %vm2797_vm1 }
 0x487   :  { %v5689_v61 = vpop.eup %5688  ;;  %5700 = vpow2.f32 %v5244_v30  ;;  %v2765_v52 = vadd.f32 %v8665_v46, %v2764_v50  ;;  %v2794_v42 = vmul.f32 %v8680_v2, %v2793_v17  ;;  %v2817_v34 = vand.u32 2147483648, %v8645_v21 }
 0x488   :  { %v5691_v39 = vpop.eup %5690  ;;  %v8720_v40 = vadd.f32 1.0, %v5689_v61  ;;  %v2780_v20 = vadd.f32 %v8673_v14, %v2779_v26  ;;  %v2809_v28 = vmul.f32 %v8690_v57, %v2808_v18  ;;  %vm2812_vm12 = vweird.f32 %v8690_v57 }
 0x489   :  { %v5693_v30 = vpop.eup %5692  ;;  %v8733_v56 = vadd.f32 1.0, %v5691_v39  ;;  %v2769_v19 = vsel %vm8726_vm13, %v8665_v46, %v2765_v52  ;;  %v2795_v11 = vadd.f32 %v8680_v2, %v2794_v42  ;;  %v2822_v13 = vmul.f32 %v8660_v6, %v8633_v31  ;;  %vm2813_vm10 = vmor %vm2811_vm15, %vm2812_vm12 }
 0x48a   :  { %vm2826_vm9 = vweird.f32 %v8633_v31  ;;  %v5695_v29 = vpop.eup %5694  ;;  %v8750_v48 = vadd.f32 1.0, %v5693_v30  ;;  %5702 = vrcp.f32 %v8668_v60  ;;  %v2784_v62 = vsel %vm8742_vm5, %v8673_v14, %v2780_v20 }
 0x48b   :  { %vm8756_vm8 = vcmp.eq.f32.partialorder %v2815_v54, 8.507059e+37  ;;  %v5697_v38 = vpop.eup %5696  ;;  %v8760_v12 = vadd.f32 1.0, %v5695_v29  ;;  %5704 = vrcp.f32 %v8720_v40  ;;  %v2774_v47 = vsel %vm8682_vm2, %v8670_v43, %v2769_v19  ;;  %v2642_v29 = vld [vmem:[#allocation5 + $0x8] sm:$0x4]  ;;  %v2648_v54 = vld [vmem:[#allocation5 + $0x2c] sm:$0x4] }
 0x48c   :  { %v2818_v50 = vor.u32 1.1754944e-38, %v2817_v34  ;;  %v5699_v17 = vpop.eup %5698  ;;  %v8766_v26 = vadd.f32 1.0, %v5697_v38  ;;  %5706 = vrcp.f32 %v8733_v56  ;;  %v2789_v14 = vsel %vm8693_vm6, %v8677_v22, %v2784_v62  ;;  %v2644_v62 = vld [vmem:[#allocation5 + $0x14] sm:$0x4] }
 0x48d   :  { %v2810_v43 = vadd.f32 %v8690_v57, %v2809_v28  ;;  %v5701_v5 = vpop.eup %5700  ;;  %v8781_v18 = vadd.f32 1.0, %v5699_v17  ;;  %5708 = vrcp.f32 %v8750_v48  ;;  %v2799_v58 = vsel %vm8776_vm14, %v8680_v2, %v2795_v11  ;;  %v2646_v17 = vld [vmem:[#allocation5 + $0x20] sm:$0x4] }
 0x48e   :  { %v2823_v10 = vsub.f32 1.0, %v2822_v13  ;;  %v8791_v22 = vadd.f32 1.0, %v5701_v5  ;;  %5710 = vrcp.f32 %v8760_v12  ;;  %v2830_v52 = vand.u32 2147483647, %v8633_v31 }
 0x48f   :  { %v2814_v61 = vsel %vm2813_vm10, %v8690_v57, %v2810_v43  ;;  %5712 = vrcp.f32 %v8766_v26  ;;  %vm2827_vm11 = vweird.f32 %v8660_v6  ;;  %v2832_v2 = vand.u32 2147483648, %v8633_v31 }
 0x490   :  { %v2824_v42 = vmul.f32 %v8660_v6, %v2823_v10  ;;  %v8800_v34 = vpop.eup %5702  ;;  %5714 = vrcp.f32 %v8781_v18  ;;  %v2804_v21 = vsel %vm8715_vm7, %v2803_v27, %v2799_v58  ;;  %v2819_v57 = vsel %vm8756_vm8, %v2818_v50, %v2814_v61  ;;  %vm8822_vm0 = vmor %vm2826_vm9, %vm2827_vm11  ;;  %v2650_v61 = vld [vmem:[#allocation5 + $0x38] sm:$0x4] }
 0x491   :  { %v2837_v39 = vmul.f32 %v8700_v63, %v8648_v55  ;;  %v8809_v59 = vpop.eup %5704  ;;  %5716 = vrcp.f32 %v8791_v22  ;;  %vm8813_vm2 = vcmp.eq.f32.partialorder %v2830_v52, 8.507059e+37  ;;  %v2845_v30 = vand.u32 2147483647, %v8648_v55 }
 0x492   :  { %v2825_v20 = vadd.f32 %v8660_v6, %v2824_v42  ;;  %v8818_v41 = vpop.eup %5706  ;;  %v2833_v19 = vor.u32 1.1754944e-38, %v2832_v2  ;;  %vm2841_vm6 = vweird.f32 %v8648_v55  ;;  %v2847_v11 = vand.u32 2147483648, %v8648_v55 }
 0x493   :  { %v2838_v51 = vsub.f32 1.0, %v2837_v39  ;;  %v8828_v13 = vpop.eup %5708  ;;  %vm2842_vm4 = vweird.f32 %v8700_v63  ;;  %v3090_v31 = vrot.slane %v8625_v24, 4  ;;  %v3091_v38 = vrot.slane %v8625_v24, 5 }
 0x494   :  { %v2829_v46 = vsel %vm8822_vm0, %v8660_v6, %v2825_v20  ;;  %v8836_v50 = vpop.eup %5710  ;;  %v3092_v58 = vrot.slane %v8625_v24, 6  ;;  %v3093_v10 = vrot.slane %v8625_v24, 7  ;;  %vm8845_vm3 = vcmp.eq.f32.partialorder %v2845_v30, 8.507059e+37  ;;  %vm2843_vm15 = vmor %vm2841_vm6, %vm2842_vm4 }
 0x495   :  { %v2834_v43 = vsel %vm8813_vm2, %v2833_v19, %v2829_v46  ;;  %v2839_v5 = vmul.f32 %v8700_v63, %v2838_v51  ;;  %v8843_v6 = vpop.eup %5712  ;;  %v2848_v42 = vor.u32 1.1754944e-38, %v2847_v11  ;;  %v3105_v2 = vmul.f32 %v3090_v31, %v2774_v47  ;;  %v8861_v31 = vld [vmem:[#allocation5 + $0x50] sm:$0x4] }
 0x496   :  { %v3106_v39 = vmul.f32 %v3091_v38, %v2789_v14  ;;  %v8849_v20 = vpop.eup %5714  ;;  %v3107_v27 = vmul.f32 %v3092_v58, %v2804_v21  ;;  %v3108_v19 = vmul.f32 %v3093_v10, %v2819_v57  ;;  %v3109_v51 = vmul.f32 %v2834_v43, %v8625_v24  ;;  %v8859_v14 = vld [vmem:[#allocation5 + $0x44] sm:$0x4] }
 0x497   :  { %v2840_v28 = vadd.f32 %v8700_v63, %v2839_v5  ;;  %v8853_v46 = vpop.eup %5716  ;;  %v3113_v30 = vunpack.c.l.bf16 %v2642_v29  ;;  %v3114_v3 = vunpack.c.l.bf16 %v2644_v62  ;;  %v3115_v11 = vunpack.c.l.bf16 %v2646_v17  ;;  %v8866_v5 = vld [vmem:[#allocation5 + $0x5c] sm:$0x4] }
 0x498   :  { %v3116_v47 = vunpack.c.l.bf16 %v2648_v54  ;;  %v3094_v57 = vrot.slane %v8625_v24, 1  ;;  %v3095_v38 = vrot.slane %v8625_v24, 2  ;;  %v3117_v43 = vunpack.c.l.bf16 %v2650_v61 }
 0x499   :  { %v2844_v21 = vsel %vm2843_vm15, %v8700_v63, %v2840_v28  ;;  %v3096_v29 = vrot.slane %v8625_v24, 3  ;;  %v3121_v62 = vadd.f32 %v3113_v30, %v3105_v2  ;;  %v3122_v17 = vadd.f32 %v3114_v3, %v3106_v39 }
 0x49a   :  { %v2849_v55 = vsel %vm8845_vm3, %v2848_v42, %v2844_v21  ;;  %v3123_v58 = vadd.f32 %v3115_v11, %v3107_v27  ;;  %v3118_v10 = vunpack.c.l.bf16 %v8859_v14  ;;  %v3119_v63 = vunpack.c.l.bf16 %v8861_v31 }
 0x49b   :  { %v8871_v54 = vmul.f32 %v3094_v57, %v2849_v55  ;;  %v3124_v28 = vadd.f32 %v3116_v47, %v3108_v19  ;;  %v3125_v36 = vadd.f32 %v3117_v43, %v3109_v51  ;;  %v3120_v61 = vunpack.c.l.bf16 %v8866_v5 }
 0x49c   :  { %v2852_v23 = vmul.f32 %v8706_v44, %v8652_v0  ;;  %5718 = vtanh.f32 %v3121_v62  ;;  %v2860_v52 = vand.u32 2147483647, %v8652_v0  ;;  %v2862_v42 = vand.u32 2147483648, %v8652_v0 }
 0x49d   :  { %v2867_v3 = vmul.f32 %v8709_v49, %v8656_v4  ;;  %5720 = vtanh.f32 %v3122_v17  ;;  %vm2856_vm1 = vweird.f32 %v8652_v0  ;;  %vm2857_vm7 = vweird.f32 %v8706_v44 }
 0x49e   :  { %v2853_v2 = vsub.f32 1.0, %v2852_v23  ;;  %5722 = vtanh.f32 %v3123_v58  ;;  %vm2871_vm13 = vweird.f32 %v8656_v4  ;;  %vm2872_vm12 = vweird.f32 %v8709_v49  ;;  %vm8905_vm8 = vmor %vm2856_vm1, %vm2857_vm7 }
 0x49f   :  { %v2868_v39 = vsub.f32 1.0, %v2867_v3  ;;  %5724 = vtanh.f32 %v3124_v28  ;;  %v2875_v19 = vand.u32 2147483647, %v8656_v4  ;;  %v2877_v51 = vand.u32 2147483648, %v8656_v4  ;;  %vm8922_vm14 = vmor %vm2871_vm13, %vm2872_vm12 }
 0x4a0   :  { %v2854_v27 = vmul.f32 %v8706_v44, %v2853_v2  ;;  %vm8889_vm5 = vcmp.eq.f32.partialorder %v2860_v52, 8.507059e+37  ;;  %v2863_v23 = vor.u32 1.1754944e-38, %v2862_v42  ;;  %v2970_v47 = vmul.f32 %v8800_v34, %v8668_v60 }
 0x4a1   :  { %v2869_v11 = vmul.f32 %v8709_v49, %v2868_v39  ;;  %5726 = vtanh.f32 %v3125_v36  ;;  %vm2974_vm9 = vweird.f32 %v8668_v60  ;;  %v2978_v57 = vand.u32 2147483647, %v8668_v60 }
 0x4a2   :  { %v2855_v21 = vadd.f32 %v8706_v44, %v2854_v27  ;;  %v8899_v43 = vpop.eup %5718  ;;  %v2971_v17 = vsub.f32 1.0, %v2970_v47  ;;  %v2980_v36 = vand.u32 2147483648, %v8668_v60  ;;  %v2985_v58 = vmul.f32 %v8809_v59, %v8720_v40 }
 0x4a3   :  { %v2870_v62 = vadd.f32 %v8709_v49, %v2869_v11  ;;  %v8913_v28 = vpop.eup %5720  ;;  %vm8926_vm10 = vcmp.eq.f32.partialorder %v2875_v19, 8.507059e+37  ;;  %v2878_v3 = vor.u32 1.1754944e-38, %v2877_v51  ;;  %vm2975_vm11 = vweird.f32 %v8800_v34 }
 0x4a4   :  { %v2859_v52 = vsel %vm8905_vm8, %v8706_v44, %v2855_v21  ;;  %v8931_v2 = vpop.eup %5722  ;;  %v2972_v39 = vmul.f32 %v8800_v34, %v2971_v17  ;;  %vm8937_vm2 = vcmp.eq.f32.partialorder %v2978_v57, 8.507059e+37  ;;  %vm2989_vm0 = vweird.f32 %v8720_v40  ;;  %vm2976_vm4 = vmor %vm2974_vm9, %vm2975_vm11 }
 0x4a5   :  { %v2874_v44 = vsel %vm8922_vm14, %v8709_v49, %v2870_v62  ;;  %v8942_v27 = vpop.eup %5724  ;;  %v2986_v19 = vsub.f32 1.0, %v2985_v58  ;;  %vm2990_vm6 = vweird.f32 %v8809_v59  ;;  %v2993_v51 = vand.u32 2147483647, %v8720_v40 }
 0x4a6   :  { %v2995_v11 = vand.u32 2147483648, %v8720_v40  ;;  %v8949_v49 = vsel %vm8889_vm5, %v2863_v23, %v2859_v52  ;;  %v2973_v47 = vadd.f32 %v8800_v34, %v2972_v39  ;;  %v2981_v21 = vor.u32 1.1754944e-38, %v2980_v36  ;;  %vm2991_vm7 = vmor %vm2989_vm0, %vm2990_vm6 }
 0x4a7   :  { %v3000_v57 = vmul.f32 %v8818_v41, %v8733_v56  ;;  %v8954_v55 = vpop.eup %5726  ;;  %v8958_v62 = vsel %vm8926_vm10, %v2878_v3, %v2874_v44  ;;  %v2987_v30 = vmul.f32 %v8809_v59, %v2986_v19  ;;  %vm3004_vm3 = vweird.f32 %v8733_v56 }
 0x4a8   :  { %v3008_v23 = vand.u32 2147483647, %v8733_v56  ;;  %v2977_v17 = vsel %vm2976_vm4, %v8800_v34, %v2973_v47  ;;  %vm3005_vm15 = vweird.f32 %v8818_v41  ;;  %v3015_v58 = vmul.f32 %v8828_v13, %v8750_v48 }
 0x4a9   :  { %v3001_v36 = vsub.f32 1.0, %v3000_v57  ;;  %v2988_v52 = vadd.f32 %v8809_v59, %v2987_v30  ;;  %vm8972_vm1 = vcmp.eq.f32.partialorder %v2993_v51, 8.507059e+37  ;;  %v2996_v60 = vor.u32 1.1754944e-38, %v2995_v11  ;;  %vm3006_vm9 = vmor %vm3004_vm3, %vm3005_vm15 }
 0x4aa   :  { %v3010_v42 = vand.u32 2147483648, %v8733_v56  ;;  %v8979_v3 = vsel %vm8937_vm2, %v2981_v21, %v2977_v17  ;;  %vm8986_vm13 = vcmp.eq.f32.partialorder %v3008_v23, 8.507059e+37  ;;  %v3016_v39 = vsub.f32 1.0, %v3015_v58 }
 0x4ab   :  { %v3002_v34 = vmul.f32 %v8818_v41, %v3001_v36  ;;  %v2992_v19 = vsel %vm2991_vm7, %v8809_v59, %v2988_v52  ;;  %vm3019_vm12 = vweird.f32 %v8750_v48  ;;  %v3023_v4 = vand.u32 2147483647, %v8750_v48 }
 0x4ac   :  { %v3030_v51 = vmul.f32 %v8836_v50, %v8760_v12  ;;  %v3017_v40 = vmul.f32 %v8828_v13, %v3016_v39  ;;  %vm3020_vm5 = vweird.f32 %v8828_v13  ;;  %v3025_v47 = vand.u32 2147483648, %v8750_v48 }
 0x4ad   :  { %v3003_v11 = vadd.f32 %v8818_v41, %v3002_v34  ;;  %v9001_v21 = vsel %vm8972_vm1, %v2996_v60, %v2992_v19  ;;  %v3011_v59 = vor.u32 1.1754944e-38, %v3010_v42  ;;  %vm3034_vm8 = vweird.f32 %v8760_v12  ;;  %vm9014_vm14 = vmor %vm3019_vm12, %vm3020_vm5 }
 0x4ae   :  { %v3031_v57 = vsub.f32 1.0, %v3030_v51  ;;  %v3018_v23 = vadd.f32 %v8828_v13, %v3017_v40  ;;  %v3038_v17 = vand.u32 2147483647, %v8760_v12  ;;  %v3040_v36 = vand.u32 2147483648, %v8760_v12 }
 0x4af   :  { %v3007_v30 = vsel %vm3006_vm9, %v8818_v41, %v3003_v11  ;;  %vm9018_vm10 = vcmp.eq.f32.partialorder %v3023_v4, 8.507059e+37  ;;  %vm3035_vm11 = vweird.f32 %v8836_v50  ;;  %v3045_v41 = vmul.f32 %v8843_v6, %v8766_v26 }
 0x4b0   :  { %v3032_v52 = vmul.f32 %v8836_v50, %v3031_v57  ;;  %v9028_v0 = vsel %vm8986_vm13, %v3011_v59, %v3007_v30  ;;  %v3022_v48 = vsel %vm9014_vm14, %v8828_v13, %v3018_v23  ;;  %v3026_v60 = vor.u32 1.1754944e-38, %v3025_v47  ;;  %vm3036_vm6 = vmor %vm3034_vm8, %vm3035_vm11 }
 0x4b1   :  { %vm3049_vm2 = vweird.f32 %v8766_v26  ;;  %vm9035_vm0 = vcmp.eq.f32.partialorder %v3038_v17, 8.507059e+37  ;;  %v3046_v39 = vsub.f32 1.0, %v3045_v41  ;;  %v3053_v19 = vand.u32 2147483647, %v8766_v26 }
 0x4b2   :  { %v3033_v42 = vadd.f32 %v8836_v50, %v3032_v52  ;;  %v3041_v44 = vor.u32 1.1754944e-38, %v3040_v36  ;;  %vm3050_vm4 = vweird.f32 %v8843_v6  ;;  %v3055_v13 = vand.u32 2147483648, %v8766_v26 }
 0x4b3   :  { %v3060_v4 = vmul.f32 %v8849_v20, %v8781_v18  ;;  %v3027_v51 = vsel %vm9018_vm10, %v3026_v60, %v3022_v48  ;;  %v3047_v40 = vmul.f32 %v8843_v6, %v3046_v39  ;;  %v3068_v47 = vand.u32 2147483647, %v8781_v18  ;;  %vm9067_vm7 = vmor %vm3049_vm2, %vm3050_vm4 }
 0x4b4   :  { %v3037_v11 = vsel %vm3036_vm6, %v8836_v50, %v3033_v42  ;;  %vm3064_vm3 = vweird.f32 %v8781_v18  ;;  %vm3065_vm15 = vweird.f32 %v8849_v20  ;;  %v3070_v12 = vand.u32 2147483648, %v8781_v18 }
 0x4b5   :  { %v3061_v59 = vsub.f32 1.0, %v3060_v4  ;;  %v3042_v57 = vsel %vm9035_vm0, %v3041_v44, %v3037_v11  ;;  %v3048_v30 = vadd.f32 %v8843_v6, %v3047_v40  ;;  %vm9057_vm1 = vcmp.eq.f32.partialorder %v3053_v19, 8.507059e+37  ;;  %vm9093_vm5 = vmor %vm3064_vm3, %vm3065_vm15 }
 0x4b6   :  { %v3075_v50 = vmul.f32 %v8853_v46, %v8791_v22  ;;  %v3056_v36 = vor.u32 1.1754944e-38, %v3055_v13  ;;  %vm9072_vm13 = vcmp.eq.f32.partialorder %v3068_v47, 8.507059e+37  ;;  %v3083_v52 = vand.u32 2147483647, %v8791_v22 }
 0x4b7   :  { %v3062_v58 = vmul.f32 %v8849_v20, %v3061_v59  ;;  %v3052_v41 = vsel %vm9067_vm7, %v8843_v6, %v3048_v30  ;;  %v3085_v26 = vand.u32 2147483648, %v8791_v22  ;;  %v3111_v60 = vmul.f32 %v3095_v38, %v8949_v49 }
 0x4b8   :  { %v3076_v48 = vsub.f32 1.0, %v3075_v50  ;;  %v3071_v34 = vor.u32 1.1754944e-38, %v3070_v12  ;;  %vm3079_vm12 = vweird.f32 %v8791_v22  ;;  %v3112_v39 = vmul.f32 %v3096_v29, %v8958_v62 }
 0x4b9   :  { %v3063_v42 = vadd.f32 %v8849_v20, %v3062_v58  ;;  %vm3080_vm9 = vweird.f32 %v8853_v46  ;;  %v3126_v38 = vadd.f32 %v3118_v10, %v8871_v54  ;;  %v3127_v24 = vadd.f32 %v3119_v63, %v3111_v60 }
 0x4ba   :  { %v3077_v19 = vmul.f32 %v8853_v46, %v3076_v48  ;;  %v3057_v29 = vsel %vm9057_vm1, %v3056_v36, %v3052_v41  ;;  %vm3084_vm8 = vcmp.eq.f32.partialorder %v3083_v52, 8.507059e+37  ;;  %v3128_v49 = vadd.f32 %v3120_v61, %v3112_v39  ;;  %vm3081_vm14 = vmor %vm3079_vm12, %vm3080_vm9 }
 0x4bb   :  { %v3067_v18 = vsel %vm9093_vm5, %v8849_v20, %v3063_v42  ;;  %v3086_v44 = vor.u32 1.1754944e-38, %v3085_v26  ;;  %5728 = vtanh.f32 %v3126_v38  ;;  %v3137_v14 = vsub.f32 1.0, %v8979_v3 }
 0x4bc   :  { %v3078_v62 = vadd.f32 %v8853_v46, %v3077_v19  ;;  %5730 = vtanh.f32 %v3127_v24  ;;  %v3138_v31 = vsub.f32 1.0, %v9001_v21  ;;  %v3139_v54 = vsub.f32 1.0, %v9028_v0  ;;  %v3190_v24 = vpop.permute.xlu2 %3189 }
 0x4bd   :  { %v3140_v10 = vsub.f32 1.0, %v3027_v51  ;;  %v3072_v20 = vsel %vm9072_vm13, %v3071_v34, %v3067_v18  ;;  %5732 = vtanh.f32 %v3128_v49  ;;  %v3145_v63 = vmul.f32 %v8899_v43, %v3137_v14 }
 0x4be   :  { %v3082_v5 = vsel %vm3081_vm14, %v8853_v46, %v3078_v62  ;;  %v3146_v13 = vmul.f32 %v8913_v28, %v3138_v31  ;;  %v3147_v22 = vmul.f32 %v8931_v2, %v3139_v54  ;;  %v3141_v11 = vsub.f32 1.0, %v3042_v57 }
 0x4bf   :  { %v3087_v61 = vsel %vm3084_vm8, %v3086_v44, %v3082_v5  ;;  %v3148_v4 = vmul.f32 %v8942_v27, %v3140_v10  ;;  %v3142_v40 = vsub.f32 1.0, %v3057_v29  ;;  %v3169_v47 = vmul.f32 %v3154_v8, %v8979_v3 }
 0x4c0   :  { %v3170_v46 = vmul.f32 %v3155_v37, %v9001_v21  ;;  %v3143_v59 = vsub.f32 1.0, %v3072_v20  ;;  %v3144_v12 = vsub.f32 1.0, %v3087_v61  ;;  %v3171_v43 = vmul.f32 %v3156_v45, %v9028_v0 }
 0x4c1   :  { %v3172_v28 = vmul.f32 %v3157_v35, %v3027_v51  ;;  %v5729_v2 = vpop.eup %5728  ;;  %v3149_v27 = vmul.f32 %v8954_v55, %v3141_v11  ;;  %v3173_v30 = vmul.f32 %v3042_v57, %v8580_v32  ;;  %v3177_v23 = vadd.f32 %v3169_v47, %v3145_v63  ;;  %v9165_v11 = vld [vmem:[#allocation5 + $0xc] sm:$0x44] }
 0x4c2   :  { %v3178_v8 = vadd.f32 %v3170_v46, %v3146_v13  ;;  %v5731_v3 = vpop.eup %5730  ;;  %v3150_v50 = vmul.f32 %v5729_v2, %v3142_v40  ;;  %v11365_v37 = vrot.slane %v8580_v32, 1  ;;  %v3179_v17 = vadd.f32 %v3171_v43, %v3147_v22  ;;  %v9169_v40 = vld [vmem:[#allocation5 + $0x3c] sm:$0x44] }
 0x4c3   :  { %v3180_v36 = vadd.f32 %v3172_v28, %v3148_v4  ;;  %v5733_v58 = vpop.eup %5732  ;;  %v3151_v56 = vmul.f32 %v5731_v3, %v3143_v59  ;;  %v11366_v45 = vrot.slane %v8580_v32, 2  ;;  %v3200_v35 = vrot.slane %v3177_v23, 4 }
 0x4c4   :  { %v3174_v21 = vmul.f32 %v11365_v37, %v3057_v29  ;;  %v3201_v51 = vrot.slane %v3178_v8, 3  ;;  %v3152_v52 = vmul.f32 %v5733_v58, %v3144_v12  ;;  %v11367_v55 = vrot.slane %v8580_v32, 3  ;;  %v9183_v58 = vld [vmem:[#allocation5 + $0x48] sm:$0x44] }
 0x4c5   :  { %v3175_v0 = vmul.f32 %v11366_v45, %v3072_v20  ;;  %v3203_v48 = vrot.slane %v3179_v17, 2  ;;  %vm11368_vm10 = vcmask 1041409   ;;  %v3205_v42 = vrot.slane %v3180_v36, 1 }
 0x4c6   :  { %v3176_v57 = vmul.f32 %v11367_v55, %v3087_v61  ;;  %v3182_v41 = vadd.f32 %v3174_v21, %v3150_v50  ;;  %v3202_v60 = vsel %vm11368_vm10, %v3201_v51, %v3200_v35  ;;  %v3181_v34 = vadd.f32 %v3173_v30, %v3149_v27 }
 0x4c7   :  { %v3183_v26 = vadd.f32 %v3175_v0, %v3151_v56  ;;  %vm11369_vm11 = vcmask 1042434   ;;  %vm11370_vm2 = vcmask 1043459   ;;  %vm11371_vm0 = vcmask 1044484  }
 0x4c8   :  { %v3184_v39 = vadd.f32 %v3176_v57, %v3152_v52  ;;  %v3204_v6 = vsel %vm11369_vm11, %v3203_v48, %v3202_v60  ;;  %v3208_v38 = vrot.slane %v3182_v41, 7  ;;  %vm3191_vm6 = vcmp.eq.s32.totalorder %v3190_v24, 1  ;;  %v9187_v52 = vld [vmem:[#allocation5 + $0x54] sm:$0x44] }
 0x4c9   :  { %v3206_v19 = vsel %vm11370_vm2, %v3205_v42, %v3204_v6  ;;  %v3210_v18 = vrot.slane %v3183_v26, 6  ;;  %vm11372_vm4 = vcmask 1045509   ;;  %vm11373_vm3 = vcmask 1046534  }
 0x4ca   :  { %v3207_v29 = vsel %vm11371_vm0, %v3181_v34, %v3206_v19  ;;  %v3212_v62 = vrot.slane %v3184_v39, 5  ;;  %vm11374_vm15 = vcmask 1047559   ;;  %v3495_v55 = vrot.slane %v9183_v58, 4 }
 0x4cb   :  { %v3209_v49 = vsel %vm11372_vm4, %v3208_v38, %v3207_v29  ;;  %v3496_v42 = vrot.slane %v9187_v52, 4 }
 0x4cc   :  { %v3211_v44 = vsel %vm11373_vm3, %v3210_v18, %v3209_v49  ;;  %v3511_v39 = vunpack.c.l.bf16 %v3495_v55 }
 0x4cd   :  { %v3213_v14 = vsel %vm11374_vm15, %v3212_v62, %v3211_v44  ;;  %v3512_v29 = vunpack.c.l.bf16 %v3496_v42 }
 0x4ce   :  { %v3215_v31 = vsel %vm3191_vm6, %v3213_v14, 0.0  ;;  %v9151_v5 = vsel %vm3191_vm6, %v3213_v14, %v8580_v32  ;;  %v9163_v32 = vld [vmem:[#allocation5] sm:$0x44] }
 0x4cf   :  { %v3217_v54 = vrot.slane %v3215_v31, 1  ;;  %v3218_v10 = vrot.slane %v3215_v31, 2  ;;  %v3219_v20 = vrot.slane %v3215_v31, 3  ;;  %3231 = vst [vmem:[#allocation10 + $0x4] sm:$0x1] %v3215_v31  ;;  %v3220_v63 = vrot.slane %v3215_v31, 4 }
 0x4d0   :  { %v3221_v61 = vrot.slane %v3215_v31, 5  ;;  %v3222_v13 = vrot.slane %v3215_v31, 6  ;;  %v3257_v22 = vpack.c.bf16 %v9151_v5, %v9151_v5  ;;  %v3223_v4 = vrot.slane %v3215_v31, 7 }
 0x4d1   :  { %3232 = vst [vmem:[#allocation10 + $0xc] sm:$0x1] %v3217_v54 }
 0x4d2   :  { %3233 = vst [vmem:[#allocation10 + $0x14] sm:$0x1] %v3218_v10  ;;  %3266 = vmatmul.bf16.vlgmr.msrb.gmra.mxu3 %v3257_v22  ;;  %3279 = vmatmul.bf16.vlgmr.msra.gmra.mxu0 %v3257_v22 }
 0x4d3   :  { %3234 = vst [vmem:[#allocation10 + $0x1c] sm:$0x1] %v3219_v20  ;;  %3292 = vmatmul.bf16.vlgmr.msra.gmra.mxu1 %v3257_v22  ;;  %4484 = vmatpush.bf16.msrb.mxu3 %v11293_v7  ;;  %v9167_v7 = vld [vmem:[#allocation5 + $0x18] sm:$0x44] }
 0x4d4   :  { %3235 = vst [vmem:[#allocation10 + $0x24] sm:$0x1] %v3220_v63 }
 0x4d5   :  { %3236 = vst [vmem:[#allocation10 + $0x2c] sm:$0x1] %v3221_v61  ;;  %v3754_v61 = vrot.slane %v9151_v5, 3 }
 0x4d6   :  { %3237 = vst [vmem:[#allocation10 + $0x34] sm:$0x1] %v3222_v13 }
 0x4d7   :  { %3238 = vst [vmem:[#allocation10 + $0x3c] sm:$0x1] %v3223_v4  ;;  %4485 = vmatpush.bf16.msrb.mxu3 %v11296_v1  ;;  %v3489_v1 = vrot.slane %v9163_v32, 4 }
 0x4d9   :  { %v3505_v47 = vunpack.c.l.bf16 %v3489_v1 }
 0x4db   :  { %4486 = vmatpush.bf16.msrb.mxu3 %v11299_v16  ;;  %v3490_v16 = vrot.slane %v9165_v11, 4 }
 0x4dd   :  { %v3506_v46 = vunpack.c.l.bf16 %v3490_v16 }
 0x4df   :  { %4487 = vmatpush.bf16.msrb.mxu3 %v11302_v9  ;;  %v9173_v9 = vld [vmem:[#allocation5 + $0x24] sm:$0x44] }
 0x4e3   :  { %4488 = vmatpush.bf16.msrb.mxu3 %v11305_v15  ;;  %v3491_v15 = vrot.slane %v9167_v7, 4 }
 0x4e5   :  { %v3507_v43 = vunpack.c.l.bf16 %v3491_v15 }
 0x4e7   :  { %4489 = vmatpush.bf16.msrb.mxu3 %v11308_v33  ;;  %v9176_v33 = vld [vmem:[#allocation5 + $0x30] sm:$0x44] }
 0x4e8   :  { %v3493_v12 = vrot.slane %v9176_v33, 4 }
 0x4ea   :  { %v3509_v21 = vunpack.c.l.bf16 %v3493_v12  ;;  %v3302_v12 = vunpack.c.l.bf16 %v9169_v40 }
 0x4eb   :  { %4490 = vmatpush.bf16.msrb.mxu3 %v11311_v25  ;;  %v3494_v25 = vrot.slane %v9169_v40, 4  ;;  %v3304_v40 = vunpack.c.l.bf16 %v9187_v52 }
 0x4ed   :  { %v3510_v28 = vunpack.c.l.bf16 %v3494_v25 }
 0x4ef   :  { %4491 = vmatpush.bf16.msrb.mxu3 %v11314_v53  ;;  %v3492_v53 = vrot.slane %v9173_v9, 4 }
 0x4f1   :  { %v3508_v8 = vunpack.c.l.bf16 %v3492_v53 }
 0x54f   :  { %v3280_v59 = vpop.f32.mrf.mxu0 }
 0x550   :  { %v3514_v2 = vrot.slane %v3280_v59, 3  ;;  %v3515_v27 = vrot.slane %v3280_v59, 4  ;;  %v3516_v30 = vrot.slane %v3280_v59, 5  ;;  %v9181_v23 = vpop.f32.mrf.mxu1  ;;  %v3517_v3 = vrot.slane %v3280_v59, 6 }
 0x551   :  { %v3518_v17 = vrot.slane %v3280_v59, 7  ;;  %v3534_v56 = vadd.f32 %v3510_v28, %v3280_v59  ;;  %v3519_v6 = vrot.slane %v3280_v59, 1  ;;  %v3520_v18 = vrot.slane %v3280_v59, 2 }
 0x552   :  { %v3529_v50 = vadd.f32 %v3514_v2, %v3505_v47  ;;  %v3530_v37 = vadd.f32 %v3515_v27, %v3506_v46  ;;  %v3531_v36 = vadd.f32 %v3516_v30, %v3507_v43  ;;  %v3532_v51 = vadd.f32 %v3517_v3, %v3508_v8 }
 0x553   :  { %v3533_v57 = vadd.f32 %v3518_v17, %v3509_v21  ;;  %v5259_v26 = vmul.f32 -1.442695, %v3534_v56  ;;  %v3535_v62 = vadd.f32 %v3519_v6, %v3511_v39  ;;  %v3536_v54 = vadd.f32 %v3520_v18, %v3512_v29 }
 0x554   :  { %v5254_v45 = vmul.f32 -1.442695, %v3529_v50  ;;  %v5255_v0 = vmul.f32 -1.442695, %v3530_v37  ;;  %v5256_v41 = vmul.f32 -1.442695, %v3531_v36  ;;  %v3297_v59 = vunpack.c.l.bf16 %v9163_v32 }
 0x555   :  { %v9185_v35 = vpop.f32.mrf.mxu3  ;;  %v5257_v34 = vmul.f32 -1.442695, %v3532_v51  ;;  %v5258_v19 = vmul.f32 -1.442695, %v3533_v57  ;;  %v5260_v20 = vmul.f32 -1.442695, %v3535_v62  ;;  %v3298_v28 = vunpack.c.l.bf16 %v9165_v11 }
 0x556   :  { %5734 = vpow2.f32 %v5254_v45  ;;  %v5261_v47 = vmul.f32 -1.442695, %v3536_v54  ;;  %v3299_v2 = vunpack.c.l.bf16 %v9167_v7  ;;  %v3300_v27 = vunpack.c.l.bf16 %v9173_v9 }
 0x557   :  { %v3282_v48 = vpop.f32.mrf.mxu0  ;;  %5736 = vpow2.f32 %v5255_v0  ;;  %v3301_v30 = vunpack.c.l.bf16 %v9176_v33  ;;  %v3303_v8 = vunpack.c.l.bf16 %v9183_v58  ;;  %v3690_v32 = vrot.slane %v9181_v23, 3 }
 0x558   :  { %v3295_v60 = vpop.f32.mrf.mxu1  ;;  %5738 = vpow2.f32 %v5256_v41  ;;  %v3306_v3 = vrot.slane %v9185_v35, 3  ;;  %v3691_v11 = vrot.slane %v9181_v23, 4  ;;  %v3307_v7 = vrot.slane %v9185_v35, 4 }
 0x559   :  { %5740 = vpow2.f32 %v5259_v26  ;;  %v3308_v9 = vrot.slane %v9185_v35, 5  ;;  %v3692_v37 = vrot.slane %v9181_v23, 5  ;;  %v3309_v21 = vrot.slane %v9185_v35, 6 }
 0x55a   :  { %5742 = vpow2.f32 %v5257_v34  ;;  %v3310_v17 = vrot.slane %v9185_v35, 7  ;;  %v3693_v58 = vrot.slane %v9181_v23, 6  ;;  %v3694_v56 = vrot.slane %v9181_v23, 7 }
 0x55b   :  { %5744 = vpow2.f32 %v5258_v19  ;;  %v3311_v45 = vrot.slane %v9185_v35, 1  ;;  %v3312_v0 = vrot.slane %v9185_v35, 2  ;;  %v3695_v55 = vrot.slane %v9181_v23, 1 }
 0x55c   :  { %v5735_v24 = vpop.eup %5734  ;;  %v3696_v57 = vrot.slane %v9181_v23, 2  ;;  %v3321_v41 = vadd.f32 %v3306_v3, %v3297_v59  ;;  %v3322_v42 = vadd.f32 %v3307_v7, %v3298_v28  ;;  %v3323_v34 = vadd.f32 %v3308_v9, %v3299_v2 }
 0x55d   :  { %v3269_v38 = vpop.f32.mrf.mxu3  ;;  %v5737_v49 = vpop.eup %5736  ;;  %v9191_v14 = vadd.f32 1.0, %v5735_v24  ;;  %v3324_v19 = vadd.f32 %v3309_v21, %v3300_v27  ;;  %v9252_v24 = vadd.f32 %v3302_v12, %v9185_v35  ;;  %v9260_v62 = vadd.f32 %v3311_v45, %v3303_v8 }
 0x55e   :  { %v5739_v44 = vpop.eup %5738  ;;  %v9193_v10 = vadd.f32 1.0, %v5737_v49  ;;  %v3325_v38 = vadd.f32 %v3310_v17, %v3301_v30 }
 0x55f   :  { %v5741_v31 = vpop.eup %5740  ;;  %v9197_v22 = vadd.f32 1.0, %v5739_v44  ;;  %5746 = vrcp.f32 %v9191_v14  ;;  %v3580_v26 = vand.u32 2147483648, %v9191_v14  ;;  %v9262_v44 = vadd.f32 %v3312_v0, %v3304_v40 }
 0x560   :  { %v5743_v63 = vpop.eup %5742  ;;  %v9201_v15 = vadd.f32 1.0, %v5741_v31  ;;  %5748 = vrcp.f32 %v9193_v10  ;;  %v3595_v6 = vand.u32 2147483648, %v9193_v10  ;;  %v3593_v59 = vand.u32 2147483647, %v9193_v10 }
 0x561   :  { %v5745_v4 = vpop.eup %5744  ;;  %5750 = vpow2.f32 %v5260_v20  ;;  %v9207_v46 = vadd.f32 1.0, %v5743_v63  ;;  %v3578_v20 = vand.u32 2147483647, %v9191_v14  ;;  %v3610_v12 = vand.u32 2147483648, %v9197_v22 }
 0x562   :  { %v9211_v43 = vadd.f32 1.0, %v5745_v4  ;;  %5752 = vrcp.f32 %v9197_v22  ;;  %v3653_v63 = vand.u32 2147483647, %v9201_v15  ;;  %v9270_v4 = vor.u32 1.1754944e-38, %v3580_v26 }
 0x563   :  { %5754 = vrcp.f32 %v9201_v15  ;;  %vm3574_vm1 = vweird.f32 %v9191_v14  ;;  %v9277_v2 = vor.u32 1.1754944e-38, %v3595_v6  ;;  %v3625_v30 = vand.u32 2147483648, %v9207_v46 }
 0x564   :  { %5756 = vpow2.f32 %v5261_v47  ;;  %vm3589_vm7 = vweird.f32 %v9193_v10  ;;  %v3640_v3 = vand.u32 2147483648, %v9211_v43  ;;  %v3608_v9 = vand.u32 2147483647, %v9197_v22 }
 0x565   :  { %v9223_v50 = vpop.eup %5746  ;;  %5758 = vrcp.f32 %v9207_v46  ;;  %v3623_v21 = vand.u32 2147483647, %v9207_v46  ;;  %vm3604_vm5 = vweird.f32 %v9197_v22  ;;  %v9294_v45 = vor.u32 1.1754944e-38, %v3610_v12 }
 0x566   :  { %v9229_v33 = vpop.eup %5748  ;;  %5760 = vrcp.f32 %v9211_v43  ;;  %v3570_v52 = vmul.f32 %v9223_v50, %v9191_v14  ;;  %vm3575_vm13 = vweird.f32 %v9223_v50  ;;  %vm9296_vm9 = vcmp.eq.f32.partialorder %v3578_v20, 8.507059e+37 }
 0x567   :  { %v5751_v36 = vpop.eup %5750  ;;  %v3585_v60 = vmul.f32 %v9229_v33, %v9193_v10  ;;  %vm3590_vm12 = vweird.f32 %v9229_v33  ;;  %v9300_v26 = vor.u32 1.1754944e-38, %v3625_v30  ;;  %vm3649_vm8 = vweird.f32 %v9201_v15  ;;  %vm9335_vm3 = vmor %vm3574_vm1, %vm3575_vm13 }
 0x568   :  { %v9239_v51 = vpop.eup %5752  ;;  %v9256_v18 = vadd.f32 1.0, %v5751_v36  ;;  %v3571_v54 = vsub.f32 1.0, %v3570_v52  ;;  %vm9305_vm10 = vcmp.eq.f32.partialorder %v3593_v59, 8.507059e+37  ;;  %vm3619_vm2 = vweird.f32 %v9207_v46  ;;  %vm9349_vm15 = vmor %vm3589_vm7, %vm3590_vm12 }
 0x569   :  { %v9245_v48 = vpop.eup %5754  ;;  %v3600_v49 = vmul.f32 %v9239_v51, %v9197_v22  ;;  %v3586_v47 = vsub.f32 1.0, %v3585_v60  ;;  %v3638_v60 = vand.u32 2147483647, %v9211_v43  ;;  %vm3605_vm11 = vweird.f32 %v9239_v51 }
 0x56a   :  { %v5757_v39 = vpop.eup %5756  ;;  %v3645_v35 = vmul.f32 %v9245_v48, %v9201_v15  ;;  %5762 = vrcp.f32 %v9256_v18  ;;  %v3572_v7 = vmul.f32 %v9223_v50, %v3571_v54  ;;  %vm3650_vm14 = vweird.f32 %v9245_v48  ;;  %vm9373_vm12 = vmor %vm3604_vm5, %vm3605_vm11 }
 0x56b   :  { %v9254_v29 = vpop.eup %5758  ;;  %v9274_v28 = vadd.f32 1.0, %v5757_v39  ;;  %v3601_v8 = vsub.f32 1.0, %v3600_v49  ;;  %v3587_v36 = vmul.f32 %v9229_v33, %v3586_v47  ;;  %v9311_v54 = vor.u32 1.1754944e-38, %v3640_v3  ;;  %vm9395_vm5 = vmor %vm3649_vm8, %vm3650_vm14 }
 0x56c   :  { %v9264_v31 = vpop.eup %5760  ;;  %v3615_v27 = vmul.f32 %v9254_v29, %v9207_v46  ;;  %v3646_v17 = vsub.f32 1.0, %v3645_v35  ;;  %v3573_v20 = vadd.f32 %v9223_v50, %v3572_v7  ;;  %v5246_v47 = vmul.f32 -1.442695, %v3321_v41 }
 0x56d   :  { %v3630_v40 = vmul.f32 %v9264_v31, %v9211_v43  ;;  %v3602_v6 = vmul.f32 %v9239_v51, %v3601_v8  ;;  %v5247_v12 = vmul.f32 -1.442695, %v3322_v42  ;;  %v3588_v59 = vadd.f32 %v9229_v33, %v3587_v36 }
 0x56e   :  { %v3616_v52 = vsub.f32 1.0, %v3615_v27  ;;  %v3647_v35 = vmul.f32 %v9245_v48, %v3646_v17  ;;  %vm9319_vm0 = vcmp.eq.f32.partialorder %v3608_v9, 8.507059e+37  ;;  %vm3634_vm6 = vweird.f32 %v9211_v43 }
 0x56f   :  { %v3631_v49 = vsub.f32 1.0, %v3630_v40  ;;  %5764 = vrcp.f32 %v9274_v28  ;;  %v5248_v8 = vmul.f32 -1.442695, %v3323_v34  ;;  %v5249_v40 = vmul.f32 -1.442695, %v3324_v19 }
 0x570   :  { %v9316_v27 = vpop.eup %5762  ;;  %v3617_v3 = vmul.f32 %v9254_v29, %v3616_v52  ;;  %vm9326_vm4 = vcmp.eq.f32.partialorder %v3653_v63, 8.507059e+37  ;;  %v3655_v41 = vand.u32 2147483648, %v9201_v15  ;;  %5766 = vpow2.f32 %v5246_v47 }
 0x571   :  { %v5250_v42 = vmul.f32 -1.442695, %v3325_v38  ;;  %v3603_v34 = vadd.f32 %v9239_v51, %v3602_v6  ;;  %v3632_v19 = vmul.f32 %v9264_v31, %v3631_v49  ;;  %5768 = vpow2.f32 %v5247_v12 }
 0x572   :  { %v5251_v63 = vmul.f32 -1.442695, %v9252_v24  ;;  %v3577_v17 = vsel %vm9335_vm3, %v9223_v50, %v3573_v20  ;;  %vm9353_vm1 = vcmp.eq.f32.partialorder %v3623_v21, 8.507059e+37  ;;  %v3648_v36 = vadd.f32 %v9245_v48, %v3647_v35 }
 0x573   :  { %v3660_v24 = vmul.f32 %v9316_v27, %v9256_v18  ;;  %5770 = vpow2.f32 %v5248_v8  ;;  %v3592_v50 = vsel %vm9349_vm15, %v9229_v33, %v3588_v59  ;;  %vm3620_vm13 = vweird.f32 %v9254_v29 }
 0x574   :  { %vm9364_vm7 = vcmp.eq.f32.partialorder %v3638_v60, 8.507059e+37  ;;  %5772 = vpow2.f32 %v5249_v40  ;;  %v5252_v21 = vmul.f32 -1.442695, %v9260_v62  ;;  %v3618_v6 = vadd.f32 %v9254_v29, %v3617_v3 }
 0x575   :  { %vm3635_vm3 = vweird.f32 %v9264_v31  ;;  %5774 = vpow2.f32 %v5250_v42  ;;  %v5253_v33 = vmul.f32 -1.442695, %v9262_v44  ;;  %v9380_v60 = vpop.eup %5764  ;;  %v9385_v62 = vsel %vm9296_vm9, %v9270_v4, %v3577_v17  ;;  %vm9411_vm9 = vmor %vm3619_vm2, %vm3620_vm13 }
 0x576   :  { %v3607_v22 = vsel %vm9373_vm12, %v9239_v51, %v3603_v34  ;;  %v3633_v49 = vadd.f32 %v9264_v31, %v3632_v19  ;;  %5776 = vpow2.f32 %v5251_v63  ;;  %v5767_v44 = vpop.eup %5766  ;;  %v9402_v4 = vsel %vm9305_vm10, %v9277_v2, %v3592_v50  ;;  %vm9431_vm8 = vmor %vm3634_vm6, %vm3635_vm3 }
 0x577   :  { %v3652_v51 = vsel %vm9395_vm5, %v9245_v48, %v3648_v36  ;;  %v3656_v0 = vor.u32 1.1754944e-38, %v3655_v41  ;;  %v3661_v35 = vsub.f32 1.0, %v3660_v24  ;;  %v5769_v47 = vpop.eup %5768  ;;  %v3668_v12 = vand.u32 2147483647, %v9256_v18 }
 0x578   :  { %v3670_v2 = vand.u32 2147483648, %v9256_v18  ;;  %5778 = vpow2.f32 %v5252_v21  ;;  %v9417_v39 = vadd.f32 1.0, %v5767_v44  ;;  %v9422_v48 = vsel %vm9319_vm0, %v9294_v45, %v3607_v22 }
 0x579   :  { %v5771_v59 = vpop.eup %5770  ;;  %v3622_v46 = vsel %vm9411_vm9, %v9254_v29, %v3618_v6  ;;  %5780 = vpow2.f32 %v5253_v33  ;;  %v9435_v40 = vadd.f32 1.0, %v5769_v47  ;;  %v3637_v45 = vsel %vm9431_vm8, %v9264_v31, %v3633_v49 }
 0x57a   :  { %v5773_v3 = vpop.eup %5772  ;;  %v9442_v30 = vsel %vm9326_vm4, %v3656_v0, %v3652_v51  ;;  %v9444_v29 = vadd.f32 1.0, %v5771_v59  ;;  %5782 = vrcp.f32 %v9417_v39  ;;  %v3662_v41 = vmul.f32 %v9316_v27, %v3661_v35 }
 0x57b   :  { %v5775_v43 = vpop.eup %5774  ;;  %v9450_v42 = vmul.f32 %v9380_v60, %v9274_v28  ;;  %v9452_v9 = vadd.f32 1.0, %v5773_v3  ;;  %5784 = vrcp.f32 %v9435_v40  ;;  %v9458_v7 = vsel %vm9353_vm1, %v9300_v26, %v3622_v46 }
 0x57c   :  { %v5777_v31 = vpop.eup %5776  ;;  %v9460_v34 = vor.u32 1.1754944e-38, %v3670_v2  ;;  %v3683_v19 = vand.u32 2147483647, %v9274_v28  ;;  %v9463_v63 = vadd.f32 1.0, %v5775_v43  ;;  %v9468_v17 = vsel %vm9364_vm7, %v9311_v54, %v3637_v45 }
 0x57d   :  { %v3685_v14 = vand.u32 2147483648, %v9274_v28  ;;  %v3372_v36 = vand.u32 2147483648, %v9417_v39  ;;  %5786 = vrcp.f32 %v9444_v29  ;;  %v3387_v21 = vand.u32 2147483648, %v9435_v40 }
 0x57e   :  { %v5779_v38 = vpop.eup %5778  ;;  %v9478_v10 = vadd.f32 %v9316_v27, %v3662_v41  ;;  %v3676_v54 = vsub.f32 1.0, %v9450_v42  ;;  %v9481_v6 = vadd.f32 1.0, %v5777_v31  ;;  %5788 = vrcp.f32 %v9452_v9 }
 0x57f   :  { %v5781_v52 = vpop.eup %5780  ;;  %vm3366_vm14 = vweird.f32 %v9417_v39  ;;  %v3370_v22 = vand.u32 2147483647, %v9417_v39  ;;  %v3402_v49 = vand.u32 2147483648, %v9444_v29  ;;  %5790 = vrcp.f32 %v9463_v63 }
 0x580   :  { %v9484_v33 = vpop.eup %5782  ;;  %v9492_v44 = vadd.f32 1.0, %v5779_v38  ;;  %v9496_v0 = vor.u32 1.1754944e-38, %v3372_v36  ;;  %vm3381_vm10 = vweird.f32 %v9435_v40  ;;  %v3385_v35 = vand.u32 2147483647, %v9435_v40 }
 0x581   :  { %v9490_v20 = vpop.eup %5784  ;;  %v3362_v51 = vmul.f32 %v9484_v33, %v9417_v39  ;;  %v9502_v15 = vor.u32 1.1754944e-38, %v3387_v21  ;;  %v3400_v2 = vand.u32 2147483647, %v9444_v29  ;;  %v3417_v59 = vand.u32 2147483648, %v9452_v9 }
 0x582   :  { %v3377_v47 = vmul.f32 %v9490_v20, %v9435_v40  ;;  %v9508_v8 = vadd.f32 1.0, %v5781_v52  ;;  %vm3396_vm11 = vweird.f32 %v9444_v29  ;;  %v3415_v45 = vand.u32 2147483647, %v9452_v9 }
 0x583   :  { %v9506_v46 = vpop.eup %5786  ;;  %v3363_v3 = vsub.f32 1.0, %v3362_v51  ;;  %5792 = vrcp.f32 %v9481_v6  ;;  %vm3367_vm2 = vweird.f32 %v9484_v33  ;;  %v9516_v31 = vor.u32 1.1754944e-38, %v3402_v49 }
 0x584   :  { %v3378_v43 = vsub.f32 1.0, %v3377_v47  ;;  %v3392_v41 = vmul.f32 %v9506_v46, %v9444_v29  ;;  %vm3411_vm0 = vweird.f32 %v9452_v9  ;;  %v9519_v36 = vpop.eup %5788  ;;  %vm9522_vm6 = vcmp.eq.f32.partialorder %v3370_v22, 8.507059e+37  ;;  %vm9557_vm3 = vmor %vm3366_vm14, %vm3367_vm2 }
 0x585   :  { %v3364_v38 = vmul.f32 %v9484_v33, %v3363_v3  ;;  %vm3382_vm4 = vweird.f32 %v9490_v20  ;;  %vm9527_vm15 = vcmp.eq.f32.partialorder %v3385_v35, 8.507059e+37  ;;  %v3430_v49 = vand.u32 2147483647, %v9463_v63  ;;  %v5791_v51 = vpop.eup %5790 }
 0x586   :  { %v3379_v47 = vmul.f32 %v9490_v20, %v3378_v43  ;;  %v3393_v53 = vsub.f32 1.0, %v3392_v41  ;;  %v3407_v22 = vmul.f32 %v9519_v36, %v9452_v9  ;;  %v3418_v3 = vor.u32 1.1754944e-38, %v3417_v59  ;;  %vm9572_vm1 = vmor %vm3381_vm10, %vm3382_vm4 }
 0x587   :  { %v3365_v25 = vadd.f32 %v9484_v33, %v3364_v38  ;;  %vm3397_vm13 = vweird.f32 %v9506_v46  ;;  %vm9538_vm7 = vcmp.eq.f32.partialorder %v3400_v2, 8.507059e+37  ;;  %vm9542_vm12 = vcmp.eq.f32.partialorder %v3415_v45, 8.507059e+37 }
 0x588   :  { %v3422_v16 = vmul.f32 %v5791_v51, %v9463_v63  ;;  %v3432_v43 = vand.u32 2147483648, %v9463_v63  ;;  %v3380_v41 = vadd.f32 %v9490_v20, %v3379_v47  ;;  %v3394_v59 = vmul.f32 %v9506_v46, %v3393_v53  ;;  %vm9591_vm10 = vmor %vm3396_vm11, %vm3397_vm13 }
 0x589   :  { %v3408_v24 = vsub.f32 1.0, %v3407_v22  ;;  %v3445_v38 = vand.u32 2147483647, %v9481_v6  ;;  %v9551_v1 = vpop.eup %5792  ;;  %vm3412_vm5 = vweird.f32 %v9519_v36  ;;  %vm9562_vm9 = vcmp.eq.f32.partialorder %v3430_v49, 8.507059e+37 }
 0x58a   :  { %v3423_v45 = vsub.f32 1.0, %v3422_v16  ;;  %vm3441_vm8 = vweird.f32 %v9481_v6  ;;  %5794 = vrcp.f32 %v9492_v44  ;;  %v3395_v39 = vadd.f32 %v9506_v46, %v3394_v59  ;;  %vm9608_vm11 = vmor %vm3411_vm0, %vm3412_vm5 }
 0x58b   :  { %v3409_v16 = vmul.f32 %v9519_v36, %v3408_v24  ;;  %vm3427_vm14 = vweird.f32 %v5791_v51  ;;  %v3447_v49 = vand.u32 2147483648, %v9481_v6  ;;  %v3369_v22 = vsel %vm9557_vm3, %v9484_v33, %v3365_v25  ;;  %v3250_v24 = vld [vmem:[#allocation5 + $0x38] sm:$0x4] }
 0x58c   :  { %v3384_v26 = vsel %vm9572_vm1, %v9490_v20, %v3380_v41  ;;  %v3424_v40 = vmul.f32 %v5791_v51, %v3423_v45  ;;  %v3437_v13 = vmul.f32 %v9551_v1, %v9481_v6  ;;  %v3433_v2 = vor.u32 1.1754944e-38, %v3432_v43 }
 0x58d   :  { %v3410_v59 = vadd.f32 %v9519_v36, %v3409_v16  ;;  %vm9596_vm2 = vcmp.eq.f32.partialorder %v3445_v38, 8.507059e+37  ;;  %v3460_v33 = vand.u32 2147483647, %v9492_v44  ;;  %v3399_v20 = vsel %vm9591_vm10, %v9506_v46, %v3395_v39  ;;  %v3246_v16 = vld [vmem:[#allocation5 + $0x20] sm:$0x4] }
 0x58e   :  { %v3425_v41 = vadd.f32 %v5791_v51, %v3424_v40  ;;  %v3438_v43 = vsub.f32 1.0, %v3437_v13  ;;  %v3462_v38 = vand.u32 2147483648, %v9492_v44  ;;  %v3374_v45 = vsel %vm9522_vm6, %v9496_v0, %v3369_v22 }
 0x58f   :  { %v3389_v46 = vsel %vm9527_vm15, %v9502_v15, %v3384_v26  ;;  %v3414_v9 = vsel %vm9608_vm11, %v9519_v36, %v3410_v59  ;;  %vm11419_vm0 = vweird.f32 %v9463_v63  ;;  %vm3456_vm1 = vweird.f32 %v9492_v44  ;;  %v3242_v36 = vld [vmem:[#allocation5 + $0x8] sm:$0x4]  ;;  %v3252_v59 = vld [vmem:[#allocation5 + $0x44] sm:$0x4] }
 0x590   :  { %vm9625_vm4 = vmor %vm11419_vm0, %vm3427_vm14  ;;  %5796 = vrcp.f32 %v9508_v8  ;;  %v5795_v13 = vpop.eup %5794  ;;  %v3439_v26 = vmul.f32 %v9551_v1, %v3438_v43  ;;  %vm3442_vm6 = vweird.f32 %v9551_v1  ;;  %v3448_v15 = vor.u32 1.1754944e-38, %v3447_v49 }
 0x591   :  { %v3429_v0 = vsel %vm9625_vm4, %v5791_v51, %v3425_v41  ;;  %v3404_v63 = vsel %vm9538_vm7, %v9516_v31, %v3399_v20  ;;  %v3419_v21 = vsel %vm9542_vm12, %v3418_v3, %v3414_v9  ;;  %v3452_v52 = vmul.f32 %v5795_v13, %v9492_v44  ;;  %v3244_v51 = vld [vmem:[#allocation5 + $0x14] sm:$0x4]  ;;  %v3248_v31 = vld [vmem:[#allocation5 + $0x2c] sm:$0x4]  ;;  %vm3443_vm12 = vmor %vm3441_vm8, %vm3442_vm6 }
 0x592   :  { %vm9641_vm15 = vcmp.eq.f32.partialorder %v3460_v33, 8.507059e+37  ;;  %v3434_v22 = vsel %vm9562_vm9, %v3433_v2, %v3429_v0  ;;  %v3440_v49 = vadd.f32 %v9551_v1, %v3439_v26  ;;  %vm3457_vm13 = vweird.f32 %v5795_v13 }
 0x593   :  { %v3463_v40 = vor.u32 1.1754944e-38, %v3462_v38  ;;  %vm3665_vm7 = vweird.f32 %v9316_v27  ;;  %v3453_v50 = vsub.f32 1.0, %v3452_v52  ;;  %v3475_v3 = vand.u32 2147483647, %v9508_v8  ;;  %v3254_v38 = vld [vmem:[#allocation5 + $0x50] sm:$0x4]  ;;  %vm3458_vm5 = vmor %vm3456_vm1, %vm3457_vm13 }
 0x594   :  { %v3705_v35 = vmul.f32 %v3690_v32, %v3374_v45  ;;  %v3706_v47 = vmul.f32 %v3691_v11, %v3389_v46  ;;  %v3444_v2 = vsel %vm3443_vm12, %v9551_v1, %v3440_v49  ;;  %v3707_v33 = vmul.f32 %v3692_v37, %v3404_v63 }
 0x595   :  { %v3708_v6 = vmul.f32 %v3693_v58, %v3419_v21  ;;  %v3713_v20 = vunpack.c.l.bf16 %v3242_v36  ;;  %vm3664_vm3 = vweird.f32 %v9256_v18  ;;  %v3449_v32 = vsel %vm9596_vm2, %v3448_v15, %v3444_v2 }
 0x596   :  { %v5797_v29 = vpop.eup %5796  ;;  %v3454_v41 = vmul.f32 %v5795_v13, %v3453_v50  ;;  %v3714_v43 = vunpack.c.l.bf16 %v3244_v51  ;;  %v3715_v11 = vunpack.c.l.bf16 %v3246_v16  ;;  %v3477_v1 = vand.u32 2147483648, %v9508_v8  ;;  %vm9703_vm4 = vmor %vm3664_vm3, %vm3665_vm7 }
 0x597   :  { %v3467_v45 = vmul.f32 %v5797_v29, %v9508_v8  ;;  %v3709_v37 = vmul.f32 %v3694_v56, %v3434_v22  ;;  %v3716_v46 = vunpack.c.l.bf16 %v3248_v31  ;;  %v3710_v9 = vmul.f32 %v3449_v32, %v9181_v23 }
 0x598   :  { %v3455_v58 = vadd.f32 %v5795_v13, %v3454_v41  ;;  %v3717_v53 = vunpack.c.l.bf16 %v3250_v24  ;;  %v3718_v0 = vunpack.c.l.bf16 %v3252_v59  ;;  %vm3472_vm9 = vweird.f32 %v5797_v29 }
 0x599   :  { %v3468_v25 = vsub.f32 1.0, %v3467_v45  ;;  %v3721_v26 = vadd.f32 %v3713_v20, %v3705_v35  ;;  %v3722_v15 = vadd.f32 %v3714_v43, %v3706_v47  ;;  %vm9676_vm8 = vcmp.eq.f32.partialorder %v3668_v12, 8.507059e+37  ;;  %v3256_v12 = vld [vmem:[#allocation5 + $0x5c] sm:$0x4] }
 0x59a   :  { %vm3679_vm14 = vweird.f32 %v9274_v28  ;;  %v3459_v56 = vsel %vm3458_vm5, %v5795_v13, %v3455_v58  ;;  %v3719_v63 = vunpack.c.l.bf16 %v3254_v38  ;;  %v3723_v21 = vadd.f32 %v3715_v11, %v3707_v33 }
 0x59b   :  { %v3724_v52 = vadd.f32 %v3716_v46, %v3708_v6  ;;  %v3464_v44 = vsel %vm9641_vm15, %v3463_v40, %v3459_v56  ;;  %v3469_v51 = vmul.f32 %v5797_v29, %v3468_v25  ;;  %v3725_v16 = vadd.f32 %v3717_v53, %v3709_v37 }
 0x59c   :  { %5798 = vtanh.f32 %v3721_v26  ;;  %v3677_v22 = vmul.f32 %v9380_v60, %v3676_v54  ;;  %v3711_v49 = vmul.f32 %v3695_v55, %v3464_v44  ;;  %v3726_v31 = vadd.f32 %v3718_v0, %v3710_v9 }
 0x59d   :  { %5800 = vtanh.f32 %v3722_v15  ;;  %v3686_v13 = vor.u32 1.1754944e-38, %v3685_v14  ;;  %v3470_v50 = vadd.f32 %v5797_v29, %v3469_v51  ;;  %vm3471_vm10 = vweird.f32 %v9508_v8 }
 0x59e   :  { %5802 = vtanh.f32 %v3723_v21  ;;  %vm3680_vm2 = vweird.f32 %v9380_v60  ;;  %vm9694_vm11 = vcmp.eq.f32.partialorder %v3683_v19, 8.507059e+37  ;;  %vm3473_vm0 = vmor %vm3471_vm10, %vm3472_vm9  ;;  %v3478_v55 = vor.u32 1.1754944e-38, %v3477_v1 }
 0x59f   :  { %v3727_v54 = vadd.f32 %v3719_v63, %v3711_v49  ;;  %5804 = vtanh.f32 %v3724_v52  ;;  %v3474_v8 = vsel %vm3473_vm0, %v5797_v29, %v3470_v50  ;;  %vm3476_vm1 = vcmp.eq.f32.partialorder %v3475_v3, 8.507059e+37  ;;  %vm9732_vm6 = vmor %vm3679_vm14, %vm3680_vm2 }
 0x5a0   :  { %v3720_v39 = vunpack.c.l.bf16 %v3256_v12  ;;  %5806 = vtanh.f32 %v3725_v16  ;;  %v3667_v19 = vsel %vm9703_vm4, %v9316_v27, %v9478_v10  ;;  %v3678_v40 = vadd.f32 %v9380_v60, %v3677_v22 }
 0x5a1   :  { %v3479_v35 = vsel %vm3476_vm1, %v3478_v55, %v3474_v8  ;;  %5808 = vtanh.f32 %v3726_v31  ;;  %v3740_v18 = vsub.f32 1.0, %v9458_v7  ;;  %v3741_v24 = vsub.f32 1.0, %v9468_v17 }
 0x5a2   :  { %v5799_v47 = vpop.eup %5798  ;;  %v3712_v59 = vmul.f32 %v3696_v57, %v3479_v35  ;;  %5810 = vtanh.f32 %v3727_v54  ;;  %v3742_v2 = vsub.f32 1.0, %v9442_v30  ;;  %v3769_v27 = vmul.f32 %v3754_v61, %v9385_v62 }
 0x5a3   :  { %v5801_v3 = vpop.eup %5800  ;;  %v11430_v10 = vrot.slane %v9151_v5, 4  ;;  %v11431_v6 = vsub.f32 1.0, %v9385_v62  ;;  %v3672_v23 = vsel %vm9676_vm8, %v9460_v34, %v3667_v19  ;;  %v11434_v61 = vrot.slane %v9151_v5, 5 }
 0x5a4   :  { %v5803_v29 = vpop.eup %5802  ;;  %v3728_v41 = vadd.f32 %v3720_v39, %v3712_v59  ;;  %v11435_v62 = vsub.f32 1.0, %v9402_v4  ;;  %v3682_v34 = vsel %vm9732_vm6, %v9380_v60, %v3678_v40  ;;  %v11436_v28 = vrot.slane %v9151_v5, 6 }
 0x5a5   :  { %v3770_v33 = vmul.f32 %v11430_v10, %v9402_v4  ;;  %v3745_v20 = vmul.f32 %v5799_v47, %v11431_v6  ;;  %v3771_v32 = vmul.f32 %v11434_v61, %v9422_v48  ;;  %v5805_v11 = vpop.eup %5804  ;;  %v11437_v45 = vsub.f32 1.0, %v9422_v48  ;;  %v3790_v47 = vpop.permute.xlu2 %3789  ;;  %v3841_v61 = vld [vmem:[#allocation5] sm:$0x88] }
 0x5a6   :  { %v3746_v43 = vmul.f32 %v5801_v3, %v11435_v62  ;;  %v3772_v38 = vmul.f32 %v11436_v28, %v9458_v7  ;;  %v5807_v46 = vpop.eup %5806  ;;  %v11438_v58 = vrot.slane %v9151_v5, 7  ;;  %5812 = vtanh.f32 %v3728_v41  ;;  %v3843_v41 = vld [vmem:[#allocation5 + $0xc] sm:$0x88]  ;;  %v9773_v62 = vld [vmem:[#allocation5 + $0x18] sm:$0x88] }
 0x5a7   :  { %v3747_v1 = vmul.f32 %v5803_v29, %v11437_v45  ;;  %v3777_v37 = vadd.f32 %v3769_v27, %v3745_v20  ;;  %v3748_v4 = vmul.f32 %v5805_v11, %v3740_v18  ;;  %v5809_v0 = vpop.eup %5808  ;;  %v3743_v25 = vsub.f32 1.0, %v3672_v23  ;;  %v9779_v28 = vld [vmem:[#allocation5 + $0x3c] sm:$0x88] }
 0x5a8   :  { %v3773_v9 = vmul.f32 %v11438_v58, %v9468_v17  ;;  %v3778_v53 = vadd.f32 %v3770_v33, %v3746_v43  ;;  %v3749_v26 = vmul.f32 %v5807_v46, %v3741_v24  ;;  %v5811_v36 = vpop.eup %5810  ;;  %v3687_v7 = vsel %vm9694_vm11, %v3686_v13, %v3682_v34  ;;  %v9775_v43 = vld [vmem:[#allocation5 + $0x24] sm:$0x88]  ;;  %v9777_v34 = vld [vmem:[#allocation5 + $0x30] sm:$0x88] }
 0x5a9   :  { %v3779_v60 = vadd.f32 %v3771_v32, %v3747_v1  ;;  %v3800_v15 = vrot.slane %v3777_v37, 5  ;;  %v3750_v48 = vmul.f32 %v5809_v0, %v3742_v2  ;;  %v3780_v56 = vadd.f32 %v3772_v38, %v3748_v4  ;;  %v3853_v32 = vld [vmem:[#allocation5 + $0x48] sm:$0x88] }
 0x5aa   :  { %v3801_v63 = vrot.slane %v3778_v53, 4  ;;  %v11439_v21 = vrot.slane %v9151_v5, 1  ;;  %v3751_v44 = vmul.f32 %v5811_v36, %v3743_v25  ;;  %v3781_v17 = vadd.f32 %v3773_v9, %v3749_v26 }
 0x5ab   :  { %v3803_v51 = vrot.slane %v3779_v60, 3  ;;  %v3760_v16 = vrot.slane %v9151_v5, 2  ;;  %v3774_v22 = vmul.f32 %v9442_v30, %v9151_v5  ;;  %vm11440_vm15 = vcmask 1041409  }
 0x5ac   :  { %v3775_v52 = vmul.f32 %v11439_v21, %v3672_v23  ;;  %v3802_v12 = vsel %vm11440_vm15, %v3801_v63, %v3800_v15  ;;  %v3805_v49 = vrot.slane %v3780_v56, 2  ;;  %v3744_v31 = vsub.f32 1.0, %v3687_v7  ;;  %v5813_v55 = vpop.eup %5812 }
 0x5ad   :  { %vm11441_vm13 = vcmask 1042434   ;;  %v3807_v42 = vrot.slane %v3781_v17, 1  ;;  %v3782_v54 = vadd.f32 %v3774_v22, %v3750_v48  ;;  %vm11442_vm7 = vcmask 1043459  }
 0x5ae   :  { %v3783_v50 = vadd.f32 %v3775_v52, %v3751_v44  ;;  %v3804_v13 = vsel %vm11441_vm13, %v3803_v51, %v3802_v12  ;;  %v3776_v8 = vmul.f32 %v3760_v16, %v3687_v7  ;;  %v3752_v39 = vmul.f32 %v5813_v55, %v3744_v31  ;;  %v3855_v52 = vld [vmem:[#allocation5 + $0x54] sm:$0x88] }
 0x5af   :  { %v3806_v14 = vsel %vm11442_vm7, %v3805_v49, %v3804_v13  ;;  %vm11443_vm12 = vcmask 1044484   ;;  %vm11444_vm3 = vcmask 1045509   ;;  %vm11445_vm5 = vcmask 1046534  }
 0x5b0   :  { %v3808_v19 = vsel %vm11443_vm12, %v3807_v42, %v3806_v14  ;;  %v3810_v35 = vrot.slane %v3783_v50, 7  ;;  %v3784_v30 = vadd.f32 %v3776_v8, %v3752_v39  ;;  %vm3791_vm9 = vcmp.eq.s32.totalorder %v3790_v47, 1 }
 0x5b1   :  { %v3809_v40 = vsel %vm11444_vm3, %v3782_v54, %v3808_v19  ;;  %vm11446_vm8 = vcmask 1047559   ;;  %v3903_v11 = vunpack.c.l.bf16 %v3853_v32  ;;  %v3897_v38 = vunpack.c.l.bf16 %v3841_v61 }
 0x5b2   :  { %v3811_v18 = vsel %vm11445_vm5, %v3810_v35, %v3809_v40  ;;  %v3812_v24 = vrot.slane %v3784_v30, 6  ;;  %v3898_v45 = vunpack.c.l.bf16 %v3843_v41  ;;  %v3899_v1 = vunpack.c.l.bf16 %v9773_v62 }
 0x5b3   :  { %v3900_v37 = vunpack.c.l.bf16 %v9775_v43  ;;  %v3901_v58 = vunpack.c.l.bf16 %v9777_v34  ;;  %v3902_v9 = vunpack.c.l.bf16 %v9779_v28  ;;  %v3904_v49 = vunpack.c.l.bf16 %v3855_v52 }
 0x5b4   :  { %v3813_v59 = vsel %vm11446_vm8, %v3812_v24, %v3811_v18  ;;  %v4089_v14 = vrot.slane %v3841_v61, 4  ;;  %v4090_v8 = vrot.slane %v3843_v41, 4  ;;  %v4095_v39 = vrot.slane %v3853_v32, 4 }
 0x5b5   :  { %v3815_v3 = vsel %vm3791_vm9, %v3813_v59, 0.0  ;;  %v9767_v2 = vsel %vm3791_vm9, %v3813_v59, %v9151_v5  ;;  %v4091_v40 = vrot.slane %v9773_v62, 4  ;;  %v4092_v35 = vrot.slane %v9775_v43, 4 }
 0x5b6   :  { %v3817_v27 = vrot.slane %v3815_v3, 1  ;;  %v3818_v10 = vrot.slane %v3815_v3, 2  ;;  %v3819_v33 = vrot.slane %v3815_v3, 3  ;;  %3831 = vst [vmem:[#allocation10 + $0x5] sm:$0x1] %v3815_v3  ;;  %v3820_v6 = vrot.slane %v3815_v3, 4 }
 0x5b7   :  { %v3857_v20 = vpack.c.bf16 %v9767_v2, %v9767_v2  ;;  %v3821_v29 = vrot.slane %v3815_v3, 5  ;;  %v3822_v23 = vrot.slane %v3815_v3, 6  ;;  %v3823_v57 = vrot.slane %v3815_v3, 7 }
 0x5b8   :  { %3832 = vst [vmem:[#allocation10 + $0xd] sm:$0x1] %v3817_v27  ;;  %v4093_v30 = vrot.slane %v9777_v34, 4  ;;  %v4094_v47 = vrot.slane %v9779_v28, 4  ;;  %v4096_v18 = vrot.slane %v3855_v52, 4  ;;  %v4105_v3 = vunpack.c.l.bf16 %v4089_v14 }
 0x5b9   :  { %3833 = vst [vmem:[#allocation10 + $0x15] sm:$0x1] %v3818_v10  ;;  %3866 = vmatmul.bf16.vlgmr.msra.gmra.mxu2 %v3857_v20  ;;  %3879 = vmatmul.bf16.vlgmr.msra.gmra.mxu3 %v3857_v20  ;;  %v4106_v27 = vunpack.c.l.bf16 %v4090_v8  ;;  %v4111_v10 = vunpack.c.l.bf16 %v4095_v39 }
 0x5ba   :  { %3834 = vst [vmem:[#allocation10 + $0x1d] sm:$0x1] %v3819_v33  ;;  %3892 = vmatmul.bf16.vlgmr.msrb.gmra.mxu0 %v3857_v20  ;;  %v4109_v32 = vunpack.c.l.bf16 %v4093_v30  ;;  %v9795_v41 = vunpack.c.l.bf16 %v4094_v47  ;;  %v9797_v62 = vunpack.c.l.bf16 %v4096_v18 }
 0x5bb   :  { %3835 = vst [vmem:[#allocation10 + $0x25] sm:$0x1] %v3820_v6 }
 0x5bc   :  { %3836 = vst [vmem:[#allocation10 + $0x2d] sm:$0x1] %v3821_v29  ;;  %v4107_v29 = vunpack.c.l.bf16 %v4091_v40 }
 0x5bd   :  { %3837 = vst [vmem:[#allocation10 + $0x35] sm:$0x1] %v3822_v23  ;;  %v4108_v23 = vunpack.c.l.bf16 %v4092_v35 }
 0x5be   :  { %3838 = vst [vmem:[#allocation10 + $0x3d] sm:$0x1] %v3823_v57 }
 0x637   :  { %v9771_v5 = vpop.f32.mrf.mxu0 }
 0x63c   :  { %v3867_v46 = vpop.f32.mrf.mxu2  ;;  %v9785_v4 = vpop.f32.mrf.mxu3 }
 0x63d   :  { %v3906_v53 = vrot.slane %v3867_v46, 2  ;;  %v3907_v0 = vrot.slane %v3867_v46, 3  ;;  %v3908_v25 = vrot.slane %v3867_v46, 4  ;;  %v3909_v26 = vrot.slane %v3867_v46, 5 }
 0x63e   :  { %v3910_v60 = vrot.slane %v3867_v46, 6  ;;  %v3911_v15 = vrot.slane %v3867_v46, 7  ;;  %v3927_v36 = vadd.f32 %v3903_v11, %v3867_v46  ;;  %v3912_v31 = vrot.slane %v3867_v46, 1 }
 0x63f   :  { %v3921_v7 = vadd.f32 %v3906_v53, %v3897_v38  ;;  %v3922_v48 = vadd.f32 %v3907_v0, %v3898_v45  ;;  %v3923_v56 = vadd.f32 %v3908_v25, %v3899_v1  ;;  %v3924_v63 = vadd.f32 %v3909_v26, %v3900_v37  ;;  %v3895_v21 = vpop.f32.mrf.mxu0 }
 0x640   :  { %v3925_v44 = vadd.f32 %v3910_v60, %v3901_v58  ;;  %v3926_v17 = vadd.f32 %v3911_v15, %v3902_v9  ;;  %v5269_v51 = vmul.f32 -1.442695, %v3927_v36  ;;  %v3928_v19 = vadd.f32 %v3912_v31, %v3904_v49 }
 0x641   :  { %v5263_v16 = vmul.f32 -1.442695, %v3921_v7  ;;  %v5264_v22 = vmul.f32 -1.442695, %v3922_v48  ;;  %v5265_v12 = vmul.f32 -1.442695, %v3923_v56 }
 0x642   :  { %v5266_v50 = vmul.f32 -1.442695, %v3924_v63  ;;  %5814 = vpow2.f32 %v5269_v51  ;;  %v5267_v13 = vmul.f32 -1.442695, %v3925_v44  ;;  %v5268_v42 = vmul.f32 -1.442695, %v3926_v17 }
 0x643   :  { %5816 = vpow2.f32 %v5263_v16  ;;  %v5270_v6 = vmul.f32 -1.442695, %v3928_v19  ;;  %v4290_v11 = vrot.slane %v9771_v5, 2  ;;  %v4114_v28 = vrot.slane %v9785_v4, 2 }
 0x644   :  { %5818 = vpow2.f32 %v5264_v22  ;;  %v3869_v55 = vpop.f32.mrf.mxu2  ;;  %v3882_v54 = vpop.f32.mrf.mxu3  ;;  %v4291_v45 = vrot.slane %v9771_v5, 3  ;;  %v4292_v1 = vrot.slane %v9771_v5, 4  ;;  %v4115_v9 = vrot.slane %v9785_v4, 3 }
 0x645   :  { %5820 = vpow2.f32 %v5265_v12  ;;  %v4116_v53 = vrot.slane %v9785_v4, 4  ;;  %v4293_v0 = vrot.slane %v9771_v5, 5  ;;  %v4117_v25 = vrot.slane %v9785_v4, 5 }
 0x646   :  { %5822 = vpow2.f32 %v5266_v50  ;;  %v4118_v26 = vrot.slane %v9785_v4, 6  ;;  %v4294_v60 = vrot.slane %v9771_v5, 6  ;;  %v4295_v15 = vrot.slane %v9771_v5, 7 }
 0x647   :  { %5824 = vpow2.f32 %v5267_v13  ;;  %v4129_v7 = vadd.f32 %v4114_v28, %v4105_v3  ;;  %v4119_v56 = vrot.slane %v9785_v4, 7  ;;  %v9826_v63 = vadd.f32 %v4111_v10, %v9785_v4 }
 0x648   :  { %v5815_v24 = vpop.eup %5814  ;;  %5826 = vpow2.f32 %v5268_v42  ;;  %v4120_v52 = vrot.slane %v9785_v4, 1  ;;  %v9832_v44 = vadd.f32 %v4115_v9, %v4106_v27  ;;  %v9834_v17 = vadd.f32 %v4116_v53, %v4107_v29  ;;  %v3850_v9 = vld [vmem:[#allocation5 + $0x38] sm:$0x8] }
 0x649   :  { %v5817_v59 = vpop.eup %5816  ;;  %v9819_v36 = vadd.f32 1.0, %v5815_v24  ;;  %v9841_v12 = vadd.f32 %v4117_v25, %v4108_v23  ;;  %v9843_v49 = vadd.f32 %v4118_v26, %v4109_v32  ;;  %v9849_v13 = vmul.f32 -1.442695, %v4129_v7 }
 0x64a   :  { %v5819_v33 = vpop.eup %5818  ;;  %v9791_v20 = vadd.f32 1.0, %v5817_v59 }
 0x64b   :  { %v5821_v57 = vpop.eup %5820  ;;  %v9793_v61 = vadd.f32 1.0, %v5819_v33 }
 0x64c   :  { %v5823_v43 = vpop.eup %5822  ;;  %v9800_v34 = vadd.f32 1.0, %v5821_v57  ;;  %5828 = vrcp.f32 %v9791_v20  ;;  %v3972_v22 = vand.u32 2147483648, %v9791_v20  ;;  %vm3966_vm14 = vweird.f32 %v9791_v20 }
 0x64d   :  { %v5825_v38 = vpop.eup %5824  ;;  %v9806_v37 = vadd.f32 1.0, %v5823_v43  ;;  %5830 = vrcp.f32 %v9793_v61  ;;  %v3970_v54 = vand.u32 2147483647, %v9791_v20  ;;  %v3987_v14 = vand.u32 2147483648, %v9793_v61 }
 0x64e   :  { %v5827_v46 = vpop.eup %5826  ;;  %5832 = vpow2.f32 %v5270_v6  ;;  %v9809_v58 = vadd.f32 1.0, %v5825_v38  ;;  %vm3981_vm10 = vweird.f32 %v9793_v61  ;;  %v3985_v39 = vand.u32 2147483647, %v9793_v61 }
 0x64f   :  { %5834 = vrcp.f32 %v9800_v34  ;;  %v9821_v48 = vadd.f32 1.0, %v5827_v46  ;;  %v3973_v30 = vor.u32 1.1754944e-38, %v3972_v22  ;;  %vm3996_vm2 = vweird.f32 %v9800_v34 }
 0x650   :  { %5836 = vrcp.f32 %v9806_v37  ;;  %v4000_v47 = vand.u32 2147483647, %v9800_v34  ;;  %vm9872_vm11 = vcmp.eq.f32.partialorder %v3970_v54, 8.507059e+37  ;;  %v3988_v33 = vor.u32 1.1754944e-38, %v3987_v14 }
 0x651   :  { %5838 = vrcp.f32 %v9809_v58  ;;  %v4002_v6 = vand.u32 2147483648, %v9800_v34  ;;  %vm4011_vm0 = vweird.f32 %v9806_v37  ;;  %vm9883_vm1 = vcmp.eq.f32.partialorder %v3985_v39, 8.507059e+37 }
 0x652   :  { %v9828_v21 = vpop.eup %5828  ;;  %5840 = vrcp.f32 %v9819_v36  ;;  %v4015_v28 = vand.u32 2147483647, %v9806_v37  ;;  %vm9893_vm15 = vcmp.eq.f32.partialorder %v4000_v47, 8.507059e+37  ;;  %v4017_v53 = vand.u32 2147483648, %v9806_v37 }
 0x653   :  { %v9836_v51 = vpop.eup %5830  ;;  %v3962_v16 = vmul.f32 %v9828_v21, %v9791_v20  ;;  %5842 = vrcp.f32 %v9821_v48  ;;  %vm3967_vm4 = vweird.f32 %v9828_v21  ;;  %vm4026_vm7 = vweird.f32 %v9809_v58 }
 0x654   :  { %v5833_v31 = vpop.eup %5832  ;;  %v3977_v50 = vmul.f32 %v9836_v51, %v9793_v61  ;;  %vm3982_vm6 = vweird.f32 %v9836_v51  ;;  %vm9906_vm12 = vmor %vm3966_vm14, %vm3967_vm4  ;;  %v4003_v20 = vor.u32 1.1754944e-38, %v4002_v6  ;;  %vm9922_vm9 = vcmp.eq.f32.partialorder %v4015_v28, 8.507059e+37 }
 0x655   :  { %v9851_v42 = vpop.eup %5834  ;;  %v3963_v55 = vsub.f32 1.0, %v3962_v16  ;;  %v9867_v24 = vadd.f32 1.0, %v5833_v31  ;;  %vm9917_vm5 = vmor %vm3981_vm10, %vm3982_vm6  ;;  %v4045_v6 = vand.u32 2147483647, %v9821_v48  ;;  %v4047_v10 = vand.u32 2147483648, %v9821_v48 }
 0x656   :  { %v3978_v8 = vsub.f32 1.0, %v3977_v50  ;;  %v3992_v19 = vmul.f32 %v9851_v42, %v9800_v34  ;;  %v9860_v40 = vpop.eup %5836  ;;  %vm3997_vm13 = vweird.f32 %v9851_v42  ;;  %v4030_v34 = vand.u32 2147483647, %v9809_v58 }
 0x657   :  { %v3964_v35 = vmul.f32 %v9828_v21, %v3963_v55  ;;  %v9865_v18 = vpop.eup %5838  ;;  %v4007_v27 = vmul.f32 %v9860_v40, %v9806_v37  ;;  %vm4012_vm3 = vweird.f32 %v9860_v40  ;;  %vm9932_vm14 = vmor %vm3996_vm2, %vm3997_vm13  ;;  %5844 = vrcp.f32 %v9867_v24 }
 0x658   :  { %v3979_v59 = vmul.f32 %v9836_v51, %v3978_v8  ;;  %v3993_v3 = vsub.f32 1.0, %v3992_v19  ;;  %v4022_v29 = vmul.f32 %v9865_v18, %v9809_v58  ;;  %v9880_v23 = vpop.eup %5840  ;;  %vm4027_vm8 = vweird.f32 %v9865_v18  ;;  %vm9943_vm10 = vmor %vm4011_vm0, %vm4012_vm3 }
 0x659   :  { %v4008_v43 = vsub.f32 1.0, %v4007_v27  ;;  %v9889_v38 = vpop.eup %5842  ;;  %v3965_v46 = vadd.f32 %v9828_v21, %v3964_v35  ;;  %v4032_v19 = vand.u32 2147483648, %v9809_v58  ;;  %v4018_v27 = vor.u32 1.1754944e-38, %v4017_v53  ;;  %vm9956_vm2 = vmor %vm4026_vm7, %vm4027_vm8 }
 0x65a   :  { %v3994_v32 = vmul.f32 %v9851_v42, %v3993_v3  ;;  %v4023_v25 = vsub.f32 1.0, %v4022_v29  ;;  %v3980_v26 = vadd.f32 %v9836_v51, %v3979_v59  ;;  %v4037_v50 = vmul.f32 %v9889_v38, %v9821_v48  ;;  %v3842_v29 = vld [vmem:[#allocation5 + $0x8] sm:$0x8] }
 0x65b   :  { %v4009_v7 = vmul.f32 %v9860_v40, %v4008_v43  ;;  %v3969_v8 = vsel %vm9906_vm12, %v9828_v21, %v3965_v46  ;;  %v4052_v21 = vmul.f32 %v9880_v23, %v9819_v36  ;;  %vm4042_vm0 = vweird.f32 %v9889_v38 }
 0x65c   :  { %v3995_v22 = vadd.f32 %v9851_v42, %v3994_v32  ;;  %v4024_v31 = vmul.f32 %v9865_v18, %v4023_v25  ;;  %v4038_v35 = vsub.f32 1.0, %v4037_v50  ;;  %v3984_v47 = vsel %vm9917_vm5, %v9836_v51, %v3980_v26 }
 0x65d   :  { %v4010_v54 = vadd.f32 %v9860_v40, %v4009_v7  ;;  %v3974_v32 = vsel %vm9872_vm11, %v3973_v30, %v3969_v8  ;;  %v3989_v28 = vsel %vm9883_vm1, %v3988_v33, %v3984_v47  ;;  %v4033_v46 = vor.u32 1.1754944e-38, %v4032_v19  ;;  %v3846_v30 = vld [vmem:[#allocation5 + $0x20] sm:$0x8]  ;;  %v3852_v47 = vld [vmem:[#allocation5 + $0x44] sm:$0x8] }
 0x65e   :  { %v4025_v39 = vadd.f32 %v9865_v18, %v4024_v31  ;;  %v3999_v3 = vsel %vm9932_vm14, %v9851_v42, %v3995_v22  ;;  %v4039_v51 = vmul.f32 %v9889_v38, %v4038_v35  ;;  %v3844_v42 = vld [vmem:[#allocation5 + $0x14] sm:$0x8]  ;;  %vm4031_vm11 = vcmp.eq.f32.partialorder %v4030_v34, 8.507059e+37  ;;  %v9986_v22 = vpop.eup %5844 }
 0x65f   :  { %v4014_v43 = vsel %vm9943_vm10, %v9860_v40, %v4010_v54  ;;  %v4004_v25 = vsel %vm9893_vm15, %v4003_v20, %v3999_v3  ;;  %vm4041_vm4 = vweird.f32 %v9821_v48  ;;  %v4053_v40 = vsub.f32 1.0, %v4052_v21 }
 0x660   :  { %v4029_v58 = vsel %vm9956_vm2, %v9865_v18, %v4025_v39  ;;  %v4040_v53 = vadd.f32 %v9889_v38, %v4039_v51  ;;  %v3848_v18 = vld [vmem:[#allocation5 + $0x2c] sm:$0x8]  ;;  %v4019_v26 = vsel %vm9922_vm9, %v4018_v27, %v4014_v43  ;;  %vm9980_vm6 = vmor %vm4041_vm4, %vm4042_vm0  ;;  %v4305_v57 = vmul.f32 %v4290_v11, %v3974_v32 }
 0x661   :  { %v4034_v7 = vsel %vm4031_vm11, %v4033_v46, %v4029_v58  ;;  %v4313_v16 = vunpack.c.l.bf16 %v3842_v29  ;;  %vm4046_vm1 = vcmp.eq.f32.partialorder %v4045_v6, 8.507059e+37  ;;  %v4306_v31 = vmul.f32 %v4291_v45, %v3989_v28 }
 0x662   :  { %v4044_v48 = vsel %vm9980_vm6, %v9889_v38, %v4040_v53  ;;  %v4314_v50 = vunpack.c.l.bf16 %v3844_v42  ;;  %v4048_v55 = vor.u32 1.1754944e-38, %v4047_v10  ;;  %v4067_v20 = vmul.f32 %v9986_v22, %v9867_v24  ;;  %v3854_v10 = vld [vmem:[#allocation5 + $0x50] sm:$0x8] }
 0x663   :  { %v4307_v11 = vmul.f32 %v4292_v1, %v4004_v25  ;;  %v4315_v54 = vunpack.c.l.bf16 %v3846_v30  ;;  %v4054_v14 = vmul.f32 %v9880_v23, %v4053_v40  ;;  %v4308_v8 = vmul.f32 %v4293_v0, %v4019_v26 }
 0x664   :  { %v4309_v38 = vmul.f32 %v4294_v60, %v4034_v7  ;;  %v4316_v61 = vunpack.c.l.bf16 %v3848_v18  ;;  %v4049_v39 = vsel %vm4046_vm1, %v4048_v55, %v4044_v48  ;;  %v4068_v45 = vsub.f32 1.0, %v4067_v20 }
 0x665   :  { %v4317_v19 = vunpack.c.l.bf16 %v3850_v9  ;;  %v4321_v35 = vadd.f32 %v4313_v16, %v4305_v57  ;;  %v4322_v59 = vadd.f32 %v4314_v50, %v4306_v31  ;;  %v4134_v1 = vadd.f32 %v4119_v56, %v9795_v41 }
 0x666   :  { %5846 = vpow2.f32 %v9849_v13  ;;  %v5272_v34 = vmul.f32 -1.442695, %v9832_v44  ;;  %vm4057_vm15 = vweird.f32 %v9880_v23  ;;  %v4062_v0 = vand.u32 2147483648, %v9819_v36 }
 0x667   :  { %v4069_v60 = vmul.f32 %v9986_v22, %v4068_v45  ;;  %v4323_v21 = vadd.f32 %v4315_v54, %v4307_v11  ;;  %v4055_v3 = vadd.f32 %v9880_v23, %v4054_v14  ;;  %vm4072_vm13 = vweird.f32 %v9986_v22 }
 0x668   :  { %v4310_v27 = vmul.f32 %v4295_v15, %v4049_v39  ;;  %v4324_v37 = vadd.f32 %v4316_v61, %v4308_v8  ;;  %v4318_v56 = vunpack.c.l.bf16 %v3852_v47  ;;  %v4325_v13 = vadd.f32 %v4317_v19, %v4309_v38 }
 0x669   :  { %v4070_v41 = vadd.f32 %v9986_v22, %v4069_v60  ;;  %5848 = vtanh.f32 %v4321_v35  ;;  %vm4056_vm7 = vweird.f32 %v9819_v36  ;;  %v4060_v44 = vand.u32 2147483647, %v9819_v36 }
 0x66a   :  { %v4077_v51 = vand.u32 2147483648, %v9867_v24  ;;  %5850 = vtanh.f32 %v4322_v59  ;;  %vm10020_vm12 = vmor %vm4056_vm7, %vm4057_vm15  ;;  %vm4071_vm3 = vweird.f32 %v9867_v24  ;;  %v4075_v15 = vand.u32 2147483647, %v9867_v24 }
 0x66b   :  { %5852 = vtanh.f32 %v4323_v21  ;;  %v5273_v29 = vmul.f32 -1.442695, %v9834_v17  ;;  %v4059_v36 = vsel %vm10020_vm12, %v9880_v23, %v4055_v3  ;;  %vm10032_vm5 = vmor %vm4071_vm3, %vm4072_vm13  ;;  %v4136_v58 = vadd.f32 %v4120_v52, %v9797_v62  ;;  %v3856_v52 = vld [vmem:[#allocation5 + $0x5c] sm:$0x8] }
 0x66c   :  { %v5847_v32 = vpop.eup %5846  ;;  %5854 = vtanh.f32 %v4324_v37  ;;  %v5274_v24 = vmul.f32 -1.442695, %v9841_v12  ;;  %v4063_v42 = vor.u32 1.1754944e-38, %v4062_v0  ;;  %v4074_v17 = vsel %vm10032_vm5, %v9986_v22, %v4070_v41 }
 0x66d   :  { %v4326_v28 = vadd.f32 %v4318_v56, %v4310_v27  ;;  %5856 = vtanh.f32 %v4325_v13  ;;  %vm4061_vm9 = vcmp.eq.f32.partialorder %v4060_v44, 8.507059e+37  ;;  %v4078_v23 = vor.u32 1.1754944e-38, %v4077_v51 }
 0x66e   :  { %5858 = vpow2.f32 %v5272_v34  ;;  %v5275_v46 = vmul.f32 -1.442695, %v9843_v49  ;;  %v4064_v30 = vsel %vm4061_vm9, %v4063_v42, %v4059_v36  ;;  %vm4076_vm8 = vcmp.eq.f32.partialorder %v4075_v15, 8.507059e+37 }
 0x66f   :  { %v10044_v53 = vpop.eup %5848  ;;  %5860 = vpow2.f32 %v5273_v29  ;;  %v5276_v4 = vmul.f32 -1.442695, %v4134_v1  ;;  %v4079_v12 = vsel %vm4076_vm8, %v4078_v23, %v4074_v17  ;;  %v5277_v25 = vmul.f32 -1.442695, %v9826_v63 }
 0x670   :  { %v10046_v62 = vpop.eup %5850  ;;  %5862 = vpow2.f32 %v5274_v24  ;;  %v4296_v18 = vrot.slane %v9771_v5, 1  ;;  %v5278_v49 = vmul.f32 -1.442695, %v4136_v58  ;;  %v4311_v7 = vmul.f32 %v4064_v30, %v9771_v5 }
 0x671   :  { %v10049_v40 = vpop.eup %5852  ;;  %5864 = vtanh.f32 %v4326_v28  ;;  %v4319_v33 = vunpack.c.l.bf16 %v3854_v10  ;;  %v10055_v57 = vadd.f32 1.0, %v5847_v32  ;;  %v4320_v9 = vunpack.c.l.bf16 %v3856_v52 }
 0x672   :  { %v10052_v26 = vpop.eup %5854  ;;  %5866 = vpow2.f32 %v5275_v46  ;;  %v4312_v22 = vmul.f32 %v4296_v18, %v4079_v12  ;;  %v4354_v5 = vrot.slane %v9767_v2, 2  ;;  %v4355_v39 = vrot.slane %v9767_v2, 3 }
 0x673   :  { %v10057_v16 = vpop.eup %5856  ;;  %5868 = vpow2.f32 %v5276_v4  ;;  %v4327_v55 = vadd.f32 %v4319_v33, %v4311_v7  ;;  %v4180_v8 = vand.u32 2147483648, %v10055_v57  ;;  %v4356_v45 = vrot.slane %v9767_v2, 4 }
 0x674   :  { %v5859_v63 = vpop.eup %5858  ;;  %5870 = vpow2.f32 %v5277_v25  ;;  %v4328_v54 = vadd.f32 %v4320_v9, %v4312_v22  ;;  %v4357_v59 = vrot.slane %v9767_v2, 5  ;;  %v4178_v34 = vand.u32 2147483647, %v10055_v57 }
 0x675   :  { %v5861_v48 = vpop.eup %5860  ;;  %5872 = vpow2.f32 %v5278_v49  ;;  %v10059_v31 = vadd.f32 1.0, %v5859_v63  ;;  %v4358_v0 = vrot.slane %v9767_v2, 6  ;;  %v4359_v60 = vrot.slane %v9767_v2, 7 }
 0x676   :  { %v5863_v50 = vpop.eup %5862  ;;  %v10061_v20 = vadd.f32 1.0, %v5861_v48  ;;  %5874 = vrcp.f32 %v10055_v57  ;;  %vm4174_vm14 = vweird.f32 %v10055_v57  ;;  %v10086_v27 = vor.u32 1.1754944e-38, %v4180_v8 }
 0x677   :  { %v10065_v11 = vpop.eup %5864  ;;  %v10067_v14 = vadd.f32 1.0, %v5863_v50  ;;  %5876 = vrcp.f32 %v10059_v31  ;;  %v4195_v61 = vand.u32 2147483648, %v10059_v31  ;;  %vm4189_vm10 = vweird.f32 %v10059_v31 }
 0x678   :  { %v5867_v38 = vpop.eup %5866  ;;  %5878 = vrcp.f32 %v10061_v20  ;;  %v4210_v47 = vand.u32 2147483648, %v10061_v20  ;;  %v4193_v56 = vand.u32 2147483647, %v10059_v31  ;;  %v4208_v44 = vand.u32 2147483647, %v10061_v20 }
 0x679   :  { %v5869_v19 = vpop.eup %5868  ;;  %v10075_v35 = vadd.f32 1.0, %v5867_v38  ;;  %5880 = vrcp.f32 %v10067_v14  ;;  %v4225_v37 = vand.u32 2147483648, %v10067_v14  ;;  %v10093_v13 = vor.u32 1.1754944e-38, %v4195_v61 }
 0x67a   :  { %v5871_v1 = vpop.eup %5870  ;;  %5882 = vtanh.f32 %v4327_v55  ;;  %v10083_v3 = vadd.f32 1.0, %v5869_v19  ;;  %vm4204_vm2 = vweird.f32 %v10061_v20  ;;  %v10104_v29 = vor.u32 1.1754944e-38, %v4210_v47 }
 0x67b   :  { %v5873_v21 = vpop.eup %5872  ;;  %5884 = vtanh.f32 %v4328_v54  ;;  %v10099_v6 = vadd.f32 1.0, %v5871_v1  ;;  %v4223_v32 = vand.u32 2147483647, %v10067_v14  ;;  %vm4219_vm11 = vweird.f32 %v10067_v14 }
 0x67c   :  { %v10089_v41 = vpop.eup %5874  ;;  %5886 = vrcp.f32 %v10075_v35  ;;  %v10109_v43 = vadd.f32 1.0, %v5873_v21  ;;  %v4238_v24 = vand.u32 2147483647, %v10075_v35  ;;  %vm10118_vm4 = vcmp.eq.f32.partialorder %v4178_v34, 8.507059e+37 }
 0x67d   :  { %v10097_v51 = vpop.eup %5876  ;;  %v4170_v15 = vmul.f32 %v10089_v41, %v10055_v57  ;;  %vm4175_vm0 = vweird.f32 %v10089_v41  ;;  %v4226_v46 = vor.u32 1.1754944e-38, %v4225_v37  ;;  %5888 = vrcp.f32 %v10083_v3 }
 0x67e   :  { %v10107_v36 = vpop.eup %5878  ;;  %v4185_v58 = vmul.f32 %v10097_v51, %v10059_v31  ;;  %vm4190_vm6 = vweird.f32 %v10097_v51  ;;  %vm10128_vm1 = vcmp.eq.f32.partialorder %v4193_v56, 8.507059e+37  ;;  %v4240_v12 = vand.u32 2147483648, %v10075_v35  ;;  %vm10164_vm9 = vmor %vm4174_vm14, %vm4175_vm0 }
 0x67f   :  { %v10116_v42 = vpop.eup %5880  ;;  %v4171_v17 = vsub.f32 1.0, %v4170_v15  ;;  %v4200_v23 = vmul.f32 %v10107_v36, %v10061_v20  ;;  %vm4205_vm15 = vweird.f32 %v10107_v36  ;;  %vm10139_vm13 = vcmp.eq.f32.partialorder %v4208_v44, 8.507059e+37  ;;  %vm10178_vm14 = vmor %vm4189_vm10, %vm4190_vm6 }
 0x680   :  { %v10125_v10 = vpop.eup %5882  ;;  %v4186_v30 = vsub.f32 1.0, %v4185_v58  ;;  %v4215_v52 = vmul.f32 %v10116_v42, %v10067_v14  ;;  %vm4220_vm7 = vweird.f32 %v10116_v42  ;;  %vm4234_vm12 = vweird.f32 %v10075_v35 }
 0x681   :  { %v10135_v25 = vpop.eup %5884  ;;  %v4172_v18 = vmul.f32 %v10089_v41, %v4171_v17  ;;  %v4201_v49 = vsub.f32 1.0, %v4200_v23  ;;  %vm10146_vm3 = vcmp.eq.f32.partialorder %v4223_v32, 8.507059e+37  ;;  %v4253_v48 = vand.u32 2147483647, %v10083_v3 }
 0x682   :  { %v5887_v33 = vpop.eup %5886  ;;  %v4187_v22 = vmul.f32 %v10097_v51, %v4186_v30  ;;  %v4216_v9 = vsub.f32 1.0, %v4215_v52  ;;  %5890 = vrcp.f32 %v10099_v6  ;;  %vm10155_vm5 = vcmp.eq.f32.partialorder %v4238_v24, 8.507059e+37 }
 0x683   :  { %v4173_v50 = vadd.f32 %v10089_v41, %v4172_v18  ;;  %v4202_v55 = vmul.f32 %v10107_v36, %v4201_v49  ;;  %v4230_v54 = vmul.f32 %v5887_v33, %v10075_v35  ;;  %v4255_v38 = vand.u32 2147483648, %v10083_v3  ;;  %v5889_v34 = vpop.eup %5888 }
 0x684   :  { %v4188_v19 = vadd.f32 %v10097_v51, %v4187_v22  ;;  %v4217_v47 = vmul.f32 %v10116_v42, %v4216_v9  ;;  %v4241_v1 = vor.u32 1.1754944e-38, %v4240_v12  ;;  %vm4249_vm8 = vweird.f32 %v10083_v3 }
 0x685   :  { %v4177_v21 = vsel %vm10164_vm9, %v10089_v41, %v4173_v50  ;;  %v4203_v37 = vadd.f32 %v10107_v36, %v4202_v55  ;;  %v4231_v56 = vsub.f32 1.0, %v4230_v54  ;;  %vm4235_vm0 = vweird.f32 %v5887_v33  ;;  %vm10190_vm9 = vmor %vm4204_vm2, %vm4205_vm15 }
 0x686   :  { %v4192_v44 = vsel %vm10178_vm14, %v10097_v51, %v4188_v19  ;;  %v4218_v31 = vadd.f32 %v10116_v42, %v4217_v47  ;;  %v4245_v15 = vmul.f32 %v5889_v34, %v10083_v3  ;;  %vm10196_vm10 = vcmp.eq.f32.partialorder %v4253_v48, 8.507059e+37  ;;  %vm10207_vm2 = vmor %vm4219_vm11, %vm4220_vm7 }
 0x687   :  { %v4207_v51 = vsel %vm10190_vm9, %v10107_v36, %v4203_v37  ;;  %v4232_v58 = vmul.f32 %v5887_v33, %v4231_v56  ;;  %v4256_v24 = vor.u32 1.1754944e-38, %v4255_v38  ;;  %vm4264_vm6 = vweird.f32 %v10099_v6 }
 0x688   :  { %v5891_v17 = vpop.eup %5890  ;;  %v4182_v23 = vsel %vm10118_vm4, %v10086_v27, %v4177_v21  ;;  %v4222_v36 = vsel %vm10207_vm2, %v10116_v42, %v4218_v31  ;;  %v4246_v30 = vsub.f32 1.0, %v4245_v15  ;;  %v4268_v14 = vand.u32 2147483647, %v10099_v6  ;;  %vm4236_vm4 = vmor %vm4234_vm12, %vm4235_vm0 }
 0x689   :  { %v4197_v52 = vsel %vm10128_vm1, %v10093_v13, %v4192_v44  ;;  %v4233_v12 = vadd.f32 %v5887_v33, %v4232_v58  ;;  %vm4250_vm11 = vweird.f32 %v5889_v34  ;;  %v4260_v18 = vmul.f32 %v5891_v17, %v10099_v6 }
 0x68a   :  { %v4212_v28 = vsel %vm10139_vm13, %v10104_v29, %v4207_v51  ;;  %v4247_v27 = vmul.f32 %v5889_v34, %v4246_v30  ;;  %v4270_v42 = vand.u32 2147483648, %v10099_v6  ;;  %5892 = vrcp.f32 %v10109_v43  ;;  %vm4251_vm13 = vmor %vm4249_vm8, %vm4250_vm11 }
 0x68b   :  { %v4227_v13 = vsel %vm10146_vm3, %v4226_v46, %v4222_v36  ;;  %v4237_v4 = vsel %vm4236_vm4, %v5887_v33, %v4233_v12  ;;  %v4261_v49 = vsub.f32 1.0, %v4260_v18  ;;  %vm4265_vm1 = vweird.f32 %v5891_v17 }
 0x68c   :  { %v4242_v22 = vsel %vm10155_vm5, %v4241_v1, %v4237_v4  ;;  %v4248_v7 = vadd.f32 %v5889_v34, %v4247_v27  ;;  %vm10235_vm15 = vcmp.eq.f32.partialorder %v4268_v14, 8.507059e+37  ;;  %v4283_v35 = vand.u32 2147483647, %v10109_v43  ;;  %vm4266_vm12 = vmor %vm4264_vm6, %vm4265_vm1 }
 0x68d   :  { %v4262_v9 = vmul.f32 %v5891_v17, %v4261_v49  ;;  %v4271_v63 = vor.u32 1.1754944e-38, %v4270_v42  ;;  %v4285_v46 = vand.u32 2147483648, %v10109_v43  ;;  %v4337_v33 = vsub.f32 1.0, %v4182_v23 }
 0x68e   :  { %v4252_v48 = vsel %vm4251_vm13, %v5889_v34, %v4248_v7  ;;  %v4338_v50 = vsub.f32 1.0, %v4197_v52  ;;  %v4339_v55 = vsub.f32 1.0, %v4212_v28  ;;  %v4340_v54 = vsub.f32 1.0, %v4227_v13 }
 0x68f   :  { %v4257_v8 = vsel %vm10196_vm10, %v4256_v24, %v4252_v48  ;;  %v4263_v38 = vadd.f32 %v5891_v17, %v4262_v9  ;;  %vm4279_vm7 = vweird.f32 %v10109_v43  ;;  %v4341_v61 = vsub.f32 1.0, %v4242_v22 }
 0x690   :  { %v4345_v19 = vmul.f32 %v10044_v53, %v4337_v33  ;;  %v5893_v3 = vpop.eup %5892  ;;  %v4342_v47 = vsub.f32 1.0, %v4257_v8  ;;  %v4346_v1 = vmul.f32 %v10046_v62, %v4338_v50  ;;  %v4347_v34 = vmul.f32 %v10049_v40, %v4339_v55 }
 0x691   :  { %v4348_v21 = vmul.f32 %v10052_v26, %v4340_v54  ;;  %v4267_v57 = vsel %vm4266_vm12, %v5891_v17, %v4263_v38  ;;  %v4275_v37 = vmul.f32 %v5893_v3, %v10109_v43  ;;  %vm4280_vm3 = vweird.f32 %v5893_v3 }
 0x692   :  { %v4349_v56 = vmul.f32 %v10057_v16, %v4341_v61  ;;  %v4272_v53 = vsel %vm10235_vm15, %v4271_v63, %v4267_v57  ;;  %v4350_v44 = vmul.f32 %v10065_v11, %v4342_v47  ;;  %v4369_v6 = vmul.f32 %v4354_v5, %v4182_v23  ;;  %vm4281_vm5 = vmor %vm4279_vm7, %vm4280_vm3  ;;  %v4445_v47 = vld [vmem:[#allocation5 + $0x18] sm:$0x88]  ;;  %v10296_v57 = vld [vmem:[#allocation5 + $0x48] sm:$0x88] }
 0x693   :  { %v4370_v62 = vmul.f32 %v4355_v39, %v4197_v52  ;;  %v4276_v40 = vsub.f32 1.0, %v4275_v37  ;;  %v4343_v41 = vsub.f32 1.0, %v4272_v53  ;;  %v4371_v26 = vmul.f32 %v4356_v45, %v4212_v28 }
 0x694   :  { %v4372_v31 = vmul.f32 %v4357_v59, %v4227_v13  ;;  %v4373_v16 = vmul.f32 %v4358_v0, %v4242_v22  ;;  %v4374_v11 = vmul.f32 %v4359_v60, %v4257_v8  ;;  %v4375_v15 = vmul.f32 %v4272_v53, %v9767_v2 }
 0x695   :  { %v4377_v5 = vadd.f32 %v4369_v6, %v4345_v19  ;;  %v4277_v32 = vmul.f32 %v5893_v3, %v4276_v40  ;;  %v4351_v39 = vmul.f32 %v10125_v10, %v4343_v41  ;;  %v4378_v51 = vadd.f32 %v4370_v62, %v4346_v1  ;;  %v10290_v19 = vld [vmem:[#allocation5 + $0x54] sm:$0x88]  ;;  %v4447_v1 = vld [vmem:[#allocation5 + $0x24] sm:$0x88] }
 0x696   :  { %v4379_v20 = vadd.f32 %v4371_v26, %v4347_v34  ;;  %v4380_v58 = vadd.f32 %v4372_v31, %v4348_v21  ;;  %v4381_v24 = vadd.f32 %v4373_v16, %v4349_v56  ;;  %v4382_v45 = vadd.f32 %v4374_v11, %v4350_v44  ;;  %v10292_v34 = vld [vmem:[#allocation5 + $0x30] sm:$0x88]  ;;  %v10294_v21 = vld [vmem:[#allocation5 + $0x3c] sm:$0x88] }
 0x697   :  { %v4400_v17 = vrot.slane %v4377_v5, 6  ;;  %v4278_v23 = vadd.f32 %v5893_v3, %v4277_v32  ;;  %v4383_v59 = vadd.f32 %v4375_v15, %v4351_v39  ;;  %v4401_v36 = vrot.slane %v4378_v51, 5 }
 0x698   :  { %v4403_v30 = vrot.slane %v4379_v20, 4  ;;  %v4286_v0 = vor.u32 1.1754944e-38, %v4285_v46  ;;  %vm4284_vm8 = vcmp.eq.f32.partialorder %v4283_v35, 8.507059e+37  ;;  %vm11493_vm14 = vcmask 1041409   ;;  %v4390_v35 = vpop.permute.xlu0 %4389 }
 0x699   :  { %v4282_v60 = vsel %vm4281_vm5, %v5893_v3, %v4278_v23  ;;  %v4402_v14 = vsel %vm11493_vm14, %v4401_v36, %v4400_v17  ;;  %v4405_v10 = vrot.slane %v4380_v58, 3  ;;  %v4407_v12 = vrot.slane %v4381_v24, 2  ;;  %v4443_v3 = vld [vmem:[#allocation5 + $0xc] sm:$0x88] }
 0x69a   :  { %v4287_v52 = vsel %vm4284_vm8, %v4286_v0, %v4282_v60  ;;  %vm11494_vm0 = vcmask 1042434   ;;  %v4360_v27 = vrot.slane %v9767_v2, 1  ;;  %v4409_v42 = vrot.slane %v4382_v45, 1 }
 0x69b   :  { %v4404_v18 = vsel %vm11494_vm0, %v4403_v30, %v4402_v14  ;;  %v4344_v28 = vsub.f32 1.0, %v4287_v52  ;;  %vm11495_vm9 = vcmask 1043459   ;;  %vm11496_vm10 = vcmask 1044484  }
 0x69c   :  { %v4406_v13 = vsel %vm11495_vm9, %v4405_v10, %v4404_v18  ;;  %v4376_v43 = vmul.f32 %v4360_v27, %v4287_v52  ;;  %vm11497_vm2 = vcmask 1045509   ;;  %vm11498_vm6 = vcmask 1046534  }
 0x69d   :  { %v4408_v4 = vsel %vm11496_vm10, %v4407_v12, %v4406_v13  ;;  %v4352_v49 = vmul.f32 %v10135_v25, %v4344_v28  ;;  %vm4391_vm11 = vcmp.eq.s32.totalorder %v4390_v35, 1  ;;  %vm11499_vm4 = vcmask 1047559  }
 0x69e   :  { %v4410_v22 = vsel %vm11497_vm2, %v4409_v42, %v4408_v4  ;;  %v4504_v37 = vunpack.c.l.bf16 %v10290_v19  ;;  %v4498_v53 = vunpack.c.l.bf16 %v4443_v3  ;;  %v4499_v44 = vunpack.c.l.bf16 %v4445_v47 }
 0x69f   :  { %v4411_v7 = vsel %vm11498_vm6, %v4383_v59, %v4410_v22  ;;  %v4384_v29 = vadd.f32 %v4376_v43, %v4352_v49  ;;  %v4500_v6 = vunpack.c.l.bf16 %v4447_v1  ;;  %v4501_v40 = vunpack.c.l.bf16 %v10292_v34 }
 0x6a0   :  { %v4502_v41 = vunpack.c.l.bf16 %v10294_v21  ;;  %v4503_v26 = vunpack.c.l.bf16 %v10296_v57  ;;  %v4690_v12 = vrot.slane %v4443_v3, 4  ;;  %v4691_v13 = vrot.slane %v4445_v47, 4 }
 0x6a1   :  { %v4412_v9 = vrot.slane %v4384_v29, 7  ;;  %v4692_v4 = vrot.slane %v4447_v1, 4  ;;  %v4693_v49 = vrot.slane %v10292_v34, 4  ;;  %v4694_v22 = vrot.slane %v10294_v21, 4 }
 0x6a2   :  { %v4695_v35 = vrot.slane %v10296_v57, 4 }
 0x6a3   :  { %v4413_v63 = vsel %vm11499_vm4, %v4412_v9, %v4411_v7  ;;  %v4696_v9 = vrot.slane %v10290_v19, 4  ;;  %v4710_v3 = vunpack.c.l.bf16 %v4694_v22 }
 0x6a4   :  { %v4415_v46 = vsel %vm4391_vm11, %v4413_v63, 0.0  ;;  %v10286_v33 = vsel %vm4391_vm11, %v4413_v63, %v9767_v2  ;;  %v4441_v2 = vld [vmem:[#allocation5] sm:$0x88]  ;;  %v4711_v34 = vunpack.c.l.bf16 %v4695_v35 }
 0x6a5   :  { %11500 = vst [vmem:[#allocation39_spill] sm:$0xff] %v10286_v33  ;;  %v4417_v48 = vrot.slane %v4415_v46, 1  ;;  %v4418_v50 = vrot.slane %v4415_v46, 2  ;;  %v4419_v55 = vrot.slane %v4415_v46, 3  ;;  %v4420_v54 = vrot.slane %v4415_v46, 4 }
 0x6a6   :  { %4431 = vst [vmem:[#allocation10 + $0x6] sm:$0x1] %v4415_v46  ;;  %v4457_v25 = vpack.c.bf16 %v10286_v33, %v10286_v33  ;;  %v4421_v8 = vrot.slane %v4415_v46, 5  ;;  %v4422_v38 = vrot.slane %v4415_v46, 6  ;;  %v4423_v61 = vrot.slane %v4415_v46, 7 }
 0x6a7   :  { %4432 = vst [vmem:[#allocation10 + $0xe] sm:$0x1] %v4417_v48  ;;  %v4497_v56 = vunpack.c.l.bf16 %v4441_v2  ;;  %v4689_v31 = vrot.slane %v4441_v2, 4  ;;  %v4706_v46 = vunpack.c.l.bf16 %v4690_v12  ;;  %v4709_v2 = vunpack.c.l.bf16 %v4693_v49 }
 0x6a8   :  { %4433 = vst [vmem:[#allocation10 + $0x16] sm:$0x1] %v4418_v50  ;;  %4466 = vmatmul.bf16.vlgmr.msrb.gmra.mxu1 %v4457_v25  ;;  %4479 = vmatmul.bf16.vlgmr.msrb.gmra.mxu2 %v4457_v25 }
 0x6a9   :  { %4434 = vst [vmem:[#allocation10 + $0x1e] sm:$0x1] %v4419_v55  ;;  %4492 = vmatmul.bf16.vlgmr.msrb.gmra.mxu3 %v4457_v25  ;;  %v4705_v60 = vunpack.c.l.bf16 %v4689_v31  ;;  %v4707_v55 = vunpack.c.l.bf16 %v4691_v13 }
 0x6aa   :  { %4435 = vst [vmem:[#allocation10 + $0x26] sm:$0x1] %v4420_v54  ;;  %v4708_v54 = vunpack.c.l.bf16 %v4692_v4 }
 0x6ab   :  { %4436 = vst [vmem:[#allocation10 + $0x2e] sm:$0x1] %v4421_v8 }
 0x6ac   :  { %4437 = vst [vmem:[#allocation10 + $0x36] sm:$0x1] %v4422_v38 }
 0x6ad   :  { %4438 = vst [vmem:[#allocation10 + $0x3e] sm:$0x1] %v4423_v61 }
 0x725   :  { %v4467_v62 = vpop.f32.mrf.mxu1 }
 0x726   :  { %v4506_v16 = vrot.slane %v4467_v62, 1  ;;  %v4507_v11 = vrot.slane %v4467_v62, 2  ;;  %v4508_v15 = vrot.slane %v4467_v62, 3  ;;  %v4509_v5 = vrot.slane %v4467_v62, 4 }
 0x727   :  { %v4510_v32 = vrot.slane %v4467_v62, 5  ;;  %v4511_v39 = vrot.slane %v4467_v62, 6  ;;  %v4512_v51 = vrot.slane %v4467_v62, 7  ;;  %v4528_v20 = vadd.f32 %v4504_v37, %v4467_v62 }
 0x728   :  { %v4521_v58 = vadd.f32 %v4506_v16, %v4497_v56  ;;  %v4522_v24 = vadd.f32 %v4507_v11, %v4498_v53  ;;  %v4523_v45 = vadd.f32 %v4508_v15, %v4499_v44  ;;  %v4524_v17 = vadd.f32 %v4509_v5, %v4500_v6 }
 0x729   :  { %v4525_v23 = vadd.f32 %v4510_v32, %v4501_v40  ;;  %v5287_v59 = vmul.f32 -1.442695, %v4528_v20  ;;  %v4526_v14 = vadd.f32 %v4511_v39, %v4502_v41  ;;  %v4527_v18 = vadd.f32 %v4512_v51, %v4503_v26 }
 0x72a   :  { %v5280_v36 = vmul.f32 -1.442695, %v4521_v58  ;;  %v5281_v30 = vmul.f32 -1.442695, %v4522_v24  ;;  %v5282_v0 = vmul.f32 -1.442695, %v4523_v45  ;;  %v4712_v11 = vunpack.c.l.bf16 %v4696_v9 }
 0x72b   :  { %v5283_v10 = vmul.f32 -1.442695, %v4524_v17  ;;  %5894 = vpow2.f32 %v5287_v59  ;;  %v10302_v52 = vpop.f32.mrf.mxu2  ;;  %v5284_v28 = vmul.f32 -1.442695, %v4525_v23  ;;  %v5285_v29 = vmul.f32 -1.442695, %v4526_v14 }
 0x72c   :  { %5896 = vpow2.f32 %v5280_v36  ;;  %v4714_v27 = vrot.slane %v10302_v52, 1  ;;  %v10305_v42 = vpop.f32.mrf.mxu3  ;;  %v5286_v63 = vmul.f32 -1.442695, %v4527_v18  ;;  %v4715_v48 = vrot.slane %v10302_v52, 2 }
 0x72d   :  { %5898 = vpow2.f32 %v5281_v30  ;;  %v4469_v43 = vpop.f32.mrf.mxu1  ;;  %v4716_v25 = vrot.slane %v10302_v52, 3  ;;  %v4717_v47 = vrot.slane %v10302_v52, 4  ;;  %v4718_v21 = vrot.slane %v10302_v52, 5 }
 0x72e   :  { %5900 = vpow2.f32 %v5282_v0  ;;  %v4729_v7 = vadd.f32 %v4714_v27, %v4705_v60  ;;  %v4719_v53 = vrot.slane %v10302_v52, 6  ;;  %v4730_v44 = vadd.f32 %v4715_v48, %v4706_v46 }
 0x72f   :  { %5902 = vpow2.f32 %v5283_v10  ;;  %v4720_v41 = vrot.slane %v10302_v52, 7  ;;  %v4731_v26 = vadd.f32 %v4716_v25, %v4707_v55  ;;  %v4732_v15 = vadd.f32 %v4717_v47, %v4708_v54 }
 0x730   :  { %5904 = vpow2.f32 %v5284_v28  ;;  %v5288_v8 = vmul.f32 -1.442695, %v4729_v7  ;;  %v4733_v32 = vadd.f32 %v4718_v21, %v4709_v2  ;;  %v4734_v39 = vadd.f32 %v4719_v53, %v4710_v3 }
 0x731   :  { %v5895_v50 = vpop.eup %5894  ;;  %5906 = vpow2.f32 %v5285_v29  ;;  %v5289_v51 = vmul.f32 -1.442695, %v4730_v44  ;;  %v4735_v58 = vadd.f32 %v4720_v41, %v4711_v34  ;;  %v5290_v24 = vmul.f32 -1.442695, %v4731_v26 }
 0x732   :  { %v5897_v38 = vpop.eup %5896  ;;  %v10313_v61 = vadd.f32 1.0, %v5895_v50  ;;  %5908 = vpow2.f32 %v5286_v63  ;;  %v4736_v17 = vadd.f32 %v4712_v11, %v10302_v52  ;;  %v5291_v23 = vmul.f32 -1.442695, %v4732_v15 }
 0x733   :  { %v5899_v1 = vpop.eup %5898  ;;  %v10316_v19 = vadd.f32 1.0, %v5897_v38  ;;  %v4482_v57 = vpop.f32.mrf.mxu2  ;;  %5910 = vpow2.f32 %v5288_v8  ;;  %v5292_v36 = vmul.f32 -1.442695, %v4733_v32  ;;  %v5293_v0 = vmul.f32 -1.442695, %v4734_v39 }
 0x734   :  { %v5901_v37 = vpop.eup %5900  ;;  %v10319_v56 = vadd.f32 1.0, %v5899_v1  ;;  %v4495_v6 = vpop.f32.mrf.mxu3  ;;  %5912 = vrcp.f32 %v10313_v61  ;;  %v5294_v14 = vmul.f32 -1.442695, %v4735_v58  ;;  %v5295_v12 = vmul.f32 -1.442695, %v4736_v17 }
 0x735   :  { %v5903_v62 = vpop.eup %5902  ;;  %v10322_v40 = vadd.f32 1.0, %v5901_v37  ;;  %5914 = vrcp.f32 %v10316_v19  ;;  %v4572_v21 = vand.u32 2147483648, %v10316_v19  ;;  %vm4566_vm1 = vweird.f32 %v10316_v19 }
 0x736   :  { %v5905_v31 = vpop.eup %5904  ;;  %v10325_v16 = vadd.f32 1.0, %v5903_v62  ;;  %5916 = vrcp.f32 %v10319_v56  ;;  %v4570_v11 = vand.u32 2147483647, %v10316_v19  ;;  %v4587_v15 = vand.u32 2147483648, %v10319_v56 }
 0x737   :  { %v10328_v5 = vadd.f32 1.0, %v5905_v31  ;;  %v5907_v20 = vpop.eup %5906  ;;  %5918 = vrcp.f32 %v10322_v40  ;;  %v4602_v32 = vand.u32 2147483648, %v10322_v40  ;;  %v4585_v58 = vand.u32 2147483647, %v10319_v56 }
 0x738   :  { %v5909_v45 = vpop.eup %5908  ;;  %5920 = vrcp.f32 %v10325_v16  ;;  %v10344_v52 = vadd.f32 1.0, %v5907_v20  ;;  %v4600_v17 = vand.u32 2147483647, %v10322_v40  ;;  %vm4581_vm7 = vweird.f32 %v10319_v56 }
 0x739   :  { %v5911_v59 = vpop.eup %5910  ;;  %5922 = vrcp.f32 %v10328_v5  ;;  %v10371_v2 = vadd.f32 1.0, %v5909_v45  ;;  %vm10465_vm5 = vcmp.eq.f32.partialorder %v4570_v11, 8.507059e+37  ;;  %vm10469_vm8 = vcmp.eq.f32.partialorder %v4585_v58, 8.507059e+37 }
 0x73a   :  { %v10336_v30 = vpop.eup %5912  ;;  %5924 = vpow2.f32 %v5289_v51  ;;  %v10348_v27 = vadd.f32 1.0, %v5911_v59  ;;  %v10403_v51 = vor.u32 1.1754944e-38, %v4572_v21  ;;  %vm4596_vm14 = vweird.f32 %v10322_v40 }
 0x73b   :  { %v10338_v60 = vpop.eup %5914  ;;  %5926 = vpow2.f32 %v5290_v24  ;;  %vm4611_vm9 = vweird.f32 %v10325_v16  ;;  %vm10508_vm2 = vcmp.eq.f32.partialorder %v4600_v17, 8.507059e+37 }
 0x73c   :  { %v10340_v10 = vpop.eup %5916  ;;  %5928 = vpow2.f32 %v5291_v23  ;;  %v4562_v4 = vmul.f32 %v10338_v60, %v10316_v19  ;;  %v4780_v41 = vand.u32 2147483648, %v10348_v27  ;;  %vm4567_vm15 = vweird.f32 %v10338_v60 }
 0x73d   :  { %v10342_v18 = vpop.eup %5918  ;;  %5930 = vpow2.f32 %v5292_v36  ;;  %v4577_v35 = vmul.f32 %v10340_v10, %v10319_v56  ;;  %vm4582_vm13 = vweird.f32 %v10340_v10  ;;  %vm10450_vm12 = vmor %vm4566_vm1, %vm4567_vm15  ;;  %vm4774_vm11 = vweird.f32 %v10348_v27 }
 0x73e   :  { %v10346_v28 = vpop.eup %5920  ;;  %5932 = vpow2.f32 %v5293_v0  ;;  %v4563_v25 = vsub.f32 1.0, %v4562_v4  ;;  %v4592_v44 = vmul.f32 %v10342_v18, %v10322_v40  ;;  %v10414_v59 = vor.u32 1.1754944e-38, %v4780_v41  ;;  %vm10504_vm10 = vmor %vm4581_vm7, %vm4582_vm13 }
 0x73f   :  { %v10350_v13 = vpop.eup %5922  ;;  %5934 = vpow2.f32 %v5294_v14  ;;  %v4578_v57 = vsub.f32 1.0, %v4577_v35  ;;  %v4607_v0 = vmul.f32 %v10346_v28, %v10325_v16  ;;  %vm4597_vm3 = vweird.f32 %v10342_v18 }
 0x740   :  { %v5925_v43 = vpop.eup %5924  ;;  %5936 = vpow2.f32 %v5295_v12  ;;  %v4564_v26 = vmul.f32 %v10338_v60, %v4563_v25  ;;  %v4593_v45 = vsub.f32 1.0, %v4592_v44  ;;  %vm4612_vm0 = vweird.f32 %v10346_v28  ;;  %vm10560_vm13 = vmor %vm4596_vm14, %vm4597_vm3 }
 0x741   :  { %v5927_v7 = vpop.eup %5926  ;;  %5938 = vrcp.f32 %v10344_v52  ;;  %v10357_v29 = vadd.f32 1.0, %v5925_v43  ;;  %v4579_v20 = vmul.f32 %v10340_v10, %v4578_v57  ;;  %v10428_v43 = vor.u32 1.1754944e-38, %v4587_v15 }
 0x742   :  { %v5929_v63 = vpop.eup %5928  ;;  %v10362_v46 = vadd.f32 1.0, %v5927_v7  ;;  %5940 = vrcp.f32 %v10348_v27  ;;  %v10418_v36 = vadd.f32 %v10338_v60, %v4564_v26  ;;  %v10430_v7 = vor.u32 1.1754944e-38, %v4602_v32 }
 0x743   :  { %v5931_v55 = vpop.eup %5930  ;;  %v10367_v54 = vadd.f32 1.0, %v5929_v63  ;;  %5942 = vrcp.f32 %v10357_v29  ;;  %v4795_v4 = vand.u32 2147483648, %v10357_v29  ;;  %v4594_v41 = vmul.f32 %v10342_v18, %v4593_v45 }
 0x744   :  { %v5933_v38 = vpop.eup %5932  ;;  %v10373_v3 = vadd.f32 1.0, %v5931_v55  ;;  %5944 = vrcp.f32 %v10362_v46  ;;  %v4810_v25 = vand.u32 2147483648, %v10362_v46  ;;  %v4569_v19 = vsel %vm10450_vm12, %v10338_v60, %v10418_v36 }
 0x745   :  { %v5935_v1 = vpop.eup %5934  ;;  %v10377_v34 = vadd.f32 1.0, %v5933_v38  ;;  %5946 = vrcp.f32 %v10367_v54  ;;  %v4580_v38 = vadd.f32 %v10340_v10, %v4579_v20  ;;  %v4825_v57 = vand.u32 2147483648, %v10367_v54 }
 0x746   :  { %v5937_v37 = vpop.eup %5936  ;;  %v10381_v53 = vadd.f32 1.0, %v5935_v1  ;;  %5948 = vrcp.f32 %v10373_v3  ;;  %v4608_v47 = vsub.f32 1.0, %v4607_v0  ;;  %v10473_v50 = vor.u32 1.1754944e-38, %v4795_v4 }
 0x747   :  { %v10387_v6 = vpop.eup %5938  ;;  %v10389_v62 = vadd.f32 1.0, %v5937_v37  ;;  %5950 = vrcp.f32 %v10377_v34  ;;  %v4840_v37 = vand.u32 2147483648, %v10373_v3  ;;  %v4855_v32 = vand.u32 2147483648, %v10377_v34 }
 0x748   :  { %v10394_v31 = vpop.eup %5940  ;;  %5952 = vrcp.f32 %v10371_v2  ;;  %v4615_v60 = vand.u32 2147483647, %v10325_v16  ;;  %v10482_v44 = vor.u32 1.1754944e-38, %v4810_v25  ;;  %v4870_v0 = vand.u32 2147483648, %v10381_v53 }
 0x749   :  { %v10400_v39 = vpop.eup %5942  ;;  %5954 = vrcp.f32 %v10381_v53  ;;  %v4770_v12 = vmul.f32 %v10394_v31, %v10348_v27  ;;  %v10485_v4 = vor.u32 1.1754944e-38, %v4825_v57  ;;  %v10487_v9 = vor.u32 1.1754944e-38, %v4840_v37 }
 0x74a   :  { %v10407_v24 = vpop.eup %5944  ;;  %5956 = vrcp.f32 %v10389_v62  ;;  %v4785_v63 = vmul.f32 %v10400_v39, %v10357_v29  ;;  %v10492_v33 = vor.u32 1.1754944e-38, %v4855_v32  ;;  %v4622_v32 = vmul.f32 %v10350_v13, %v10328_v5 }
 0x74b   :  { %v10412_v23 = vpop.eup %5946  ;;  %v4800_v55 = vmul.f32 %v10407_v24, %v10362_v46  ;;  %v4771_v8 = vsub.f32 1.0, %v4770_v12  ;;  %11507 = vst [vmem:[#allocation38_spill] sm:$0xff] %v10485_v4  ;;  %vm4775_vm6 = vweird.f32 %v10394_v31  ;;  %v4584_v17 = vsel %vm10504_vm10, %v10340_v10, %v4580_v38 }
 0x74c   :  { %v10423_v14 = vpop.eup %5948  ;;  %v4815_v21 = vmul.f32 %v10412_v23, %v10367_v54  ;;  %v4786_v36 = vsub.f32 1.0, %v4785_v63  ;;  %11508 = vst [vmem:[#allocation20_spill] sm:$0xff] %v10487_v9  ;;  %v4595_v9 = vadd.f32 %v10342_v18, %v4594_v41  ;;  %v4623_v4 = vsub.f32 1.0, %v4622_v32  ;;  %vm10629_vm10 = vmor %vm4774_vm11, %vm4775_vm6 }
 0x74d   :  { %v10432_v35 = vpop.eup %5950  ;;  %v4830_v15 = vmul.f32 %v10423_v14, %v10373_v3  ;;  %v4801_v58 = vsub.f32 1.0, %v4800_v55  ;;  %11509 = vst [vmem:[#allocation14_spill] sm:$0xff] %v10492_v33  ;;  %v4885_v55 = vand.u32 2147483648, %v10389_v62  ;;  %v10498_v25 = vmul.f32 %v10394_v31, %v4771_v8 }
 0x74e   :  { %v10440_v1 = vpop.eup %5952  ;;  %v4845_v48 = vmul.f32 %v10432_v35, %v10377_v34  ;;  %v4816_v12 = vsub.f32 1.0, %v4815_v21  ;;  %v10522_v8 = vor.u32 1.1754944e-38, %v4870_v0  ;;  %vm4790_vm4 = vweird.f32 %v10400_v39 }
 0x74f   :  { %v10456_v26 = vpop.eup %5954  ;;  %v4831_v49 = vsub.f32 1.0, %v4830_v15  ;;  %v4609_v15 = vmul.f32 %v10346_v28, %v4608_v47  ;;  %v10520_v56 = vmul.f32 %v10407_v24, %v4801_v58  ;;  %v10536_v0 = vor.u32 1.1754944e-38, %v4885_v55 }
 0x750   :  { %v10480_v11 = vpop.eup %5956  ;;  %v4860_v22 = vmul.f32 %v10456_v26, %v10381_v53  ;;  %v4846_v21 = vsub.f32 1.0, %v4845_v48  ;;  %v10517_v48 = vmul.f32 %v10400_v39, %v4786_v36  ;;  %v10528_v33 = vmul.f32 %v10412_v23, %v4816_v12 }
 0x751   :  { %v4875_v63 = vmul.f32 %v10480_v11, %v10389_v62  ;;  %v10534_v36 = vmul.f32 %v10423_v14, %v4831_v49  ;;  %v4637_v10 = vmul.f32 %v10387_v6, %v10344_v52  ;;  %v10551_v41 = vsel %vm10469_vm8, %v10428_v43, %v4584_v17 }
 0x752   :  { %v4861_v47 = vsub.f32 1.0, %v4860_v22  ;;  %v10541_v38 = vmul.f32 %v10432_v35, %v4846_v21  ;;  %v10546_v22 = vsel %vm10465_vm5, %v10403_v51, %v4569_v19  ;;  %v4610_v49 = vadd.f32 %v10346_v28, %v4609_v15  ;;  %vm10588_vm5 = vmor %vm4611_vm9, %vm4612_vm0 }
 0x753   :  { %v4876_v58 = vsub.f32 1.0, %v4875_v63  ;;  %vm4626_vm1 = vweird.f32 %v10328_v5  ;;  %vm4789_vm15 = vweird.f32 %v10357_v29  ;;  %vm10564_vm7 = vcmp.eq.f32.partialorder %v4615_v60, 8.507059e+37 }
 0x754   :  { %v4617_v43 = vand.u32 2147483648, %v10325_v16  ;;  %v4638_v19 = vsub.f32 1.0, %v4637_v10  ;;  %v4652_v20 = vmul.f32 %v10440_v1, %v10371_v2  ;;  %v10572_v45 = vmul.f32 %v10456_v26, %v4861_v47  ;;  %vm10658_vm11 = vmor %vm4789_vm15, %vm4790_vm4 }
 0x755   :  { %v4599_v40 = vsel %vm10560_vm13, %v10342_v18, %v4595_v9  ;;  %v4624_v63 = vmul.f32 %v10350_v13, %v4623_v4  ;;  %v4630_v60 = vand.u32 2147483647, %v10328_v5  ;;  %vm4641_vm12 = vweird.f32 %v10344_v52 }
 0x756   :  { %vm4805_vm3 = vweird.f32 %v10407_v24  ;;  %v10582_v55 = vmul.f32 %v10480_v11, %v4876_v58  ;;  %vm4627_vm8 = vweird.f32 %v10350_v13  ;;  %v4632_v18 = vand.u32 2147483648, %v10328_v5 }
 0x757   :  { %v4653_v9 = vsub.f32 1.0, %v4652_v20  ;;  %vm4656_vm14 = vweird.f32 %v10371_v2  ;;  %v4614_v4 = vsel %vm10588_vm5, %v10346_v28, %v4610_v49  ;;  %v4639_v57 = vmul.f32 %v10387_v6, %v4638_v19  ;;  %vm10645_vm6 = vmor %vm4626_vm1, %vm4627_vm8  ;;  %v4442_v19 = vld [vmem:[#allocation5 + $0x8] sm:$0x8] }
 0x758   :  { %v4645_v15 = vand.u32 2147483647, %v10344_v52  ;;  %v4667_v16 = vmul.f32 %v10336_v30, %v10313_v61  ;;  %vm4804_vm0 = vweird.f32 %v10362_v46  ;;  %v10607_v32 = vsel %vm10508_vm2, %v10430_v7, %v4599_v40 }
 0x759   :  { %v4618_v17 = vor.u32 1.1754944e-38, %v4617_v43  ;;  %v4647_v47 = vand.u32 2147483648, %v10344_v52  ;;  %v4654_v28 = vmul.f32 %v10440_v1, %v4653_v9  ;;  %v4625_v58 = vadd.f32 %v10350_v13, %v4624_v63  ;;  %v4446_v63 = vld [vmem:[#allocation5 + $0x20] sm:$0x8] }
 0x75a   :  { %vm10613_vm13 = vcmp.eq.f32.partialorder %v4630_v60, 8.507059e+37  ;;  %v4660_v49 = vand.u32 2147483647, %v10371_v2  ;;  %v4668_v12 = vsub.f32 1.0, %v4667_v16  ;;  %v4633_v37 = vor.u32 1.1754944e-38, %v4632_v18 }
 0x75b   :  { %v10621_v7 = vsel %vm10564_vm7, %v4618_v17, %v4614_v4  ;;  %vm4642_vm2 = vweird.f32 %v10387_v6  ;;  %v4662_v43 = vand.u32 2147483648, %v10371_v2  ;;  %vm4834_vm9 = vweird.f32 %v10373_v3 }
 0x75c   :  { %v4640_v20 = vadd.f32 %v10387_v6, %v4639_v57  ;;  %vm10635_vm5 = vcmp.eq.f32.partialorder %v4645_v15, 8.507059e+37  ;;  %vm4657_vm7 = vweird.f32 %v10440_v1  ;;  %v4669_v40 = vmul.f32 %v10336_v30, %v4668_v12  ;;  %vm10675_vm4 = vmor %vm4641_vm12, %vm4642_vm2  ;;  %v4452_v57 = vld [vmem:[#allocation5 + $0x44] sm:$0x8] }
 0x75d   :  { %v4648_v60 = vor.u32 1.1754944e-38, %v4647_v47  ;;  %v4655_v21 = vadd.f32 %v10440_v1, %v4654_v28  ;;  %v4773_v18 = vadd.f32 %v10394_v31, %v10498_v25  ;;  %v4788_v9 = vadd.f32 %v10400_v39, %v10517_v48  ;;  %vm10690_vm12 = vmor %vm4656_vm14, %vm4657_vm7 }
 0x75e   :  { %v4629_v5 = vsel %vm10645_vm6, %v10350_v13, %v4625_v58  ;;  %vm10665_vm1 = vcmp.eq.f32.partialorder %v4660_v49, 8.507059e+37  ;;  %v4670_v25 = vadd.f32 %v10336_v30, %v4669_v40  ;;  %vm4672_vm8 = vweird.f32 %v10336_v30  ;;  %vm10715_vm14 = vmor %vm4804_vm0, %vm4805_vm3 }
 0x75f   :  { %v4663_v15 = vor.u32 1.1754944e-38, %v4662_v43  ;;  %vm4671_vm15 = vweird.f32 %v10313_v61  ;;  %v4677_v13 = vand.u32 2147483648, %v10313_v61  ;;  %v4803_v16 = vadd.f32 %v10407_v24, %v10520_v56 }
 0x760   :  { %v4644_v17 = vsel %vm10675_vm4, %v10387_v6, %v4640_v20  ;;  %v4675_v47 = vand.u32 2147483647, %v10313_v61  ;;  %v4778_v28 = vand.u32 2147483647, %v10348_v27  ;;  %v4793_v58 = vand.u32 2147483647, %v10357_v29  ;;  %vm10700_vm2 = vmor %vm4671_vm15, %vm4672_vm8 }
 0x761   :  { %v4659_v56 = vsel %vm10690_vm12, %v10440_v1, %v4655_v21  ;;  %v4777_v2 = vsel %vm10629_vm10, %v10394_v31, %v4773_v18  ;;  %v4792_v61 = vsel %vm10658_vm11, %v10400_v39, %v4788_v9  ;;  %v4808_v27 = vand.u32 2147483647, %v10362_v46  ;;  %v4444_v20 = vld [vmem:[#allocation5 + $0x14] sm:$0x8]  ;;  %v4448_v18 = vld [vmem:[#allocation5 + $0x2c] sm:$0x8] }
 0x762   :  { %v4674_v1 = vsel %vm10700_vm2, %v10336_v30, %v4670_v25  ;;  %v10724_v31 = vadd.f32 %v10412_v23, %v10528_v33  ;;  %v4823_v39 = vand.u32 2147483647, %v10367_v54  ;;  %v10729_v49 = vadd.f32 %v10423_v14, %v10534_v36 }
 0x763   :  { %v4634_v46 = vsel %vm10613_vm13, %v4633_v37, %v4629_v5  ;;  %v4649_v12 = vsel %vm10635_vm5, %v4648_v60, %v4644_v17  ;;  %v4678_v43 = vor.u32 1.1754944e-38, %v4677_v13  ;;  %v4807_v30 = vsel %vm10715_vm14, %v10407_v24, %v4803_v16  ;;  %v4454_v13 = vld [vmem:[#allocation5 + $0x50] sm:$0x8] }
 0x764   :  { %vm11540_vm3 = vweird.f32 %v10412_v23  ;;  %vm11541_vm0 = vweird.f32 %v10367_v54  ;;  %vm4850_vm7 = vweird.f32 %v10432_v35  ;;  %v4664_v36 = vsel %vm10665_vm1, %v4663_v15, %v4659_v56 }
 0x765   :  { %vm10742_vm10 = vmor %vm11541_vm0, %vm11540_vm3  ;;  %vm4676_vm13 = vcmp.eq.f32.partialorder %v4675_v47, 8.507059e+37  ;;  %vm4779_vm5 = vcmp.eq.f32.partialorder %v4778_v28, 8.507059e+37  ;;  %vm4794_vm6 = vcmp.eq.f32.partialorder %v4793_v58, 8.507059e+37  ;;  %vm11544_vm11 = vweird.f32 %v10423_v14  ;;  %v4456_v47 = vld [vmem:[#allocation5 + $0x5c] sm:$0x8] }
 0x766   :  { %vm10753_vm8 = vmor %vm4834_vm9, %vm11544_vm11  ;;  %vm4865_vm4 = vweird.f32 %v10456_v26  ;;  %v4679_v54 = vsel %vm4676_vm13, %v4678_v43, %v4674_v1  ;;  %v10759_v10 = vsel %vm4779_vm5, %v10414_v59, %v4777_v2  ;;  %v10762_v37 = vsel %vm4794_vm6, %v10473_v50, %v4792_v61 }
 0x767   :  { %vm4809_vm1 = vcmp.eq.f32.partialorder %v4808_v27, 8.507059e+37  ;;  %vm4849_vm15 = vweird.f32 %v10377_v34  ;;  %vm4880_vm12 = vweird.f32 %v10480_v11  ;;  %v4822_v40 = vsel %vm10742_vm10, %v10412_v23, %v10724_v31 }
 0x768   :  { %v10767_v51 = vsel %vm4809_vm1, %v10482_v44, %v4807_v30  ;;  %vm10773_vm9 = vcmp.eq.f32.partialorder %v4823_v39, 8.507059e+37  ;;  %v4837_v50 = vsel %vm10753_vm8, %v10423_v14, %v10729_v49  ;;  %vm4864_vm2 = vweird.f32 %v10381_v53  ;;  %vm10807_vm3 = vmor %vm4849_vm15, %vm4850_vm7 }
 0x769   :  { %v4838_v44 = vand.u32 2147483647, %v10373_v3  ;;  %v4848_v60 = vadd.f32 %v10432_v35, %v10541_v38  ;;  %v4890_v21 = vrot.slane %v10305_v42, 1  ;;  %v4891_v23 = vrot.slane %v10305_v42, 2  ;;  %v4450_v3 = vld [vmem:[#allocation5 + $0x38] sm:$0x8]  ;;  %vm10819_vm0 = vmor %vm4864_vm2, %vm4865_vm4 }
 0x76a   :  { %vm4879_vm14 = vweird.f32 %v10389_v62  ;;  %v4853_v9 = vand.u32 2147483647, %v10377_v34  ;;  %v4863_v14 = vadd.f32 %v10456_v26, %v10572_v45  ;;  %v4892_v4 = vrot.slane %v10305_v42, 3 }
 0x76b   :  { %v4893_v5 = vrot.slane %v10305_v42, 4  ;;  %v4894_v38 = vrot.slane %v10305_v42, 5  ;;  %v4895_v25 = vrot.slane %v10305_v42, 6  ;;  %v4905_v48 = vmul.f32 %v4890_v21, %v10546_v22  ;;  %vm10831_vm10 = vmor %vm4879_vm14, %vm4880_vm12 }
 0x76c   :  { %v4906_v15 = vmul.f32 %v4891_v23, %v10551_v41  ;;  %v4878_v16 = vadd.f32 %v10480_v11, %v10582_v55  ;;  %v4896_v45 = vrot.slane %v10305_v42, 7  ;;  %v4907_v17 = vmul.f32 %v4892_v4, %v10607_v32 }
 0x76d   :  { %v4908_v52 = vmul.f32 %v4893_v5, %v10621_v7  ;;  %v4909_v28 = vmul.f32 %v4894_v38, %v4634_v46  ;;  %v4910_v58 = vmul.f32 %v4895_v25, %v4649_v12  ;;  %v4913_v56 = vunpack.c.l.bf16 %v4442_v19  ;;  %v11551_v46 = vld [vmem:[#allocation38_spill] sm:$0xff] }
 0x76e   :  { %v4914_v6 = vunpack.c.l.bf16 %v4444_v20  ;;  %v4915_v2 = vunpack.c.l.bf16 %v4446_v63  ;;  %v4916_v61 = vunpack.c.l.bf16 %v4448_v18  ;;  %v4917_v22 = vunpack.c.l.bf16 %v4450_v3  ;;  %v11556_v20 = vld [vmem:[#allocation20_spill] sm:$0xff] }
 0x76f   :  { %v4918_v27 = vunpack.c.l.bf16 %v4452_v57  ;;  %v4911_v41 = vmul.f32 %v4896_v45, %v4664_v36  ;;  %v4919_v29 = vunpack.c.l.bf16 %v4454_v13  ;;  %v4921_v1 = vadd.f32 %v4913_v56, %v4905_v48 }
 0x770   :  { %v4922_v31 = vadd.f32 %v4914_v6, %v4906_v15  ;;  %v4912_v55 = vmul.f32 %v4679_v54, %v10305_v42  ;;  %v4920_v39 = vunpack.c.l.bf16 %v4456_v47  ;;  %v4923_v49 = vadd.f32 %v4915_v2, %v4907_v17 }
 0x771   :  { %v4924_v32 = vadd.f32 %v4916_v61, %v4908_v52  ;;  %v4827_v12 = vsel %vm10773_vm9, %v11551_v46, %v4822_v40  ;;  %v4868_v43 = vand.u32 2147483647, %v10381_v53  ;;  %v4925_v30 = vadd.f32 %v4917_v22, %v4909_v28  ;;  %v11557_v40 = vld [vmem:[#allocation14_spill] sm:$0xff] }
 0x772   :  { %5958 = vtanh.f32 %v4921_v1  ;;  %v4852_v34 = vsel %vm10807_vm3, %v10432_v35, %v4848_v60  ;;  %v4883_v33 = vand.u32 2147483647, %v10389_v62  ;;  %v4926_v36 = vadd.f32 %v4918_v27, %v4910_v58 }
 0x773   :  { %5960 = vtanh.f32 %v4922_v31  ;;  %vm4839_vm7 = vcmp.eq.f32.partialorder %v4838_v44, 8.507059e+37  ;;  %v4867_v53 = vsel %vm10819_vm0, %v10456_v26, %v4863_v14  ;;  %v4927_v54 = vadd.f32 %v4919_v29, %v4911_v41 }
 0x774   :  { %5962 = vtanh.f32 %v4923_v49  ;;  %vm4854_vm13 = vcmp.eq.f32.partialorder %v4853_v9, 8.507059e+37  ;;  %v4882_v35 = vsel %vm10831_vm10, %v10480_v11, %v4878_v16  ;;  %v4928_v19 = vadd.f32 %v4920_v39, %v4912_v55  ;;  %v11558_v9 = vld [vmem:[#allocation39_spill] sm:$0xff] }
 0x775   :  { %5964 = vtanh.f32 %v4924_v32  ;;  %v4842_v62 = vsel %vm4839_vm7, %v11556_v20, %v4837_v50  ;;  %v4857_v59 = vsel %vm4854_vm13, %v11557_v40, %v4852_v34  ;;  %vm4869_vm5 = vcmp.eq.f32.partialorder %v4868_v43, 8.507059e+37 }
 0x776   :  { %5966 = vtanh.f32 %v4925_v30  ;;  %v4872_v63 = vsel %vm4869_vm5, %v10522_v8, %v4867_v53  ;;  %vm4884_vm6 = vcmp.eq.f32.partialorder %v4883_v33, 8.507059e+37  ;;  %v4937_v26 = vsub.f32 1.0, %v10759_v10 }
 0x777   :  { %5968 = vtanh.f32 %v4926_v36  ;;  %v4887_v60 = vsel %vm4884_vm6, %v10536_v0, %v4882_v35  ;;  %v4938_v11 = vsub.f32 1.0, %v10762_v37  ;;  %v4939_v21 = vsub.f32 1.0, %v10767_v51  ;;  %v4990_v35 = vpop.permute.xlu1 %4989 }
 0x778   :  { %v5959_v44 = vpop.eup %5958  ;;  %5970 = vtanh.f32 %v4927_v54  ;;  %v4940_v50 = vsub.f32 1.0, %v4827_v12  ;;  %v11559_v14 = vrot.slane %v11558_v9, 1  ;;  %v4941_v5 = vsub.f32 1.0, %v4842_v62 }
 0x779   :  { %v5961_v23 = vpop.eup %5960  ;;  %5972 = vtanh.f32 %v4928_v19  ;;  %v4945_v18 = vmul.f32 %v5959_v44, %v4937_v26  ;;  %v4942_v3 = vsub.f32 1.0, %v4857_v59  ;;  %v11560_v0 = vrot.slane %v11558_v9, 2 }
 0x77a   :  { %v4969_v8 = vmul.f32 %v11559_v14, %v10759_v10  ;;  %v5963_v4 = vpop.eup %5962  ;;  %v4946_v57 = vmul.f32 %v5961_v23, %v4938_v11  ;;  %v4943_v48 = vsub.f32 1.0, %v4872_v63  ;;  %v11561_v13 = vrot.slane %v11558_v9, 3 }
 0x77b   :  { %v4970_v38 = vmul.f32 %v11560_v0, %v10762_v37  ;;  %v5965_v25 = vpop.eup %5964  ;;  %v4947_v15 = vmul.f32 %v5963_v4, %v4939_v21  ;;  %v4944_v52 = vsub.f32 1.0, %v4887_v60  ;;  %v11562_v10 = vrot.slane %v11558_v9, 4 }
 0x77c   :  { %v4971_v16 = vmul.f32 %v11561_v13, %v10767_v51  ;;  %v4977_v45 = vadd.f32 %v4969_v8, %v4945_v18  ;;  %v5967_v17 = vpop.eup %5966  ;;  %v4948_v47 = vmul.f32 %v5965_v25, %v4940_v50  ;;  %v11563_v2 = vrot.slane %v11558_v9, 5 }
 0x77d   :  { %v4972_v28 = vmul.f32 %v11562_v10, %v4827_v12  ;;  %v4978_v58 = vadd.f32 %v4970_v38, %v4946_v57  ;;  %v5969_v56 = vpop.eup %5968  ;;  %v4949_v6 = vmul.f32 %v5967_v17, %v4941_v5  ;;  %v11564_v29 = vrot.slane %v11558_v9, 6 }
 0x77e   :  { %v4973_v37 = vmul.f32 %v11563_v2, %v4842_v62  ;;  %v4979_v61 = vadd.f32 %v4971_v16, %v4947_v15  ;;  %v5000_v22 = vrot.slane %v4977_v45, 7  ;;  %v5971_v27 = vpop.eup %5970  ;;  %v4950_v41 = vmul.f32 %v5969_v56, %v4942_v3 }
 0x77f   :  { %v4974_v51 = vmul.f32 %v11564_v29, %v4857_v59  ;;  %v4980_v1 = vadd.f32 %v4972_v28, %v4948_v47  ;;  %v5001_v31 = vrot.slane %v4978_v58, 6  ;;  %v5973_v55 = vpop.eup %5972  ;;  %v4951_v39 = vmul.f32 %v5971_v27, %v4943_v48 }
 0x780   :  { %v11565_v49 = vrot.slane %v11558_v9, 7  ;;  %v4981_v7 = vadd.f32 %v4973_v37, %v4949_v6  ;;  %v5003_v46 = vrot.slane %v4979_v61, 5  ;;  %v4952_v12 = vmul.f32 %v5973_v55, %v4944_v52 }
 0x781   :  { %v4982_v43 = vadd.f32 %v4974_v51, %v4950_v41  ;;  %vm11566_vm11 = vcmask 1041409   ;;  %v5005_v42 = vrot.slane %v4980_v1, 4  ;;  %vm11567_vm8 = vcmask 1042434  }
 0x782   :  { %v4975_v32 = vmul.f32 %v11565_v49, %v4872_v63  ;;  %v5002_v30 = vsel %vm11566_vm11, %v5001_v31, %v5000_v22  ;;  %v5007_v36 = vrot.slane %v4981_v7, 3  ;;  %v4976_v24 = vmul.f32 %v4887_v60, %v11558_v9 }
 0x783   :  { %v5004_v33 = vsel %vm11567_vm8, %v5003_v46, %v5002_v30  ;;  %vm11568_vm4 = vcmask 1043459   ;;  %v5009_v54 = vrot.slane %v4982_v43, 2  ;;  %vm11569_vm1 = vcmask 1044484  }
 0x784   :  { %v4983_v34 = vadd.f32 %v4975_v32, %v4951_v39  ;;  %v5006_v53 = vsel %vm11568_vm4, %v5005_v42, %v5004_v33  ;;  %v4984_v62 = vadd.f32 %v4976_v24, %v4952_v12  ;;  %vm11570_vm15 = vcmask 1045509  }
 0x785   :  { %v5008_v19 = vsel %vm11569_vm1, %v5007_v36, %v5006_v53  ;;  %vm11571_vm12 = vcmask 1046534   ;;  %vm4991_vm9 = vcmp.eq.s32.totalorder %v4990_v35, 1  ;;  %vm11572_vm2 = vcmask 1047559  }
 0x786   :  { %v5011_v20 = vrot.slane %v4983_v34, 1  ;;  %v5010_v40 = vsel %vm11570_vm15, %v5009_v54, %v5008_v19 }
 0x788   :  { %v5012_v59 = vsel %vm11571_vm12, %v5011_v20, %v5010_v40 }
 0x789   :  { %v5013_v63 = vsel %vm11572_vm2, %v4984_v62, %v5012_v59 }
 0x78a   :  { %v5015_v26 = vsel %vm4991_vm9, %v5013_v63, 0.0  ;;  %v5039_v44 = vsel %vm4991_vm9, %v5013_v63, %v11558_v9 }
 0x78b   :  { %v5017_v11 = vrot.slane %v5015_v26, 1  ;;  %v5018_v60 = vrot.slane %v5015_v26, 2  ;;  %v5019_v21 = vrot.slane %v5015_v26, 3  ;;  %5031 = vst [vmem:[#allocation10 + $0x7] sm:$0x1] %v5015_v26  ;;  %v5020_v23 = vrot.slane %v5015_v26, 4 }
 0x78c   :  { %5040 = vst [vmem:[#allocation2] sm:$0xff] %v5039_v44  ;;  %v5021_v50 = vrot.slane %v5015_v26, 5  ;;  %v5022_v18 = vrot.slane %v5015_v26, 6  ;;  %v5023_v14 = vrot.slane %v5015_v26, 7 }
 0x78d   :  { %5032 = vst [vmem:[#allocation10 + $0xf] sm:$0x1] %v5017_v11 }
 0x78e   :  { %5033 = vst [vmem:[#allocation10 + $0x17] sm:$0x1] %v5018_v60 }
 0x78f   :  { %5034 = vst [vmem:[#allocation10 + $0x1f] sm:$0x1] %v5019_v21 }
 0x790   :  { %5035 = vst [vmem:[#allocation10 + $0x27] sm:$0x1] %v5020_v23 }
 0x791   :  { %5036 = vst [vmem:[#allocation10 + $0x2f] sm:$0x1] %v5021_v50 }
 0x792   :  { %5037 = vst [vmem:[#allocation10 + $0x37] sm:$0x1] %v5022_v18 }
 0x793   :  { %5038 = vst [vmem:[#allocation10 + $0x3f] sm:$0x1] %v5023_v14 }
 0x794 PF:  { %s5047_s9 = sshll.u32 %s10881_s4, 4  ;;  %s6062_s10 = smov [#allocation10]   ;;  %s5048_s9 = int_to_ptr.hbm [resolvable:$true] %s5047_s9 }
 0x795   :  { %s5045_s11 = sshll.u32 %s6062_s10, 4  ;;  %s6063_s12 = smov 128   ;;  %s5046_s11 = int_to_ptr.vmem [resolvable:$true] %s5045_s11 }
 0x796   :  { %s6064_s13 = smov 8  }
 0x797   :  { %5053 = dma.vmem_to_hbm [thread:$0]  %s5046_s11, 1024, %s5048_s9, [#allocation7], %s6063_s12, %s6063_s12, %s6064_s13  }
 0x798   :  { %6053 = dma.done.wait [#allocation7], 1024  }
 0x799   :  { %6054 = vsyncadd [#allocation7], 4294966272 }
 0x79a   :  { %5058 = vsyncpa [#allocation6], 1 }
 0x79b   :  { %5059 = vsyncpa [#allocation9], 1 }
 0x79c   :  { %5060 = vsyncpa [#allocation7], 1 }

</bundles_post_ra>
